<compile_context>
chip_gen: v5e
topology: v5e:2x2
jax: 0.10.0
libtpu: 0.0.40
codegen_flags: <defaults>
</compile_context>

<pallas_src>
import functools
import math

import jax
import jax.numpy as jnp
from jax import lax
from jax.experimental import pallas as pl
from jax.experimental.pallas import tpu as pltpu


# ------------------------------ in-kernel math -------------------------------


def _layernorm(h, w, b, eps=1e-5):
    mu = jnp.mean(h, axis=-1, keepdims=True)
    c = h - mu
    var = jnp.mean(c * c, axis=-1, keepdims=True)
    return c * lax.rsqrt(var + eps) * w + b


def _gelu_tanh(x):
    c = math.sqrt(2.0 / math.pi)
    return 0.5 * x * (1.0 + jnp.tanh(c * (x + 0.044715 * x * x * x)))


# --------------------- pass A: ln_1 + fused QKV projection -------------------
# Emits q/k/v head-major (B, H, T, hd) bf16 so pass B needs no per-step
# relayouts of (T, C)-sized K/V.


def _qkv_kernel(n_head, x_ref, ln1_w, ln1_b, w_qkv, b_qkv, q_ref, k_ref, v_ref):
    x = x_ref[0]                                        # (tt, C) f32
    tt, C = x.shape
    hd = C // n_head
    h = _layernorm(x, ln1_w[0], ln1_b[0])               # f32 (VPU)
    qkv = jnp.dot(h.astype(jnp.bfloat16), w_qkv[...],   # bf16 MXU, f32 acc
                  preferred_element_type=jnp.float32) + b_qkv[0]
    qkv = qkv.astype(jnp.bfloat16)                      # (tt, 3C) bf16

    def head_major(a):                                  # (tt, C) -> (H, tt, hd)
        return a.reshape(tt, n_head, hd).transpose(1, 0, 2)

    q_ref[0] = head_major(qkv[:, :C])
    k_ref[0] = head_major(qkv[:, C:2 * C])
    v_ref[0] = head_major(qkv[:, 2 * C:])


# ---- pass B: flash-style causal attention + proj + residual + MLP + residual


def _attn_mlp_kernel(n_head, tile_kv,
                     x_ref, q_ref, k_ref, v_ref,
                     w_attn_proj, b_attn_proj,
                     ln2_w, ln2_b,
                     w_fc, b_fc, w_mlp_proj, b_mlp_proj,
                     out_ref):
    x = x_ref[0]                                        # (tq, C) f32
    tq, C = x.shape
    hd = C // n_head
    scale = 1.0 / math.sqrt(hd)

    q = q_ref[0]                                        # (H, tq, hd) bf16
    q0 = pl.program_id(1) * tq                          # first query row index
    # kv blocks needed to cover causal keys [0, q0 + tq): skips everything
    # strictly above the diagonal (~2x less MXU / exp work on average).
    num_kv = (q0 + tq + tile_kv - 1) // tile_kv

    row = q0 + lax.broadcasted_iota(jnp.int32, (tq, tile_kv), 0)

    def body(j, carry):
        acc, m_i, l_i = carry
        start = pl.multiple_of(j * tile_kv, tile_kv)
        k_blk = k_ref[0, :, pl.ds(start, tile_kv), :]   # (H, tkv, hd) bf16
        v_blk = v_ref[0, :, pl.ds(start, tile_kv), :]   # (H, tkv, hd) bf16

        s = jnp.einsum("hqd,hkd->hqk", q, k_blk,
                       preferred_element_type=jnp.float32) * scale

        col = start + lax.broadcasted_iota(jnp.int32, (tq, tile_kv), 1)
        bias = jnp.where(row >= col, 0.0, -1e30).astype(jnp.float32)
        s = s + bias[None, :, :]

        m_new = jnp.maximum(m_i, jnp.max(s, axis=-1, keepdims=True))
        alpha = jnp.exp(m_i - m_new)
        p = jnp.exp(s - m_new)                          # un-normalised probs
        l_new = alpha * l_i + jnp.sum(p, axis=-1, keepdims=True)
        acc_new = alpha * acc + jnp.einsum(
            "hqk,hkd->hqd", p.astype(jnp.bfloat16), v_blk,
            preferred_element_type=jnp.float32)
        return acc_new, m_new, l_new

    acc0 = jnp.zeros((n_head, tq, hd), jnp.float32)
    m0 = jnp.full((n_head, tq, 1), -1e30, jnp.float32)  # finite (no inf-inf NaN)
    l0 = jnp.zeros((n_head, tq, 1), jnp.float32)
    acc, _, l_i = lax.fori_loop(0, num_kv, body, (acc0, m0, l0))

    # deferred softmax normalisation on the small (H, tq, hd) output (EUP).
    y = (acc * pl.reciprocal(l_i, approx=True)).astype(jnp.bfloat16)
    # single bf16 head-merge relayout, then one lane-dense MXU matmul.
    y = y.transpose(1, 0, 2).reshape(tq, C)

    y = jnp.dot(y, w_attn_proj[...],
                preferred_element_type=jnp.float32) + b_attn_proj[0]
    x1 = x + y

    h2 = _layernorm(x1, ln2_w[0], ln2_b[0])
    ff = jnp.dot(h2.astype(jnp.bfloat16), w_fc[...],
                 preferred_element_type=jnp.float32) + b_fc[0]
    ff = _gelu_tanh(ff)
    ff = jnp.dot(ff.astype(jnp.bfloat16), w_mlp_proj[...],
                 preferred_element_type=jnp.float32) + b_mlp_proj[0]

    out_ref[0] = (x1 + ff).astype(out_ref.dtype)


# --------------------------------- wrapper -----------------------------------


def _param_spec(shape, single_buffer):
    nd = len(shape)
    idx = lambda b, t, _nd=nd: (0,) * _nd               # constant index map
    if single_buffer:
        # weights never change across the grid -> single buffer (halves their
        # VMEM footprint; important on v7x's 64 MiB VMEM).
        return pl.BlockSpec(shape, idx, pipeline_mode=pl.Buffered(1))
    return pl.BlockSpec(shape, idx)


def _vmem_limit_bytes():
    # Generation-aware VMEM budget: 3/4 of physical capacity
    # (v5e/v6e: ~96 MiB, v7x: ~48 MiB); conservative 48 MiB fallback.
    try:
        cap = getattr(pltpu.get_tpu_info(), "vmem_capacity_bytes", None)
        if cap:
            return int(min(cap * 3 // 4, 112 * 1024 * 1024))
    except Exception:
        pass
    return 48 * 1024 * 1024


def gpt2_block(x, params, n_head, tile_t=128, tile_kv=256,
               single_buffer_weights=False):
    """GPT-2 Block forward. x: (B, T, C) f32.

    tile_t:   query-tile length (bump to 256 on v6e for fewer grid steps).
    tile_kv:  kv block length of the inner flash loop (256-512 for long T).
    single_buffer_weights: opt-in single-buffered weight BlockSpecs (v7x).
    """
    B, T, C = x.shape
    assert C % n_head == 0
    tile_t = min(tile_t, T)
    tile_kv = min(tile_kv, T)
    assert T % tile_t == 0 and T % tile_kv == 0
    nt = T // tile_t
    hd = C // n_head
    bf16 = jnp.bfloat16

    ln1_w, ln1_b = params["ln1_w"], params["ln1_b"]
    ln2_w, ln2_b = params["ln2_w"], params["ln2_b"]
    w_qkv = params["w_qkv"].astype(bf16)
    b_qkv = params["b_qkv"]
    w_attn_proj = params["w_attn_proj"].astype(bf16)
    b_attn_proj = params["b_attn_proj"]
    w_fc = params["w_fc"].astype(bf16)
    b_fc = params["b_fc"]
    w_mlp_proj = params["w_mlp_proj"].astype(bf16)
    b_mlp_proj = params["b_mlp_proj"]

    pspec = functools.partial(_param_spec, single_buffer=single_buffer_weights)
    cparams = pltpu.CompilerParams(
        dimension_semantics=("parallel", "parallel"),
        vmem_limit_bytes=_vmem_limit_bytes(),
    )

    x_tile_spec = pl.BlockSpec((1, tile_t, C), lambda b, t: (b, t, 0))
    qkv_tile_spec = pl.BlockSpec((1, n_head, tile_t, hd),
                                 lambda b, t: (b, 0, t, 0))
    # Constant in t -> K/V are DMA'd once per batch and stay VMEM-resident
    # across all q-tiles of that batch (revisit reuse).
    kv_full_spec = pl.BlockSpec((1, n_head, T, hd), lambda b, t: (b, 0, 0, 0))

    # ---- pass A: ln_1 + QKV projection, tiled over (B, T/tile_t) ----
    hm_shape = jax.ShapeDtypeStruct((B, n_head, T, hd), bf16)
    q, k, v = pl.pallas_call(
        functools.partial(_qkv_kernel, n_head),
        out_shape=(hm_shape, hm_shape, hm_shape),
        grid_spec=pltpu.PrefetchScalarGridSpec(
            num_scalar_prefetch=0,
            grid=(B, nt),
            in_specs=[x_tile_spec,
                      pspec(ln1_w.shape), pspec(ln1_b.shape),
                      pspec(w_qkv.shape), pspec(b_qkv.shape)],
            out_specs=(qkv_tile_spec, qkv_tile_spec, qkv_tile_spec),
        ),
        compiler_params=cparams,
    )(x, ln1_w, ln1_b, w_qkv, b_qkv)

    # ---- pass B: flash attention + residual + MLP + residual per (B, q-tile)
    out = pl.pallas_call(
        functools.partial(_attn_mlp_kernel, n_head, tile_kv),
        out_shape=jax.ShapeDtypeStruct((B, T, C), x.dtype),
        grid_spec=pltpu.PrefetchScalarGridSpec(
            num_scalar_prefetch=0,
            grid=(B, nt),
            in_specs=[x_tile_spec,                 # x q-tile (residual) f32
                      qkv_tile_spec,               # q tile (H, tq, hd) bf16
                      kv_full_spec,                # K (H, T, hd) bf16, per batch
                      kv_full_spec,                # V (H, T, hd) bf16, per batch
                      pspec(w_attn_proj.shape), pspec(b_attn_proj.shape),
                      pspec(ln2_w.shape), pspec(ln2_b.shape),
                      pspec(w_fc.shape), pspec(b_fc.shape),
                      pspec(w_mlp_proj.shape), pspec(b_mlp_proj.shape)],
            out_specs=x_tile_spec,                 # lane-dense (tq, C) store
        ),
        compiler_params=cparams,
    )(x, q, k, v, w_attn_proj, b_attn_proj, ln2_w, ln2_b,
      w_fc, b_fc, w_mlp_proj, b_mlp_proj)
    return out


# ----------------------------- pure-JAX reference ----------------------------


def ref_block(x, params, n_head):
    def ln(h, w, b):
        mu = h.mean(-1, keepdims=True)
        var = ((h - mu) ** 2).mean(-1, keepdims=True)
        return (h - mu) / jnp.sqrt(var + 1e-5) * w + b

    B, T, C = x.shape
    hd = C // n_head
    h = ln(x, params["ln1_w"][0], params["ln1_b"][0])
    qkv = h @ params["w_qkv"] + params["b_qkv"][0]
    q, k, v = jnp.split(qkv, 3, axis=-1)
    q = q.reshape(B, T, n_head, hd).transpose(0, 2, 1, 3)
    k = k.reshape(B, T, n_head, hd).transpose(0, 2, 1, 3)
    v = v.reshape(B, T, n_head, hd).transpose(0, 2, 1, 3)
    s = jnp.einsum("bhqd,bhkd->bhqk", q, k) / math.sqrt(hd)
    mask = jnp.tril(jnp.ones((T, T), bool))
    s = jnp.where(mask, s, -jnp.inf)
    p = jax.nn.softmax(s, axis=-1)
    y = jnp.einsum("bhqk,bhkd->bhqd", p, v).transpose(0, 2, 1, 3).reshape(B, T, C)
    y = y @ params["w_attn_proj"] + params["b_attn_proj"][0]
    x1 = x + y
    h2 = ln(x1, params["ln2_w"][0], params["ln2_b"][0])
    ff = h2 @ params["w_fc"] + params["b_fc"][0]
    c = math.sqrt(2.0 / math.pi)
    ff = 0.5 * ff * (1.0 + jnp.tanh(c * (ff + 0.044715 * ff ** 3)))
    ff = ff @ params["w_mlp_proj"] + params["b_mlp_proj"][0]
    return x1 + ff


# ----------------------------------- main -------------------------------------

if __name__ == "__main__":
    # small shapes consistent with the module; 2 q-tiles and 2 kv-blocks so
    # both the sequence tiling and the causal kv-block skipping are exercised.
    B, T, C, n_head = 2, 256, 128, 4

    key = jax.random.PRNGKey(0)
    ks = jax.random.split(key, 16)

    def nrm(k, shape, scale=0.02):
        return (scale * jax.random.normal(k, shape)).astype(jnp.float32)

    params = {
        # LayerNorm params stored as (1, C); linear weights pre-transposed to
        # (in, out); biases as (1, out).
        "ln1_w": jnp.ones((1, C), jnp.float32) + nrm(ks[0], (1, C)),
        "ln1_b": nrm(ks[1], (1, C)),
        "w_qkv": nrm(ks[2], (C, 3 * C)),
        "b_qkv": nrm(ks[3], (1, 3 * C)),
        "w_attn_proj": nrm(ks[4], (C, C)),
        "b_attn_proj": nrm(ks[5], (1, C)),
        "ln2_w": jnp.ones((1, C), jnp.float32) + nrm(ks[6], (1, C)),
        "ln2_b": nrm(ks[7], (1, C)),
        "w_fc": nrm(ks[8], (C, 4 * C)),
        "b_fc": nrm(ks[9], (1, 4 * C)),
        "w_mlp_proj": nrm(ks[10], (4 * C, C)),
        "b_mlp_proj": nrm(ks[11], (1, C)),
    }

    x = jax.random.normal(ks[12], (B, T, C), jnp.float32)

    out = gpt2_block(x, params, n_head, tile_t=128, tile_kv=128)
    out = jax.block_until_ready(out)

    ref = ref_block(x, params, n_head)
    assert out.shape == (B, T, C)
    # bf16 MXU operands (f32 accumulate) + approx reciprocal -> looser tol.
    assert jnp.allclose(out, ref, atol=2e-2, rtol=2e-2), (
        float(jnp.max(jnp.abs(out - ref))))

    print("KERNEL_OK")
</pallas_src>

<mosaic_0001>
module attributes {stable_mosaic.version = 11 : i64} {
  func.func @_qkv_kernel(%arg0: i32, %arg1: i32, %arg2: memref<1x128x128xf32, #tpu.memory_space<vmem>>, %arg3: memref<1x128xf32, #tpu.memory_space<vmem>>, %arg4: memref<1x128xf32, #tpu.memory_space<vmem>>, %arg5: memref<128x384xbf16, #tpu.memory_space<vmem>>, %arg6: memref<1x384xf32, #tpu.memory_space<vmem>>, %arg7: memref<1x4x128x32xbf16, #tpu.memory_space<vmem>>, %arg8: memref<1x4x128x32xbf16, #tpu.memory_space<vmem>>, %arg9: memref<1x4x128x32xbf16, #tpu.memory_space<vmem>>) attributes {dimension_semantics = [#tpu.dimension_semantics<parallel>, #tpu.dimension_semantics<parallel>], iteration_bounds = array<i64: 2, 2>, scalar_prefetch = 0 : i64, scratch_operands = 0 : i64, tpu.core_type = #tpu.core_type<tc>, window_params = [{transform_indices = @transform_0, window_bounds = array<i64: 1, 128, 128>}, {pipeline_mode = #tpu.pipeline_mode<synchronous>, transform_indices = @transform_1, window_bounds = array<i64: 1, 128>}, {pipeline_mode = #tpu.pipeline_mode<synchronous>, transform_indices = @transform_2, window_bounds = array<i64: 1, 128>}, {pipeline_mode = #tpu.pipeline_mode<synchronous>, transform_indices = @transform_3, window_bounds = array<i64: 128, 384>}, {pipeline_mode = #tpu.pipeline_mode<synchronous>, transform_indices = @transform_4, window_bounds = array<i64: 1, 384>}, {transform_indices = @transform_5, window_bounds = array<i64: 1, 4, 128, 32>}, {transform_indices = @transform_6, window_bounds = array<i64: 1, 4, 128, 32>}, {transform_indices = @transform_7, window_bounds = array<i64: 1, 4, 128, 32>}]} {
    %c0 = arith.constant 0 : index
    %c0_0 = arith.constant 0 : index
    %c0_1 = arith.constant 0 : index
    %0 = vector.load %arg2[%c0, %c0_0, %c0_1] : memref<1x128x128xf32, #tpu.memory_space<vmem>>, vector<1x128x128xf32>
    %1 = vector.shape_cast %0 : vector<1x128x128xf32> to vector<128x128xf32>
    %c0_2 = arith.constant 0 : index
    %c0_3 = arith.constant 0 : index
    %2 = vector.load %arg3[%c0_2, %c0_3] : memref<1x128xf32, #tpu.memory_space<vmem>>, vector<1x128xf32>
    %3 = vector.shape_cast %2 : vector<1x128xf32> to vector<128xf32>
    %c0_4 = arith.constant 0 : index
    %c0_5 = arith.constant 0 : index
    %4 = vector.load %arg4[%c0_4, %c0_5] : memref<1x128xf32, #tpu.memory_space<vmem>>, vector<1x128xf32>
    %5 = vector.shape_cast %4 : vector<1x128xf32> to vector<128xf32>
    %cst = arith.constant dense<0.000000e+00> : vector<128xf32>
    %6 = vector.multi_reduction <add>, %1, %cst [1] : vector<128x128xf32> to vector<128xf32>
    %7 = vector.shape_cast %6 : vector<128xf32> to vector<128x1xf32>
    %cst_6 = arith.constant 1.280000e+02 : f32
    %8 = vector.broadcast %cst_6 : f32 to vector<128x1xf32>
    %9 = arith.divf %7, %8 : vector<128x1xf32>
    %10 = vector.broadcast %9 : vector<128x1xf32> to vector<128x128xf32>
    %11 = arith.subf %1, %10 : vector<128x128xf32>
    %12 = arith.mulf %11, %11 : vector<128x128xf32>
    %cst_7 = arith.constant dense<0.000000e+00> : vector<128xf32>
    %13 = vector.multi_reduction <add>, %12, %cst_7 [1] : vector<128x128xf32> to vector<128xf32>
    %14 = vector.shape_cast %13 : vector<128xf32> to vector<128x1xf32>
    %cst_8 = arith.constant 1.280000e+02 : f32
    %15 = vector.broadcast %cst_8 : f32 to vector<128x1xf32>
    %16 = arith.divf %14, %15 : vector<128x1xf32>
    %cst_9 = arith.constant 9.99999974E-6 : f32
    %17 = vector.broadcast %cst_9 : f32 to vector<128x1xf32>
    %18 = arith.addf %16, %17 : vector<128x1xf32>
    %19 = math.rsqrt %18 : vector<128x1xf32>
    %20 = vector.broadcast %19 : vector<128x1xf32> to vector<128x128xf32>
    %21 = arith.mulf %11, %20 : vector<128x128xf32>
    %22 = vector.shape_cast %3 : vector<128xf32> to vector<1x128xf32>
    %23 = vector.broadcast %22 : vector<1x128xf32> to vector<128x128xf32>
    %24 = arith.mulf %21, %23 : vector<128x128xf32>
    %25 = vector.shape_cast %5 : vector<128xf32> to vector<1x128xf32>
    %26 = vector.broadcast %25 : vector<1x128xf32> to vector<128x128xf32>
    %27 = arith.addf %24, %26 : vector<128x128xf32>
    %28 = arith.truncf %27 : vector<128x128xf32> to vector<128x128xbf16>
    %c0_10 = arith.constant 0 : index
    %c0_11 = arith.constant 0 : index
    %29 = vector.load %arg5[%c0_10, %c0_11] : memref<128x384xbf16, #tpu.memory_space<vmem>>, vector<128x384xbf16>
    %cst_12 = arith.constant dense<0.000000e+00> : vector<128x384xf32>
    %30 = tpu.matmul %28, %29, %cst_12 {dimension_numbers = #tpu.dot_dimension_numbers<[1], [0], [0], [1], [0, 0, 1, 1], [], []>} : vector<128x128xbf16>, vector<128x384xbf16>, vector<128x384xf32> -> vector<128x384xf32>
    %c0_13 = arith.constant 0 : index
    %c0_14 = arith.constant 0 : index
    %31 = vector.load %arg6[%c0_13, %c0_14] : memref<1x384xf32, #tpu.memory_space<vmem>>, vector<1x384xf32>
    %32 = vector.shape_cast %31 : vector<1x384xf32> to vector<384xf32>
    %33 = vector.shape_cast %32 : vector<384xf32> to vector<1x384xf32>
    %34 = vector.broadcast %33 : vector<1x384xf32> to vector<128x384xf32>
    %35 = arith.addf %30, %34 : vector<128x384xf32>
    %36 = arith.truncf %35 : vector<128x384xf32> to vector<128x384xbf16>
    %37 = vector.extract_strided_slice %36 {offsets = [0, 0], sizes = [128, 128], strides = [1, 1]} : vector<128x384xbf16> to vector<128x128xbf16>
    %38 = vector.shape_cast %37 : vector<128x128xbf16> to vector<128x4x32xbf16>
    %39 = tpu.transpose %38, [1, 0, 2] : vector<128x4x32xbf16> -> vector<4x128x32xbf16>
    %c0_15 = arith.constant 0 : index
    %c0_16 = arith.constant 0 : index
    %c0_17 = arith.constant 0 : index
    %c0_18 = arith.constant 0 : index
    %40 = vector.load %arg7[%c0_15, %c0_16, %c0_17, %c0_18] : memref<1x4x128x32xbf16, #tpu.memory_space<vmem>>, vector<1x4x128x32xbf16>
    %41 = vector.shape_cast %40 : vector<1x4x128x32xbf16> to vector<4x128x32xbf16>
    %42 = vector.shape_cast %39 : vector<4x128x32xbf16> to vector<1x4x128x32xbf16>
    tpu.vector_store %arg7[%c0_15, %c0_16, %c0_17, %c0_18], %42 {strides = array<i32>} : memref<1x4x128x32xbf16, #tpu.memory_space<vmem>>, vector<1x4x128x32xbf16>,
    %43 = vector.extract_strided_slice %36 {offsets = [0, 128], sizes = [128, 128], strides = [1, 1]} : vector<128x384xbf16> to vector<128x128xbf16>
    %44 = vector.shape_cast %43 : vector<128x128xbf16> to vector<128x4x32xbf16>
    %45 = tpu.transpose %44, [1, 0, 2] : vector<128x4x32xbf16> -> vector<4x128x32xbf16>
    %c0_19 = arith.constant 0 : index
    %c0_20 = arith.constant 0 : index
    %c0_21 = arith.constant 0 : index
    %c0_22 = arith.constant 0 : index
    %46 = vector.load %arg8[%c0_19, %c0_20, %c0_21, %c0_22] : memref<1x4x128x32xbf16, #tpu.memory_space<vmem>>, vector<1x4x128x32xbf16>
    %47 = vector.shape_cast %46 : vector<1x4x128x32xbf16> to vector<4x128x32xbf16>
    %48 = vector.shape_cast %45 : vector<4x128x32xbf16> to vector<1x4x128x32xbf16>
    tpu.vector_store %arg8[%c0_19, %c0_20, %c0_21, %c0_22], %48 {strides = array<i32>} : memref<1x4x128x32xbf16, #tpu.memory_space<vmem>>, vector<1x4x128x32xbf16>,
    %49 = vector.extract_strided_slice %36 {offsets = [0, 256], sizes = [128, 128], strides = [1, 1]} : vector<128x384xbf16> to vector<128x128xbf16>
    %50 = vector.shape_cast %49 : vector<128x128xbf16> to vector<128x4x32xbf16>
    %51 = tpu.transpose %50, [1, 0, 2] : vector<128x4x32xbf16> -> vector<4x128x32xbf16>
    %c0_23 = arith.constant 0 : index
    %c0_24 = arith.constant 0 : index
    %c0_25 = arith.constant 0 : index
    %c0_26 = arith.constant 0 : index
    %52 = vector.load %arg9[%c0_23, %c0_24, %c0_25, %c0_26] : memref<1x4x128x32xbf16, #tpu.memory_space<vmem>>, vector<1x4x128x32xbf16>
    %53 = vector.shape_cast %52 : vector<1x4x128x32xbf16> to vector<4x128x32xbf16>
    %54 = vector.shape_cast %51 : vector<4x128x32xbf16> to vector<1x4x128x32xbf16>
    tpu.vector_store %arg9[%c0_23, %c0_24, %c0_25, %c0_26], %54 {strides = array<i32>} : memref<1x4x128x32xbf16, #tpu.memory_space<vmem>>, vector<1x4x128x32xbf16>,
    return
  }
  func.func @transform_0(%arg0: i32, %arg1: i32) -> (i32, i32, i32) {
    %c0_i32 = arith.constant 0 : i32
    %c0_i32_0 = arith.constant 0 : i32
    return %arg0, %arg1, %c0_i32 : i32, i32, i32
  }
  func.func @transform_1(%arg0: i32, %arg1: i32) -> (i32, i32) {
    %c0_i32 = arith.constant 0 : i32
    %c0_i32_0 = arith.constant 0 : i32
    %c0_i32_1 = arith.constant 0 : i32
    return %c0_i32, %c0_i32_0 : i32, i32
  }
  func.func @transform_2(%arg0: i32, %arg1: i32) -> (i32, i32) {
    %c0_i32 = arith.constant 0 : i32
    %c0_i32_0 = arith.constant 0 : i32
    %c0_i32_1 = arith.constant 0 : i32
    return %c0_i32, %c0_i32_0 : i32, i32
  }
  func.func @transform_3(%arg0: i32, %arg1: i32) -> (i32, i32) {
    %c0_i32 = arith.constant 0 : i32
    %c0_i32_0 = arith.constant 0 : i32
    %c0_i32_1 = arith.constant 0 : i32
    return %c0_i32, %c0_i32_0 : i32, i32
  }
  func.func @transform_4(%arg0: i32, %arg1: i32) -> (i32, i32) {
    %c0_i32 = arith.constant 0 : i32
    %c0_i32_0 = arith.constant 0 : i32
    %c0_i32_1 = arith.constant 0 : i32
    return %c0_i32, %c0_i32_0 : i32, i32
  }
  func.func @transform_5(%arg0: i32, %arg1: i32) -> (i32, i32, i32, i32) {
    %c0_i32 = arith.constant 0 : i32
    %c0_i32_0 = arith.constant 0 : i32
    %c0_i32_1 = arith.constant 0 : i32
    return %arg0, %c0_i32, %arg1, %c0_i32_0 : i32, i32, i32, i32
  }
  func.func @transform_6(%arg0: i32, %arg1: i32) -> (i32, i32, i32, i32) {
    %c0_i32 = arith.constant 0 : i32
    %c0_i32_0 = arith.constant 0 : i32
    %c0_i32_1 = arith.constant 0 : i32
    return %arg0, %c0_i32, %arg1, %c0_i32_0 : i32, i32, i32, i32
  }
  func.func @transform_7(%arg0: i32, %arg1: i32) -> (i32, i32, i32, i32) {
    %c0_i32 = arith.constant 0 : i32
    %c0_i32_0 = arith.constant 0 : i32
    %c0_i32_1 = arith.constant 0 : i32
    return %arg0, %c0_i32, %arg1, %c0_i32_0 : i32, i32, i32, i32
  }
}

</mosaic_0001>

<bundles_post_ra>
// kernel: tpu_custom_call.1
= control target key start
LH: loop header
LB: loop body
LE: loop exit
PB: predicated region body
PF: predicated region fallthrough
CT: control target
= control target key end

     0   :  { %s12797_s0 = inlined_call_operand.hbm [shape: f32[2,256,128], index: 0, kind: input, shape index: {}]   ;;  %s12798_s1 = inlined_call_operand.hbm [shape: f32[1,128], index: 1, kind: input, shape index: {}]   ;;  %s12799_s2 = inlined_call_operand.hbm [shape: f32[1,128], index: 2, kind: input, shape index: {}]   ;;  %s12800_s3 = inlined_call_operand.hbm [shape: bf16[128,384], index: 3, kind: input, shape index: {}]   ;;  %s12801_s4 = inlined_call_operand.vmem [shape: f32[1,384], index: 4, kind: input, shape index: {}]   ;;  %s12802_s5 = inlined_call_operand.vmem [shape: bf16[2,4,256,32], index: 5, kind: output, shape index: {0}]   ;;  %s12803_s6 = inlined_call_operand.vmem [shape: bf16[2,4,256,32], index: 6, kind: output, shape index: {1}]   ;;  %s12804_s7 = inlined_call_operand.vmem [shape: bf16[2,4,256,32], index: 7, kind: output, shape index: {2}]  }
   0x1   :  { %12813 = sst [smem:[#allocation19_spill]] %s12798_s1 }
   0x2   :  { %12814 = sst [smem:[#allocation20_spill]] %s12799_s2 }
   0x3   :  { %12815 = sst [smem:[#allocation21_spill]] %s12800_s3 }
   0x4   :  { %12816 = sst [smem:[#allocation22_spill]] %s12802_s5 }
   0x5   :  { %12817 = sst [smem:[#allocation23_spill]] %s12803_s6 }
   0x6   :  { %12818 = sst [smem:[#allocation24_spill]] %s12804_s7 }
   0x7   :  { %13 = vsyncpa [#allocation3], 0 }
   0x8   :  { %15 = vsyncpa [#allocation3 + $0x1], 0 }
   0x9   :  { %16 = vsyncpa [#allocation5], 0 }
   0xa   :  { %17 = vsyncpa [#allocation8], 0  ;;  %s8924_s24 = smov 0   ;;  %s8926_s25 = smov 0  }
   0xb   :  { %s8928_s26 = smov 0   ;;  %s8930_s27 = smov 0  }
   0xc   :  { %s8932_s28 = smov 0   ;;  %s8934_s29 = smov 0  }
   0xd   :  { %s8936_s30 = smov 0   ;;  %s8938_s8 = smov 0  }
   0xe LB: > { %12819 = sst [smem:[#allocation15_spill]] %s8857_s28  ;;  %s8350_s9 = sadd.s32 4294967295, %s8869_s8   ;;  %s8869_s8 = sphi %s8938_s8, %s23_s8   ;;  %s8865_s30 = sphi %s8936_s30, %s12894_s30   ;;  %s8861_s29 = sphi %s8934_s29, %s12893_s29   ;;  %s8857_s28 = sphi %s8932_s28, %s12892_s28   ;;  %s8853_s27 = sphi %s8930_s27, %s12891_s27   ;;  %s8849_s26 = sphi %s8928_s26, %s12890_s26   ;;  %s8845_s25 = sphi %s8926_s25, %s12889_s25   ;;  %s8841_s24 = sphi %s8924_s24, %s12888_s24  }
   0xf   : > { %p57_p0 = scmp.ne.s32.totalorder %s8845_s25, %s8841_s24  ;;  %p8964_p1 = scmp.eq.s32.totalorder %s8350_s9, 0 }
  0x10   : > { %p8968_p2 = scmp.eq.s32.totalorder %s8350_s9, 3  ;;  %p8352_p3 = scmp.ge.s32.totalorder %s8869_s8, 1 }
  0x11   : > { %p236_p4 = scmp.lt.s32.totalorder %s8869_s8, 5  ;;  %p8976_p5 = por %p8964_p1, %p57_p0 }
  0x12   : > { %s12824_s1 = sld [smem:[#allocation19_spill]]  ;;  %s8871_s17 = smov [#allocation4]  }
  0x13   : > { %p8980_p6 = pnand %p8352_p3, %p236_p4  ;;  %s250_s18 = sshll.u32 %s8871_s17, 4  ;;  %s251_s18 = int_to_ptr.vmem [resolvable:$true] %s250_s18 }
  0x14   : > { %s12826_s2 = sld [smem:[#allocation20_spill]]  ;;  %s8872_s23 = smov [#allocation6]  }
  0x15   : > { %p8541_p7 = pneg %p8980_p6  ;;  %s262_s24 = sshll.u32 %s8872_s23, 4  ;;  %s263_s24 = int_to_ptr.vmem [resolvable:$true] %s262_s24 }
  0x16   : > { %s12827_s3 = sld [smem:[#allocation21_spill]]  ;;  %s8873_s17 = smov [#allocation7]  }
  0x17   : > { %p8991_p8 = pnand %p8541_p7, %p8964_p1  ;;  %s273_s20 = sshll.u32 %s8873_s17, 4  ;;  %s274_s20 = int_to_ptr.vmem [resolvable:$true] %s273_s20 }
  0x18   : > { %s248_s16 = sshll.u32 %s12824_s1, 4  ;;  %s8874_s21 = smov 192   ;;  %s249_s16 = int_to_ptr.hbm [resolvable:$true] %s248_s16 }
  0x19   : > { %8544 = dma.hbm_to_vmem [thread:$0]  (!%p8991_p8), %s249_s16, 16, %s251_s18, [#allocation5]  }
  0x1a   : > { %s260_s22 = sshll.u32 %s12826_s2, 4  ;;  %s8875_s23 = smov 12   ;;  %s261_s22 = int_to_ptr.hbm [resolvable:$true] %s260_s22 }
  0x1b   : > { %8547 = dma.hbm_to_vmem [thread:$0]  (!%p8991_p8), %s261_s22, 16, %s263_s24, [#allocation5]  }
  0x1c   : > { %s271_s15 = sshll.u32 %s12827_s3, 4  ;;  %s32_s16 = sadd.s32 1, %s8861_s29  ;;  %s272_s15 = int_to_ptr.hbm [resolvable:$true] %s271_s15 }
  0x1d   : > { %8550 = dma.hbm_to_vmem [thread:$0]  (!%p8991_p8), %s272_s15, 3072, %s274_s20, [#allocation8], %s8874_s21, %s8874_s21, %s8875_s23  }
  0x1e   : > { %s35_s18 = sadd.s32 1, %s8865_s30  ;;  %p33_p9 = scmp.ge.s32.totalorder %s32_s16, 2 }
  0x1f   : > { %s44_s9 = sadd.s32 1, %s8849_s26  ;;  %p51_p10 = scmp.ne.s32.totalorder %s8849_s26, %s8845_s25 }
  0x20   : > { %p52_p11 = scmp.eq.s32.totalorder %s8869_s8, 0  ;;  %s12896_s16 = smov (%p33_p9, %s32_s16), 0 }
  0x21   : > { %12828 = sst [smem:[#allocation16_spill]] %s12896_s16  ;;  %s12898_s18 = smov (!%p33_p9, %s35_s18), %s8865_s30 }
  0x22   : > { %s40_s22 = ssub.s32 %s8861_s29, %s12896_s16  ;;  %p9018_p12 = por %p52_p11, %p51_p10 }
  0x23   : > { %p37_p13 = scmp.ge.s32.totalorder %s12898_s18, 2  ;;  %p9024_p0 = por %p8968_p2, %p51_p10 }
  0x24   : > { %p8558_p3 = scmp.lt.s32.totalorder %s8869_s8, 4  ;;  %s290_s14 = sand.u32 1, %s8849_s26  }
  0x25   : > { %s12900_s18 = smov (%p37_p13, %s12898_s18), 0  ;;  %s8357_s15 = sshll.u32 %s290_s14, 7 }
  0x26   : > { %s39_s17 = ssub.s32 %s8865_s30, %s12900_s18  ;;  %s8358_s21 = sshll.u32 %s8861_s29, 4 }
  0x27   : > { %s41_s20 = sor.u32 %s40_s22, %s39_s17  ;;  %s8359_s23 = sshll.u32 %s8865_s30, 5 }
  0x28   : > { %p42_p4 = scmp.eq.s32.totalorder %s41_s20, 0  ;;  %s299_s1 = sadd.s32 %s8359_s23, %s8358_s21 }
  0x29   : > { %s294_s2 = scalar_lea.vmem [#allocation2], %s8357_s15  ;;  %s8360_s16 = sshll.u32 %s299_s1, 3 }
  0x2a   : > { %s304_s11 = sshll.u32 %s294_s2, 4  ;;  %s301_s5 = scalar_lea.hbm %s12797_s0, %s8360_s16  ;;  %s305_s11 = int_to_ptr.vmem [resolvable:$true] %s304_s11 }
  0x2b   : > { %s9037_s3 = scalar_select %p42_p4, %s8849_s26, %s44_s9  }
  0x2c   : > { %p8552_p2 = pnand %p8558_p3, %p9018_p12  ;;  %s302_s28 = sshll.u32 %s301_s5, 4  ;;  %s303_s28 = int_to_ptr.hbm [resolvable:$true] %s302_s28 }
  0x2d   : > { %s291_s22 = scalar_lea.sflag [#allocation3], %s290_s14  ;;  %s8876_s17 = smov 128  }
  0x2e   : > { %s8877_s20 = smov 8   ;;  %316 = sbr.rel (%p8980_p6) target bundleno = 1431 (0x597), region = 40 }
  0x2f   : > { %8554 = dma.hbm_to_vmem [thread:$0]  (!%p8552_p2), %s303_s28, 2048, %s305_s11, %s291_s22, %s8876_s17, %s8876_s17, %s8877_s20  }
  0x33   : > { %s9049_s1 = sand.u32 1, %s8845_s25  }
  0x34   : > { %s8362_s2 = sshll.u32 %s9049_s1, 7  ;;  %s319_s6 = scalar_lea.sflag [#allocation3], %s9049_s1 }
  0x35   : > { %s9053_s7 = scalar_lea.vmem [#allocation2], %s8362_s2 }
  0x36   : > { %8828 = dma.done.wait (%p8976_p5), %s319_s6, 2048  }
  0x37   : > { %8830 = vsyncadd (%p8976_p5), %s319_s6, 4294965248 }
  0x38   : > { %8832 = dma.done.wait (%p8964_p1), [#allocation5], 32  }
  0x39   : > { %8834 = vsyncadd (%p8964_p1), [#allocation5], 4294967264 }
  0x3a   : > { %8836 = dma.done.wait (%p8964_p1), [#allocation8], 3072  }
  0x3b   : > { %8838 = vsyncadd (%p8964_p1), [#allocation8], 4294964224  ;;  %v393_v0 = vld [vmem:[%s9053_s7 + $0x60] sm:$0xff]  ;;  %v383_v2 = vld [vmem:[%s9053_s7 + $0x10] sm:$0xff]  ;;  %v8878_v16 = vmov 128.0   ;;  %s8879_s10 = smov 96  }
  0x3c   : > { %v381_v1 = vld [vmem:[%s9053_s7] sm:$0xff]  ;;  %423 = vadd.xlane.f32.xlu1 %v393_v0  ;;  %403 = vadd.xlane.f32.xlu2 %v383_v2  ;;  %v394_v3 = vld [vmem:[%s9053_s7 + $0x68] sm:$0xff]  ;;  %v384_v5 = vld [vmem:[%s9053_s7 + $0x18] sm:$0xff]  ;;  %8641 = vrcp.f32 %v8878_v16  ;;  %s8880_s12 = smov 64   ;;  %s8881_s13 = smov 32  }
  0x3d   : > { %399 = vadd.xlane.f32.xlu0 %v381_v1  ;;  %v382_v4 = vld [vmem:[%s9053_s7 + $0x8] sm:$0xff]  ;;  %v395_v6 = vld [vmem:[%s9053_s7 + $0x70] sm:$0xff]  ;;  %v9075_v7 = vld [vmem:[%s9053_s7 + $0x78] sm:$0xff]  ;;  %s9938_s16 = sshll.u32 %s9049_s1, 8  ;;  %s12881_s15 = sld [smem:[#allocation15_spill]] (%p9024_p0) }
  0x3e   : > { %v9078_v8 = vld [vmem:[%s9053_s7 + $0x20] sm:$0xff]  ;;  %v9083_v9 = vld [vmem:[%s9053_s7 + $0x28] sm:$0xff]  ;;  %v9086_v10 = vld [vmem:[%s9053_s7 + $0x58] sm:$0xff]  ;;  %s9964_s9 = scalar_lea.vmem [#allocation9], %s9938_s16  ;;  %s10006_s24 = scalar_lea.vmem [#allocation10], %s9938_s16 }
  0x3f   : > { %v9089_v11 = vld [vmem:[%s9053_s7 + $0x30] sm:$0xff]  ;;  %v9095_v12 = vld [vmem:[%s9053_s7 + $0x38] sm:$0xff]  ;;  %v9098_v13 = vld [vmem:[%s9053_s7 + $0x40] sm:$0xff]  ;;  %s10097_s14 = scalar_lea.vmem [#allocation11], %s9938_s16  ;;  %s8468_s21 = sshll.u32 (%p9024_p0), %s8853_s27, 4 }
  0x40   : > { %v9103_v14 = vld [vmem:[%s9053_s7 + $0x48] sm:$0xff]  ;;  %v9107_v15 = vld [vmem:[%s9053_s7 + $0x50] sm:$0xff]  ;;  %s12882_s1 = sld [smem:[#allocation22_spill]] (%p9024_p0) }
  0x42   : > { %v8642_v17 = vpop.eup %8641 }
  0x43   : > { %v432_v18 = vmul.f32 128.0, %v8642_v17  ;;  %vm436_vm0 = vweird.f32 %v8642_v17  ;;  %s8469_s23 = sshll.u32 (%p9024_p0), %s12881_s15, 7 }
  0x44   : > { %425 = vadd.xlane.f32.xlu1 %v394_v3  ;;  %405 = vadd.xlane.f32.xlu2 %v384_v5  ;;  %s7282_s11 = sadd.s32 (%p9024_p0), %s8469_s23, %s8468_s21 }
  0x45   : > { %401 = vadd.xlane.f32.xlu0 %v382_v4  ;;  %v433_v19 = vsub.f32 1.0, %v432_v18  ;;  %s8470_s22 = sshll.u32 (%p9024_p0), %s7282_s11, 2 }
  0x46   : > { %s12563_s2 = scalar_lea.vmem (%p9024_p0), %s12882_s1, %s8470_s22 }
  0x47   : > { %v434_v20 = vmul.f32 %v8642_v17, %v433_v19 }
  0x49   : > { %v435_v21 = vadd.f32 %v8642_v17, %v434_v20 }
  0x4b   : > { %v9110_v22 = vsel %vm436_vm0, %v8642_v17, %v435_v21 }
  0x4c   : > { %429 = vadd.xlane.f32.xlu1 %v9075_v7  ;;  %407 = vadd.xlane.f32.xlu2 %v9078_v8 }
  0x4d   : > { %427 = vadd.xlane.f32.xlu0 %v395_v6 }
  0x54   : > { %421 = vadd.xlane.f32.xlu1 %v9086_v10  ;;  %411 = vadd.xlane.f32.xlu2 %v9089_v11 }
  0x55   : > { %409 = vadd.xlane.f32.xlu0 %v9083_v9 }
  0x5c   : > { %415 = vadd.xlane.f32.xlu2 %v9098_v13 }
  0x5d   : > { %413 = vadd.xlane.f32.xlu0 %v9095_v12 }
  0x65   : > { %417 = vadd.xlane.f32.xlu0 %v9103_v14 }
  0x6d   : > { %419 = vadd.xlane.f32.xlu0 %v9107_v15 }
  0xaf   : > { %v424_v23 = vpop.xlane.xlu1 %423  ;;  %v404_v27 = vpop.xlane.xlu2 %403 }
  0xb0   : > { %v400_v24 = vpop.xlane.xlu0 %399  ;;  %v450_v25 = vmul.f32 %v9110_v22, %v424_v23  ;;  %v440_v38 = vmul.f32 %v9110_v22, %v404_v27  ;;  %v8501_v27 = vld [vmem:[#allocation7 + $0xb0] sm:$0xf0] }
  0xb1   : > { %v438_v26 = vmul.f32 %v9110_v22, %v400_v24 }
  0xb2   : > { %v9114_v28 = vsub.f32 %v393_v0, %v450_v25  ;;  %v9134_v43 = vsub.f32 %v383_v2, %v440_v38  ;;  %v8497_v38 = vld [vmem:[#allocation7 + $0x94] sm:$0xf] }
  0xb3   : > { %v9116_v29 = vsub.f32 %v381_v1, %v438_v26  ;;  %v8455_v26 = vld [vmem:[#allocation7 + $0xa8] sm:$0xf] }
  0xb4   : > { %v482_v30 = vmul.f32 %v9114_v28, %v9114_v28  ;;  %v472_v50 = vmul.f32 %v9134_v43, %v9134_v43 }
  0xb5   : > { %v470_v31 = vmul.f32 %v9116_v29, %v9116_v29 }
  0xb6   : > { %510 = vadd.xlane.f32.xlu0 %v482_v30  ;;  %v8500_v30 = vld [vmem:[#allocation7 + $0xac] sm:$0xf] }
  0xb7   : > { %486 = vadd.xlane.f32.xlu1 %v470_v31  ;;  %v426_v32 = vpop.xlane.xlu1 %425  ;;  %v406_v36 = vpop.xlane.xlu2 %405  ;;  %v8456_v31 = vor.u32 %v8501_v27, %v8455_v26  ;;  %v8485_v26 = vld [vmem:[#allocation7 + $0x34] sm:$0xf] }
  0xb8   : > { %v402_v33 = vpop.xlane.xlu0 %401  ;;  %v451_v34 = vmul.f32 %v9110_v22, %v426_v32  ;;  %v441_v40 = vmul.f32 %v9110_v22, %v406_v36  ;;  %v8463_v32 = vld [vmem:[#allocation7 + $0xb0] sm:$0xf]  ;;  %v8498_v36 = vld [vmem:[#allocation7 + $0x98] sm:$0xf0] }
  0xb9   : > { %v439_v35 = vmul.f32 %v9110_v22, %v402_v33  ;;  %v8502_v33 = vld [vmem:[#allocation7 + $0xb8] sm:$0xf0]  ;;  %940 = vmatpush.bf16.msra.mxu0 %v8456_v31  ;;  %8503 = vmatpush.bf16.msra.mxu3 %v8456_v31  ;;  %v8403_v31 = vld [vmem:[#allocation7 + $0x38] sm:$0xf] }
  0xba   : > { %v9124_v37 = vsub.f32 %v394_v3, %v451_v34  ;;  %v9136_v44 = vsub.f32 %v384_v5, %v441_v40 }
  0xbb   : > { %v9127_v39 = vsub.f32 %v382_v4, %v439_v35  ;;  %v9203_v35 = vor.u32 %v8502_v33, %v8463_v32 }
  0xbc   : > { %v483_v41 = vmul.f32 %v9124_v37, %v9124_v37  ;;  %v473_v51 = vmul.f32 %v9136_v44, %v9136_v44 }
  0xbd   : > { %v471_v42 = vmul.f32 %v9127_v39, %v9127_v39  ;;  %1038 = vmatpush.bf16.msra.mxu2 %v9203_v35 }
  0xbf   : > { %512 = vadd.xlane.f32.xlu1 %v483_v41  ;;  %488 = vadd.xlane.f32.xlu2 %v471_v42  ;;  %v430_v46 = vpop.xlane.xlu1 %429  ;;  %v408_v48 = vpop.xlane.xlu2 %407  ;;  %v8445_v41 = vld [vmem:[#allocation7 + $0x9c] sm:$0xf0]  ;;  %v8451_v42 = vld [vmem:[#allocation7 + $0x98] sm:$0xf] }
  0xc0   : > { %v428_v45 = vpop.xlane.xlu0 %427  ;;  %v453_v52 = vmul.f32 %v9110_v22, %v430_v46  ;;  %v442_v58 = vmul.f32 %v9110_v22, %v408_v48  ;;  %v9207_v46 = vor.u32 %v8497_v38, %v8445_v41  ;;  %v8431_v48 = vld [vmem:[#allocation7 + $0x78] sm:$0xf]  ;;  %v8482_v41 = vld [vmem:[#allocation7 + $0x1c] sm:$0xf] }
  0xc1   : > { %v452_v47 = vmul.f32 %v9110_v22, %v428_v45  ;;  %v8499_v45 = vld [vmem:[#allocation7 + $0xa0] sm:$0xf0]  ;;  %v8383_v38 = vld [vmem:[#allocation7 + $0x18] sm:$0xf] }
  0xc2   : > { %v9149_v54 = vsub.f32 %v9075_v7, %v453_v52  ;;  %v9162_v63 = vsub.f32 %v9078_v8, %v442_v58 }
  0xc3   : > { %v9139_v49 = vsub.f32 %v395_v6, %v452_v47  ;;  %v9209_v47 = vor.u32 %v8499_v45, %v8451_v42 }
  0xc4   : > { %v485_v60 = vmul.f32 %v9149_v54, %v9149_v54  ;;  %v474_v5 = vmul.f32 %v9162_v63, %v9162_v63 }
  0xc5   : > { %v484_v53 = vmul.f32 %v9139_v49, %v9139_v49  ;;  %1039 = vmatpush.bf16.msra.mxu2 %v9209_v47 }
  0xc7   : > { %490 = vadd.xlane.f32.xlu1 %v472_v50  ;;  %492 = vadd.xlane.f32.xlu2 %v473_v51  ;;  %v412_v57 = vpop.xlane.xlu2 %411  ;;  %v8495_v50 = vld [vmem:[#allocation7 + $0x80] sm:$0xf0]  ;;  %v8494_v51 = vld [vmem:[#allocation7 + $0x7c] sm:$0xf] }
  0xc8   : > { %514 = vadd.xlane.f32.xlu0 %v484_v53  ;;  %v410_v55 = vpop.xlane.xlu0 %409  ;;  %v444_v61 = vmul.f32 %v9110_v22, %v412_v57  ;;  %v8432_v52 = vor.u32 %v8495_v50, %v8431_v48  ;;  %v8433_v53 = vld [vmem:[#allocation7 + $0x84] sm:$0xf0] }
  0xc9   : > { %v443_v56 = vmul.f32 %v9110_v22, %v410_v55  ;;  %v8439_v55 = vld [vmem:[#allocation7 + $0x80] sm:$0xf]  ;;  %v9213_v57 = vor.u32 %v8494_v51, %v8433_v53  ;;  %v8385_v50 = vld [vmem:[#allocation7 + $0x24] sm:$0xf0] }
  0xca   : > { %v9165_v0 = vsub.f32 %v9089_v11, %v444_v61  ;;  %v8492_v61 = vld [vmem:[#allocation7 + $0x68] sm:$0xf0]  ;;  %v8391_v51 = vld [vmem:[#allocation7 + $0x20] sm:$0xf]  ;;  %v9239_v53 = vor.u32 %v8482_v41, %v8385_v50 }
  0xcb   : > { %v9154_v59 = vsub.f32 %v9083_v9, %v443_v56  ;;  %v8496_v56 = vld [vmem:[#allocation7 + $0x88] sm:$0xf0] }
  0xcc   : > { %v476_v6 = vmul.f32 %v9165_v0, %v9165_v0  ;;  %v9215_v58 = vor.u32 %v8496_v56, %v8439_v55 }
  0xcd   : > { %v475_v62 = vmul.f32 %v9154_v59, %v9154_v59 }
  0xce   : > { %1040 = vmatpush.bf16.msra.mxu2 %v9215_v58 }
  0xcf   : > { %516 = vadd.xlane.f32.xlu1 %v485_v60  ;;  %496 = vadd.xlane.f32.xlu2 %v475_v62  ;;  %v416_v3 = vpop.xlane.xlu2 %415  ;;  %v8419_v60 = vld [vmem:[#allocation7 + $0x60] sm:$0xf]  ;;  %v8491_v62 = vld [vmem:[#allocation7 + $0x64] sm:$0xf] }
  0xd0   : > { %v414_v1 = vpop.xlane.xlu0 %413  ;;  %v446_v7 = vmul.f32 %v9110_v22, %v416_v3  ;;  %v8427_v3 = vld [vmem:[#allocation7 + $0x68] sm:$0xf] }
  0xd1   : > { %v445_v2 = vmul.f32 %v9110_v22, %v414_v1  ;;  %v8420_v1 = vor.u32 %v8492_v61, %v8419_v60  ;;  %v8371_v61 = vld [vmem:[#allocation7] sm:$0xf] }
  0xd2   : > { %v9179_v9 = vsub.f32 %v9098_v13, %v446_v7 }
  0xd3   : > { %v9169_v4 = vsub.f32 %v9095_v12, %v445_v2  ;;  %v422_v12 = vpop.xlane.xlu1 %421  ;;  %v8421_v2 = vld [vmem:[#allocation7 + $0x6c] sm:$0xf0] }
  0xd4   : > { %v478_v18 = vmul.f32 %v9179_v9, %v9179_v9  ;;  %v449_v19 = vmul.f32 %v9110_v22, %v422_v12  ;;  %v8488_v12 = vld [vmem:[#allocation7 + $0x4c] sm:$0xf] }
  0xd5   : > { %v477_v8 = vmul.f32 %v9169_v4, %v9169_v4 }
  0xd6   : > { %v9191_v13 = vsub.f32 %v9086_v10, %v449_v19  ;;  %v8457_v10 = vld [vmem:[#allocation7 + $0xb4] sm:$0xf0]  ;;  %v8415_v19 = vld [vmem:[#allocation7 + $0x50] sm:$0xf] }
  0xd7   : > { %494 = vadd.xlane.f32.xlu1 %v474_v5  ;;  %498 = vadd.xlane.f32.xlu2 %v476_v6  ;;  %v9201_v34 = vor.u32 %v8500_v30, %v8457_v10  ;;  %v8493_v5 = vld [vmem:[#allocation7 + $0x70] sm:$0xf0]  ;;  %v9219_v6 = vor.u32 %v8491_v62, %v8421_v2  ;;  %v8397_v30 = vld [vmem:[#allocation7 + $0x3c] sm:$0xf0]  ;;  %v8487_v10 = vld [vmem:[#allocation7 + $0x40] sm:$0xf0] }
  0xd8   : > { %500 = vadd.xlane.f32.xlu0 %v477_v8  ;;  %v418_v11 = vpop.xlane.xlu0 %417  ;;  %v9221_v7 = vor.u32 %v8493_v5, %v8427_v3  ;;  %v8407_v8 = vld [vmem:[#allocation7 + $0x48] sm:$0xf]  ;;  %v9231_v32 = vor.u32 %v8485_v26, %v8397_v30  ;;  %v9233_v33 = vor.u32 %v8487_v10, %v8403_v31  ;;  %v8480_v62 = vld [vmem:[#allocation7 + $0x8] sm:$0xf0]  ;;  %v8373_v3 = vld [vmem:[#allocation7 + $0xc] sm:$0xf0] }
  0xd9   : > { %v447_v16 = vmul.f32 %v9110_v22, %v418_v11  ;;  %989 = vmatpush.bf16.msra.mxu1 %v9201_v34  ;;  %v8489_v11 = vld [vmem:[#allocation7 + $0x50] sm:$0xf0]  ;;  %v8372_v2 = vor.u32 %v8480_v62, %v8371_v61  ;;  %v8379_v5 = vld [vmem:[#allocation7 + $0x8] sm:$0xf] }
  0xda   : > { %1041 = vmatpush.bf16.msra.mxu2 %v9221_v7 }
  0xdb   : > { %v9183_v17 = vsub.f32 %v9103_v14, %v447_v16  ;;  %v481_v14 = vmul.f32 %v9191_v13, %v9191_v13  ;;  %v8408_v16 = vor.u32 %v8489_v11, %v8407_v8  ;;  %v8481_v8 = vld [vmem:[#allocation7 + $0x10] sm:$0xf0] }
  0xdd   : > { %v479_v20 = vmul.f32 %v9183_v17, %v9183_v17  ;;  %990 = vmatpush.bf16.msra.mxu1 %v9207_v46 }
  0xdf   : > { %502 = vadd.xlane.f32.xlu1 %v478_v18  ;;  %504 = vadd.xlane.f32.xlu2 %v479_v20  ;;  %v8409_v18 = vld [vmem:[#allocation7 + $0x54] sm:$0xf0]  ;;  %v8490_v20 = vld [vmem:[#allocation7 + $0x58] sm:$0xf0] }
  0xe0   : > { %v420_v21 = vpop.xlane.xlu0 %419 }
  0xe1   : > { %v448_v23 = vmul.f32 %v9110_v22, %v420_v21  ;;  %991 = vmatpush.bf16.msra.mxu1 %v9213_v57  ;;  %v9225_v21 = vor.u32 %v8488_v12, %v8409_v18  ;;  %v9253_v12 = vor.u32 %v8481_v8, %v8379_v5 }
  0xe3   : > { %v9195_v24 = vsub.f32 %v9107_v15, %v448_v23  ;;  %v8443_v15 = vld [vmem:[#allocation7 + $0x90] sm:$0xf]  ;;  %v9227_v23 = vor.u32 %v8490_v20, %v8415_v19 }
  0xe4   : > { %v8444_v40 = vor.u32 %v8498_v36, %v8443_v15 }
  0xe5   : > { %v480_v25 = vmul.f32 %v9195_v24, %v9195_v24  ;;  %992 = vmatpush.bf16.msra.mxu1 %v9219_v6  ;;  %1042 = vmatpush.bf16.msra.mxu2 %v9227_v23 }
  0xe6   : > { %941 = vmatpush.bf16.msra.mxu0 %v8444_v40  ;;  %8504 = vmatpush.bf16.msra.mxu3 %v8444_v40  ;;  %v8483_v40 = vld [vmem:[#allocation7 + $0x20] sm:$0xf0] }
  0xe7   : > { %508 = vadd.xlane.f32.xlu1 %v481_v14  ;;  %506 = vadd.xlane.f32.xlu0 %v480_v25  ;;  %v8395_v14 = vld [vmem:[#allocation7 + $0x30] sm:$0xf]  ;;  %v8486_v25 = vld [vmem:[#allocation7 + $0x38] sm:$0xf0]  ;;  %v8384_v48 = vor.u32 %v8483_v40, %v8383_v38 }
  0xe8   : > { %v8396_v27 = vor.u32 %v8486_v25, %v8395_v14 }
  0xe9   : > { %993 = vmatpush.bf16.msra.mxu1 %v9225_v21  ;;  %1043 = vmatpush.bf16.msra.mxu2 %v9233_v33 }
  0xea   : > { %942 = vmatpush.bf16.msra.mxu0 %v8432_v52  ;;  %8505 = vmatpush.bf16.msra.mxu3 %v8432_v52  ;;  %v8484_v52 = vld [vmem:[#allocation7 + $0x28] sm:$0xf0] }
  0xeb   : > { %v9241_v55 = vor.u32 %v8484_v52, %v8391_v51 }
  0xed   : > { %994 = vmatpush.bf16.msra.mxu1 %v9231_v32  ;;  %1044 = vmatpush.bf16.msra.mxu2 %v9241_v55 }
  0xee   : > { %943 = vmatpush.bf16.msra.mxu0 %v8420_v1  ;;  %8506 = vmatpush.bf16.msra.mxu3 %v8420_v1  ;;  %v8479_v1 = vld [vmem:[#allocation7 + $0x4] sm:$0xf] }
  0xef   : > { %v9251_v11 = vor.u32 %v8479_v1, %v8373_v3 }
  0xf1   : > { %995 = vmatpush.bf16.msra.mxu1 %v9239_v53  ;;  %1045 = vmatpush.bf16.msra.mxu2 %v9253_v12 }
  0xf2   : > { %944 = vmatpush.bf16.msra.mxu0 %v8408_v16  ;;  %8507 = vmatpush.bf16.msra.mxu3 %v8408_v16 }
  0xf5   : > { %996 = vmatpush.bf16.msra.mxu1 %v9251_v11 }
  0xf6   : > { %945 = vmatpush.bf16.msra.mxu0 %v8396_v27  ;;  %8508 = vmatpush.bf16.msra.mxu3 %v8396_v27 }
  0xfa   : > { %946 = vmatpush.bf16.msra.mxu0 %v8384_v48  ;;  %8509 = vmatpush.bf16.msra.mxu3 %v8384_v48 }
  0xfe   : > { %947 = vmatpush.bf16.msra.mxu0 %v8372_v2  ;;  %8510 = vmatpush.bf16.msra.mxu3 %v8372_v2 }
 0x102   : > { %8511 = vmatpush.bf16.msrb.mxu3 %v9201_v34 }
 0x106   : > { %8512 = vmatpush.bf16.msrb.mxu3 %v9207_v46 }
 0x10a   : > { %8513 = vmatpush.bf16.msrb.mxu3 %v9213_v57 }
 0x10e   : > { %8514 = vmatpush.bf16.msrb.mxu3 %v9219_v6 }
 0x112   : > { %8515 = vmatpush.bf16.msrb.mxu3 %v9225_v21 }
 0x116   : > { %8516 = vmatpush.bf16.msrb.mxu3 %v9231_v32 }
 0x11a   : > { %8517 = vmatpush.bf16.msrb.mxu3 %v9239_v53 }
 0x11e   : > { %8518 = vmatpush.bf16.msrb.mxu3 %v9251_v11 }
 0x129   : > { %v511_v36 = vpop.xlane.xlu0 %510 }
 0x12a   : > { %v487_v15 = vpop.xlane.xlu1 %486  ;;  %v530_v45 = vmul.f32 %v511_v36, %v9110_v22 }
 0x12b   : > { %v518_v42 = vmul.f32 %v487_v15, %v9110_v22 }
 0x12c   : > { %v9245_v60 = vadd.f32 1e-05, %v530_v45 }
 0x12d   : > { %v9243_v56 = vadd.f32 1e-05, %v518_v42 }
 0x12e   : > { %vm676_vm1 = vweird.f32 %v9245_v60 }
 0x12f   : > { %8643 = vrsqrt.f32 %v9243_v56  ;;  %vm556_vm4 = vweird.f32 %v9243_v56 }
 0x130   : > { %8645 = vrsqrt.f32 %v9245_v60 }
 0x132   : > { %v513_v16 = vpop.xlane.xlu1 %512  ;;  %v489_v18 = vpop.xlane.xlu2 %488 }
 0x133   : > { %v531_v19 = vmul.f32 %v513_v16, %v9110_v22  ;;  %v519_v20 = vmul.f32 %v489_v18, %v9110_v22 }
 0x135   : > { %v9260_v14 = vpop.eup %8643  ;;  %v547_v25 = vadd.f32 1e-05, %v531_v19  ;;  %v9262_v26 = vadd.f32 1e-05, %v519_v20 }
 0x136   : > { %v9264_v27 = vpop.eup %8645  ;;  %v551_v30 = vmul.f32 %v9260_v14, %v9243_v56  ;;  %vm557_vm3 = vweird.f32 %v9260_v14 }
 0x137   : > { %v671_v31 = vmul.f32 %v9264_v27, %v9245_v60  ;;  %8647 = vrsqrt.f32 %v547_v25  ;;  %vm677_vm2 = vweird.f32 %v9264_v27  ;;  %vm686_vm6 = vweird.f32 %v547_v25  ;;  %vm9303_vm7 = vmor %vm556_vm4, %vm557_vm3 }
 0x138   : > { %v552_v10 = vmul.f32 %v9260_v14, %v551_v30  ;;  %8649 = vrsqrt.f32 %v9262_v26  ;;  %vm9298_vm5 = vmor %vm676_vm1, %vm677_vm2  ;;  %vm566_vm11 = vweird.f32 %v9262_v26 }
 0x139   : > { %v672_v34 = vmul.f32 %v9264_v27, %v671_v31 }
 0x13a   : > { %v553_v15 = vmul.f32 0.5, %v552_v10  ;;  %v491_v36 = vpop.xlane.xlu1 %490  ;;  %v493_v38 = vpop.xlane.xlu2 %492 }
 0x13b   : > { %v673_v40 = vmul.f32 0.5, %v672_v34  ;;  %v520_v41 = vmul.f32 %v491_v36, %v9110_v22  ;;  %v521_v42 = vmul.f32 %v493_v38, %v9110_v22  ;;  %v515_v45 = vpop.xlane.xlu0 %514 }
 0x13c   : > { %v554_v48 = vsub.f32 1.5, %v553_v15  ;;  %v532_v50 = vmul.f32 %v515_v45, %v9110_v22 }
 0x13d   : > { %v9278_v51 = vpop.eup %8647  ;;  %v674_v52 = vsub.f32 1.5, %v673_v40  ;;  %v9280_v46 = vadd.f32 1e-05, %v520_v41  ;;  %v9282_v61 = vadd.f32 1e-05, %v521_v42 }
 0x13e   : > { %v8650_v62 = vpop.eup %8649  ;;  %v681_v1 = vmul.f32 %v9278_v51, %v547_v25  ;;  %v9285_v2 = vadd.f32 1e-05, %v532_v50  ;;  %v555_v57 = vmul.f32 %v9260_v14, %v554_v48  ;;  %vm687_vm8 = vweird.f32 %v9278_v51 }
 0x13f   : > { %v561_v3 = vmul.f32 %v8650_v62, %v9262_v26  ;;  %8651 = vrsqrt.f32 %v9280_v46  ;;  %v675_v8 = vmul.f32 %v9264_v27, %v674_v52  ;;  %vm567_vm9 = vweird.f32 %v8650_v62  ;;  %vm9329_vm10 = vmor %vm686_vm6, %vm687_vm8 }
 0x140   : > { %v682_v5 = vmul.f32 %v9278_v51, %v681_v1  ;;  %8653 = vrsqrt.f32 %v9282_v61  ;;  %v559_v10 = vsel %vm9303_vm7, %v9260_v14, %v555_v57  ;;  %vm568_vm12 = vmor %vm566_vm11, %vm567_vm9  ;;  %vm576_vm13 = vweird.f32 %v9280_v46 }
 0x141   : > { %v562_v16 = vmul.f32 %v8650_v62, %v561_v3  ;;  %8655 = vrsqrt.f32 %v9285_v2  ;;  %v679_v36 = vsel %vm9298_vm5, %v9264_v27, %v675_v8  ;;  %v710_v52 = vmul.f32 %v559_v10, %v9116_v29  ;;  %v9346_v3 = vld [vmem:[#allocation4] ss:$0 sm:$0xff] }
 0x142   : > { %v683_v18 = vmul.f32 0.5, %v682_v5  ;;  %v517_v19 = vpop.xlane.xlu1 %516  ;;  %v497_v20 = vpop.xlane.xlu2 %496  ;;  %v722_v25 = vmul.f32 %v679_v36, %v9114_v28  ;;  %vm586_vm14 = vweird.f32 %v9282_v61  ;;  %vm696_vm1 = vweird.f32 %v9285_v2 }
 0x143   : > { %v563_v6 = vmul.f32 0.5, %v562_v16  ;;  %v533_v31 = vmul.f32 %v517_v19, %v9110_v22  ;;  %v523_v56 = vmul.f32 %v497_v20, %v9110_v22 }
 0x144   : > { %v684_v34 = vsub.f32 1.5, %v683_v18  ;;  %v741_v10 = vmul.f32 %v9346_v3, %v722_v25 }
 0x145   : > { %v9314_v15 = vpop.eup %8651  ;;  %v564_v38 = vsub.f32 1.5, %v563_v6  ;;  %v9319_v40 = vadd.f32 1e-05, %v533_v31  ;;  %v9321_v41 = vadd.f32 1e-05, %v523_v56 }
 0x146   : > { %v9323_v42 = vpop.eup %8653  ;;  %v685_v45 = vmul.f32 %v9278_v51, %v684_v34  ;;  %v571_v14 = vmul.f32 %v9314_v15, %v9280_v46  ;;  %v9367_v56 = vld [vmem:[#allocation6] ss:$0 sm:$0xff]  ;;  %vm577_vm15 = vweird.f32 %v9314_v15 }
 0x147   : > { %v565_v27 = vmul.f32 %v8650_v62, %v564_v38  ;;  %v581_v48 = vmul.f32 %v9323_v42, %v9282_v61  ;;  %8657 = vrsqrt.f32 %v9319_v40  ;;  %v9339_v50 = vpop.eup %8655  ;;  %vm587_vm0 = vweird.f32 %v9323_v42  ;;  %vm9393_vm3 = vmor %vm576_vm13, %vm577_vm15 }
 0x148   : > { %v572_v1 = vmul.f32 %v9314_v15, %v571_v14  ;;  %8659 = vrsqrt.f32 %v9321_v41  ;;  %v689_v26 = vsel %vm9329_vm10, %v9278_v51, %v685_v45  ;;  %v691_v28 = vmul.f32 %v9339_v50, %v9285_v2  ;;  %vm9404_vm6 = vmor %vm586_vm14, %vm587_vm0 }
 0x149   : > { %v569_v57 = vsel %vm568_vm12, %v8650_v62, %v565_v27  ;;  %v582_v5 = vmul.f32 %v9323_v42, %v581_v48  ;;  %v723_v20 = vmul.f32 %v689_v26, %v9124_v37  ;;  %v729_v62 = vmul.f32 %v9346_v3, %v710_v52 }
 0x14a   : > { %v573_v29 = vmul.f32 0.5, %v572_v1  ;;  %v495_v8 = vpop.xlane.xlu1 %494  ;;  %v499_v16 = vpop.xlane.xlu2 %498  ;;  %v711_v60 = vmul.f32 %v569_v57, %v9127_v39  ;;  %v692_v19 = vmul.f32 %v9339_v50, %v691_v28  ;;  %vm697_vm2 = vweird.f32 %v9339_v50 }
 0x14b   : > { %v583_v18 = vmul.f32 0.5, %v582_v5  ;;  %v522_v32 = vmul.f32 %v495_v8, %v9110_v22  ;;  %v501_v51 = vpop.xlane.xlu0 %500  ;;  %v524_v38 = vmul.f32 %v499_v16, %v9110_v22  ;;  %v742_v48 = vmul.f32 %v9346_v3, %v723_v20  ;;  %vm9416_vm7 = vmor %vm696_vm1, %vm697_vm2 }
 0x14c   : > { %v574_v6 = vsub.f32 1.5, %v573_v29  ;;  %v693_v39 = vmul.f32 0.5, %v692_v19  ;;  %v525_v45 = vmul.f32 %v501_v51, %v9110_v22  ;;  %v730_v21 = vmul.f32 %v9346_v3, %v711_v60 }
 0x14d   : > { %v9363_v30 = vpop.eup %8657  ;;  %v9365_v31 = vadd.f32 1e-05, %v522_v32  ;;  %v584_v34 = vsub.f32 1.5, %v583_v18  ;;  %v748_v25 = vadd.f32 %v9367_v56, %v729_v62  ;;  %vm706_vm4 = vweird.f32 %v9319_v40 }
 0x14e   : > { %v9370_v37 = vpop.eup %8659  ;;  %v701_v53 = vmul.f32 %v9363_v30, %v9319_v40  ;;  %v694_v36 = vsub.f32 1.5, %v693_v39  ;;  %v575_v52 = vmul.f32 %v9314_v15, %v574_v6  ;;  %vm707_vm5 = vweird.f32 %v9363_v30 }
 0x14f   : > { %v601_v27 = vmul.f32 %v9370_v37, %v9321_v41  ;;  %8661 = vrsqrt.f32 %v9365_v31  ;;  %v585_v26 = vmul.f32 %v9323_v42, %v584_v34  ;;  %v9409_v29 = vadd.f32 1e-05, %v524_v38  ;;  %vm9428_vm8 = vmor %vm706_vm4, %vm707_vm5 }
 0x150   : > { %v702_v14 = vmul.f32 %v9363_v30, %v701_v53  ;;  %v695_v46 = vmul.f32 %v9339_v50, %v694_v36  ;;  %v9411_v8 = vadd.f32 1e-05, %v525_v45  ;;  %v760_v16 = vadd.f32 %v9367_v56, %v741_v10 }
 0x151   : > { %v602_v61 = vmul.f32 %v9370_v37, %v601_v27  ;;  %v749_v19 = vadd.f32 %v9367_v56, %v730_v21  ;;  %v761_v32 = vadd.f32 %v9367_v56, %v742_v48  ;;  %v579_v20 = vsel %vm9393_vm3, %v9314_v15, %v575_v52 }
 0x152   : > { %v703_v57 = vmul.f32 0.5, %v702_v14  ;;  %v503_v11 = vpop.xlane.xlu1 %502  ;;  %v505_v5 = vpop.xlane.xlu2 %504  ;;  %v589_v39 = vsel %vm9404_vm6, %v9323_v42, %v585_v26  ;;  %v699_v40 = vsel %vm9416_vm7, %v9339_v50, %v695_v46  ;;  %8663 = vrsqrt.f32 %v9409_v29 }
 0x153   : > { %v526_v2 = vmul.f32 %v503_v11, %v9110_v22  ;;  %v527_v62 = vmul.f32 %v505_v5, %v9110_v22  ;;  %v764_v34 = vpack.c.bf16 %v749_v19, %v748_v25  ;;  %v9440_v15 = vpack.c.bf16 %v761_v32, %v760_v16 }
 0x154   : > { %v704_v18 = vsub.f32 1.5, %v703_v57  ;;  %v603_v38 = vmul.f32 0.5, %v602_v61  ;;  %8665 = vrsqrt.f32 %v9411_v8  ;;  %v712_v21 = vmul.f32 %v579_v20, %v9134_v43 }
 0x155   : > { %v9434_v6 = vpop.eup %8661  ;;  %v9448_v36 = vadd.f32 1e-05, %v526_v2  ;;  %948 = vmatmul.bf16.vlgmr.msra.gmra.mxu0 %v764_v34  ;;  %978 = vmatmul.bf16.vlgmr.msra.gmra.mxu3 %v9440_v15  ;;  %v9455_v45 = vadd.f32 1e-05, %v527_v62  ;;  %v713_v14 = vmul.f32 %v589_v39, %v9136_v44  ;;  %vm606_vm9 = vweird.f32 %v9321_v41 }
 0x156   : > { %v705_v10 = vmul.f32 %v9363_v30, %v704_v18  ;;  %v591_v53 = vmul.f32 %v9434_v6, %v9365_v31  ;;  %997 = vmatmul.bf16.vlgmr.msra.gmra.mxu1 %v764_v34  ;;  %1046 = vmatmul.bf16.vlgmr.msra.gmra.mxu2 %v764_v34  ;;  %v604_v1 = vsub.f32 1.5, %v603_v38  ;;  %vm607_vm10 = vweird.f32 %v9370_v37 }
 0x157   : > { %8519 = vmatpush.bf16.msra.mxu3 %v9203_v35  ;;  %8667 = vrsqrt.f32 %v9448_v36  ;;  %v732_v35 = vmul.f32 %v9346_v3, %v713_v14  ;;  %vm9488_vm11 = vmor %vm606_vm9, %vm607_vm10  ;;  %vm596_vm12 = vweird.f32 %v9365_v31  ;;  %vm597_vm13 = vweird.f32 %v9434_v6 }
 0x158   : > { %v709_v42 = vsel %vm9428_vm8, %v9363_v30, %v705_v10  ;;  %v592_v50 = vmul.f32 %v9434_v6, %v591_v53  ;;  %v724_v30 = vmul.f32 %v699_v40, %v9139_v49  ;;  %8669 = vrsqrt.f32 %v9455_v45  ;;  %v9466_v43 = vpop.eup %8663  ;;  %vm9508_vm14 = vmor %vm596_vm12, %vm597_vm13 }
 0x159   : > { %v725_v52 = vmul.f32 %v709_v42, %v9149_v54  ;;  %v731_v54 = vmul.f32 %v9346_v3, %v712_v21  ;;  %v611_v16 = vmul.f32 %v9466_v43, %v9409_v29  ;;  %v751_v41 = vadd.f32 %v9367_v56, %v732_v35 }
 0x15a   : > { %v509_v27 = vpop.xlane.xlu1 %508  ;;  %v507_v48 = vpop.xlane.xlu0 %506  ;;  %v593_v25 = vmul.f32 0.5, %v592_v50  ;;  %v743_v28 = vmul.f32 %v9346_v3, %v724_v30  ;;  %vm636_vm15 = vweird.f32 %v9448_v36  ;;  %vm646_vm1 = vweird.f32 %v9455_v45 }
 0x15b   : > { %v529_v26 = vmul.f32 %v509_v27, %v9110_v22  ;;  %v528_v44 = vmul.f32 %v507_v48, %v9110_v22  ;;  %v9470_v57 = vpop.eup %8665  ;;  %8520 = vmatpush.bf16.msra.mxu3 %v9209_v47  ;;  %v744_v46 = vmul.f32 %v9346_v3, %v725_v52  ;;  %v605_v22 = vmul.f32 %v9370_v37, %v604_v1 }
 0x15c   : > { %v594_v11 = vsub.f32 1.5, %v593_v25  ;;  %v621_v47 = vmul.f32 %v9470_v57, %v9411_v8  ;;  %v750_v32 = vadd.f32 %v9367_v56, %v731_v54  ;;  %v762_v51 = vadd.f32 %v9367_v56, %v743_v28 }
 0x15d   : > { %v9473_v49 = vadd.f32 1e-05, %v529_v26  ;;  %v9478_v5 = vadd.f32 1e-05, %v528_v44  ;;  %v8668_v60 = vpop.eup %8667  ;;  %v763_v2 = vadd.f32 %v9367_v56, %v744_v46  ;;  %v609_v62 = vsel %vm9488_vm11, %v9370_v37, %v605_v22 }
 0x15e   : > { %v8670_v61 = vpop.eup %8669  ;;  %v631_v19 = vmul.f32 %v8668_v60, %v9448_v36  ;;  %v595_v20 = vmul.f32 %v9434_v6, %v594_v11  ;;  %v612_v10 = vmul.f32 %v9466_v43, %v611_v16  ;;  %vm637_vm0 = vweird.f32 %v8668_v60 }
 0x15f   : > { %8671 = vrsqrt.f32 %v9473_v49  ;;  %8521 = vmatpush.bf16.msra.mxu3 %v9215_v58  ;;  %v641_v31 = vmul.f32 %v8670_v61, %v9455_v45  ;;  %v622_v58 = vmul.f32 %v9470_v57, %v621_v47  ;;  %v9515_v53 = vpack.c.bf16 %v763_v2, %v762_v51  ;;  %vm9529_vm3 = vmor %vm636_vm15, %vm637_vm0 }
 0x160   : > { %8673 = vrsqrt.f32 %v9478_v5  ;;  %v632_v34 = vmul.f32 %v8668_v60, %v631_v19  ;;  %v765_v37 = vpack.c.bf16 %v751_v41, %v750_v32  ;;  %v599_v21 = vsel %vm9508_vm14, %v9434_v6, %v595_v20 }
 0x161   : > { %v642_v40 = vmul.f32 %v8670_v61, %v641_v31  ;;  %vm647_vm2 = vweird.f32 %v8670_v61  ;;  %v715_v52 = vmul.f32 %v609_v62, %v9154_v59  ;;  %v613_v25 = vmul.f32 0.5, %v612_v10 }
 0x162   : > { %v633_v38 = vmul.f32 0.5, %v632_v34  ;;  %v714_v26 = vmul.f32 %v599_v21, %v9162_v63  ;;  %v623_v44 = vmul.f32 0.5, %v622_v58  ;;  %vm9537_vm4 = vmor %vm646_vm1, %vm647_vm2  ;;  %vm666_vm5 = vweird.f32 %v9473_v49 }
 0x163   : > { %8522 = vmatpush.bf16.msra.mxu3 %v9221_v7  ;;  %v643_v14 = vmul.f32 0.5, %v642_v40  ;;  %vm656_vm7 = vweird.f32 %v9478_v5  ;;  %vm616_vm9 = vweird.f32 %v9409_v29  ;;  %vm617_vm12 = vweird.f32 %v9466_v43 }
 0x164   : > { %v634_v48 = vsub.f32 1.5, %v633_v38  ;;  %v624_v18 = vsub.f32 1.5, %v623_v44  ;;  %v734_v19 = vmul.f32 %v9346_v3, %v715_v52  ;;  %vm626_vm13 = vweird.f32 %v9411_v8  ;;  %vm9579_vm15 = vmor %vm616_vm9, %vm617_vm12 }
 0x165   : > { %v8672_v42 = vpop.eup %8671  ;;  %953 = vmatmul.bf16.gmra.mxu0 %v765_v37  ;;  %983 = vmatmul.bf16.gmra.mxu3 %v9515_v53  ;;  %v644_v6 = vsub.f32 1.5, %v643_v14  ;;  %vm627_vm14 = vweird.f32 %v9470_v57  ;;  %vm1434_vm1 = vcmask 1047556   ;;  %vm3120_vm2 = vcmask 257024  }
 0x166   : > { %v8674_v50 = vpop.eup %8673  ;;  %v661_v27 = vmul.f32 %v8672_v42, %v9473_v49  ;;  %1002 = vmatmul.bf16.gmra.mxu1 %v765_v37  ;;  %v635_v54 = vmul.f32 %v8668_v60, %v634_v48  ;;  %1051 = vmatmul.bf16.gmra.mxu2 %v765_v37  ;;  %vm667_vm6 = vweird.f32 %v8672_v42  ;;  %v625_v39 = vmul.f32 %v9470_v57, %v624_v18  ;;  %vm9585_vm0 = vmor %vm626_vm13, %vm627_vm14 }
 0x167   : > { %v651_v30 = vmul.f32 %v8674_v50, %v9478_v5  ;;  %8523 = vmatpush.bf16.msra.mxu3 %v9227_v23  ;;  %v645_v36 = vmul.f32 %v8670_v61, %v644_v6  ;;  %vm657_vm8 = vweird.f32 %v8674_v50  ;;  %vm9551_vm10 = vmor %vm666_vm5, %vm667_vm6  ;;  %v614_v5 = vsub.f32 1.5, %v613_v25 }
 0x168   : > { %v662_v1 = vmul.f32 %v8672_v42, %v661_v27  ;;  %v639_v63 = vsel %vm9529_vm3, %v8668_v60, %v635_v54  ;;  %v733_v60 = vmul.f32 %v9346_v3, %v714_v26  ;;  %vm9557_vm11 = vmor %vm656_vm7, %vm657_vm8  ;;  %v629_v38 = vsel %vm9585_vm0, %v9470_v57, %v625_v39 }
 0x169   : > { %v652_v35 = vmul.f32 %v8674_v50, %v651_v30  ;;  %v718_v45 = vmul.f32 %v639_v63, %v9179_v9  ;;  %v649_v46 = vsel %vm9537_vm4, %v8670_v61, %v645_v36  ;;  %v615_v8 = vmul.f32 %v9466_v43, %v614_v5 }
 0x16a   : > { %v663_v11 = vmul.f32 0.5, %v662_v1  ;;  %v719_v23 = vmul.f32 %v649_v46, %v9183_v17  ;;  %v752_v51 = vadd.f32 %v9367_v56, %v733_v60 }
 0x16b   : > { %v653_v28 = vmul.f32 0.5, %v652_v35  ;;  %8524 = vmatpush.bf16.msra.mxu3 %v9233_v33  ;;  %v737_v61 = vmul.f32 %v9346_v3, %v718_v45 }
 0x16c   : > { %v664_v22 = vsub.f32 1.5, %v663_v11  ;;  %v738_v32 = vmul.f32 %v9346_v3, %v719_v23 }
 0x16d   : > { %v654_v16 = vsub.f32 1.5, %v653_v28  ;;  %v756_v41 = vadd.f32 %v9367_v56, %v737_v61 }
 0x16e   : > { %v665_v9 = vmul.f32 %v8672_v42, %v664_v22  ;;  %v757_v2 = vadd.f32 %v9367_v56, %v738_v32 }
 0x16f   : > { %v655_v17 = vmul.f32 %v8674_v50, %v654_v16  ;;  %8525 = vmatpush.bf16.msra.mxu3 %v9241_v55  ;;  %v753_v55 = vadd.f32 %v9367_v56, %v734_v19 }
 0x170   : > { %v669_v33 = vsel %vm9551_vm10, %v8672_v42, %v665_v9  ;;  %v768_v34 = vpack.c.bf16 %v757_v2, %v756_v41 }
 0x171   : > { %v721_v20 = vmul.f32 %v669_v33, %v9191_v13  ;;  %v659_v31 = vsel %vm9557_vm11, %v8674_v50, %v655_v17  ;;  %v766_v29 = vpack.c.bf16 %v753_v55, %v752_v51 }
 0x172   : > { %v720_v13 = vmul.f32 %v659_v31, %v9195_v24  ;;  %v619_v24 = vsel %vm9579_vm15, %v9466_v43, %v615_v8 }
 0x173   : > { %v740_v58 = vmul.f32 %v9346_v3, %v721_v20  ;;  %8526 = vmatpush.bf16.msra.mxu3 %v9253_v12  ;;  %v716_v21 = vmul.f32 %v619_v24, %v9165_v0  ;;  %v717_v12 = vmul.f32 %v629_v38, %v9169_v4  ;;  %v804_v0 = vld [vmem:[%s12801_s4] sm:$0x7] }
 0x174   : > { %v739_v40 = vmul.f32 %v9346_v3, %v720_v13  ;;  %v9614_v4 = vperm.slane %v804_v0, 0  ;;  %v9622_v7 = vperm.slane %v804_v0, 2 }
 0x175   : > { %v759_v42 = vadd.f32 %v9367_v56, %v740_v58  ;;  %958 = vmatmul.bf16.gmra.mxu0 %v766_v29  ;;  %1027 = vmatmul.bf16.vlgmr.msrb.gmra.mxu3 %v9440_v15  ;;  %v735_v14 = vmul.f32 %v9346_v3, %v716_v21  ;;  %v736_v43 = vmul.f32 %v9346_v3, %v717_v12  ;;  %v9616_v3 = vperm.slane %v804_v0, 1 }
 0x176   : > { %v758_v37 = vadd.f32 %v9367_v56, %v739_v40  ;;  %1007 = vmatmul.bf16.gmra.mxu1 %v766_v29  ;;  %1056 = vmatmul.bf16.gmra.mxu2 %v766_v29 }
 0x177   : > { %v754_v27 = vadd.f32 %v9367_v56, %v735_v14  ;;  %v755_v57 = vadd.f32 %v9367_v56, %v736_v43 }
 0x178   : > { %v769_v50 = vpack.c.bf16 %v759_v42, %v758_v37 }
 0x179   : > { %v767_v48 = vpack.c.bf16 %v755_v57, %v754_v27 }
 0x185   : > { %963 = vmatmul.bf16.gmra.mxu0 %v767_v48  ;;  %1032 = vmatmul.bf16.gmra.mxu3 %v9515_v53 }
 0x186   : > { %1012 = vmatmul.bf16.gmra.mxu1 %v767_v48  ;;  %1061 = vmatmul.bf16.gmra.mxu2 %v767_v48 }
 0x195   : > { %968 = vmatmul.bf16.gmra.mxu0 %v768_v34  ;;  %1076 = vmatmul.bf16.vlgmr.msra.gmra.mxu3 %v9440_v15 }
 0x196   : > { %1017 = vmatmul.bf16.gmra.mxu1 %v768_v34  ;;  %1066 = vmatmul.bf16.gmra.mxu2 %v768_v34 }
 0x1a5   : > { %973 = vmatmul.bf16.gmra.mxu0 %v769_v50  ;;  %1081 = vmatmul.bf16.gmra.mxu3 %v9515_v53 }
 0x1a6   : > { %1022 = vmatmul.bf16.gmra.mxu1 %v769_v50  ;;  %1071 = vmatmul.bf16.gmra.mxu2 %v769_v50 }
 0x1d2   : > { %v949_v56 = vpop.f32.mrf.mxu0 }
 0x1d3   : > { %v950_v30 = vadd.f32 %v949_v56, %v9614_v4  ;;  %v998_v52 = vpop.f32.mrf.mxu1 }
 0x1d4   : > { %v999_v15 = vadd.f32 %v998_v52, %v9616_v3 }
 0x1d6   : > { %v9620_v25 = vpack.c.bf16 %v999_v15, %v950_v30 }
 0x1d8   : > { %1135 = vrot.lane.b32.xlu2 %v9620_v25, %s8879_s10  ;;  %1167 = vrot.lane.b32.xlu0 %v9620_v25, %s8880_s12  ;;  %v9628_v53 = vpop.f32.mrf.mxu3 }
 0x1d9   : > { %v1047_v6 = vpop.f32.mrf.mxu2  ;;  %v980_v50 = vadd.f32 %v9628_v53, %v9614_v4 }
 0x1da   : > { %v1048_v1 = vadd.f32 %v1047_v6, %v9622_v7  ;;  %v951_v44 = vpop.f32.mrf.mxu0 }
 0x1db   : > { %v1000_v54 = vpop.f32.mrf.mxu1  ;;  %v952_v59 = vadd.f32 %v951_v44, %v9614_v4 }
 0x1dc   : > { %v9631_v26 = vpack.c.bf16 %v1048_v1, %v1048_v1  ;;  %v1001_v35 = vadd.f32 %v1000_v54, %v9616_v3 }
 0x1de   : > { %5217 = vrot.lane.b32.xlu1 %v9631_v26, %s8879_s10  ;;  %v9643_v63 = vpack.c.bf16 %v1001_v35, %v952_v59 }
 0x1e0   : > { %1199 = vrot.lane.b32.xlu2 %v9620_v25, %s8881_s13  ;;  %5249 = vrot.lane.b32.xlu0 %v9631_v26, %s8880_s12  ;;  %v9641_v36 = vpop.f32.mrf.mxu3 }
 0x1e1   : > { %v1049_v11 = vpop.f32.mrf.mxu2 }
 0x1e2   : > { %v1050_v28 = vadd.f32 %v1049_v11, %v9622_v7  ;;  %v954_v45 = vpop.f32.mrf.mxu0  ;;  %v982_v11 = vadd.f32 %v9641_v36, %v9614_v4 }
 0x1e3   : > { %v1003_v46 = vpop.f32.mrf.mxu1  ;;  %v955_v16 = vadd.f32 %v954_v45, %v9614_v4  ;;  %v3185_v45 = vrot.slane %v9620_v25, 4 }
 0x1e4   : > { %v9654_v49 = vpack.c.bf16 %v1050_v28, %v1050_v28  ;;  %v1004_v60 = vadd.f32 %v1003_v46, %v9616_v3  ;;  %v12808_v46 = vrot.slane %v9643_v63, 4 }
 0x1e6   : > { %1201 = vrot.lane.b32.xlu1 %v9643_v63, %s8881_s13  ;;  %v9664_v9 = vpack.c.bf16 %v1004_v60, %v955_v16 }
 0x1e8   : > { %5281 = vrot.lane.b32.xlu2 %v9631_v26, %s8881_s13  ;;  %1137 = vrot.lane.b32.xlu0 %v9643_v63, %s8879_s10  ;;  %v9652_v22 = vpop.f32.mrf.mxu3 }
 0x1e9   : > { %v1052_v23 = vpop.f32.mrf.mxu2 }
 0x1ea   : > { %v956_v5 = vpop.f32.mrf.mxu0  ;;  %v1053_v17 = vadd.f32 %v1052_v23, %v9622_v7 }
 0x1eb   : > { %v1005_v18 = vpop.f32.mrf.mxu1  ;;  %v957_v31 = vadd.f32 %v956_v5, %v9614_v4  ;;  %v1234_v5 = vshrl.u32 %v9620_v25, 16 }
 0x1ec   : > { %v9675_v33 = vpack.c.bf16 %v1053_v17, %v1053_v17  ;;  %v1006_v51 = vadd.f32 %v1005_v18, %v9616_v3  ;;  %v9760_v18 = vshrl.u32 %v3185_v45, 16 }
 0x1ee   : > { %5283 = vrot.lane.b32.xlu1 %v9654_v49, %s8881_s13  ;;  %v9685_v2 = vpack.c.bf16 %v1006_v51, %v957_v31  ;;  %v9773_v31 = vshrl.u32 %v12808_v46, 16 }
 0x1f0   : > { %1169 = vrot.lane.b32.xlu2 %v9643_v63, %s8880_s12  ;;  %5219 = vrot.lane.b32.xlu0 %v9654_v49, %s8879_s10  ;;  %v9666_v47 = vpop.f32.mrf.mxu3  ;;  %v12806_v16 = vrot.slane %v9685_v2, 4 }
 0x1f1   : > { %v1054_v61 = vpop.f32.mrf.mxu2 }
 0x1f2   : > { %v959_v19 = vpop.f32.mrf.mxu0  ;;  %v1055_v39 = vadd.f32 %v1054_v61, %v9622_v7  ;;  %v5316_v61 = vshrl.u32 %v9631_v26, 16 }
 0x1f3   : > { %v1008_v32 = vpop.f32.mrf.mxu1  ;;  %v960_v34 = vadd.f32 %v959_v19, %v9614_v4  ;;  %v985_v19 = vadd.f32 %v9652_v22, %v9614_v4 }
 0x1f4   : > { %v9694_v55 = vpack.c.bf16 %v1055_v39, %v1055_v39  ;;  %v1009_v58 = vadd.f32 %v1008_v32, %v9616_v3  ;;  %v987_v32 = vadd.f32 %v9666_v47, %v9614_v4 }
 0x1f6   : > { %1139 = vrot.lane.b32.xlu1 %v9664_v9, %s8879_s10  ;;  %v9704_v38 = vpack.c.bf16 %v1009_v58, %v960_v34  ;;  %v9784_v34 = vshrl.u32 %v12806_v16, 16  ;;  %v8883_v58 = vmov 1934713408  }
 0x1f7   : > { %v1439_v16 = vunpack.c.l.s4 %v8883_v58 }
 0x1f8   : > { %5251 = vrot.lane.b32.xlu2 %v9654_v49, %s8880_s12  ;;  %1203 = vrot.lane.b32.xlu0 %v9664_v9, %s8881_s13  ;;  %v1028_v41 = vpop.f32.mrf.mxu3 }
 0x1f9   : > { %v1057_v20 = vpop.f32.mrf.mxu2  ;;  %v1029_v37 = vadd.f32 %v1028_v41, %v9616_v3 }
 0x1fa   : > { %v961_v8 = vpop.f32.mrf.mxu0  ;;  %v1058_v57 = vadd.f32 %v1057_v20, %v9622_v7 }
 0x1fb   : > { %v1010_v62 = vpop.f32.mrf.mxu1  ;;  %v9715_v14 = vpack.c.bf16 %v1029_v37, %v980_v50  ;;  %v962_v15 = vadd.f32 %v961_v8, %v9614_v4 }
 0x1fc   : > { %v9724_v48 = vpack.c.bf16 %v1058_v57, %v1058_v57  ;;  %v1011_v53 = vadd.f32 %v1010_v62, %v9616_v3 }
 0x1fe   : > { %1171 = vrot.lane.b32.xlu1 %v9664_v9, %s8880_s12  ;;  %v9734_v6 = vpack.c.bf16 %v1011_v53, %v962_v15 }
 0x200   : > { %5221 = vrot.lane.b32.xlu2 %v9675_v33, %s8879_s10  ;;  %5285 = vrot.lane.b32.xlu0 %v9675_v33, %s8881_s13  ;;  %v1030_v13 = vpop.f32.mrf.mxu3 }
 0x201   : > { %v1059_v10 = vpop.f32.mrf.mxu2  ;;  %v1031_v54 = vadd.f32 %v1030_v13, %v9616_v3 }
 0x202   : > { %v964_v40 = vpop.f32.mrf.mxu0  ;;  %v1060_v23 = vadd.f32 %v1059_v10, %v9622_v7 }
 0x203   : > { %v1013_v29 = vpop.f32.mrf.mxu1  ;;  %v9745_v28 = vpack.c.bf16 %v1031_v54, %v982_v11  ;;  %v965_v51 = vadd.f32 %v964_v40, %v9614_v4 }
 0x204   : > { %v1014_v8 = vadd.f32 %v1013_v29, %v9616_v3  ;;  %v9779_v10 = vpack.c.bf16 %v1060_v23, %v1060_v23 }
 0x206   : > { %5253 = vrot.lane.b32.xlu1 %v9675_v33, %s8880_s12  ;;  %v9794_v15 = vpack.c.bf16 %v1014_v8, %v965_v51 }
 0x208   : > { %1141 = vrot.lane.b32.xlu2 %v9685_v2, %s8879_s10  ;;  %1173 = vrot.lane.b32.xlu0 %v9685_v2, %s8880_s12  ;;  %v1033_v42 = vpop.f32.mrf.mxu3 }
 0x209   : > { %v1062_v24 = vpop.f32.mrf.mxu2  ;;  %v1034_v62 = vadd.f32 %v1033_v42, %v9616_v3 }
 0x20a   : > { %v966_v21 = vpop.f32.mrf.mxu0  ;;  %v1063_v39 = vadd.f32 %v1062_v24, %v9622_v7 }
 0x20b   : > { %v1015_v12 = vpop.f32.mrf.mxu1  ;;  %v967_v40 = vadd.f32 %v966_v21, %v9614_v4  ;;  %v9796_v53 = vpack.c.bf16 %v1034_v62, %v985_v19  ;;  %v12807_v21 = vrot.slane %v9664_v9, 4 }
 0x20c   : > { %v1016_v29 = vadd.f32 %v1015_v12, %v9616_v3  ;;  %v9798_v54 = vpack.c.bf16 %v1063_v39, %v1063_v39 }
 0x20e   : > { %5223 = vrot.lane.b32.xlu1 %v9694_v55, %s8879_s10  ;;  %12861 = vst [vmem:[#allocation17_spill] sm:$0xff] %v9798_v54  ;;  %v9810_v11 = vpack.c.bf16 %v1016_v29, %v967_v40 }
 0x210   : > { %1205 = vrot.lane.b32.xlu2 %v9685_v2, %s8881_s13  ;;  %5255 = vrot.lane.b32.xlu0 %v9694_v55, %s8880_s12  ;;  %v1035_v43 = vpop.f32.mrf.mxu3  ;;  %12862 = vst [vmem:[#allocation18_spill] sm:$0xff] %v9810_v11 }
 0x211   : > { %v1064_v27 = vpop.f32.mrf.mxu2  ;;  %v1036_v42 = vadd.f32 %v1035_v43, %v9616_v3 }
 0x212   : > { %v969_v0 = vpop.f32.mrf.mxu0  ;;  %v1065_v24 = vadd.f32 %v1064_v27, %v9622_v7  ;;  %v8882_v27 = vmov 1983009808  }
 0x213   : > { %v1018_v56 = vpop.f32.mrf.mxu1  ;;  %v970_v37 = vadd.f32 %v969_v0, %v9614_v4  ;;  %v1425_v0 = vunpack.c.l.s4 %v8882_v27  ;;  %v9812_v23 = vpack.c.bf16 %v1036_v42, %v987_v32 }
 0x214   : > { %v1019_v50 = vadd.f32 %v1018_v56, %v9616_v3  ;;  %v9816_v51 = vpack.c.bf16 %v1065_v24, %v1065_v24 }
 0x216   : > { %1207 = vrot.lane.b32.xlu1 %v9704_v38, %s8881_s13 }
 0x218   : > { %5287 = vrot.lane.b32.xlu2 %v9694_v55, %s8881_s13  ;;  %1143 = vrot.lane.b32.xlu0 %v9704_v38, %s8879_s10  ;;  %v1077_v52 = vpop.f32.mrf.mxu3 }
 0x219   : > { %v1067_v30 = vpop.f32.mrf.mxu2  ;;  %v1078_v43 = vadd.f32 %v1077_v52, %v9622_v7  ;;  %v9818_v52 = vpack.c.bf16 %v1019_v50, %v970_v37 }
 0x21a   : > { %v971_v1 = vpop.f32.mrf.mxu0  ;;  %v1068_v12 = vadd.f32 %v1067_v30, %v9622_v7 }
 0x21b   : > { %v1020_v44 = vpop.f32.mrf.mxu1  ;;  %v972_v19 = vadd.f32 %v971_v1, %v9614_v4  ;;  %v9827_v1 = vpack.c.bf16 %v1078_v43, %v1078_v43 }
 0x21c   : > { %v1021_v30 = vadd.f32 %v1020_v44, %v9616_v3  ;;  %v9825_v42 = vpack.c.bf16 %v1068_v12, %v1068_v12  ;;  %v9829_v44 = vunpack.c.0.s8 %v1425_v0 }
 0x21e   : > { %1159 = vrot.lane.b32.xlu1 %v9715_v14, %s8879_s10  ;;  %v9831_v50 = vpack.c.bf16 %v1021_v30, %v972_v19 }
 0x220   : > { %1175 = vrot.lane.b32.xlu2 %v9704_v38, %s8880_s12  ;;  %1191 = vrot.lane.b32.xlu0 %v9715_v14, %s8880_s12  ;;  %v1079_v35 = vpop.f32.mrf.mxu3 }
 0x221   : > { %v1069_v59 = vpop.f32.mrf.mxu2  ;;  %v1080_v8 = vadd.f32 %v1079_v35, %v9622_v7 }
 0x222   : > { %v974_v36 = vpop.f32.mrf.mxu0  ;;  %v1070_v39 = vadd.f32 %v1069_v59, %v9622_v7 }
 0x223   : > { %v1023_v60 = vpop.f32.mrf.mxu1  ;;  %v975_v27 = vadd.f32 %v974_v36, %v9614_v4  ;;  %v9843_v30 = vpack.c.bf16 %v1080_v8, %v1080_v8 }
 0x224   : > { %v1024_v40 = vadd.f32 %v1023_v60, %v9616_v3  ;;  %v9841_v19 = vpack.c.bf16 %v1070_v39, %v1070_v39 }
 0x226   : > { %5289 = vrot.lane.b32.xlu1 %v9724_v48, %s8881_s13 }
 0x228   : > { %1223 = vrot.lane.b32.xlu2 %v9715_v14, %s8881_s13  ;;  %5225 = vrot.lane.b32.xlu0 %v9724_v48, %s8879_s10  ;;  %v1082_v13 = vpop.f32.mrf.mxu3 }
 0x229   : > { %v1072_v22 = vpop.f32.mrf.mxu2  ;;  %v1083_v59 = vadd.f32 %v1082_v13, %v9622_v7 }
 0x22a   : > { %v976_v32 = vpop.f32.mrf.mxu0  ;;  %v1073_v35 = vadd.f32 %v1072_v22, %v9622_v7  ;;  %v9845_v22 = vpack.c.bf16 %v1024_v40, %v975_v27 }
 0x22b   : > { %v1025_v29 = vpop.f32.mrf.mxu1  ;;  %v977_v12 = vadd.f32 %v976_v32, %v9614_v4 }
 0x22c   : > { %v1026_v43 = vadd.f32 %v1025_v29, %v9616_v3 }
 0x22e   : > { %1177 = vrot.lane.b32.xlu1 %v9734_v6, %s8880_s12 }
 0x230   : > { %5257 = vrot.lane.b32.xlu2 %v9724_v48, %s8880_s12  ;;  %1209 = vrot.lane.b32.xlu0 %v9734_v6, %s8881_s13  ;;  %v1084_v36 = vpop.f32.mrf.mxu3 }
 0x231   : > { %v1074_v57 = vpop.f32.mrf.mxu2  ;;  %v1085_v3 = vadd.f32 %v1084_v36, %v9622_v7 }
 0x232   : > { %v9768_v41 = vpop.permute.xlu2 %1135  ;;  %v1075_v4 = vadd.f32 %v1074_v57, %v9622_v7  ;;  %v9867_v7 = vpack.c.bf16 %v1026_v43, %v977_v12 }
 0x233   : > { %v3201_v56 = vrot.slane %v9768_v41, 4  ;;  %v1235_v62 = vshrl.u32 %v9768_v41, 16  ;;  %v1233_v60 = vpack.i.b16 %v9768_v41, %v9620_v25  ;;  %v9860_v41 = vshrl.u32 %v12807_v21, 16 }
 0x234   : > { %v9862_v25 = vpack.c.bf16 %v1073_v35, %v1073_v35  ;;  %v9873_v32 = vpack.c.bf16 %v1075_v4, %v1075_v4  ;;  %v9875_v29 = vpack.c.bf16 %v1085_v3, %v1085_v3 }
 0x235   : > { %v3253_v24 = vshrl.u32 %v3201_v56, 16  ;;  %v1236_v0 = vpack.i.b16 %v1235_v62, %v1234_v5  ;;  %v3251_v13 = vpack.i.b16 %v3201_v56, %v3185_v45  ;;  %v9864_v45 = vpack.c.bf16 %v1083_v59, %v1083_v59 }
 0x236   : > { %1225 = vrot.lane.b32.xlu1 %v9745_v28, %s8881_s13  ;;  %v1427_v58 = vperm.slane %v1233_v60, %v9829_v44  ;;  %v9870_v56 = vunpack.c.0.s8 %v1439_v16 }
 0x237   : > { %v3254_v5 = vpack.i.b16 %v3253_v24, %v9760_v18  ;;  %v1454_v18 = vperm.slane %v1236_v0, %v9829_v44  ;;  %v3445_v62 = vperm.slane %v3251_v13, %v9829_v44 }
 0x238   : > { %1145 = vrot.lane.b32.xlu2 %v9734_v6, %s8879_s10  ;;  %1161 = vrot.lane.b32.xlu0 %v9745_v28, %s8879_s10  ;;  %v1436_v59 = vrot.slane %v1427_v58, 4 }
 0x239   : > { %v9878_v24 = vperm.slane %v3254_v5, %v9829_v44  ;;  %v1462_v12 = vrot.slane %v1454_v18, 4  ;;  %v3453_v4 = vrot.slane %v3445_v62, 4 }
 0x23a   : > { %v1200_v37 = vpop.permute.xlu2 %1199 }
 0x23b   : > { %v3233_v57 = vrot.slane %v1200_v37, 4  ;;  %v1241_v39 = vshrl.u32 %v1200_v37, 16 }
 0x23d   : > { %v3259_v43 = vshrl.u32 %v3233_v57, 16 }
 0x23e   : > { %5259 = vrot.lane.b32.xlu1 %v9779_v10, %s8880_s12 }
 0x240   : > { %1193 = vrot.lane.b32.xlu2 %v9745_v28, %s8880_s12  ;;  %5291 = vrot.lane.b32.xlu0 %v9779_v10, %s8881_s13 }
 0x242   : > { %v9882_v0 = vpop.permute.xlu2 %5281 }
 0x246   : > { %1147 = vrot.lane.b32.xlu1 %v9794_v15, %s8879_s10 }
 0x248   : > { %5227 = vrot.lane.b32.xlu2 %v9779_v10, %s8879_s10  ;;  %1179 = vrot.lane.b32.xlu0 %v9794_v15, %s8880_s12 }
 0x24a   : > { %v1168_v8 = vpop.permute.xlu0 %1167 }
 0x24b   : > { %v1239_v27 = vpack.i.b16 %v1200_v37, %v1168_v8  ;;  %v1240_v40 = vshrl.u32 %v1168_v8, 16  ;;  %v3217_v35 = vrot.slane %v1168_v8, 4  ;;  %v3479_v8 = vrot.slane %v9878_v24, 4 }
 0x24d   : > { %v1242_v36 = vpack.i.b16 %v1241_v39, %v1240_v40  ;;  %v1432_v60 = vperm.slane %v1239_v27, %v9829_v44  ;;  %v3257_v37 = vpack.i.b16 %v3233_v57, %v3217_v35  ;;  %v3258_v13 = vshrl.u32 %v3217_v35, 16 }
 0x24e   : > { %1195 = vrot.lane.b32.xlu1 %v9796_v53, %s8880_s12  ;;  %v5323_v57 = vshrl.u32 %v9882_v0, 16 }
 0x24f   : > { %v1433_v21 = vrot.slane %v1432_v60, 4  ;;  %v1437_v3 = vsel %vm1434_vm1, %v1432_v60, %v1436_v59  ;;  %v1459_v5 = vperm.slane %v1242_v36, %v9829_v44  ;;  %v3260_v27 = vpack.i.b16 %v3259_v43, %v3258_v13 }
 0x250   : > { %v1445_v39 = vperm.slane %v1437_v3, %v9870_v56  ;;  %v3450_v40 = vperm.slane %v3257_v37, %v9829_v44  ;;  %1211 = vrot.lane.b32.xlu2 %v9794_v15, %s8881_s13  ;;  %1227 = vrot.lane.b32.xlu0 %v9796_v53, %s8881_s13 }
 0x251   : > { %v1435_v35 = vsel %vm1434_vm1, %v1433_v21, %v1427_v58  ;;  %v1460_v59 = vrot.slane %v1459_v5, 4  ;;  %v1463_v36 = vsel %vm1434_vm1, %v1459_v5, %v1462_v12  ;;  %v3476_v47 = vperm.slane %v3260_v27, %v9829_v44 }
 0x252   : > { %v1441_v60 = vperm.slane %v1435_v35, %v9870_v56  ;;  %v1448_v16 = vrot.slane %v1445_v39, 4  ;;  %v1471_v43 = vperm.slane %v1463_v36, %v9870_v56  ;;  %v3451_v13 = vrot.slane %v3450_v40, 4 }
 0x253   : > { %v1461_v37 = vsel %vm1434_vm1, %v1460_v59, %v1454_v18  ;;  %v3454_v3 = vsel %vm1434_vm1, %v3450_v40, %v3453_v4 }
 0x254   : > { %v1446_v20 = vrot.slane %v1441_v60, 4  ;;  %v1449_v21 = vsel %vm1434_vm1, 0, %v1448_v16  ;;  %v1467_v58 = vperm.slane %v1461_v37, %v9870_v56  ;;  %v1474_v12 = vrot.slane %v1471_v43, 4 }
 0x255   : > { %v2256_v5 = vsel %vm1434_vm1, %v1448_v16, %v1441_v60  ;;  %v2261_v39 = vrot.slane %v1449_v21, 4  ;;  %v3452_v35 = vsel %vm1434_vm1, %v3451_v13, %v3445_v62  ;;  %v3462_v36 = vperm.slane %v3454_v3, %v9870_v56 }
 0x256   : > { %v1447_v18 = vsel %vm1434_vm1, 0, %v1446_v20  ;;  %v1472_v4 = vrot.slane %v1467_v58, 4  ;;  %v1475_v27 = vsel %vm1434_vm1, 0, %v1474_v12  ;;  %v2260_v40 = vperm.slane %v2256_v5, %v9829_v44  ;;  %5229 = vrot.lane.b32.xlu1 %v9798_v54, %s8879_s10 }
 0x257   : > { %v2262_v59 = vsel %vm1434_vm1, %v2261_v39, %v1447_v18  ;;  %v2275_v46 = vsel %vm1434_vm1, %v1474_v12, %v1467_v58  ;;  %v2280_v37 = vrot.slane %v1475_v27, 4  ;;  %v3458_v43 = vperm.slane %v3452_v35, %v9870_v56  ;;  %v5218_v35 = vpop.permute.xlu1 %5217 }
 0x258   : > { %v1473_v62 = vsel %vm1434_vm1, 0, %v1472_v4  ;;  %v2266_v20 = vperm.slane %v2262_v59, %v9829_v44  ;;  %v2279_v16 = vperm.slane %v2275_v46, %v9829_v44  ;;  %v3465_v60 = vrot.slane %v3462_v36, 4  ;;  %1163 = vrot.lane.b32.xlu2 %v9796_v53, %s8879_s10  ;;  %5261 = vrot.lane.b32.xlu0 %v9798_v54, %s8880_s12  ;;  %v9929_v36 = vpop.permute.xlu2 %1169 }
 0x259   : > { %v2281_v13 = vsel %vm1434_vm1, %v2280_v37, %v1473_v62  ;;  %v3463_v3 = vrot.slane %v3458_v43, 4  ;;  %v3477_v21 = vrot.slane %v3476_v47, 4  ;;  %v3480_v58 = vsel %vm1434_vm1, %v3476_v47, %v3479_v8 }
 0x25a   : > { %v2267_v12 = vrot.slane %v2266_v20, 4  ;;  %v2285_v5 = vperm.slane %v2281_v13, %v9829_v44  ;;  %v3466_v39 = vsel %vm1434_vm1, 0, %v3465_v60  ;;  %v3488_v46 = vperm.slane %v3480_v58, %v9870_v56 }
 0x25b   : > { %v3464_v18 = vsel %vm1434_vm1, 0, %v3463_v3  ;;  %v3478_v4 = vsel %vm1434_vm1, %v3477_v21, %v9878_v24  ;;  %v4273_v27 = vsel %vm1434_vm1, %v3465_v60, %v3458_v43  ;;  %v4278_v59 = vrot.slane %v3466_v39, 4 }
 0x25c   : > { %v2268_v47 = vsel %vm1434_vm1, %v2267_v12, %v2260_v40  ;;  %v2286_v8 = vrot.slane %v2285_v5, 4  ;;  %v3484_v37 = vperm.slane %v3478_v4, %v9870_v56  ;;  %v3491_v62 = vrot.slane %v3488_v46, 4 }
 0x25d   : > { %v2272_v20 = vperm.slane %v2268_v47, %v9870_v56  ;;  %v4279_v13 = vsel %vm1434_vm1, %v4278_v59, %v3464_v18  ;;  %v5317_v58 = vshrl.u32 %v5218_v35, 16  ;;  %v4277_v5 = vperm.slane %v4273_v27, %v9829_v44 }
 0x25e   : > { %v2287_v24 = vsel %vm1434_vm1, %v2286_v8, %v2279_v16  ;;  %v3489_v21 = vrot.slane %v3484_v37, 4  ;;  %v3492_v43 = vsel %vm1434_vm1, 0, %v3491_v62  ;;  %v4283_v40 = vperm.slane %v4279_v13, %v9829_v44  ;;  %1213 = vrot.lane.b32.xlu1 %v9810_v11, %s8881_s13 }
 0x25f   : > { %v2273_v60 = vrot.slane %v2272_v20, 4  ;;  %v2291_v12 = vperm.slane %v2287_v24, %v9870_v56  ;;  %v5315_v39 = vpack.i.b16 %v5218_v35, %v9631_v26  ;;  %v2868_v46 = vshrl.u32 %v2272_v20, 16 }
 0x260   : > { %v3490_v18 = vsel %vm1434_vm1, 0, %v3489_v21  ;;  %v4284_v16 = vrot.slane %v4283_v40, 4  ;;  %v4297_v4 = vrot.slane %v3492_v43, 4  ;;  %5293 = vrot.lane.b32.xlu2 %v9798_v54, %s8881_s13  ;;  %1149 = vrot.lane.b32.xlu0 %v9810_v11, %s8879_s10  ;;  %v4292_v13 = vsel %vm1434_vm1, %v3491_v62, %v3484_v37  ;;  %v5250_v37 = vpop.permute.xlu0 %5249 }
 0x261   : > { %v2274_v59 = vsel %vm1434_vm1, 0, %v2273_v60  ;;  %v2292_v27 = vrot.slane %v2291_v12, 4  ;;  %v2866_v47 = vpack.i.b16 %v2291_v12, %v2272_v20  ;;  %v2869_v35 = vshrl.u32 %v2291_v12, 16 }
 0x262   : > { %v4285_v8 = vsel %vm1434_vm1, %v4284_v16, %v4277_v5  ;;  %v4298_v24 = vsel %vm1434_vm1, %v4297_v4, %v3490_v18  ;;  %v5318_v21 = vpack.i.b16 %v5317_v58, %v5316_v61  ;;  %v2876_v12 = vshrl.u32 %v2274_v59, 16  ;;  %v9975_v16 = vpop.permute.xlu2 %5251  ;;  %v9977_v4 = vpop.permute.xlu1 %1201 }
 0x263   : > { %v2293_v43 = vsel %vm1434_vm1, 0, %v2292_v27  ;;  %v2870_v40 = vpack.i.b16 %v2869_v35, %v2868_v46  ;;  %3121 = vst.msk [vmem:[%s9964_s9] sm:$0xf] %vm3120_vm2, %v2866_v47  ;;  %v4289_v20 = vperm.slane %v4285_v8, %v9870_v56  ;;  %v4302_v60 = vperm.slane %v4298_v24, %v9829_v44 }
 0x264   : > { %v2874_v62 = vpack.i.b16 %v2293_v43, %v2274_v59  ;;  %v2877_v5 = vshrl.u32 %v2293_v43, 16  ;;  %v5509_v26 = vperm.slane %v5315_v39, %v9829_v44  ;;  %v4296_v58 = vperm.slane %v4292_v13, %v9829_v44 }
 0x265   : > { %3137 = vst.msk [vmem:[%s9964_s9 + $0x40] sm:$0xf] %vm3120_vm2, %v2870_v40  ;;  %v4290_v61 = vrot.slane %v4289_v20, 4  ;;  %v4303_v46 = vrot.slane %v4302_v60, 4  ;;  %v5535_v18 = vperm.slane %v5318_v21, %v9829_v44  ;;  %v1252_v27 = vshrl.u32 %v9929_v36, 16 }
 0x266   : > { %v3218_v59 = vrot.slane %v9929_v36, 4  ;;  %v2878_v47 = vpack.i.b16 %v2877_v5, %v2876_v12  ;;  %3153 = vst.msk [vmem:[%s9964_s9 + $0x80] sm:$0xf] %vm3120_vm2, %v2874_v62  ;;  %v5321_v39 = vpack.i.b16 %v9882_v0, %v5250_v37  ;;  %v4885_v8 = vshrl.u32 %v4289_v20, 16  ;;  %1165 = vrot.lane.b32.xlu1 %v9812_v23, %s8879_s10 }
 0x267   : > { %v4304_v35 = vsel %vm1434_vm1, %v4303_v46, %v4296_v58  ;;  %v5517_v13 = vrot.slane %v5509_v26, 4  ;;  %v5322_v24 = vshrl.u32 %v5250_v37, 16  ;;  %v4291_v21 = vsel %vm1434_vm1, 0, %v4290_v61 }
 0x268   : > { %3169 = vst.msk [vmem:[%s9964_s9 + $0xc0] sm:$0xf] %vm3120_vm2, %v2878_v47  ;;  %v4308_v43 = vperm.slane %v4304_v35, %v9870_v56  ;;  %v5514_v40 = vperm.slane %v5321_v39, %v9829_v44  ;;  %v1253_v60 = vshrl.u32 %v9977_v4, 16  ;;  %1181 = vrot.lane.b32.xlu2 %v9810_v11, %s8880_s12  ;;  %1197 = vrot.lane.b32.xlu0 %v9812_v23, %s8880_s12  ;;  %v5543_v37 = vrot.slane %v5535_v18, 4 }
 0x269   : > { %v5324_v62 = vpack.i.b16 %v5323_v57, %v5322_v24  ;;  %v1251_v12 = vpack.i.b16 %v9977_v4, %v9929_v36  ;;  %v3234_v5 = vrot.slane %v9977_v4, 4  ;;  %v4893_v39 = vshrl.u32 %v4291_v21, 16 }
 0x26a   : > { %v4309_v61 = vrot.slane %v4308_v43, 4  ;;  %v4883_v58 = vpack.i.b16 %v4308_v43, %v4289_v20  ;;  %v4886_v46 = vshrl.u32 %v4308_v43, 16  ;;  %v5515_v47 = vrot.slane %v5514_v40, 4 }
 0x26b   : > { %v5518_v35 = vsel %vm1434_vm1, %v5514_v40, %v5517_v13  ;;  %v5540_v3 = vperm.slane %v5324_v62, %v9829_v44  ;;  %v1254_v17 = vpack.i.b16 %v1253_v60, %v1252_v27  ;;  %v10017_v24 = vperm.slane %v1251_v12, %v9829_v44  ;;  %v5222_v60 = vpop.permute.xlu2 %5221 }
 0x26c   : > { %v4310_v11 = vsel %vm1434_vm1, 0, %v4309_v61  ;;  %v4887_v54 = vpack.i.b16 %v4886_v46, %v4885_v8  ;;  %5137 = vst.msk [vmem:[%s10006_s24] sm:$0xf] %vm3120_vm2, %v4883_v58  ;;  %v5516_v0 = vsel %vm1434_vm1, %v5515_v47, %v5509_v26  ;;  %v5526_v57 = vperm.slane %v5518_v35, %v9870_v56 }
 0x26d   : > { %v4891_v36 = vpack.i.b16 %v4310_v11, %v4291_v21  ;;  %v4894_v20 = vshrl.u32 %v4310_v11, 16  ;;  %v5522_v4 = vperm.slane %v5516_v0, %v9870_v56  ;;  %v5541_v13 = vrot.slane %v5540_v3, 4 }
 0x26e   : > { %5153 = vst.msk [vmem:[%s10006_s24 + $0x40] sm:$0xf] %vm3120_vm2, %v4887_v54  ;;  %v5529_v27 = vrot.slane %v5526_v57, 4  ;;  %v5544_v8 = vsel %vm1434_vm1, %v5540_v3, %v5543_v37  ;;  %v3269_v43 = vpack.i.b16 %v3234_v5, %v3218_v59  ;;  %5295 = vrot.lane.b32.xlu1 %v9816_v51, %s8881_s13  ;;  %v3270_v54 = vshrl.u32 %v3218_v59, 16 }
 0x26f   : > { %v4895_v40 = vpack.i.b16 %v4894_v20, %v4893_v39  ;;  %5169 = vst.msk [vmem:[%s10006_s24 + $0x80] sm:$0xf] %vm3120_vm2, %v4891_v36  ;;  %v5527_v26 = vrot.slane %v5522_v4, 4  ;;  %v5542_v21 = vsel %vm1434_vm1, %v5541_v13, %v5535_v18  ;;  %v5552_v11 = vperm.slane %v5544_v8, %v9870_v56  ;;  %v1138_v20 = vpop.permute.xlu0 %1137 }
 0x270   : > { %v5530_v37 = vsel %vm1434_vm1, 0, %v5529_v27  ;;  %v5548_v62 = vperm.slane %v5542_v21, %v9870_v56  ;;  %1229 = vrot.lane.b32.xlu2 %v9812_v23, %s8881_s13  ;;  %5231 = vrot.lane.b32.xlu0 %v9816_v51, %s8879_s10  ;;  %v1511_v59 = vperm.slane %v1254_v17, %v9829_v44  ;;  %v6337_v46 = vsel %vm1434_vm1, %v5529_v27, %v5522_v4 }
 0x271   : > { %5185 = vst.msk [vmem:[%s10006_s24 + $0xc0] sm:$0xf] %vm3120_vm2, %v4895_v40  ;;  %v5528_v18 = vsel %vm1434_vm1, 0, %v5527_v26  ;;  %v5555_v12 = vrot.slane %v5552_v11, 4  ;;  %v6342_v61 = vrot.slane %v5530_v37, 4  ;;  %v3271_v47 = vshrl.u32 %v3234_v5, 16 }
 0x272   : > { %v5553_v58 = vrot.slane %v5548_v62, 4  ;;  %v5339_v39 = vpack.i.b16 %v5222_v60, %v9675_v33  ;;  %v1486_v57 = vrot.slane %v10017_v24, 4  ;;  %v10042_v36 = vperm.slane %v3269_v43, %v9829_v44 }
 0x273   : > { %v5556_v35 = vsel %vm1434_vm1, 0, %v5555_v12  ;;  %v6343_v0 = vsel %vm1434_vm1, %v6342_v61, %v5528_v18  ;;  %v6356_v8 = vsel %vm1434_vm1, %v5555_v12, %v5548_v62  ;;  %v6341_v5 = vperm.slane %v6337_v46, %v9829_v44  ;;  %v10058_v12 = vpop.permute.xlu1 %5283 }
 0x274   : > { %v5554_v13 = vsel %vm1434_vm1, 0, %v5553_v58  ;;  %v6347_v17 = vperm.slane %v6343_v0, %v9829_v44  ;;  %v6361_v4 = vrot.slane %v5556_v35, 4  ;;  %v1512_v27 = vrot.slane %v1511_v59, 4 }
 0x275   : > { %v3272_v40 = vpack.i.b16 %v3271_v47, %v3270_v54  ;;  %v5341_v26 = vshrl.u32 %v5222_v60, 16  ;;  %v1245_v37 = vpack.i.b16 %v1138_v20, %v9643_v63  ;;  %v1247_v43 = vshrl.u32 %v1138_v20, 16 }
 0x276   : > { %v6348_v21 = vrot.slane %v6347_v17, 4  ;;  %v6362_v11 = vsel %vm1434_vm1, %v6361_v4, %v5554_v13  ;;  %v6360_v18 = vperm.slane %v6356_v8, %v9829_v44  ;;  %v10056_v62 = vperm.slane %v5339_v39, %v9829_v44  ;;  %1183 = vrot.lane.b32.xlu1 %v9818_v52, %s8880_s12 }
 0x277   : > { %v6366_v61 = vperm.slane %v6362_v11, %v9829_v44  ;;  %v10053_v58 = vperm.slane %v3272_v40, %v9829_v44  ;;  %v3503_v54 = vrot.slane %v10042_v36, 4  ;;  %v12863_v46 = vshrl.u32 %v9643_v63, 16 }
 0x278   : > { %v6349_v60 = vsel %vm1434_vm1, %v6348_v21, %v6341_v5  ;;  %v1480_v35 = vperm.slane %v1245_v37, %v9829_v44  ;;  %5263 = vrot.lane.b32.xlu2 %v9816_v51, %s8880_s12  ;;  %v12864_v13 = vshrl.u32 %v9675_v33, 16  ;;  %v3202_v8 = vrot.slane %v1138_v20, 4  ;;  %1215 = vrot.lane.b32.xlu0 %v9818_v52, %s8881_s13 }
 0x279   : > { %v1248_v47 = vpack.i.b16 %v1247_v43, %v12863_v46  ;;  %v6353_v39 = vperm.slane %v6349_v60, %v9870_v56  ;;  %v6367_v0 = vrot.slane %v6366_v61, 4  ;;  %v3529_v43 = vrot.slane %v10053_v58, 4 }
 0x27a   : > { %v10072_v17 = vpack.i.b16 %v5341_v26, %v12864_v13  ;;  %v1487_v4 = vsel %vm1434_vm1, %v1486_v57, %v1480_v35  ;;  %v1488_v5 = vrot.slane %v1480_v35, 4 }
 0x27b   : > { %v1506_v40 = vperm.slane %v1248_v47, %v9829_v44  ;;  %v6354_v11 = vrot.slane %v6353_v39, 4  ;;  %v6368_v37 = vsel %vm1434_vm1, %v6367_v0, %v6360_v18  ;;  %v1493_v33 = vperm.slane %v1487_v4, %v9870_v56 }
 0x27c   : > { %v6372_v20 = vperm.slane %v6368_v37, %v9870_v56  ;;  %v1489_v26 = vsel %vm1434_vm1, %v10017_v24, %v1488_v5  ;;  %v6949_v60 = vshrl.u32 %v6353_v39, 16  ;;  %v12865_v18 = vrot.slane %v9643_v63, 4 }
 0x27d   : > { %v1513_v57 = vsel %vm1434_vm1, %v1512_v27, %v1506_v40  ;;  %v1514_v61 = vrot.slane %v1506_v40, 4  ;;  %v1497_v46 = vperm.slane %v1489_v26, %v9870_v56  ;;  %v6355_v0 = vsel %vm1434_vm1, 0, %v6354_v11 }
 0x27e   : > { %v1519_v47 = vperm.slane %v1513_v57, %v9870_v56  ;;  %v3263_v35 = vpack.i.b16 %v3202_v8, %v12865_v18  ;;  %v6373_v13 = vrot.slane %v6372_v20, 4  ;;  %v6947_v4 = vpack.i.b16 %v6372_v20, %v6353_v39  ;;  %5241 = vrot.lane.b32.xlu1 %v9827_v1, %s8879_s10 }
 0x27f   : > { %v6950_v37 = vshrl.u32 %v6372_v20, 16  ;;  %v1498_v21 = vrot.slane %v1493_v33, 4  ;;  %v1500_v3 = vrot.slane %v1497_v46, 4  ;;  %v1515_v24 = vsel %vm1434_vm1, %v1511_v59, %v1514_v61 }
 0x280   : > { %v1524_v27 = vrot.slane %v1519_v47, 4  ;;  %v6374_v5 = vsel %vm1434_vm1, 0, %v6373_v13  ;;  %7201 = vst.msk [vmem:[%s10097_s14] sm:$0xf] %vm3120_vm2, %v6947_v4  ;;  %v1523_v63 = vperm.slane %v1515_v24, %v9870_v56  ;;  %v3265_v39 = vshrl.u32 %v3202_v8, 16  ;;  %1151 = vrot.lane.b32.xlu2 %v9818_v52, %s8879_s10  ;;  %5273 = vrot.lane.b32.xlu0 %v9827_v1, %s8880_s12 }
 0x281   : > { %v6951_v40 = vpack.i.b16 %v6950_v37, %v6949_v60  ;;  %v6955_v59 = vpack.i.b16 %v6374_v5, %v6355_v0  ;;  %v6957_v11 = vshrl.u32 %v6355_v0, 16  ;;  %v6958_v20 = vshrl.u32 %v6374_v5, 16 }
 0x282   : > { %v1501_v26 = vsel %vm1434_vm1, 0, %v1500_v3  ;;  %v1526_v57 = vrot.slane %v1523_v63, 4  ;;  %v2294_v61 = vsel %vm1434_vm1, %v1500_v3, %v1493_v33  ;;  %v3266_v8 = vpack.i.b16 %v3265_v39, %v9773_v31 }
 0x283   : > { %7217 = vst.msk [vmem:[%s10097_s14 + $0x40] sm:$0xf] %vm3120_vm2, %v6951_v40  ;;  %v2299_v60 = vrot.slane %v1501_v26, 4  ;;  %v6959_v46 = vpack.i.b16 %v6958_v20, %v6957_v11  ;;  %v1499_v18 = vsel %vm1434_vm1, 0, %v1498_v21  ;;  %v1525_v0 = vsel %vm1434_vm1, 0, %v1524_v27 }
 0x284   : > { %7233 = vst.msk [vmem:[%s10097_s14 + $0x80] sm:$0xf] %vm3120_vm2, %v6955_v59  ;;  %v3497_v13 = vperm.slane %v3263_v35, %v9829_v44  ;;  %v1527_v4 = vsel %vm1434_vm1, 0, %v1526_v57  ;;  %v2298_v37 = vperm.slane %v2294_v61, %v9829_v44  ;;  %v3523_v3 = vperm.slane %v3266_v8, %v9829_v44 }
 0x285   : > { %v2300_v24 = vsel %vm1434_vm1, %v2299_v60, %v1499_v18  ;;  %7249 = vst.msk [vmem:[%s10097_s14 + $0xc0] sm:$0xf] %vm3120_vm2, %v6959_v46  ;;  %v2318_v33 = vrot.slane %v1527_v4, 4  ;;  %v5335_v27 = vshrl.u32 %v10058_v12, 16  ;;  %v2313_v59 = vsel %vm1434_vm1, %v1526_v57, %v1519_v47 }
 0x286   : > { %v2304_v31 = vperm.slane %v2300_v24, %v9829_v44  ;;  %v3504_v21 = vsel %vm1434_vm1, %v3503_v54, %v3497_v13  ;;  %v3505_v35 = vrot.slane %v3497_v13, 4  ;;  %v3530_v40 = vsel %vm1434_vm1, %v3529_v43, %v3523_v3  ;;  %5265 = vrot.lane.b32.xlu1 %v9825_v42, %s8880_s12 }
 0x287   : > { %v3510_v5 = vperm.slane %v3504_v21, %v9870_v56  ;;  %v3531_v63 = vrot.slane %v3523_v3, 4  ;;  %v2319_v11 = vsel %vm1434_vm1, %v2318_v33, %v1525_v0  ;;  %v3536_v20 = vperm.slane %v3530_v40, %v9870_v56 }
 0x288   : > { %v2305_v39 = vrot.slane %v2304_v31, 4  ;;  %v2323_v54 = vperm.slane %v2319_v11, %v9829_v44  ;;  %v3506_v26 = vsel %vm1434_vm1, %v10042_v36, %v3505_v35  ;;  %5233 = vrot.lane.b32.xlu2 %v9825_v42, %s8879_s10  ;;  %5297 = vrot.lane.b32.xlu0 %v9825_v42, %s8881_s13  ;;  %v2317_v36 = vperm.slane %v2313_v59, %v9829_v44 }
 0x289   : > { %v3515_v61 = vrot.slane %v3510_v5, 4  ;;  %v3532_v43 = vsel %vm1434_vm1, %v10053_v58, %v3531_v63  ;;  %v3514_v57 = vperm.slane %v3506_v26, %v9870_v56  ;;  %v3541_v8 = vrot.slane %v3536_v20, 4 }
 0x28a   : > { %v2306_v47 = vsel %vm1434_vm1, %v2305_v39, %v2298_v37  ;;  %v3540_v60 = vperm.slane %v3532_v43, %v9870_v56  ;;  %v2324_v18 = vrot.slane %v2323_v54, 4  ;;  %v12866_v58 = vshrl.u32 %v9975_v16, 16  ;;  %v1142_v43 = vpop.permute.xlu2 %1141 }
 0x28b   : > { %v2310_v46 = vperm.slane %v2306_v47, %v9870_v56  ;;  %v10152_v13 = vperm.slane %v10072_v17, %v9829_v44  ;;  %v3517_v4 = vrot.slane %v3514_v57, 4  ;;  %v12867_v24 = vpack.i.b16 %v10058_v12, %v9975_v16 }
 0x28c   : > { %v5336_v0 = vpack.i.b16 %v5335_v27, %v12866_v58  ;;  %v3543_v37 = vrot.slane %v3540_v60, 4  ;;  %v2325_v33 = vsel %vm1434_vm1, %v2324_v18, %v2317_v36  ;;  %v3516_v21 = vsel %vm1434_vm1, 0, %v3515_v61  ;;  %v5220_v58 = vpop.permute.xlu0 %5219 }
 0x28d   : > { %v10158_v3 = vperm.slane %v12867_v24, %v9829_v44  ;;  %v2311_v31 = vrot.slane %v2310_v46, 4  ;;  %v3542_v35 = vsel %vm1434_vm1, 0, %v3541_v8  ;;  %v2329_v27 = vperm.slane %v2325_v33, %v9870_v56 }
 0x28e   : > { %v3518_v17 = vsel %vm1434_vm1, 0, %v3517_v4  ;;  %v3544_v40 = vsel %vm1434_vm1, 0, %v3543_v37  ;;  %v4311_v63 = vsel %vm1434_vm1, %v3517_v4, %v3510_v5  ;;  %v2884_v16 = vshrl.u32 %v2310_v46, 16  ;;  %1153 = vrot.lane.b32.xlu1 %v9831_v50, %s8879_s10 }
 0x28f   : > { %v2312_v39 = vsel %vm1434_vm1, 0, %v2311_v31  ;;  %v4316_v12 = vrot.slane %v3518_v17, 4  ;;  %v10169_v59 = vperm.slane %v5336_v0, %v9829_v44  ;;  %v2330_v11 = vrot.slane %v2329_v27, 4 }
 0x290   : > { %v2882_v54 = vpack.i.b16 %v2329_v27, %v2310_v46  ;;  %v2885_v26 = vshrl.u32 %v2329_v27, 16  ;;  %v5567_v61 = vrot.slane %v10158_v3, 4  ;;  %v4315_v47 = vperm.slane %v4311_v63, %v9829_v44  ;;  %5305 = vrot.lane.b32.xlu2 %v9827_v1, %s8881_s13  ;;  %1185 = vrot.lane.b32.xlu0 %v9831_v50, %s8880_s12 }
 0x291   : > { %v4317_v5 = vsel %vm1434_vm1, %v4316_v12, %v3516_v21  ;;  %v4330_v57 = vsel %vm1434_vm1, %v3543_v37, %v3536_v20  ;;  %v4335_v60 = vrot.slane %v3544_v40, 4  ;;  %v2331_v8 = vsel %vm1434_vm1, 0, %v2330_v11 }
 0x292   : > { %v2886_v46 = vpack.i.b16 %v2885_v26, %v2884_v16  ;;  %v2892_v36 = vshrl.u32 %v2312_v39, 16  ;;  %3122 = vst.msk [vmem:[%s9964_s9 + $0x4] sm:$0xf] %vm3120_vm2, %v2882_v54  ;;  %v4321_v18 = vperm.slane %v4317_v5, %v9829_v44  ;;  %v2890_v0 = vpack.i.b16 %v2331_v8, %v2312_v39 }
 0x293   : > { %v2893_v4 = vshrl.u32 %v2331_v8, 16  ;;  %v4336_v20 = vsel %vm1434_vm1, %v4335_v60, %v3542_v35  ;;  %v1271_v37 = vshrl.u32 %v1142_v43, 16  ;;  %v1269_v33 = vpack.i.b16 %v1142_v43, %v9685_v2 }
 0x294   : > { %3138 = vst.msk [vmem:[%s9964_s9 + $0x44] sm:$0xf] %vm3120_vm2, %v2886_v46  ;;  %v4322_v24 = vrot.slane %v4321_v18, 4  ;;  %v4340_v31 = vperm.slane %v4336_v20, %v9829_v44  ;;  %v3204_v21 = vrot.slane %v1142_v43, 4  ;;  %v12868_v17 = vshrl.u32 %v9685_v2, 16 }
 0x295   : > { %v2894_v27 = vpack.i.b16 %v2893_v4, %v2892_v36  ;;  %3154 = vst.msk [vmem:[%s9964_s9 + $0x84] sm:$0xf] %vm3120_vm2, %v2890_v0  ;;  %v5327_v63 = vpack.i.b16 %v5220_v58, %v9654_v49  ;;  %v5329_v39 = vshrl.u32 %v5220_v58, 16  ;;  %v4334_v16 = vperm.slane %v4330_v57, %v9829_v44  ;;  %v1140_v4 = vpop.permute.xlu1 %1139 }
 0x296   : > { %v1272_v40 = vpack.i.b16 %v1271_v37, %v12868_v17  ;;  %v4323_v35 = vsel %vm1434_vm1, %v4322_v24, %v4315_v47  ;;  %v4341_v12 = vrot.slane %v4340_v31, 4  ;;  %v12869_v11 = vrot.slane %v9685_v2, 4  ;;  %5235 = vrot.lane.b32.xlu1 %v9841_v19, %s8879_s10 }
 0x297   : > { %v5621_v26 = vrot.slane %v10056_v62, 4  ;;  %v5647_v43 = vrot.slane %v10152_v13, 4  ;;  %3170 = vst.msk [vmem:[%s9964_s9 + $0xc4] sm:$0xf] %vm3120_vm2, %v2894_v27  ;;  %v4327_v5 = vperm.slane %v4323_v35, %v9870_v56  ;;  %v5593_v60 = vrot.slane %v10169_v59, 4 }
 0x298   : > { %v3287_v54 = vpack.i.b16 %v3204_v21, %v12869_v11  ;;  %v4342_v8 = vsel %vm1434_vm1, %v4341_v12, %v4334_v16  ;;  %v10207_v47 = vperm.slane %v1269_v33, %v9829_v44  ;;  %v3289_v57 = vshrl.u32 %v3204_v21, 16  ;;  %1217 = vrot.lane.b32.xlu2 %v9831_v50, %s8881_s13  ;;  %5243 = vrot.lane.b32.xlu0 %v9843_v30, %s8879_s10 }
 0x299   : > { %v5561_v46 = vperm.slane %v5327_v63, %v9829_v44  ;;  %v4328_v2 = vrot.slane %v4327_v5, 4  ;;  %v4346_v36 = vperm.slane %v4342_v8, %v9870_v56  ;;  %v10214_v18 = vperm.slane %v1272_v40, %v9829_v44 }
 0x29a   : > { %v12870_v58 = vshrl.u32 %v9654_v49, 16  ;;  %v4901_v20 = vshrl.u32 %v4327_v5, 16  ;;  %v10221_v37 = vperm.slane %v3287_v54, %v9829_v44  ;;  %v3290_v17 = vpack.i.b16 %v3289_v57, %v9784_v34 }
 0x29b   : > { %v5568_v24 = vsel %vm1434_vm1, %v5567_v61, %v5561_v46  ;;  %v5569_v31 = vrot.slane %v5561_v46, 4  ;;  %v4329_v33 = vsel %vm1434_vm1, 0, %v4328_v2  ;;  %v4347_v21 = vrot.slane %v4346_v36, 4 }
 0x29c   : > { %v5330_v0 = vpack.i.b16 %v5329_v39, %v12870_v58  ;;  %v4899_v49 = vpack.i.b16 %v4346_v36, %v4327_v5  ;;  %v4902_v27 = vshrl.u32 %v4346_v36, 16  ;;  %v5574_v63 = vperm.slane %v5568_v24, %v9870_v56 }
 0x29d   : > { %v5570_v40 = vsel %vm1434_vm1, %v10158_v3, %v5569_v31  ;;  %v1257_v39 = vpack.i.b16 %v1140_v4, %v9664_v9  ;;  %v4348_v61 = vsel %vm1434_vm1, 0, %v4347_v21  ;;  %v4909_v54 = vshrl.u32 %v4329_v33, 16 }
 0x29e   : > { %v4903_v35 = vpack.i.b16 %v4902_v27, %v4901_v20  ;;  %5138 = vst.msk [vmem:[%s10006_s24 + $0x4] sm:$0xf] %vm3120_vm2, %v4899_v49  ;;  %v5578_v16 = vperm.slane %v5570_v40, %v9870_v56  ;;  %v5587_v12 = vperm.slane %v5330_v0, %v9829_v44  ;;  %v4907_v11 = vpack.i.b16 %v4348_v61, %v4329_v33 }
 0x29f   : > { %v4910_v34 = vshrl.u32 %v4348_v61, 16  ;;  %v5579_v5 = vrot.slane %v5574_v63, 4  ;;  %v1259_v46 = vshrl.u32 %v1140_v4, 16  ;;  %v1592_v36 = vrot.slane %v10207_v47, 4  ;;  %1219 = vrot.lane.b32.xlu1 %v9845_v22, %s8881_s13 }
 0x2a0   : > { %5154 = vst.msk [vmem:[%s10006_s24 + $0x44] sm:$0xf] %vm3120_vm2, %v4903_v35  ;;  %v5581_v3 = vrot.slane %v5578_v16, 4  ;;  %v5594_v8 = vsel %vm1434_vm1, %v5593_v60, %v5587_v12  ;;  %v5595_v57 = vrot.slane %v5587_v12, 4  ;;  %v10244_v58 = vperm.slane %v3290_v17, %v9829_v44  ;;  %5275 = vrot.lane.b32.xlu2 %v9843_v30, %s8880_s12  ;;  %5267 = vrot.lane.b32.xlu0 %v9841_v19, %s8880_s12 }
 0x2a1   : > { %v4911_v2 = vpack.i.b16 %v4910_v34, %v4909_v54  ;;  %5170 = vst.msk [vmem:[%s10006_s24 + $0x84] sm:$0xf] %vm3120_vm2, %v4907_v11  ;;  %v5600_v0 = vperm.slane %v5594_v8, %v9870_v56  ;;  %v12871_v24 = vshrl.u32 %v9664_v9, 16  ;;  %v10255_v33 = vperm.slane %v1257_v39, %v9829_v44 }
 0x2a2   : > { %v5582_v20 = vsel %vm1434_vm1, 0, %v5581_v3  ;;  %v5596_v60 = vsel %vm1434_vm1, %v10169_v59, %v5595_v57  ;;  %v6375_v27 = vsel %vm1434_vm1, %v5581_v3, %v5574_v63  ;;  %v1618_v59 = vrot.slane %v10214_v18, 4  ;;  %v1172_v57 = vpop.permute.xlu1 %1171 }
 0x2a3   : > { %v1260_v31 = vpack.i.b16 %v1259_v46, %v12871_v24  ;;  %5186 = vst.msk [vmem:[%s10006_s24 + $0xc4] sm:$0xf] %vm3120_vm2, %v4911_v2  ;;  %v5604_v21 = vperm.slane %v5596_v60, %v9870_v56  ;;  %v5605_v49 = vrot.slane %v5600_v0, 4  ;;  %v6380_v17 = vrot.slane %v5582_v20, 4 }
 0x2a4   : > { %v5580_v40 = vsel %vm1434_vm1, 0, %v5579_v5  ;;  %v3203_v61 = vrot.slane %v1140_v4, 4  ;;  %v6379_v63 = vperm.slane %v6375_v27, %v9829_v44  ;;  %v12872_v34 = vrot.slane %v9664_v9, 4  ;;  %v1204_v5 = vpop.permute.xlu0 %1203 }
 0x2a5   : > { %v10268_v39 = vperm.slane %v1260_v31, %v9829_v44  ;;  %v5607_v12 = vrot.slane %v5604_v21, 4  ;;  %v6381_v11 = vsel %vm1434_vm1, %v6380_v17, %v5580_v40  ;;  %v5606_v46 = vsel %vm1434_vm1, 0, %v5605_v49 }
 0x2a6   : > { %v6385_v54 = vperm.slane %v6381_v11, %v9829_v44  ;;  %v3275_v3 = vpack.i.b16 %v3203_v61, %v12872_v34  ;;  %v3277_v8 = vshrl.u32 %v3203_v61, 16  ;;  %v1540_v2 = vrot.slane %v10255_v33, 4 }
 0x2a7   : > { %v5608_v4 = vsel %vm1434_vm1, 0, %v5607_v12  ;;  %v1566_v20 = vrot.slane %v10268_v39, 4  ;;  %v6394_v24 = vsel %vm1434_vm1, %v5607_v12, %v5600_v0  ;;  %v3235_v27 = vrot.slane %v1204_v5, 4  ;;  %5277 = vrot.lane.b32.xlu1 %v9864_v45, %s8880_s12 }
 0x2a8   : > { %v6386_v60 = vrot.slane %v6385_v54, 4  ;;  %v6399_v31 = vrot.slane %v5608_v4, 4  ;;  %v3278_v21 = vpack.i.b16 %v3277_v8, %v9860_v41  ;;  %v10284_v9 = vperm.slane %v3275_v3, %v9829_v44  ;;  %5299 = vrot.lane.b32.xlu2 %v9841_v19, %s8881_s13  ;;  %1155 = vrot.lane.b32.xlu0 %v9845_v22, %s8879_s10 }
 0x2a9   : > { %v1263_v17 = vpack.i.b16 %v1204_v5, %v1172_v57  ;;  %v1264_v40 = vshrl.u32 %v1172_v57, 16  ;;  %v1265_v11 = vshrl.u32 %v1204_v5, 16  ;;  %v3219_v54 = vrot.slane %v1172_v57, 4 }
 0x2aa   : > { %v6387_v49 = vsel %vm1434_vm1, %v6386_v60, %v6379_v63  ;;  %v6400_v61 = vsel %vm1434_vm1, %v6399_v31, %v5606_v46  ;;  %v6398_v0 = vperm.slane %v6394_v24, %v9829_v44  ;;  %v10296_v34 = vperm.slane %v3278_v21, %v9829_v44 }
 0x2ab   : > { %v6391_v41 = vperm.slane %v6387_v49, %v9870_v56  ;;  %v6404_v12 = vperm.slane %v6400_v61, %v9829_v44  ;;  %v3557_v63 = vrot.slane %v10284_v9, 4  ;;  %v1266_v3 = vpack.i.b16 %v1265_v11, %v1264_v40 }
 0x2ac   : > { %v1537_v8 = vperm.slane %v1263_v17, %v9829_v44  ;;  %v3281_v5 = vpack.i.b16 %v3235_v27, %v3219_v54  ;;  %v3283_v4 = vshrl.u32 %v3235_v27, 16  ;;  %v3282_v60 = vshrl.u32 %v3219_v54, 16 }
 0x2ad   : > { %v6392_v57 = vrot.slane %v6391_v41, 4  ;;  %v6405_v46 = vrot.slane %v6404_v12, 4  ;;  %v1563_v49 = vperm.slane %v1266_v3, %v9829_v44  ;;  %v6965_v35 = vshrl.u32 %v6391_v41, 16 }
 0x2ae   : > { %v1538_v31 = vrot.slane %v1537_v8, 4  ;;  %v1541_v24 = vsel %vm1434_vm1, %v1537_v8, %v1540_v2  ;;  %v3554_v21 = vperm.slane %v3281_v5, %v9829_v44  ;;  %v3284_v54 = vpack.i.b16 %v3283_v4, %v3282_v60 }
 0x2af   : > { %v6393_v61 = vsel %vm1434_vm1, 0, %v6392_v57  ;;  %v6406_v16 = vsel %vm1434_vm1, %v6405_v46, %v6398_v0  ;;  %v1549_v40 = vperm.slane %v1541_v24, %v9870_v56  ;;  %v1564_v11 = vrot.slane %v1563_v49, 4  ;;  %5301 = vrot.lane.b32.xlu1 %v9862_v25, %s8881_s13 }
 0x2b0   : > { %v6410_v17 = vperm.slane %v6406_v16, %v9870_v56  ;;  %v1539_v27 = vsel %vm1434_vm1, %v1538_v31, %v10255_v33  ;;  %v1567_v3 = vsel %vm1434_vm1, %v1563_v49, %v1566_v20  ;;  %v3555_v8 = vrot.slane %v3554_v21, 4  ;;  %1187 = vrot.lane.b32.xlu2 %v9845_v22, %s8880_s12  ;;  %5237 = vrot.lane.b32.xlu0 %v9862_v25, %s8879_s10 }
 0x2b1   : > { %v1545_v2 = vperm.slane %v1539_v27, %v9870_v56  ;;  %v1552_v12 = vrot.slane %v1549_v40, 4  ;;  %v1565_v16 = vsel %vm1434_vm1, %v1564_v11, %v10268_v39  ;;  %v1575_v4 = vperm.slane %v1567_v3, %v9870_v56 }
 0x2b2   : > { %v6411_v0 = vrot.slane %v6410_v17, 4  ;;  %v6963_v5 = vpack.i.b16 %v6410_v17, %v6391_v41  ;;  %v6966_v57 = vshrl.u32 %v6410_v17, 16  ;;  %v1571_v20 = vperm.slane %v1565_v16, %v9870_v56 }
 0x2b3   : > { %v1550_v33 = vrot.slane %v1545_v2, 4  ;;  %v1553_v46 = vsel %vm1434_vm1, 0, %v1552_v12  ;;  %v6973_v31 = vshrl.u32 %v6393_v61, 16  ;;  %v1578_v27 = vrot.slane %v1575_v4, 4 }
 0x2b4   : > { %v6412_v41 = vsel %vm1434_vm1, 0, %v6411_v0  ;;  %v6967_v60 = vpack.i.b16 %v6966_v57, %v6965_v35  ;;  %7202 = vst.msk [vmem:[%s10097_s14 + $0x4] sm:$0xf] %vm3120_vm2, %v6963_v5  ;;  %v2337_v39 = vrot.slane %v1553_v46, 4  ;;  %v1576_v17 = vrot.slane %v1571_v20, 4  ;;  %v10337_v5 = vpop.permute.xlu2 %1205 }
 0x2b5   : > { %v6971_v24 = vpack.i.b16 %v6412_v41, %v6393_v61  ;;  %v6974_v49 = vshrl.u32 %v6412_v41, 16  ;;  %v1551_v40 = vsel %vm1434_vm1, 0, %v1550_v33  ;;  %v2332_v11 = vsel %vm1434_vm1, %v1552_v12, %v1545_v2 }
 0x2b6   : > { %7218 = vst.msk [vmem:[%s10097_s14 + $0x44] sm:$0xf] %vm3120_vm2, %v6967_v60  ;;  %v2338_v3 = vsel %vm1434_vm1, %v2337_v39, %v1551_v40  ;;  %v3556_v35 = vsel %vm1434_vm1, %v3555_v8, %v10284_v9  ;;  %v3583_v61 = vrot.slane %v10296_v34, 4  ;;  %v3558_v16 = vsel %vm1434_vm1, %v3554_v21, %v3557_v63 }
 0x2b7   : > { %v6975_v0 = vpack.i.b16 %v6974_v49, %v6973_v31  ;;  %7234 = vst.msk [vmem:[%s10097_s14 + $0x84] sm:$0xf] %vm3120_vm2, %v6971_v24  ;;  %v2342_v57 = vperm.slane %v2338_v3, %v9829_v44  ;;  %v1577_v33 = vsel %vm1434_vm1, 0, %v1576_v17  ;;  %v1579_v2 = vsel %vm1434_vm1, 0, %v1578_v27  ;;  %1189 = vrot.lane.b32.xlu1 %v9867_v7, %s8880_s12  ;;  %v5254_v3 = vpop.permute.xlu1 %5253 }
 0x2b8   : > { %v3562_v12 = vperm.slane %v3556_v35, %v9870_v56  ;;  %v3566_v46 = vperm.slane %v3558_v16, %v9870_v56  ;;  %v2336_v9 = vperm.slane %v2332_v11, %v9829_v44  ;;  %v2356_v4 = vrot.slane %v1579_v2, 4  ;;  %5245 = vrot.lane.b32.xlu2 %v9864_v45, %s8879_s10  ;;  %1221 = vrot.lane.b32.xlu0 %v9867_v7, %s8881_s13  ;;  %v5286_v11 = vpop.permute.xlu0 %5285 }
 0x2b9   : > { %7250 = vst.msk [vmem:[%s10097_s14 + $0xc4] sm:$0xf] %vm3120_vm2, %v6975_v0  ;;  %v2343_v8 = vrot.slane %v2342_v57, 4  ;;  %v3580_v41 = vperm.slane %v3284_v54, %v9829_v44  ;;  %v3236_v63 = vrot.slane %v10337_v5, 4  ;;  %v2351_v21 = vsel %vm1434_vm1, %v1578_v27, %v1571_v20 }
 0x2ba   : > { %v3567_v60 = vrot.slane %v3562_v12, 4  ;;  %v3569_v31 = vrot.slane %v3566_v46, 4  ;;  %v2357_v24 = vsel %vm1434_vm1, %v2356_v4, %v1577_v33  ;;  %v2355_v35 = vperm.slane %v2351_v21, %v9829_v44 }
 0x2bb   : > { %v2344_v39 = vsel %vm1434_vm1, %v2343_v8, %v2336_v9  ;;  %v3581_v49 = vrot.slane %v3580_v41, 4  ;;  %v3584_v40 = vsel %vm1434_vm1, %v3580_v41, %v3583_v61  ;;  %v2361_v17 = vperm.slane %v2357_v24, %v9829_v44 }
 0x2bc   : > { %v2348_v54 = vperm.slane %v2344_v39, %v9870_v56  ;;  %v3568_v20 = vsel %vm1434_vm1, 0, %v3567_v60  ;;  %v3570_v27 = vsel %vm1434_vm1, 0, %v3569_v31  ;;  %v3592_v61 = vperm.slane %v3584_v40, %v9870_v56 }
 0x2bd   : > { %v3582_v0 = vsel %vm1434_vm1, %v3581_v49, %v10296_v34  ;;  %v4354_v57 = vrot.slane %v3570_v27, 4  ;;  %v2362_v33 = vrot.slane %v2361_v17, 4  ;;  %v4349_v46 = vsel %vm1434_vm1, %v3569_v31, %v3562_v12 }
 0x2be   : > { %v2349_v16 = vrot.slane %v2348_v54, 4  ;;  %v3588_v2 = vperm.slane %v3582_v0, %v9870_v56  ;;  %v3595_v9 = vrot.slane %v3592_v61, 4  ;;  %v5347_v4 = vshrl.u32 %v5286_v11, 16 }
 0x2bf   : > { %v4355_v8 = vsel %vm1434_vm1, %v4354_v57, %v3568_v20  ;;  %v5345_v41 = vpack.i.b16 %v5286_v11, %v5254_v3  ;;  %v2363_v21 = vsel %vm1434_vm1, %v2362_v33, %v2355_v35  ;;  %v2900_v49 = vshrl.u32 %v2348_v54, 16  ;;  %5247 = vrot.lane.b32.xlu1 %v9875_v29, %s8879_s10 }
 0x2c0   : > { %v2350_v60 = vsel %vm1434_vm1, 0, %v2349_v16  ;;  %v3593_v39 = vrot.slane %v3588_v2, 4  ;;  %v4359_v34 = vperm.slane %v4355_v8, %v9829_v44  ;;  %v2367_v24 = vperm.slane %v2363_v21, %v9870_v56  ;;  %5269 = vrot.lane.b32.xlu2 %v9862_v25, %s8880_s12  ;;  %5279 = vrot.lane.b32.xlu0 %v9875_v29, %s8880_s12 }
 0x2c1   : > { %v3596_v40 = vsel %vm1434_vm1, 0, %v3595_v9  ;;  %v4353_v17 = vperm.slane %v4349_v46, %v9829_v44  ;;  %v2908_v12 = vshrl.u32 %v2350_v60, 16  ;;  %v5346_v61 = vshrl.u32 %v5254_v3, 16 }
 0x2c2   : > { %v3594_v31 = vsel %vm1434_vm1, 0, %v3593_v39  ;;  %v4360_v20 = vrot.slane %v4359_v34, 4  ;;  %v4373_v27 = vrot.slane %v3596_v40, 4  ;;  %v2368_v11 = vrot.slane %v2367_v24, 4 }
 0x2c3   : > { %v2898_v35 = vpack.i.b16 %v2367_v24, %v2348_v54  ;;  %v2901_v0 = vshrl.u32 %v2367_v24, 16  ;;  %v4368_v16 = vsel %vm1434_vm1, %v3595_v9, %v3588_v2  ;;  %v5618_v46 = vperm.slane %v5345_v41, %v9829_v44 }
 0x2c4   : > { %v4361_v57 = vsel %vm1434_vm1, %v4360_v20, %v4353_v17  ;;  %v4374_v33 = vsel %vm1434_vm1, %v4373_v27, %v3594_v31  ;;  %v2369_v8 = vsel %vm1434_vm1, 0, %v2368_v11  ;;  %v5348_v24 = vpack.i.b16 %v5347_v4, %v5346_v61  ;;  %v10405_v20 = vpop.permute.xlu0 %1173 }
 0x2c5   : > { %v2902_v21 = vpack.i.b16 %v2901_v0, %v2900_v49  ;;  %3123 = vst.msk [vmem:[%s9964_s9 + $0x8] sm:$0xf] %vm3120_vm2, %v2898_v35  ;;  %v4365_v54 = vperm.slane %v4361_v57, %v9870_v56  ;;  %v4378_v3 = vperm.slane %v4374_v33, %v9829_v44  ;;  %v2906_v39 = vpack.i.b16 %v2369_v8, %v2350_v60 }
 0x2c6   : > { %v2909_v34 = vshrl.u32 %v2369_v8, 16  ;;  %v5619_v40 = vrot.slane %v5618_v46, 4  ;;  %v4372_v9 = vperm.slane %v4368_v16, %v9829_v44  ;;  %v5622_v49 = vsel %vm1434_vm1, %v5618_v46, %v5621_v26 }
 0x2c7   : > { %3139 = vst.msk [vmem:[%s9964_s9 + $0x48] sm:$0xf] %vm3120_vm2, %v2902_v21  ;;  %v4366_v2 = vrot.slane %v4365_v54, 4  ;;  %v4379_v41 = vrot.slane %v4378_v3, 4  ;;  %v5630_v4 = vperm.slane %v5622_v49, %v9870_v56  ;;  %v5644_v31 = vperm.slane %v5348_v24, %v9829_v44  ;;  %5271 = vrot.lane.b32.xlu1 %v9873_v32, %s8880_s12 }
 0x2c8   : > { %v2910_v17 = vpack.i.b16 %v2909_v34, %v2908_v12  ;;  %3155 = vst.msk [vmem:[%s9964_s9 + $0x88] sm:$0xf] %vm3120_vm2, %v2906_v39  ;;  %v5620_v60 = vsel %vm1434_vm1, %v5619_v40, %v10056_v62  ;;  %v1277_v27 = vshrl.u32 %v10337_v5, 16  ;;  %v10410_v11 = vshrl.u32 %v3236_v63, 16  ;;  %1157 = vrot.lane.b32.xlu2 %v9867_v7, %s8879_s10  ;;  %5303 = vrot.lane.b32.xlu0 %v9873_v32, %s8881_s13 }
 0x2c9   : > { %v4380_v26 = vsel %vm1434_vm1, %v4379_v41, %v4372_v9  ;;  %v5626_v12 = vperm.slane %v5620_v60, %v9870_v56  ;;  %v4367_v62 = vsel %vm1434_vm1, 0, %v4366_v2  ;;  %v5633_v0 = vrot.slane %v5630_v4, 4 }
 0x2ca   : > { %3171 = vst.msk [vmem:[%s9964_s9 + $0xc8] sm:$0xf] %vm3120_vm2, %v2910_v17  ;;  %v4384_v35 = vperm.slane %v4380_v26, %v9870_v56  ;;  %v5645_v61 = vrot.slane %v5644_v31, 4  ;;  %v4917_v57 = vshrl.u32 %v4365_v54, 16  ;;  %v5648_v33 = vsel %vm1434_vm1, %v5644_v31, %v5647_v43 }
 0x2cb   : > { %v5631_v16 = vrot.slane %v5626_v12, 4  ;;  %v1275_v46 = vpack.i.b16 %v10337_v5, %v10405_v20  ;;  %v5634_v39 = vsel %vm1434_vm1, 0, %v5633_v0  ;;  %v4925_v34 = vshrl.u32 %v4367_v62, 16 }
 0x2cc   : > { %v4385_v8 = vrot.slane %v4384_v35, 4  ;;  %v4915_v21 = vpack.i.b16 %v4384_v35, %v4365_v54  ;;  %v4918_v3 = vshrl.u32 %v4384_v35, 16  ;;  %v5646_v40 = vsel %vm1434_vm1, %v5645_v61, %v10152_v13 }
 0x2cd   : > { %v5632_v24 = vsel %vm1434_vm1, 0, %v5631_v16  ;;  %v5656_v43 = vperm.slane %v5648_v33, %v9870_v56  ;;  %v5652_v54 = vperm.slane %v5646_v40, %v9870_v56  ;;  %v6413_v41 = vsel %vm1434_vm1, %v5633_v0, %v5626_v12 }
 0x2ce   : > { %v4386_v2 = vsel %vm1434_vm1, 0, %v4385_v8  ;;  %v4919_v9 = vpack.i.b16 %v4918_v3, %v4917_v57  ;;  %5139 = vst.msk [vmem:[%s10006_s24 + $0x8] sm:$0xf] %vm3120_vm2, %v4915_v21  ;;  %v6418_v4 = vrot.slane %v5634_v39, 4  ;;  %v1276_v31 = vshrl.u32 %v10405_v20, 16 }
 0x2cf   : > { %v4923_v49 = vpack.i.b16 %v4386_v2, %v4367_v62  ;;  %v4926_v17 = vshrl.u32 %v4386_v2, 16  ;;  %v5659_v60 = vrot.slane %v5656_v43, 4  ;;  %v5657_v13 = vrot.slane %v5652_v54, 4  ;;  %5307 = vrot.lane.b32.xlu1 %v9843_v30, %s8881_s13 }
 0x2d0   : > { %5155 = vst.msk [vmem:[%s10006_s24 + $0x48] sm:$0xf] %vm3120_vm2, %v4919_v9  ;;  %v1589_v26 = vperm.slane %v1275_v46, %v9829_v44  ;;  %v3220_v35 = vrot.slane %v10405_v20, 4  ;;  %v6419_v12 = vsel %vm1434_vm1, %v6418_v4, %v5632_v24  ;;  %v6417_v16 = vperm.slane %v6413_v41, %v9829_v44  ;;  %5239 = vrot.lane.b32.xlu2 %v9873_v32, %s8879_s10 }
 0x2d1   : > { %v4927_v61 = vpack.i.b16 %v4926_v17, %v4925_v34  ;;  %5171 = vst.msk [vmem:[%s10006_s24 + $0x88] sm:$0xf] %vm3120_vm2, %v4923_v49  ;;  %v5660_v57 = vsel %vm1434_vm1, 0, %v5659_v60  ;;  %v6432_v62 = vsel %vm1434_vm1, %v5659_v60, %v5652_v54  ;;  %v5658_v0 = vsel %vm1434_vm1, 0, %v5657_v13  ;;  %5309 = vrot.lane.b32.xlu0 %v9864_v45, %s8881_s13 }
 0x2d2   : > { %v6423_v33 = vperm.slane %v6419_v12, %v9829_v44  ;;  %v6437_v46 = vrot.slane %v5660_v57, 4  ;;  %v1278_v20 = vpack.i.b16 %v1277_v27, %v1276_v31  ;;  %v1590_v8 = vrot.slane %v1589_v26, 4 }
 0x2d3   : > { %5187 = vst.msk [vmem:[%s10006_s24 + $0xc8] sm:$0xf] %vm3120_vm2, %v4927_v61  ;;  %v1593_v21 = vsel %vm1434_vm1, %v1589_v26, %v1592_v36  ;;  %v3293_v3 = vpack.i.b16 %v3236_v63, %v3220_v35  ;;  %v6436_v34 = vperm.slane %v6432_v62, %v9829_v44  ;;  %v3294_v2 = vshrl.u32 %v3220_v35, 16 }
 0x2d4   : > { %v6424_v39 = vrot.slane %v6423_v33, 4  ;;  %v6438_v24 = vsel %vm1434_vm1, %v6437_v46, %v5658_v0  ;;  %v1601_v40 = vperm.slane %v1593_v21, %v9870_v56  ;;  %v1591_v43 = vsel %vm1434_vm1, %v1590_v8, %v10207_v47 }
 0x2d5   : > { %v6442_v27 = vperm.slane %v6438_v24, %v9829_v44  ;;  %v1615_v36 = vperm.slane %v1278_v20, %v9829_v44  ;;  %v1597_v63 = vperm.slane %v1591_v43, %v9870_v56  ;;  %v3606_v54 = vperm.slane %v3293_v3, %v9829_v44 }
 0x2d6   : > { %v6425_v5 = vsel %vm1434_vm1, %v6424_v39, %v6417_v16  ;;  %v1604_v9 = vrot.slane %v1601_v40, 4  ;;  %v3296_v57 = vpack.i.b16 %v10410_v11, %v3294_v2 }
 0x2d7   : > { %v6429_v41 = vperm.slane %v6425_v5, %v9870_v56  ;;  %v6443_v49 = vrot.slane %v6442_v27, 4  ;;  %v1616_v17 = vrot.slane %v1615_v36, 4  ;;  %v1619_v60 = vsel %vm1434_vm1, %v1615_v36, %v1618_v59 }
 0x2d8   : > { %v1602_v4 = vrot.slane %v1597_v63, 4  ;;  %v1605_v47 = vsel %vm1434_vm1, 0, %v1604_v9  ;;  %v1627_v13 = vperm.slane %v1619_v60, %v9870_v56  ;;  %v2370_v31 = vsel %vm1434_vm1, %v1604_v9, %v1597_v63  ;;  %5311 = vrot.lane.b32.xlu2 %v9875_v29, %s8881_s13 }
 0x2d9   : > { %v6430_v26 = vrot.slane %v6429_v41, 4  ;;  %v6444_v35 = vsel %vm1434_vm1, %v6443_v49, %v6436_v34  ;;  %v1617_v61 = vsel %vm1434_vm1, %v1616_v17, %v10214_v18  ;;  %v6981_v33 = vshrl.u32 %v6429_v41, 16 }
 0x2da   : > { %v6448_v12 = vperm.slane %v6444_v35, %v9870_v56  ;;  %v1603_v62 = vsel %vm1434_vm1, 0, %v1602_v4  ;;  %v1623_v59 = vperm.slane %v1617_v61, %v9870_v56  ;;  %v1630_v0 = vrot.slane %v1627_v13, 4  ;;  %v5224_v61 = vpop.permute.xlu1 %5223 }
 0x2db   : > { %v6431_v16 = vsel %vm1434_vm1, 0, %v6430_v26  ;;  %v2374_v46 = vperm.slane %v2370_v31, %v9829_v44  ;;  %v2375_v20 = vrot.slane %v1605_v47, 4  ;;  %v3607_v21 = vrot.slane %v3606_v54, 4 }
 0x2dc   : > { %v6449_v18 = vrot.slane %v6448_v12, 4  ;;  %v6979_v8 = vpack.i.b16 %v6448_v12, %v6429_v41  ;;  %v6982_v11 = vshrl.u32 %v6448_v12, 16  ;;  %v6989_v3 = vshrl.u32 %v6431_v16, 16  ;;  %v10501_v41 = vpop.permute.xlu2 %5287 }
 0x2dd   : > { %v1628_v39 = vrot.slane %v1623_v59, 4  ;;  %v1631_v34 = vsel %vm1434_vm1, 0, %v1630_v0  ;;  %v2376_v24 = vsel %vm1434_vm1, %v2375_v20, %v1603_v62  ;;  %v2389_v36 = vsel %vm1434_vm1, %v1630_v0, %v1623_v59 }
 0x2de   : > { %v6450_v40 = vsel %vm1434_vm1, 0, %v6449_v18  ;;  %v6983_v27 = vpack.i.b16 %v6982_v11, %v6981_v33  ;;  %7203 = vst.msk [vmem:[%s10097_s14 + $0x8] sm:$0xf] %vm3120_vm2, %v6979_v8  ;;  %v2380_v43 = vperm.slane %v2376_v24, %v9829_v44  ;;  %v2394_v9 = vrot.slane %v1631_v34, 4 }
 0x2df   : > { %v6987_v2 = vpack.i.b16 %v6450_v40, %v6431_v16  ;;  %v6990_v5 = vshrl.u32 %v6450_v40, 16  ;;  %v1629_v63 = vsel %vm1434_vm1, 0, %v1628_v39  ;;  %v3608_v17 = vsel %vm1434_vm1, %v3607_v21, %v10221_v37 }
 0x2e0   : > { %7219 = vst.msk [vmem:[%s10097_s14 + $0x48] sm:$0xf] %vm3120_vm2, %v6983_v27  ;;  %v2381_v49 = vrot.slane %v2380_v43, 4  ;;  %v12873_v60 = vrot.slane %v10221_v37, 4  ;;  %v3632_v47 = vperm.slane %v3296_v57, %v9829_v44  ;;  %v2395_v31 = vsel %vm1434_vm1, %v2394_v9, %v1629_v63 }
 0x2e1   : > { %v6991_v13 = vpack.i.b16 %v6990_v5, %v6989_v3  ;;  %7235 = vst.msk [vmem:[%s10097_s14 + $0x88] sm:$0xf] %vm3120_vm2, %v6987_v2  ;;  %v3614_v26 = vperm.slane %v3608_v17, %v9870_v56  ;;  %v2399_v62 = vperm.slane %v2395_v31, %v9829_v44  ;;  %v12874_v37 = vrot.slane %v10244_v58, 4 }
 0x2e2   : > { %v3610_v4 = vsel %vm1434_vm1, %v3606_v54, %v12873_v60  ;;  %v2382_v12 = vsel %vm1434_vm1, %v2381_v49, %v2374_v46  ;;  %v3633_v59 = vrot.slane %v3632_v47, 4  ;;  %v2393_v20 = vperm.slane %v2389_v36, %v9829_v44 }
 0x2e3   : > { %v3618_v35 = vperm.slane %v3610_v4, %v9870_v56  ;;  %v3636_v54 = vsel %vm1434_vm1, %v3632_v47, %v12874_v37  ;;  %7251 = vst.msk [vmem:[%s10097_s14 + $0xc8] sm:$0xf] %vm3120_vm2, %v6991_v13  ;;  %v2386_v57 = vperm.slane %v2382_v12, %v9870_v56  ;;  %v3619_v0 = vrot.slane %v3614_v26, 4 }
 0x2e4   : > { %v3644_v33 = vperm.slane %v3636_v54, %v9870_v56  ;;  %v2400_v18 = vrot.slane %v2399_v62, 4  ;;  %v3634_v46 = vsel %vm1434_vm1, %v3633_v59, %v10244_v58  ;;  %v5351_v8 = vpack.i.b16 %v5224_v61, %v9694_v55  ;;  %v10539_v13 = vpop.permute.xlu2 %1175 }
 0x2e5   : > { %v3621_v16 = vrot.slane %v3618_v35, 4  ;;  %v2387_v11 = vrot.slane %v2386_v57, 4  ;;  %v3620_v21 = vsel %vm1434_vm1, 0, %v3619_v0  ;;  %v5353_v39 = vshrl.u32 %v5224_v61, 16 }
 0x2e6   : > { %v2401_v34 = vsel %vm1434_vm1, %v2400_v18, %v2393_v20  ;;  %v3640_v24 = vperm.slane %v3634_v46, %v9870_v56  ;;  %v3647_v40 = vrot.slane %v3644_v33, 4  ;;  %v2916_v58 = vshrl.u32 %v2386_v57, 16 }
 0x2e7   : > { %v3622_v3 = vsel %vm1434_vm1, 0, %v3621_v16  ;;  %v4387_v27 = vsel %vm1434_vm1, %v3621_v16, %v3614_v26  ;;  %v2388_v43 = vsel %vm1434_vm1, 0, %v2387_v11  ;;  %v2405_v36 = vperm.slane %v2401_v34, %v9870_v56 }
 0x2e8   : > { %v4392_v2 = vrot.slane %v3622_v3, 4  ;;  %v2924_v5 = vshrl.u32 %v2388_v43, 16  ;;  %v3645_v63 = vrot.slane %v3640_v24, 4  ;;  %v3648_v9 = vsel %vm1434_vm1, 0, %v3647_v40 }
 0x2e9   : > { %v4391_v49 = vperm.slane %v4387_v27, %v9829_v44  ;;  %v2406_v17 = vrot.slane %v2405_v36, 4  ;;  %v2914_v60 = vpack.i.b16 %v2405_v36, %v2386_v57  ;;  %v2917_v4 = vshrl.u32 %v2405_v36, 16  ;;  %v5256_v57 = vpop.permute.xlu0 %5255 }
 0x2ea   : > { %v4393_v47 = vsel %vm1434_vm1, %v4392_v2, %v3620_v21  ;;  %v3646_v31 = vsel %vm1434_vm1, 0, %v3645_v63  ;;  %v4406_v35 = vsel %vm1434_vm1, %v3647_v40, %v3640_v24  ;;  %v4411_v61 = vrot.slane %v3648_v9, 4  ;;  %v10557_v21 = vpop.permute.xlu1 %1207 }
 0x2eb   : > { %v4397_v26 = vperm.slane %v4393_v47, %v9829_v44  ;;  %v2407_v12 = vsel %vm1434_vm1, 0, %v2406_v17  ;;  %v2918_v62 = vpack.i.b16 %v2917_v4, %v2916_v58  ;;  %3124 = vst.msk [vmem:[%s9964_s9 + $0xc] sm:$0xf] %vm3120_vm2, %v2914_v60  ;;  %v12875_v59 = vshrl.u32 %v9694_v55, 16 }
 0x2ec   : > { %v5665_v54 = vperm.slane %v5351_v8, %v9829_v44  ;;  %v2922_v0 = vpack.i.b16 %v2407_v12, %v2388_v43  ;;  %v2925_v16 = vshrl.u32 %v2407_v12, 16  ;;  %v4412_v20 = vsel %vm1434_vm1, %v4411_v61, %v3646_v31 }
 0x2ed   : > { %v5354_v37 = vpack.i.b16 %v5353_v39, %v12875_v59  ;;  %v4398_v33 = vrot.slane %v4397_v26, 4  ;;  %v5359_v18 = vshrl.u32 %v10501_v41, 16  ;;  %v1288_v46 = vshrl.u32 %v10539_v13, 16  ;;  %3140 = vst.msk [vmem:[%s9964_s9 + $0x4c] sm:$0xf] %vm3120_vm2, %v2918_v62 }
 0x2ee   : > { %v4416_v11 = vperm.slane %v4412_v20, %v9829_v44  ;;  %v2926_v8 = vpack.i.b16 %v2925_v16, %v2924_v5  ;;  %3156 = vst.msk [vmem:[%s9964_s9 + $0x8c] sm:$0xf] %vm3120_vm2, %v2922_v0  ;;  %v5673_v39 = vrot.slane %v5665_v54, 4  ;;  %v5357_v34 = vpack.i.b16 %v10501_v41, %v5256_v57 }
 0x2ef   : > { %v5691_v55 = vperm.slane %v5354_v37, %v9829_v44  ;;  %v4399_v3 = vsel %vm1434_vm1, %v4398_v33, %v4391_v49  ;;  %v4410_v40 = vperm.slane %v4406_v35, %v9829_v44  ;;  %v5358_v43 = vshrl.u32 %v5256_v57, 16 }
 0x2f0   : > { %v4403_v24 = vperm.slane %v4399_v3, %v9870_v56  ;;  %v4417_v27 = vrot.slane %v4416_v11, 4  ;;  %v3221_v36 = vrot.slane %v10539_v13, 4  ;;  %3172 = vst.msk [vmem:[%s9964_s9 + $0xcc] sm:$0xf] %vm3120_vm2, %v2926_v8  ;;  %v5670_v2 = vperm.slane %v5357_v34, %v9829_v44 }
 0x2f1   : > { %v5699_v58 = vrot.slane %v5691_v55, 4  ;;  %v1289_v5 = vshrl.u32 %v10557_v21, 16  ;;  %v5360_v49 = vpack.i.b16 %v5359_v18, %v5358_v43  ;;  %v1287_v41 = vpack.i.b16 %v10557_v21, %v10539_v13 }
 0x2f2   : > { %v4404_v63 = vrot.slane %v4403_v24, 4  ;;  %v4418_v9 = vsel %vm1434_vm1, %v4417_v27, %v4410_v40  ;;  %v4933_v60 = vshrl.u32 %v4403_v24, 16  ;;  %v5671_v4 = vrot.slane %v5670_v2, 4 }
 0x2f3   : > { %v4422_v17 = vperm.slane %v4418_v9, %v9870_v56  ;;  %v5674_v47 = vsel %vm1434_vm1, %v5670_v2, %v5673_v39  ;;  %v5696_v35 = vperm.slane %v5360_v49, %v9829_v44  ;;  %v1290_v61 = vpack.i.b16 %v1289_v5, %v1288_v46 }
 0x2f4   : > { %v4405_v31 = vsel %vm1434_vm1, 0, %v4404_v63  ;;  %v5682_v26 = vperm.slane %v5674_v47, %v9870_v56  ;;  %v5672_v57 = vsel %vm1434_vm1, %v5671_v4, %v5665_v54  ;;  %v1641_v2 = vperm.slane %v1287_v41, %v9829_v44 }
 0x2f5   : > { %v4423_v12 = vrot.slane %v4422_v17, 4  ;;  %v4931_v62 = vpack.i.b16 %v4422_v17, %v4403_v24  ;;  %v4934_v59 = vshrl.u32 %v4422_v17, 16  ;;  %v4941_v37 = vshrl.u32 %v4405_v31, 16 }
 0x2f6   : > { %v5685_v0 = vrot.slane %v5682_v26, 4  ;;  %v5697_v16 = vrot.slane %v5696_v35, 4  ;;  %v5700_v33 = vsel %vm1434_vm1, %v5696_v35, %v5699_v58  ;;  %v5678_v11 = vperm.slane %v5672_v57, %v9870_v56  ;;  %v10609_v26 = vpop.permute.xlu2 %1223 }
 0x2f7   : > { %v4424_v20 = vsel %vm1434_vm1, 0, %v4423_v12  ;;  %v4935_v18 = vpack.i.b16 %v4934_v59, %v4933_v60  ;;  %5140 = vst.msk [vmem:[%s10006_s24 + $0xc] sm:$0xf] %vm3120_vm2, %v4931_v62  ;;  %v5708_v46 = vperm.slane %v5700_v33, %v9870_v56  ;;  %v12876_v5 = vrot.slane %v9704_v38, 4  ;;  %v10602_v60 = vpop.permute.xlu0 %1143 }
 0x2f8   : > { %v4939_v8 = vpack.i.b16 %v4424_v20, %v4405_v31  ;;  %v4942_v3 = vshrl.u32 %v4424_v20, 16  ;;  %v5686_v39 = vsel %vm1434_vm1, 0, %v5685_v0  ;;  %v5698_v54 = vsel %vm1434_vm1, %v5697_v16, %v5691_v55 }
 0x2f9   : > { %5156 = vst.msk [vmem:[%s10006_s24 + $0x4c] sm:$0xf] %vm3120_vm2, %v4935_v18  ;;  %v5683_v34 = vrot.slane %v5678_v11, 4  ;;  %v5704_v24 = vperm.slane %v5698_v54, %v9870_v56  ;;  %v5711_v40 = vrot.slane %v5708_v46, 4  ;;  %v6451_v27 = vsel %vm1434_vm1, %v5685_v0, %v5678_v11 }
 0x2fa   : > { %v4943_v43 = vpack.i.b16 %v4942_v3, %v4941_v37  ;;  %5172 = vst.msk [vmem:[%s10006_s24 + $0x8c] sm:$0xf] %vm3120_vm2, %v4939_v8  ;;  %v6456_v58 = vrot.slane %v5686_v39, 4  ;;  %v10596_v63 = vshrl.u32 %v12876_v5, 16  ;;  %v3306_v55 = vshrl.u32 %v3221_v36, 16 }
 0x2fb   : > { %v5684_v9 = vsel %vm1434_vm1, 0, %v5683_v34  ;;  %v5709_v49 = vrot.slane %v5704_v24, 4  ;;  %v5712_v17 = vsel %vm1434_vm1, 0, %v5711_v40  ;;  %v6455_v4 = vperm.slane %v6451_v27, %v9829_v44 }
 0x2fc   : > { %5188 = vst.msk [vmem:[%s10006_s24 + $0xcc] sm:$0xf] %vm3120_vm2, %v4943_v43  ;;  %v6457_v41 = vsel %vm1434_vm1, %v6456_v58, %v5684_v9  ;;  %v6470_v47 = vsel %vm1434_vm1, %v5711_v40, %v5704_v24  ;;  %v6475_v31 = vrot.slane %v5712_v17, 4  ;;  %v1667_v62 = vperm.slane %v1290_v61, %v9829_v44 }
 0x2fd   : > { %v5710_v35 = vsel %vm1434_vm1, 0, %v5709_v49  ;;  %v6461_v12 = vperm.slane %v6457_v41, %v9829_v44  ;;  %v3237_v59 = vrot.slane %v10557_v21, 4  ;;  %v1642_v57 = vrot.slane %v1641_v2, 4 }
 0x2fe   : > { %v6476_v37 = vsel %vm1434_vm1, %v6475_v31, %v5710_v35  ;;  %v1281_v0 = vpack.i.b16 %v10602_v60, %v9704_v38  ;;  %v1283_v16 = vshrl.u32 %v10602_v60, 16  ;;  %v1385_v46 = vshrl.u32 %v10609_v26, 16 }
 0x2ff   : > { %v6462_v33 = vrot.slane %v6461_v12, 4  ;;  %v6480_v20 = vperm.slane %v6476_v37, %v9829_v44  ;;  %v3305_v18 = vpack.i.b16 %v3237_v59, %v3221_v36  ;;  %v3307_v11 = vshrl.u32 %v3237_v59, 16 }
 0x300   : > { %v6474_v61 = vperm.slane %v6470_v47, %v9829_v44  ;;  %v12877_v21 = vshrl.u32 %v9704_v38, 16  ;;  %v1636_v3 = vperm.slane %v1281_v0, %v9829_v44  ;;  %v1668_v34 = vrot.slane %v1667_v62, 4 }
 0x301   : > { %v6463_v39 = vsel %vm1434_vm1, %v6462_v33, %v6455_v4  ;;  %v6481_v54 = vrot.slane %v6480_v20, 4  ;;  %v3658_v24 = vperm.slane %v3305_v18, %v9829_v44  ;;  %v3308_v58 = vpack.i.b16 %v3307_v11, %v3306_v55 }
 0x302   : > { %v1284_v8 = vpack.i.b16 %v1283_v16, %v12877_v21  ;;  %v6467_v40 = vperm.slane %v6463_v39, %v9870_v56  ;;  %v1643_v13 = vsel %vm1434_vm1, %v1642_v57, %v1636_v3  ;;  %v1644_v36 = vrot.slane %v1636_v3, 4 }
 0x303   : > { %v6482_v43 = vsel %vm1434_vm1, %v6481_v54, %v6474_v61  ;;  %v1649_v5 = vperm.slane %v1643_v13, %v9870_v56  ;;  %v3205_v9 = vrot.slane %v10602_v60, 4  ;;  %v3659_v4 = vrot.slane %v3658_v24, 4  ;;  %v10651_v54 = vpop.permute.xlu1 %1159 }
 0x304   : > { %v1662_v27 = vperm.slane %v1284_v8, %v9829_v44  ;;  %v6468_v49 = vrot.slane %v6467_v40, 4  ;;  %v6486_v17 = vperm.slane %v6482_v43, %v9870_v56  ;;  %v1645_v41 = vsel %vm1434_vm1, %v1641_v2, %v1644_v36 }
 0x305   : > { %v6997_v47 = vshrl.u32 %v6467_v40, 16  ;;  %v1653_v31 = vperm.slane %v1645_v41, %v9870_v56  ;;  %v1654_v35 = vrot.slane %v1649_v5, 4  ;;  %v10641_v0 = vperm.slane %v3308_v58, %v9829_v44 }
 0x306   : > { %v1669_v12 = vsel %vm1434_vm1, %v1668_v34, %v1662_v27  ;;  %v6469_v59 = vsel %vm1434_vm1, 0, %v6468_v49  ;;  %v6487_v55 = vrot.slane %v6486_v17, 4  ;;  %v6995_v37 = vpack.i.b16 %v6486_v17, %v6467_v40 }
 0x307   : > { %v6998_v57 = vshrl.u32 %v6486_v17, 16  ;;  %v7005_v60 = vshrl.u32 %v6469_v59, 16  ;;  %v1656_v16 = vrot.slane %v1653_v31, 4  ;;  %v1670_v33 = vrot.slane %v1662_v27, 4 }
 0x308   : > { %v6488_v2 = vsel %vm1434_vm1, 0, %v6487_v55  ;;  %7204 = vst.msk [vmem:[%s10097_s14 + $0xc] sm:$0xf] %vm3120_vm2, %v6995_v37  ;;  %v1675_v18 = vperm.slane %v1669_v12, %v9870_v56  ;;  %v12878_v11 = vrot.slane %v9704_v38, 4  ;;  %v1655_v34 = vsel %vm1434_vm1, 0, %v1654_v35 }
 0x309   : > { %v6999_v20 = vpack.i.b16 %v6998_v57, %v6997_v47  ;;  %v7003_v21 = vpack.i.b16 %v6488_v2, %v6469_v59  ;;  %v7006_v8 = vshrl.u32 %v6488_v2, 16  ;;  %v1657_v3 = vsel %vm1434_vm1, 0, %v1656_v16 }
 0x30a   : > { %v3299_v61 = vpack.i.b16 %v3205_v9, %v12878_v11  ;;  %v1671_v39 = vsel %vm1434_vm1, %v1667_v62, %v1670_v33  ;;  %v1680_v13 = vrot.slane %v1675_v18, 4  ;;  %v2413_v36 = vrot.slane %v1657_v3, 4 }
 0x30b   : > { %7220 = vst.msk [vmem:[%s10097_s14 + $0x4c] sm:$0xf] %vm3120_vm2, %v6999_v20  ;;  %v1679_v40 = vperm.slane %v1671_v39, %v9870_v56  ;;  %v7007_v27 = vpack.i.b16 %v7006_v8, %v7005_v60  ;;  %v2408_v38 = vsel %vm1434_vm1, %v1656_v16, %v1649_v5  ;;  %v3301_v43 = vshrl.u32 %v3205_v9, 16 }
 0x30c   : > { %7236 = vst.msk [vmem:[%s10097_s14 + $0x8c] sm:$0xf] %vm3120_vm2, %v7003_v21  ;;  %v3653_v58 = vperm.slane %v3299_v61, %v9829_v44  ;;  %v3685_v62 = vrot.slane %v10641_v0, 4  ;;  %v2414_v17 = vsel %vm1434_vm1, %v2413_v36, %v1655_v34  ;;  %v1377_v41 = vpack.i.b16 %v10651_v54, %v9715_v14 }
 0x30d   : > { %v1682_v49 = vrot.slane %v1679_v40, 4  ;;  %7252 = vst.msk [vmem:[%s10097_s14 + $0xcc] sm:$0xf] %vm3120_vm2, %v7007_v27  ;;  %v2418_v47 = vperm.slane %v2414_v17, %v9829_v44  ;;  %v3302_v31 = vpack.i.b16 %v3301_v43, %v10596_v63  ;;  %v2412_v12 = vperm.slane %v2408_v38, %v9829_v44 }
 0x30e   : > { %v3660_v35 = vsel %vm1434_vm1, %v3659_v4, %v3653_v58  ;;  %v3661_v5 = vrot.slane %v3653_v58, 4  ;;  %v1379_v55 = vshrl.u32 %v10651_v54, 16  ;;  %v1681_v37 = vsel %vm1434_vm1, 0, %v1680_v13 }
 0x30f   : > { %v1683_v9 = vsel %vm1434_vm1, 0, %v1682_v49  ;;  %v3666_v59 = vperm.slane %v3660_v35, %v9870_v56  ;;  %v2419_v57 = vrot.slane %v2418_v47, 4  ;;  %v2427_v33 = vsel %vm1434_vm1, %v1682_v49, %v1675_v18  ;;  %v10685_v18 = vpop.permute.xlu2 %5257 }
 0x310   : > { %v2432_v60 = vrot.slane %v1683_v9, 4  ;;  %v3662_v16 = vsel %vm1434_vm1, %v3658_v24, %v3661_v5  ;;  %v3679_v4 = vperm.slane %v3302_v31, %v9829_v44  ;;  %v1378_v2 = vshrl.u32 %v9715_v14, 16 }
 0x311   : > { %v3670_v63 = vperm.slane %v3662_v16, %v9870_v56  ;;  %v3245_v20 = vrot.slane %v10609_v26, 4  ;;  %v2420_v11 = vsel %vm1434_vm1, %v2419_v57, %v2412_v12  ;;  %v3671_v21 = vrot.slane %v3666_v59, 4 }
 0x312   : > { %v2433_v61 = vsel %vm1434_vm1, %v2432_v60, %v1681_v37  ;;  %v2424_v8 = vperm.slane %v2420_v11, %v9870_v56  ;;  %v1380_v39 = vpack.i.b16 %v1379_v55, %v1378_v2  ;;  %v2431_v34 = vperm.slane %v2427_v33, %v9829_v44 }
 0x313   : > { %v2437_v3 = vperm.slane %v2433_v61, %v9829_v44  ;;  %v3673_v24 = vrot.slane %v3670_v63, 4  ;;  %v3686_v40 = vsel %vm1434_vm1, %v3685_v62, %v3679_v4  ;;  %v3687_v13 = vrot.slane %v3679_v4, 4 }
 0x314   : > { %v10690_v36 = vperm.slane %v1377_v41, %v9829_v44  ;;  %v2425_v27 = vrot.slane %v2424_v8, 4  ;;  %v3197_v58 = vrot.slane %v9715_v14, 4  ;;  %v3672_v49 = vsel %vm1434_vm1, 0, %v3671_v21 }
 0x315   : > { %v2438_v38 = vrot.slane %v2437_v3, 4  ;;  %v3674_v43 = vsel %vm1434_vm1, 0, %v3673_v24  ;;  %v3688_v17 = vsel %vm1434_vm1, %v10641_v0, %v3687_v13  ;;  %v3692_v47 = vperm.slane %v3686_v40, %v9870_v56 }
 0x316   : > { %v4430_v31 = vrot.slane %v3674_v43, 4  ;;  %v3696_v35 = vperm.slane %v3688_v17, %v9870_v56  ;;  %v4425_v41 = vsel %vm1434_vm1, %v3673_v24, %v3666_v59  ;;  %v10702_v5 = vperm.slane %v1380_v39, %v9829_v44 }
 0x317   : > { %v2439_v62 = vsel %vm1434_vm1, %v2438_v38, %v2431_v34  ;;  %v2426_v9 = vsel %vm1434_vm1, 0, %v2425_v27  ;;  %v3697_v12 = vrot.slane %v3692_v47, 4  ;;  %v2932_v55 = vshrl.u32 %v2424_v8, 16 }
 0x318   : > { %v2443_v14 = vperm.slane %v2439_v62, %v9870_v56  ;;  %v4431_v0 = vsel %vm1434_vm1, %v4430_v31, %v3672_v49  ;;  %v3699_v37 = vrot.slane %v3696_v35, 4  ;;  %v3213_v60 = vrot.slane %v10651_v54, 4  ;;  %v1146_v49 = vpop.permute.xlu2 %1145  ;;  %v1192_v35 = vpop.permute.xlu0 %1191 }
 0x319   : > { %v4435_v57 = vperm.slane %v4431_v0, %v9829_v44  ;;  %v4429_v63 = vperm.slane %v4425_v41, %v9829_v44  ;;  %v2940_v4 = vshrl.u32 %v2426_v9, 16  ;;  %v3698_v2 = vsel %vm1434_vm1, 0, %v3697_v12 }
 0x31a   : > { %v2444_v16 = vrot.slane %v2443_v14, 4  ;;  %v2930_v33 = vpack.i.b16 %v2443_v14, %v2424_v8  ;;  %v2933_v59 = vshrl.u32 %v2443_v14, 16  ;;  %v3700_v11 = vsel %vm1434_vm1, 0, %v3699_v37 }
 0x31b   : > { %v4436_v61 = vrot.slane %v4435_v57, 4  ;;  %v4449_v24 = vrot.slane %v3700_v11, 4  ;;  %v3395_v54 = vpack.i.b16 %v3213_v60, %v3197_v58  ;;  %v4444_v40 = vsel %vm1434_vm1, %v3699_v37, %v3692_v47 }
 0x31c   : > { %v2445_v21 = vsel %vm1434_vm1, 0, %v2444_v16  ;;  %v2934_v3 = vpack.i.b16 %v2933_v59, %v2932_v55  ;;  %3125 = vst.msk [vmem:[%s9964_s9 + $0x10] sm:$0xf] %vm3120_vm2, %v2930_v33  ;;  %v3396_v38 = vshrl.u32 %v3197_v58, 16  ;;  %v3397_v43 = vshrl.u32 %v3213_v60, 16 }
 0x31d   : > { %v2938_v39 = vpack.i.b16 %v2445_v21, %v2426_v9  ;;  %v2941_v8 = vshrl.u32 %v2445_v21, 16  ;;  %v4437_v34 = vsel %vm1434_vm1, %v4436_v61, %v4429_v63  ;;  %v4450_v27 = vsel %vm1434_vm1, %v4449_v24, %v3698_v2 }
 0x31e   : > { %3141 = vst.msk [vmem:[%s9964_s9 + $0x50] sm:$0xf] %vm3120_vm2, %v2934_v3  ;;  %v4441_v13 = vperm.slane %v4437_v34, %v9870_v56  ;;  %v10723_v17 = vshrl.u32 %v3245_v20, 16  ;;  %v5370_v31 = vshrl.u32 %v10685_v18, 16  ;;  %v4454_v47 = vperm.slane %v4450_v27, %v9829_v44 }
 0x31f   : > { %v2942_v62 = vpack.i.b16 %v2941_v8, %v2940_v4  ;;  %3157 = vst.msk [vmem:[%s9964_s9 + $0x90] sm:$0xf] %vm3120_vm2, %v2938_v39  ;;  %v3398_v9 = vpack.i.b16 %v3397_v43, %v3396_v38  ;;  %v10730_v14 = vperm.slane %v3395_v54, %v9829_v44  ;;  %v3190_v58 = vrot.slane %v9734_v6, 4 }
 0x320   : > { %v4442_v41 = vrot.slane %v4441_v13, 4  ;;  %v4448_v12 = vperm.slane %v4444_v40, %v9829_v44  ;;  %v4455_v0 = vrot.slane %v4454_v47, 4  ;;  %v2060_v55 = vrot.slane %v10690_v36, 4 }
 0x321   : > { %3173 = vst.msk [vmem:[%s9964_s9 + $0xd0] sm:$0xf] %vm3120_vm2, %v2942_v62  ;;  %v1295_v37 = vshrl.u32 %v1146_v49, 16  ;;  %v2086_v60 = vrot.slane %v10702_v5, 4  ;;  %v1293_v16 = vpack.i.b16 %v1146_v49, %v9734_v6  ;;  %v1383_v33 = vpack.i.b16 %v10609_v26, %v1192_v35 }
 0x322   : > { %v4443_v57 = vsel %vm1434_vm1, 0, %v4442_v41  ;;  %v4456_v59 = vsel %vm1434_vm1, %v4455_v0, %v4448_v12  ;;  %v4949_v63 = vshrl.u32 %v4441_v13, 16  ;;  %v1294_v4 = vshrl.u32 %v9734_v6, 16 }
 0x323   : > { %v3206_v2 = vrot.slane %v1146_v49, 4  ;;  %v4460_v11 = vperm.slane %v4456_v59, %v9870_v56  ;;  %v4077_v61 = vrot.slane %v10730_v14, 4  ;;  %v10746_v21 = vperm.slane %v3398_v9, %v9829_v44 }
 0x324   : > { %v3312_v3 = vshrl.u32 %v3190_v58, 16  ;;  %v4957_v24 = vshrl.u32 %v4443_v57, 16  ;;  %v1296_v54 = vpack.i.b16 %v1295_v37, %v1294_v4  ;;  %v1384_v39 = vshrl.u32 %v1192_v35, 16 }
 0x325   : > { %v2057_v8 = vperm.slane %v1383_v33, %v9829_v44  ;;  %v4461_v34 = vrot.slane %v4460_v11, 4  ;;  %v4947_v40 = vpack.i.b16 %v4460_v11, %v4441_v13  ;;  %v4950_v27 = vshrl.u32 %v4460_v11, 16 }
 0x326   : > { %v10750_v6 = vperm.slane %v1293_v16, %v9829_v44  ;;  %v3311_v38 = vpack.i.b16 %v3206_v2, %v3190_v58  ;;  %v3313_v43 = vshrl.u32 %v3206_v2, 16  ;;  %v1386_v49 = vpack.i.b16 %v1385_v46, %v1384_v39 }
 0x327   : > { %v2058_v62 = vrot.slane %v2057_v8, 4  ;;  %v4462_v47 = vsel %vm1434_vm1, 0, %v4461_v34  ;;  %v4951_v41 = vpack.i.b16 %v4950_v27, %v4949_v63  ;;  %5141 = vst.msk [vmem:[%s10006_s24 + $0x10] sm:$0xf] %vm3120_vm2, %v4947_v40  ;;  %v4103_v9 = vrot.slane %v10746_v21, 4 }
 0x328   : > { %v2061_v13 = vsel %vm1434_vm1, %v2057_v8, %v2060_v55  ;;  %v4955_v12 = vpack.i.b16 %v4462_v47, %v4443_v57  ;;  %v4958_v0 = vshrl.u32 %v4462_v47, 16  ;;  %v10760_v37 = vperm.slane %v1296_v54, %v9829_v44 }
 0x329   : > { %v2059_v46 = vsel %vm1434_vm1, %v2058_v62, %v10690_v36  ;;  %5157 = vst.msk [vmem:[%s10006_s24 + $0x50] sm:$0xf] %vm3120_vm2, %v4951_v41  ;;  %v1696_v58 = vrot.slane %v10750_v6, 4  ;;  %v2069_v33 = vperm.slane %v2061_v13, %v9870_v56  ;;  %v2083_v59 = vperm.slane %v1386_v49, %v9829_v44 }
 0x32a   : > { %v2065_v16 = vperm.slane %v2059_v46, %v9870_v56  ;;  %v4959_v55 = vpack.i.b16 %v4958_v0, %v4957_v24  ;;  %5173 = vst.msk [vmem:[%s10006_s24 + $0x90] sm:$0xf] %vm3120_vm2, %v4955_v12  ;;  %v3314_v57 = vpack.i.b16 %v3313_v43, %v3312_v3  ;;  %v10773_v63 = vperm.slane %v3311_v38, %v9829_v44 }
 0x32b   : > { %v3229_v4 = vrot.slane %v1192_v35, 4  ;;  %v2072_v36 = vrot.slane %v2069_v33, 4  ;;  %v2084_v11 = vrot.slane %v2083_v59, 4  ;;  %v2087_v54 = vsel %vm1434_vm1, %v2083_v59, %v2086_v60  ;;  %v5290_v60 = vpop.permute.xlu1 %5289 }
 0x32c   : > { %v2070_v2 = vrot.slane %v2065_v16, 4  ;;  %5189 = vst.msk [vmem:[%s10006_s24 + $0xd0] sm:$0xf] %vm3120_vm2, %v4959_v55  ;;  %v1722_v39 = vrot.slane %v10760_v37, 4  ;;  %v2095_v8 = vperm.slane %v2087_v54, %v9870_v56  ;;  %v10788_v38 = vperm.slane %v3314_v57, %v9829_v44 }
 0x32d   : > { %v3401_v24 = vpack.i.b16 %v3245_v20, %v3229_v4  ;;  %v3402_v34 = vshrl.u32 %v3229_v4, 16  ;;  %v2073_v40 = vsel %vm1434_vm1, 0, %v2072_v36  ;;  %v2085_v35 = vsel %vm1434_vm1, %v2084_v11, %v10702_v5 }
 0x32e   : > { %v2071_v3 = vsel %vm1434_vm1, 0, %v2070_v2  ;;  %v2712_v27 = vsel %vm1434_vm1, %v2072_v36, %v2065_v16  ;;  %v2091_v43 = vperm.slane %v2085_v35, %v9870_v56  ;;  %v2098_v49 = vrot.slane %v2095_v8, 4 }
 0x32f   : > { %v2717_v62 = vrot.slane %v2073_v40, 4  ;;  %v3713_v26 = vrot.slane %v10773_v63, 4  ;;  %v2716_v20 = vperm.slane %v2712_v27, %v9829_v44  ;;  %v3404_v47 = vpack.i.b16 %v10723_v17, %v3402_v34 }
 0x330   : > { %v4074_v41 = vperm.slane %v3401_v24, %v9829_v44  ;;  %v2096_v13 = vrot.slane %v2091_v43, 4  ;;  %v2099_v5 = vsel %vm1434_vm1, 0, %v2098_v49  ;;  %v5369_v0 = vpack.i.b16 %v5290_v60, %v10685_v18 }
 0x331   : > { %v2718_v12 = vsel %vm1434_vm1, %v2717_v62, %v2071_v3  ;;  %v2736_v16 = vrot.slane %v2099_v5, 4  ;;  %v5371_v59 = vshrl.u32 %v5290_v60, 16  ;;  %v2731_v57 = vsel %vm1434_vm1, %v2098_v49, %v2091_v43 }
 0x332   : > { %v2722_v46 = vperm.slane %v2718_v12, %v9829_v44  ;;  %v4075_v33 = vrot.slane %v4074_v41, 4  ;;  %v2097_v55 = vsel %vm1434_vm1, 0, %v2096_v13  ;;  %v4078_v17 = vsel %vm1434_vm1, %v4074_v41, %v4077_v61 }
 0x333   : > { %v4100_v4 = vperm.slane %v3404_v47, %v9829_v44  ;;  %v2737_v36 = vsel %vm1434_vm1, %v2736_v16, %v2097_v55  ;;  %v4086_v54 = vperm.slane %v4078_v17, %v9870_v56  ;;  %v2735_v61 = vperm.slane %v2731_v57, %v9829_v44 }
 0x334   : > { %v2723_v2 = vrot.slane %v2722_v46, 4  ;;  %v4076_v11 = vsel %vm1434_vm1, %v4075_v33, %v10730_v14  ;;  %v2741_v8 = vperm.slane %v2737_v36, %v9829_v44  ;;  %v5372_v5 = vpack.i.b16 %v5371_v59, %v5370_v31 }
 0x335   : > { %v4082_v24 = vperm.slane %v4076_v11, %v9870_v56  ;;  %v4101_v34 = vrot.slane %v4100_v4, 4  ;;  %v4104_v3 = vsel %vm1434_vm1, %v4100_v4, %v4103_v9  ;;  %v4089_v35 = vrot.slane %v4086_v54, 4 }
 0x336   : > { %v2724_v40 = vsel %vm1434_vm1, %v2723_v2, %v2716_v20  ;;  %v4112_v27 = vperm.slane %v4104_v3, %v9870_v56  ;;  %v2742_v43 = vrot.slane %v2741_v8, 4  ;;  %v5364_v9 = vshrl.u32 %v9724_v48, 16  ;;  %v5226_v8 = vpop.permute.xlu0 %5225 }
 0x337   : > { %v2728_v60 = vperm.slane %v2724_v40, %v9870_v56  ;;  %v4087_v14 = vrot.slane %v4082_v24, 4  ;;  %v4102_v49 = vsel %vm1434_vm1, %v4101_v34, %v10746_v21  ;;  %v4090_v62 = vsel %vm1434_vm1, 0, %v4089_v35 }
 0x338   : > { %v4108_v47 = vperm.slane %v4102_v49, %v9870_v56  ;;  %v4115_v41 = vrot.slane %v4112_v27, 4  ;;  %v2743_v13 = vsel %vm1434_vm1, %v2742_v43, %v2735_v61  ;;  %v5722_v12 = vperm.slane %v5369_v0, %v9829_v44  ;;  %v10838_v61 = vpop.permute.xlu2 %1193 }
 0x339   : > { %v2729_v20 = vrot.slane %v2728_v60, 4  ;;  %v2747_v46 = vperm.slane %v2743_v13, %v9870_v56  ;;  %v4088_v16 = vsel %vm1434_vm1, 0, %v4087_v14  ;;  %v4729_v57 = vsel %vm1434_vm1, %v4089_v35, %v4082_v24 }
 0x33a   : > { %v4113_v21 = vrot.slane %v4108_v47, 4  ;;  %v4116_v33 = vsel %vm1434_vm1, 0, %v4115_v41  ;;  %v4734_v17 = vrot.slane %v4090_v62, 4  ;;  %v3060_v18 = vshrl.u32 %v2728_v60, 16 }
 0x33b   : > { %v2730_v55 = vsel %vm1434_vm1, 0, %v2729_v20  ;;  %v4753_v4 = vrot.slane %v4116_v33, 4  ;;  %v2748_v2 = vrot.slane %v2747_v46, 4  ;;  %v3058_v36 = vpack.i.b16 %v2747_v46, %v2728_v60 }
 0x33c   : > { %v3061_v31 = vshrl.u32 %v2747_v46, 16  ;;  %v3068_v0 = vshrl.u32 %v2730_v55, 16  ;;  %v4114_v59 = vsel %vm1434_vm1, 0, %v4113_v21  ;;  %v4735_v11 = vsel %vm1434_vm1, %v4734_v17, %v4088_v16 }
 0x33d   : > { %v4748_v54 = vsel %vm1434_vm1, %v4115_v41, %v4108_v47  ;;  %v2749_v34 = vsel %vm1434_vm1, 0, %v2748_v2  ;;  %3133 = vst.msk [vmem:[%s9964_s9 + $0x30] sm:$0xf] %vm3120_vm2, %v3058_v36  ;;  %v4739_v24 = vperm.slane %v4735_v11, %v9829_v44  ;;  %v4754_v40 = vsel %vm1434_vm1, %v4753_v4, %v4114_v59 }
 0x33e   : > { %v3062_v3 = vpack.i.b16 %v3061_v31, %v3060_v18  ;;  %v3066_v35 = vpack.i.b16 %v2749_v34, %v2730_v55  ;;  %v3069_v27 = vshrl.u32 %v2749_v34, 16  ;;  %v4758_v60 = vperm.slane %v4754_v40, %v9829_v44 }
 0x33f   : > { %v5748_v43 = vperm.slane %v5372_v5, %v9829_v44  ;;  %v4733_v14 = vperm.slane %v4729_v57, %v9829_v44  ;;  %v4740_v49 = vrot.slane %v4739_v24, 4  ;;  %v5723_v62 = vrot.slane %v5722_v12, 4 }
 0x340   : > { %3149 = vst.msk [vmem:[%s9964_s9 + $0x70] sm:$0xf] %vm3120_vm2, %v3062_v3  ;;  %v5363_v47 = vpack.i.b16 %v5226_v8, %v9724_v48  ;;  %v3070_v41 = vpack.i.b16 %v3069_v27, %v3068_v0  ;;  %v4752_v20 = vperm.slane %v4748_v54, %v9829_v44  ;;  %v4759_v13 = vrot.slane %v4758_v60, 4  ;;  %v10867_v27 = vpop.permute.xlu1 %1177 }
 0x341   : > { %3165 = vst.msk [vmem:[%s9964_s9 + $0xb0] sm:$0xf] %vm3120_vm2, %v3066_v35  ;;  %v5365_v46 = vshrl.u32 %v5226_v8, 16  ;;  %v3739_v16 = vrot.slane %v10788_v38, 4  ;;  %v4741_v21 = vsel %vm1434_vm1, %v4740_v49, %v4733_v14  ;;  %v5376_v33 = vshrl.u32 %v9779_v10, 16 }
 0x342   : > { %v5717_v5 = vperm.slane %v5363_v47, %v9829_v44  ;;  %3181 = vst.msk [vmem:[%s9964_s9 + $0xf0] sm:$0xf] %vm3120_vm2, %v3070_v41  ;;  %v4745_v55 = vperm.slane %v4741_v21, %v9870_v56  ;;  %v4760_v48 = vsel %vm1434_vm1, %v4759_v13, %v4752_v20  ;;  %v5749_v57 = vrot.slane %v5748_v43, 4 }
 0x343   : > { %v5366_v17 = vpack.i.b16 %v5365_v46, %v5364_v9  ;;  %v4764_v4 = vperm.slane %v4760_v48, %v9870_v56  ;;  %v1390_v18 = vshrl.u32 %v9745_v28, 16  ;;  %v1396_v24 = vshrl.u32 %v10838_v61, 16  ;;  %v1210_v48 = vpop.permute.xlu0 %1209 }
 0x344   : > { %v5724_v2 = vsel %vm1434_vm1, %v5723_v62, %v5717_v5  ;;  %v5725_v36 = vrot.slane %v5717_v5, 4  ;;  %v4746_v31 = vrot.slane %v4745_v55, 4  ;;  %v5077_v0 = vshrl.u32 %v4745_v55, 16 }
 0x345   : > { %v5730_v59 = vperm.slane %v5724_v2, %v9870_v56  ;;  %v5743_v11 = vperm.slane %v5366_v17, %v9829_v44  ;;  %v4765_v54 = vrot.slane %v4764_v4, 4  ;;  %v5075_v8 = vpack.i.b16 %v4764_v4, %v4745_v55 }
 0x346   : > { %v5078_v34 = vshrl.u32 %v4764_v4, 16  ;;  %v5726_v3 = vsel %vm1434_vm1, %v5722_v12, %v5725_v36  ;;  %v4747_v9 = vsel %vm1434_vm1, 0, %v4746_v31  ;;  %v5228_v12 = vpop.permute.xlu2 %5227  ;;  %v3230_v46 = vrot.slane %v10838_v61, 4 }
 0x347   : > { %v5734_v40 = vperm.slane %v5726_v3, %v9870_v56  ;;  %v5750_v35 = vsel %vm1434_vm1, %v5749_v57, %v5743_v11  ;;  %v4766_v60 = vsel %vm1434_vm1, 0, %v4765_v54  ;;  %5149 = vst.msk [vmem:[%s10006_s24 + $0x30] sm:$0xf] %vm3120_vm2, %v5075_v8  ;;  %v5735_v49 = vrot.slane %v5730_v59, 4 }
 0x348   : > { %v5079_v14 = vpack.i.b16 %v5078_v34, %v5077_v0  ;;  %v5751_v62 = vrot.slane %v5743_v11, 4  ;;  %v5083_v47 = vpack.i.b16 %v4766_v60, %v4747_v9  ;;  %v5085_v41 = vshrl.u32 %v4747_v9, 16 }
 0x349   : > { %v5086_v20 = vshrl.u32 %v4766_v60, 16  ;;  %v5737_v13 = vrot.slane %v5734_v40, 4  ;;  %v5756_v5 = vperm.slane %v5750_v35, %v9870_v56  ;;  %v3222_v55 = vrot.slane %v10867_v27, 4 }
 0x34a   : > { %5165 = vst.msk [vmem:[%s10006_s24 + $0x70] sm:$0xf] %vm3120_vm2, %v5079_v14  ;;  %v5752_v21 = vsel %vm1434_vm1, %v5748_v43, %v5751_v62  ;;  %v5375_v2 = vpack.i.b16 %v5228_v12, %v9779_v10  ;;  %v5736_v36 = vsel %vm1434_vm1, 0, %v5735_v49  ;;  %v5377_v43 = vshrl.u32 %v5228_v12, 16 }
 0x34b   : > { %v5087_v57 = vpack.i.b16 %v5086_v20, %v5085_v41  ;;  %5181 = vst.msk [vmem:[%s10006_s24 + $0xb0] sm:$0xf] %vm3120_vm2, %v5083_v47  ;;  %v5738_v17 = vsel %vm1434_vm1, 0, %v5737_v13  ;;  %v5760_v4 = vperm.slane %v5752_v21, %v9870_v56  ;;  %v6489_v31 = vsel %vm1434_vm1, %v5737_v13, %v5730_v59 }
 0x34c   : > { %v6494_v0 = vrot.slane %v5738_v17, 4  ;;  %v5761_v11 = vrot.slane %v5756_v5, 4  ;;  %v1299_v8 = vpack.i.b16 %v1210_v48, %v10867_v27  ;;  %v1301_v34 = vshrl.u32 %v1210_v48, 16 }
 0x34d   : > { %5197 = vst.msk [vmem:[%s10006_s24 + $0xf0] sm:$0xf] %vm3120_vm2, %v5087_v57  ;;  %v5763_v54 = vrot.slane %v5760_v4, 4  ;;  %v10890_v3 = vshrl.u32 %v3230_v46, 16  ;;  %v1300_v40 = vshrl.u32 %v10867_v27, 16  ;;  %v3238_v35 = vrot.slane %v1210_v48, 4 }
 0x34e   : > { %v6495_v9 = vsel %vm1434_vm1, %v6494_v0, %v5736_v36  ;;  %v10897_v49 = vshrl.u32 %v3222_v55, 16  ;;  %v6493_v62 = vperm.slane %v6489_v31, %v9829_v44  ;;  %v10902_v47 = vpack.i.b16 %v5377_v43, %v5376_v33 }
 0x34f   : > { %v5764_v59 = vsel %vm1434_vm1, 0, %v5763_v54  ;;  %v6499_v60 = vperm.slane %v6495_v9, %v9829_v44  ;;  %v6508_v14 = vsel %vm1434_vm1, %v5763_v54, %v5756_v5  ;;  %v1302_v41 = vpack.i.b16 %v1301_v34, %v1300_v40 }
 0x350   : > { %v6513_v12 = vrot.slane %v5764_v59, 4  ;;  %v5762_v20 = vsel %vm1434_vm1, 0, %v5761_v11  ;;  %v10906_v13 = vperm.slane %v5375_v2, %v9829_v44  ;;  %v1693_v21 = vperm.slane %v1299_v8, %v9829_v44 }
 0x351   : > { %v6500_v27 = vrot.slane %v6499_v60, 4  ;;  %v6512_v5 = vperm.slane %v6508_v14, %v9829_v44  ;;  %v1719_v57 = vperm.slane %v1302_v41, %v9829_v44  ;;  %v3319_v17 = vshrl.u32 %v3238_v35, 16 }
 0x352   : > { %v6514_v48 = vsel %vm1434_vm1, %v6513_v12, %v5762_v20  ;;  %v1694_v4 = vrot.slane %v1693_v21, 4  ;;  %v1697_v36 = vsel %vm1434_vm1, %v1693_v21, %v1696_v58  ;;  %v3317_v34 = vpack.i.b16 %v3238_v35, %v3222_v55 }
 0x353   : > { %v6501_v10 = vsel %vm1434_vm1, %v6500_v27, %v6493_v62  ;;  %v6518_v33 = vperm.slane %v6514_v48, %v9829_v44  ;;  %v1705_v31 = vperm.slane %v1697_v36, %v9870_v56  ;;  %v1720_v0 = vrot.slane %v1719_v57, 4 }
 0x354   : > { %v6505_v2 = vperm.slane %v6501_v10, %v9870_v56  ;;  %v1723_v43 = vsel %vm1434_vm1, %v1719_v57, %v1722_v39  ;;  %v1695_v54 = vsel %vm1434_vm1, %v1694_v4, %v10750_v6  ;;  %v3320_v59 = vpack.i.b16 %v3319_v17, %v10897_v49 }
 0x355   : > { %v6519_v11 = vrot.slane %v6518_v33, 4  ;;  %v1731_v8 = vperm.slane %v1723_v43, %v9870_v56  ;;  %v1701_v40 = vperm.slane %v1695_v54, %v9870_v56  ;;  %v1708_v58 = vrot.slane %v1705_v31, 4 }
 0x356   : > { %v6506_v9 = vrot.slane %v6505_v2, 4  ;;  %v7013_v14 = vshrl.u32 %v6505_v2, 16  ;;  %v1721_v62 = vsel %vm1434_vm1, %v1720_v0, %v10760_v37  ;;  %v3710_v27 = vperm.slane %v3317_v34, %v9829_v44 }
 0x357   : > { %v6520_v60 = vsel %vm1434_vm1, %v6519_v11, %v6512_v5  ;;  %v1734_v39 = vrot.slane %v1731_v8, 4  ;;  %v1706_v41 = vrot.slane %v1701_v40, 4  ;;  %v1709_v55 = vsel %vm1434_vm1, 0, %v1708_v58  ;;  %v10945_v8 = vpop.permute.xlu1 %1225 }
 0x358   : > { %v6507_v12 = vsel %vm1434_vm1, 0, %v6506_v9  ;;  %v6524_v6 = vperm.slane %v6520_v60, %v9870_v56  ;;  %v1727_v35 = vperm.slane %v1721_v62, %v9870_v56  ;;  %v2446_v49 = vsel %vm1434_vm1, %v1708_v58, %v1701_v40 }
 0x359   : > { %v1735_v20 = vsel %vm1434_vm1, 0, %v1734_v39  ;;  %v1707_v48 = vsel %vm1434_vm1, 0, %v1706_v41  ;;  %v7021_v57 = vshrl.u32 %v6507_v12, 16  ;;  %v2450_v10 = vperm.slane %v2446_v49, %v9829_v44 }
 0x35a   : > { %v6525_v21 = vrot.slane %v6524_v6, 4  ;;  %v7011_v5 = vpack.i.b16 %v6524_v6, %v6505_v2  ;;  %v7014_v37 = vshrl.u32 %v6524_v6, 16  ;;  %v1732_v17 = vrot.slane %v1727_v35, 4 }
 0x35b   : > { %v2451_v33 = vrot.slane %v1709_v55, 4  ;;  %v2465_v31 = vsel %vm1434_vm1, %v1734_v39, %v1727_v35  ;;  %v2470_v0 = vrot.slane %v1735_v20, 4  ;;  %v3711_v40 = vrot.slane %v3710_v27, 4 }
 0x35c   : > { %v6526_v4 = vsel %vm1434_vm1, 0, %v6525_v21  ;;  %v7015_v36 = vpack.i.b16 %v7014_v37, %v7013_v14  ;;  %7205 = vst.msk [vmem:[%s10097_s14 + $0x10] sm:$0xf] %vm3120_vm2, %v7011_v5  ;;  %v1733_v11 = vsel %vm1434_vm1, 0, %v1732_v17  ;;  %v3714_v58 = vsel %vm1434_vm1, %v3710_v27, %v3713_v26 }
 0x35d   : > { %v7019_v43 = vpack.i.b16 %v6526_v4, %v6507_v12  ;;  %v7022_v2 = vshrl.u32 %v6526_v4, 16  ;;  %v2452_v54 = vsel %vm1434_vm1, %v2451_v33, %v1707_v48  ;;  %v2471_v9 = vsel %vm1434_vm1, %v2470_v0, %v1733_v11 }
 0x35e   : > { %7221 = vst.msk [vmem:[%s10097_s14 + $0x50] sm:$0xf] %vm3120_vm2, %v7015_v36  ;;  %v2456_v34 = vperm.slane %v2452_v54, %v9829_v44  ;;  %v2475_v14 = vperm.slane %v2471_v9, %v9829_v44  ;;  %v3722_v62 = vperm.slane %v3714_v58, %v9870_v56  ;;  %v3736_v39 = vperm.slane %v3320_v59, %v9829_v44 }
 0x35f   : > { %v7023_v60 = vpack.i.b16 %v7022_v2, %v7021_v57  ;;  %7237 = vst.msk [vmem:[%s10097_s14 + $0x90] sm:$0xf] %vm3120_vm2, %v7019_v43  ;;  %v2469_v6 = vperm.slane %v2465_v31, %v9829_v44  ;;  %v3712_v41 = vsel %vm1434_vm1, %v3711_v40, %v10773_v63  ;;  %v1397_v55 = vshrl.u32 %v10945_v8, 16 }
 0x360   : > { %v2457_v12 = vrot.slane %v2456_v34, 4  ;;  %v2476_v26 = vrot.slane %v2475_v14, 4  ;;  %v3718_v35 = vperm.slane %v3712_v41, %v9870_v56  ;;  %v3725_v20 = vrot.slane %v3722_v62, 4 }
 0x361   : > { %7253 = vst.msk [vmem:[%s10097_s14 + $0xd0] sm:$0xf] %vm3120_vm2, %v7023_v60  ;;  %v3737_v49 = vrot.slane %v3736_v39, 4  ;;  %v10968_v27 = vperm.slane %v10902_v47, %v9829_v44  ;;  %v3740_v21 = vsel %vm1434_vm1, %v3736_v39, %v3739_v16  ;;  %v1395_v63 = vpack.i.b16 %v10945_v8, %v10838_v61 }
 0x362   : > { %v2458_v59 = vsel %vm1434_vm1, %v2457_v12, %v2450_v10  ;;  %v2477_v37 = vsel %vm1434_vm1, %v2476_v26, %v2469_v6  ;;  %v3723_v48 = vrot.slane %v3718_v35, 4  ;;  %v1398_v57 = vpack.i.b16 %v1397_v55, %v1396_v24 }
 0x363   : > { %v2462_v5 = vperm.slane %v2458_v59, %v9870_v56  ;;  %v2481_v47 = vperm.slane %v2477_v37, %v9870_v56  ;;  %v3726_v17 = vsel %vm1434_vm1, 0, %v3725_v20  ;;  %v3738_v10 = vsel %vm1434_vm1, %v3737_v49, %v10788_v38 }
 0x364   : > { %v3748_v16 = vperm.slane %v3740_v21, %v9870_v56  ;;  %v3724_v36 = vsel %vm1434_vm1, 0, %v3723_v48  ;;  %v3744_v31 = vperm.slane %v3738_v10, %v9870_v56  ;;  %v4463_v34 = vsel %vm1434_vm1, %v3725_v20, %v3718_v35  ;;  %v1162_v21 = vpop.permute.xlu0 %1161 }
 0x365   : > { %v2463_v33 = vrot.slane %v2462_v5, 4  ;;  %v2948_v4 = vshrl.u32 %v2462_v5, 16  ;;  %v2482_v0 = vrot.slane %v2481_v47, 4  ;;  %v2946_v43 = vpack.i.b16 %v2481_v47, %v2462_v5 }
 0x366   : > { %v2949_v2 = vshrl.u32 %v2481_v47, 16  ;;  %v3751_v24 = vrot.slane %v3748_v16, 4  ;;  %v3749_v54 = vrot.slane %v3744_v31, 4  ;;  %v4468_v38 = vrot.slane %v3726_v17, 4  ;;  %v11008_v17 = vpop.permute.xlu2 %1211 }
 0x367   : > { %v2464_v11 = vsel %vm1434_vm1, 0, %v2463_v33  ;;  %v2483_v9 = vsel %vm1434_vm1, 0, %v2482_v0  ;;  %3126 = vst.msk [vmem:[%s9964_s9 + $0x14] sm:$0xf] %vm3120_vm2, %v2946_v43  ;;  %v5777_v6 = vrot.slane %v10906_v13, 4  ;;  %v2109_v26 = vperm.slane %v1395_v63, %v9829_v44 }
 0x368   : > { %v2950_v40 = vpack.i.b16 %v2949_v2, %v2948_v4  ;;  %v2956_v58 = vshrl.u32 %v2464_v11, 16  ;;  %v3752_v60 = vsel %vm1434_vm1, 0, %v3751_v24  ;;  %v2954_v14 = vpack.i.b16 %v2483_v9, %v2464_v11 }
 0x369   : > { %v2957_v62 = vshrl.u32 %v2483_v9, 16  ;;  %v3750_v39 = vsel %vm1434_vm1, 0, %v3749_v54  ;;  %v4469_v12 = vsel %vm1434_vm1, %v4468_v38, %v3724_v36  ;;  %v4487_v55 = vrot.slane %v3752_v60, 4 }
 0x36a   : > { %3142 = vst.msk [vmem:[%s9964_s9 + $0x54] sm:$0xf] %vm3120_vm2, %v2950_v40  ;;  %v4473_v41 = vperm.slane %v4469_v12, %v9829_v44  ;;  %v5803_v35 = vrot.slane %v10968_v27, 4  ;;  %v3246_v49 = vrot.slane %v10945_v8, 4  ;;  %v3198_v59 = vrot.slane %v9745_v28, 4 }
 0x36b   : > { %v2958_v20 = vpack.i.b16 %v2957_v62, %v2956_v58  ;;  %3158 = vst.msk [vmem:[%s9964_s9 + $0x94] sm:$0xf] %vm3120_vm2, %v2954_v14  ;;  %v4467_v5 = vperm.slane %v4463_v34, %v9829_v44  ;;  %v4482_v48 = vsel %vm1434_vm1, %v3751_v24, %v3744_v31  ;;  %v4488_v47 = vsel %vm1434_vm1, %v4487_v55, %v3750_v39 }
 0x36c   : > { %v4474_v37 = vrot.slane %v4473_v41, 4  ;;  %v4492_v63 = vperm.slane %v4488_v47, %v9829_v44  ;;  %v2135_v10 = vperm.slane %v1398_v57, %v9829_v44  ;;  %v3413_v8 = vpack.i.b16 %v3246_v49, %v3230_v46 }
 0x36d   : > { %3174 = vst.msk [vmem:[%s9964_s9 + $0xd4] sm:$0xf] %vm3120_vm2, %v2958_v20  ;;  %v3415_v16 = vshrl.u32 %v3246_v49, 16  ;;  %v2110_v4 = vrot.slane %v2109_v26, 4  ;;  %v1389_v36 = vpack.i.b16 %v1162_v21, %v9745_v28  ;;  %v1306_v31 = vshrl.u32 %v9794_v15, 16 }
 0x36e   : > { %v4475_v33 = vsel %vm1434_vm1, %v4474_v37, %v4467_v5  ;;  %v4486_v43 = vperm.slane %v4482_v48, %v9829_v44  ;;  %v4493_v2 = vrot.slane %v4492_v63, 4  ;;  %v1313_v24 = vshrl.u32 %v11008_v17, 16 }
 0x36f   : > { %v4479_v0 = vperm.slane %v4475_v33, %v9870_v56  ;;  %v4126_v57 = vperm.slane %v3413_v8, %v9829_v44  ;;  %v3239_v61 = vrot.slane %v11008_v17, 4  ;;  %v1391_v46 = vshrl.u32 %v1162_v21, 16 }
 0x370   : > { %v2104_v11 = vperm.slane %v1389_v36, %v9829_v44  ;;  %v4494_v34 = vsel %vm1434_vm1, %v4493_v2, %v4486_v43  ;;  %v2136_v38 = vrot.slane %v2135_v10, 4  ;;  %v3416_v9 = vpack.i.b16 %v3415_v16, %v10890_v3 }
 0x371   : > { %v4480_v54 = vrot.slane %v4479_v0, 4  ;;  %v4498_v40 = vperm.slane %v4494_v34, %v9870_v56  ;;  %v4965_v58 = vshrl.u32 %v4479_v0, 16  ;;  %v1392_v60 = vpack.i.b16 %v1391_v46, %v1390_v18 }
 0x372   : > { %v2111_v14 = vsel %vm1434_vm1, %v2110_v4, %v2104_v11  ;;  %v2112_v39 = vrot.slane %v2104_v11, 4  ;;  %v3214_v41 = vrot.slane %v1162_v21, 4  ;;  %v4127_v3 = vrot.slane %v4126_v57, 4 }
 0x373   : > { %v4481_v62 = vsel %vm1434_vm1, 0, %v4480_v54  ;;  %v2117_v12 = vperm.slane %v2111_v14, %v9870_v56  ;;  %v4499_v55 = vrot.slane %v4498_v40, 4  ;;  %v4963_v20 = vpack.i.b16 %v4498_v40, %v4479_v0 }
 0x374   : > { %v4966_v49 = vshrl.u32 %v4498_v40, 16  ;;  %v4973_v5 = vshrl.u32 %v4481_v62, 16  ;;  %v11034_v37 = vperm.slane %v3416_v9, %v9829_v44  ;;  %v2113_v28 = vsel %vm1434_vm1, %v2109_v26, %v2112_v39 }
 0x375   : > { %v2130_v18 = vperm.slane %v1392_v60, %v9829_v44  ;;  %v4500_v48 = vsel %vm1434_vm1, 0, %v4499_v55  ;;  %5142 = vst.msk [vmem:[%s10006_s24 + $0x14] sm:$0xf] %vm3120_vm2, %v4963_v20  ;;  %v2121_v21 = vperm.slane %v2113_v28, %v9870_v56  ;;  %v3407_v63 = vpack.i.b16 %v3214_v41, %v3198_v59 }
 0x376   : > { %v4967_v47 = vpack.i.b16 %v4966_v49, %v4965_v58  ;;  %v4971_v8 = vpack.i.b16 %v4500_v48, %v4481_v62  ;;  %v4974_v16 = vshrl.u32 %v4500_v48, 16  ;;  %v2122_v33 = vrot.slane %v2117_v12, 4 }
 0x377   : > { %v2137_v4 = vsel %vm1434_vm1, %v2136_v38, %v2130_v18  ;;  %v2124_v26 = vrot.slane %v2121_v21, 4  ;;  %v2138_v36 = vrot.slane %v2130_v18, 4  ;;  %v3409_v43 = vshrl.u32 %v3214_v41, 16 }
 0x378   : > { %5158 = vst.msk [vmem:[%s10006_s24 + $0x54] sm:$0xf] %vm3120_vm2, %v4967_v47  ;;  %v2143_v0 = vperm.slane %v2137_v4, %v9870_v56  ;;  %v4975_v2 = vpack.i.b16 %v4974_v16, %v4973_v5  ;;  %v11050_v46 = vshrl.u32 %v3239_v61, 16  ;;  %v3408_v11 = vshrl.u32 %v3198_v59, 16 }
 0x379   : > { %5174 = vst.msk [vmem:[%s10006_s24 + $0x94] sm:$0xf] %vm3120_vm2, %v4971_v8  ;;  %v4121_v54 = vperm.slane %v3407_v63, %v9829_v44  ;;  %v4153_v34 = vrot.slane %v11034_v37, 4  ;;  %v2125_v38 = vsel %vm1434_vm1, 0, %v2124_v26  ;;  %v2139_v9 = vsel %vm1434_vm1, %v2135_v10, %v2138_v36  ;;  %v11077_v8 = vpop.permute.xlu2 %1163 }
 0x37a   : > { %v3199_v40 = vrot.slane %v9796_v53, 4  ;;  %5190 = vst.msk [vmem:[%s10006_s24 + $0xd4] sm:$0xf] %vm3120_vm2, %v4975_v2  ;;  %v2147_v58 = vperm.slane %v2139_v9, %v9870_v56  ;;  %v2148_v60 = vrot.slane %v2143_v0, 4  ;;  %v2755_v14 = vrot.slane %v2125_v38, 4 }
 0x37b   : > { %v3410_v62 = vpack.i.b16 %v3409_v43, %v3408_v11  ;;  %v2123_v39 = vsel %vm1434_vm1, 0, %v2122_v33  ;;  %v2750_v59 = vsel %vm1434_vm1, %v2124_v26, %v2117_v12  ;;  %v4128_v41 = vsel %vm1434_vm1, %v4127_v3, %v4121_v54 }
 0x37c   : > { %v4129_v55 = vrot.slane %v4121_v54, 4  ;;  %v2150_v20 = vrot.slane %v2147_v58, 4  ;;  %v2756_v49 = vsel %vm1434_vm1, %v2755_v14, %v2123_v39  ;;  %v4134_v10 = vperm.slane %v4128_v41, %v9870_v56  ;;  %v5260_v14 = vpop.permute.xlu1 %5259 }
 0x37d   : > { %v4147_v5 = vperm.slane %v3410_v62, %v9829_v44  ;;  %v2760_v28 = vperm.slane %v2756_v49, %v9829_v44  ;;  %v1402_v48 = vshrl.u32 %v9796_v53, 16  ;;  %v11071_v47 = vshrl.u32 %v3199_v40, 16 }
 0x37e   : > { %v4130_v18 = vsel %vm1434_vm1, %v4126_v57, %v4129_v55  ;;  %v2149_v12 = vsel %vm1434_vm1, 0, %v2148_v60  ;;  %v2151_v3 = vsel %vm1434_vm1, 0, %v2150_v20  ;;  %v2754_v21 = vperm.slane %v2750_v59, %v9829_v44 }
 0x37f   : > { %v4138_v63 = vperm.slane %v4130_v18, %v9870_v56  ;;  %v2761_v16 = vrot.slane %v2760_v28, 4  ;;  %v2769_v33 = vsel %vm1434_vm1, %v2150_v20, %v2143_v0  ;;  %v2774_v57 = vrot.slane %v2151_v3, 4 }
 0x380   : > { %v4154_v4 = vsel %vm1434_vm1, %v4153_v34, %v4147_v5  ;;  %v4139_v26 = vrot.slane %v4134_v10, 4  ;;  %v4155_v43 = vrot.slane %v4147_v5, 4  ;;  %v1401_v38 = vpack.i.b16 %v11077_v8, %v9796_v53 }
 0x381   : > { %v4141_v36 = vrot.slane %v4138_v63, 4  ;;  %v4160_v2 = vperm.slane %v4154_v4, %v9870_v56  ;;  %v2762_v11 = vsel %vm1434_vm1, %v2761_v16, %v2754_v21  ;;  %v2775_v54 = vsel %vm1434_vm1, %v2774_v57, %v2149_v12 }
 0x382   : > { %v1403_v9 = vshrl.u32 %v11077_v8, 16  ;;  %v2766_v58 = vperm.slane %v2762_v11, %v9870_v56  ;;  %v2779_v0 = vperm.slane %v2775_v54, %v9829_v44  ;;  %v4156_v60 = vsel %vm1434_vm1, %v11034_v37, %v4155_v43 }
 0x383   : > { %v4142_v34 = vsel %vm1434_vm1, 0, %v4141_v36  ;;  %v2773_v62 = vperm.slane %v2769_v33, %v9829_v44  ;;  %v4164_v39 = vperm.slane %v4156_v60, %v9870_v56  ;;  %v4165_v59 = vrot.slane %v4160_v2, 4 }
 0x384   : > { %v4772_v41 = vrot.slane %v4142_v34, 4  ;;  %v2767_v55 = vrot.slane %v2766_v58, 4  ;;  %v2780_v20 = vrot.slane %v2779_v0, 4  ;;  %v4140_v49 = vsel %vm1434_vm1, 0, %v4139_v26  ;;  %v5292_v26 = vpop.permute.xlu0 %5291 }
 0x385   : > { %v4767_v5 = vsel %vm1434_vm1, %v4141_v36, %v4134_v10  ;;  %v4167_v28 = vrot.slane %v4164_v39, 4  ;;  %v5382_v12 = vshrl.u32 %v5260_v14, 16  ;;  %v1404_v3 = vpack.i.b16 %v1403_v9, %v1402_v48 }
 0x386   : > { %v4773_v18 = vsel %vm1434_vm1, %v4772_v41, %v4140_v49  ;;  %v2781_v37 = vsel %vm1434_vm1, %v2780_v20, %v2773_v62  ;;  %v3076_v21 = vshrl.u32 %v2766_v58, 16  ;;  %v11100_v16 = vperm.slane %v1401_v38, %v9829_v44 }
 0x387   : > { %v4777_v63 = vperm.slane %v4773_v18, %v9829_v44  ;;  %v2785_v33 = vperm.slane %v2781_v37, %v9870_v56  ;;  %v4166_v57 = vsel %vm1434_vm1, 0, %v4165_v59  ;;  %v4168_v4 = vsel %vm1434_vm1, 0, %v4167_v28  ;;  %v11120_v37 = vpop.permute.xlu1 %1147 }
 0x388   : > { %v4771_v10 = vperm.slane %v4767_v5, %v9829_v44  ;;  %v2768_v48 = vsel %vm1434_vm1, 0, %v2767_v55  ;;  %v4786_v43 = vsel %vm1434_vm1, %v4167_v28, %v4160_v2  ;;  %v4791_v11 = vrot.slane %v4168_v4, 4 }
 0x389   : > { %v4778_v36 = vrot.slane %v4777_v63, 4  ;;  %v2786_v54 = vrot.slane %v2785_v33, 4  ;;  %v3074_v9 = vpack.i.b16 %v2785_v33, %v2766_v58  ;;  %v3077_v38 = vshrl.u32 %v2785_v33, 16 }
 0x38a   : > { %v3215_v0 = vrot.slane %v11077_v8, 4  ;;  %v4792_v60 = vsel %vm1434_vm1, %v4791_v11, %v4166_v57  ;;  %v5381_v62 = vpack.i.b16 %v5292_v26, %v5260_v14  ;;  %v5383_v39 = vshrl.u32 %v5292_v26, 16 }
 0x38b   : > { %v4779_v34 = vsel %vm1434_vm1, %v4778_v36, %v4771_v10  ;;  %v2787_v59 = vsel %vm1434_vm1, 0, %v2786_v54  ;;  %v3078_v41 = vpack.i.b16 %v3077_v38, %v3076_v21  ;;  %3134 = vst.msk [vmem:[%s9964_s9 + $0x34] sm:$0xf] %vm3120_vm2, %v3074_v9  ;;  %v4796_v58 = vperm.slane %v4792_v60, %v9829_v44 }
 0x38c   : > { %v4783_v2 = vperm.slane %v4779_v34, %v9870_v56  ;;  %v3082_v55 = vpack.i.b16 %v2787_v59, %v2768_v48  ;;  %v3084_v20 = vshrl.u32 %v2768_v48, 16  ;;  %v3085_v49 = vshrl.u32 %v2787_v59, 16 }
 0x38d   : > { %v3191_v8 = vrot.slane %v9794_v15, 4  ;;  %3150 = vst.msk [vmem:[%s9964_s9 + $0x74] sm:$0xf] %vm3120_vm2, %v3078_v41  ;;  %v4790_v5 = vperm.slane %v4786_v43, %v9829_v44  ;;  %v4797_v28 = vrot.slane %v4796_v58, 4  ;;  %v5384_v18 = vpack.i.b16 %v5383_v39, %v5382_v12 }
 0x38e   : > { %v4784_v14 = vrot.slane %v4783_v2, 4  ;;  %v3086_v21 = vpack.i.b16 %v3085_v49, %v3084_v20  ;;  %3166 = vst.msk [vmem:[%s9964_s9 + $0xb4] sm:$0xf] %vm3120_vm2, %v3082_v55  ;;  %v2164_v63 = vrot.slane %v11100_v16, 4  ;;  %v11126_v33 = vperm.slane %v1404_v3, %v9829_v44 }
 0x38f   : > { %v5774_v57 = vperm.slane %v5381_v62, %v9829_v44  ;;  %v4798_v10 = vsel %vm1434_vm1, %v4797_v28, %v4790_v5  ;;  %v3419_v26 = vpack.i.b16 %v3215_v0, %v3199_v40  ;;  %v5800_v12 = vperm.slane %v5384_v18, %v9829_v44 }
 0x390   : > { %v4785_v4 = vsel %vm1434_vm1, 0, %v4784_v14  ;;  %3182 = vst.msk [vmem:[%s9964_s9 + $0xf4] sm:$0xf] %vm3120_vm2, %v3086_v21  ;;  %v4802_v48 = vperm.slane %v4798_v10, %v9870_v56  ;;  %v5093_v36 = vshrl.u32 %v4783_v2, 16  ;;  %v11137_v43 = vshrl.u32 %v3215_v0, 16 }
 0x391   : > { %v1305_v3 = vpack.i.b16 %v11120_v37, %v9794_v15  ;;  %v5775_v11 = vrot.slane %v5774_v57, 4  ;;  %v5778_v54 = vsel %vm1434_vm1, %v5774_v57, %v5777_v6  ;;  %v5801_v53 = vrot.slane %v5800_v12, 4 }
 0x392   : > { %v5804_v40 = vsel %vm1434_vm1, %v5800_v12, %v5803_v35  ;;  %v4803_v9 = vrot.slane %v4802_v48, 4  ;;  %v5091_v38 = vpack.i.b16 %v4802_v48, %v4783_v2  ;;  %v5094_v34 = vshrl.u32 %v4802_v48, 16 }
 0x393   : > { %v5101_v0 = vshrl.u32 %v4785_v4, 16  ;;  %v5776_v60 = vsel %vm1434_vm1, %v5775_v11, %v10906_v13  ;;  %v5786_v62 = vperm.slane %v5778_v54, %v9870_v56  ;;  %v5802_v39 = vsel %vm1434_vm1, %v5801_v53, %v10968_v27  ;;  %v1180_v53 = vpop.permute.xlu0 %1179 }
 0x394   : > { %v5812_v6 = vperm.slane %v5804_v40, %v9870_v56  ;;  %v4804_v59 = vsel %vm1434_vm1, 0, %v4803_v9  ;;  %v5095_v41 = vpack.i.b16 %v5094_v34, %v5093_v36  ;;  %5150 = vst.msk [vmem:[%s10006_s24 + $0x34] sm:$0xf] %vm3120_vm2, %v5091_v38  ;;  %v5782_v35 = vperm.slane %v5776_v60, %v9870_v56 }
 0x395   : > { %v5808_v2 = vperm.slane %v5802_v39, %v9870_v56  ;;  %v5099_v58 = vpack.i.b16 %v4804_v59, %v4785_v4  ;;  %v5102_v55 = vshrl.u32 %v4804_v59, 16  ;;  %v5789_v13 = vrot.slane %v5786_v62, 4 }
 0x396   : > { %v5815_v20 = vrot.slane %v5812_v6, 4  ;;  %5166 = vst.msk [vmem:[%s10006_s24 + $0x74] sm:$0xf] %vm3120_vm2, %v5095_v41  ;;  %v5787_v27 = vrot.slane %v5782_v35, 4  ;;  %v1307_v14 = vshrl.u32 %v11120_v37, 16  ;;  %v1740_v5 = vperm.slane %v1305_v3, %v9829_v44 }
 0x397   : > { %v5813_v49 = vrot.slane %v5808_v2, 4  ;;  %v5103_v28 = vpack.i.b16 %v5102_v55, %v5101_v0  ;;  %5182 = vst.msk [vmem:[%s10006_s24 + $0xb4] sm:$0xf] %vm3120_vm2, %v5099_v58  ;;  %v5790_v18 = vsel %vm1434_vm1, 0, %v5789_v13  ;;  %v6527_v57 = vsel %vm1434_vm1, %v5789_v13, %v5782_v35 }
 0x398   : > { %v5816_v21 = vsel %vm1434_vm1, 0, %v5815_v20  ;;  %v2190_v4 = vrot.slane %v11126_v33, 4  ;;  %v5788_v10 = vsel %vm1434_vm1, 0, %v5787_v27  ;;  %v6532_v48 = vrot.slane %v5790_v18, 4 }
 0x399   : > { %v5814_v12 = vsel %vm1434_vm1, 0, %v5813_v49  ;;  %5198 = vst.msk [vmem:[%s10006_s24 + $0xf4] sm:$0xf] %vm3120_vm2, %v5103_v28  ;;  %v3422_v36 = vpack.i.b16 %v11137_v43, %v11071_v47  ;;  %v11175_v3 = vperm.slane %v3419_v26, %v9829_v44  ;;  %v6551_v11 = vrot.slane %v5816_v21, 4 }
 0x39a   : > { %v1308_v54 = vpack.i.b16 %v1307_v14, %v1306_v31  ;;  %v6531_v40 = vperm.slane %v6527_v57, %v9829_v44  ;;  %v6533_v9 = vsel %vm1434_vm1, %v6532_v48, %v5788_v10  ;;  %v6546_v38 = vsel %vm1434_vm1, %v5815_v20, %v5808_v2 }
 0x39b   : > { %v3207_v34 = vrot.slane %v11120_v37, 4  ;;  %v6537_v0 = vperm.slane %v6533_v9, %v9829_v44  ;;  %v6552_v60 = vsel %vm1434_vm1, %v6551_v11, %v5814_v12  ;;  %v1748_v62 = vrot.slane %v1740_v5, 4 }
 0x39c   : > { %v1766_v26 = vperm.slane %v1308_v54, %v9829_v44  ;;  %v6556_v39 = vperm.slane %v6552_v60, %v9829_v44  ;;  %v1311_v59 = vpack.i.b16 %v11008_v17, %v1180_v53  ;;  %v3324_v35 = vshrl.u32 %v3191_v8, 16 }
 0x39d   : > { %v3323_v31 = vpack.i.b16 %v3207_v34, %v3191_v8  ;;  %v3325_v6 = vshrl.u32 %v3207_v34, 16  ;;  %v6538_v41 = vrot.slane %v6537_v0, 4  ;;  %v1312_v37 = vshrl.u32 %v1180_v53, 16 }
 0x39e   : > { %v3223_v2 = vrot.slane %v1180_v53, 4  ;;  %v6550_v58 = vperm.slane %v6546_v38, %v9829_v44  ;;  %v6557_v55 = vrot.slane %v6556_v39, 4  ;;  %v1745_v20 = vperm.slane %v1311_v59, %v9829_v44 }
 0x39f   : > { %v11194_v13 = vperm.slane %v3323_v31, %v9829_v44  ;;  %v6539_v27 = vsel %vm1434_vm1, %v6538_v41, %v6531_v40  ;;  %v1774_v49 = vrot.slane %v1766_v26, 4  ;;  %v3326_v14 = vpack.i.b16 %v3325_v6, %v3324_v35 }
 0x3a0   : > { %v1314_v28 = vpack.i.b16 %v1313_v24, %v1312_v37  ;;  %v6543_v15 = vperm.slane %v6539_v27, %v9870_v56  ;;  %v6558_v8 = vsel %vm1434_vm1, %v6557_v55, %v6550_v58  ;;  %v3329_v18 = vpack.i.b16 %v3239_v61, %v3223_v2 }
 0x3a1   : > { %v3330_v21 = vshrl.u32 %v3223_v2, 16  ;;  %v6562_v57 = vperm.slane %v6558_v8, %v9870_v56  ;;  %v1746_v10 = vrot.slane %v1745_v20, 4  ;;  %v1749_v12 = vsel %vm1434_vm1, %v1745_v20, %v1748_v62 }
 0x3a2   : > { %v1771_v48 = vperm.slane %v1314_v28, %v9829_v44  ;;  %v6544_v11 = vrot.slane %v6543_v15, 4  ;;  %v7029_v54 = vshrl.u32 %v6543_v15, 16  ;;  %v3765_v24 = vrot.slane %v11194_v13, 4 }
 0x3a3   : > { %v1757_v53 = vperm.slane %v1749_v12, %v9870_v56  ;;  %v6563_v40 = vrot.slane %v6562_v57, 4  ;;  %v7027_v9 = vpack.i.b16 %v6562_v57, %v6543_v15  ;;  %v7030_v17 = vshrl.u32 %v6562_v57, 16 }
 0x3a4   : > { %v1747_v61 = vsel %vm1434_vm1, %v1746_v10, %v1740_v5  ;;  %v6545_v38 = vsel %vm1434_vm1, 0, %v6544_v11  ;;  %v1772_v60 = vrot.slane %v1771_v48, 4  ;;  %v1775_v6 = vsel %vm1434_vm1, %v1771_v48, %v1774_v49 }
 0x3a5   : > { %v1753_v34 = vperm.slane %v1747_v61, %v9870_v56  ;;  %v1760_v0 = vrot.slane %v1757_v53, 4  ;;  %v6564_v62 = vsel %vm1434_vm1, 0, %v6563_v40  ;;  %v7031_v39 = vpack.i.b16 %v7030_v17, %v7029_v54  ;;  %7206 = vst.msk [vmem:[%s10097_s14 + $0x14] sm:$0xf] %vm3120_vm2, %v7027_v9  ;;  %v11249_v61 = vpop.permute.xlu1 %1195 }
 0x3a6   : > { %v7037_v31 = vshrl.u32 %v6545_v38, 16  ;;  %v7035_v59 = vpack.i.b16 %v6564_v62, %v6545_v38  ;;  %v7038_v41 = vshrl.u32 %v6564_v62, 16  ;;  %v3783_v37 = vperm.slane %v3326_v14, %v9829_v44 }
 0x3a7   : > { %v1758_v35 = vrot.slane %v1753_v34, 4  ;;  %v1761_v5 = vsel %vm1434_vm1, 0, %v1760_v0  ;;  %7222 = vst.msk [vmem:[%s10097_s14 + $0x54] sm:$0xf] %vm3120_vm2, %v7031_v39  ;;  %v1773_v2 = vsel %vm1434_vm1, %v1772_v60, %v1766_v26  ;;  %v1783_v58 = vperm.slane %v1775_v6, %v9870_v56  ;;  %v11255_v60 = vpop.permute.xlu0 %1227 }
 0x3a8   : > { %v2489_v55 = vrot.slane %v1761_v5, 4  ;;  %v7039_v20 = vpack.i.b16 %v7038_v41, %v7037_v31  ;;  %7238 = vst.msk [vmem:[%s10097_s14 + $0x94] sm:$0xf] %vm3120_vm2, %v7035_v59  ;;  %v1779_v49 = vperm.slane %v1773_v2, %v9870_v56  ;;  %v2484_v28 = vsel %vm1434_vm1, %v1760_v0, %v1753_v34 }
 0x3a9   : > { %v1759_v27 = vsel %vm1434_vm1, 0, %v1758_v35  ;;  %v1786_v15 = vrot.slane %v1783_v58, 4  ;;  %v3332_v57 = vpack.i.b16 %v11050_v46, %v3330_v21  ;;  %v3762_v14 = vperm.slane %v3329_v18, %v9829_v44 }
 0x3aa   : > { %v2490_v8 = vsel %vm1434_vm1, %v2489_v55, %v1759_v27  ;;  %v4181_v26 = vrot.slane %v11175_v3, 4  ;;  %v11235_v10 = vperm.slane %v3422_v36, %v9829_v44  ;;  %7254 = vst.msk [vmem:[%s10097_s14 + $0xd4] sm:$0xf] %vm3120_vm2, %v7039_v20  ;;  %v1784_v12 = vrot.slane %v1779_v49, 4 }
 0x3ab   : > { %v2494_v48 = vperm.slane %v2490_v8, %v9829_v44  ;;  %v3791_v11 = vrot.slane %v3783_v37, 4  ;;  %v1787_v54 = vsel %vm1434_vm1, 0, %v1786_v15  ;;  %v3763_v53 = vrot.slane %v3762_v14, 4 }
 0x3ac   : > { %v3766_v46 = vsel %vm1434_vm1, %v3762_v14, %v3765_v24  ;;  %v1785_v18 = vsel %vm1434_vm1, 0, %v1784_v12  ;;  %v2488_v21 = vperm.slane %v2484_v28, %v9829_v44  ;;  %v2508_v9 = vrot.slane %v1787_v54, 4 }
 0x3ad   : > { %v2495_v40 = vrot.slane %v2494_v48, 4  ;;  %v2503_v47 = vsel %vm1434_vm1, %v1786_v15, %v1779_v49  ;;  %v3764_v43 = vsel %vm1434_vm1, %v3763_v53, %v11194_v13  ;;  %v3774_v36 = vperm.slane %v3766_v46, %v9870_v56 }
 0x3ae   : > { %v3788_v17 = vperm.slane %v3332_v57, %v9829_v44  ;;  %v4207_v38 = vrot.slane %v11235_v10, 4  ;;  %v2509_v34 = vsel %vm1434_vm1, %v2508_v9, %v1785_v18  ;;  %v3770_v0 = vperm.slane %v3764_v43, %v9870_v56 }
 0x3af   : > { %v2496_v24 = vsel %vm1434_vm1, %v2495_v40, %v2488_v21  ;;  %v2513_v13 = vperm.slane %v2509_v34, %v9829_v44  ;;  %v3777_v39 = vrot.slane %v3774_v36, 4  ;;  %v2507_v6 = vperm.slane %v2503_v47, %v9829_v44 }
 0x3b0   : > { %v2500_v62 = vperm.slane %v2496_v24, %v9870_v56  ;;  %v3789_v31 = vrot.slane %v3788_v17, 4  ;;  %v3775_v59 = vrot.slane %v3770_v0, 4  ;;  %v3792_v41 = vsel %vm1434_vm1, %v3788_v17, %v3791_v11 }
 0x3b1   : > { %v1408_v35 = vshrl.u32 %v11249_v61, 16  ;;  %v2514_v2 = vrot.slane %v2513_v13, 4  ;;  %v3778_v58 = vsel %vm1434_vm1, 0, %v3777_v39  ;;  %v1407_v55 = vpack.i.b16 %v11255_v60, %v11249_v61 }
 0x3b2   : > { %v2501_v5 = vrot.slane %v2500_v62, 4  ;;  %v3790_v20 = vsel %vm1434_vm1, %v3789_v31, %v3783_v37  ;;  %v3800_v27 = vperm.slane %v3792_v41, %v9870_v56  ;;  %v4501_v49 = vsel %vm1434_vm1, %v3777_v39, %v3770_v0 }
 0x3b3   : > { %v3231_v28 = vrot.slane %v11249_v61, 4  ;;  %v2515_v15 = vsel %vm1434_vm1, %v2514_v2, %v2507_v6  ;;  %v2964_v8 = vshrl.u32 %v2500_v62, 16  ;;  %v3776_v57 = vsel %vm1434_vm1, 0, %v3775_v59 }
 0x3b4   : > { %v3796_v14 = vperm.slane %v3790_v20, %v9870_v56  ;;  %v2502_v12 = vsel %vm1434_vm1, 0, %v2501_v5  ;;  %v2519_v48 = vperm.slane %v2515_v15, %v9870_v56  ;;  %v3803_v11 = vrot.slane %v3800_v27, 4 }
 0x3b5   : > { %v4506_v37 = vrot.slane %v3778_v58, 4  ;;  %v4505_v53 = vperm.slane %v4501_v49, %v9829_v44  ;;  %v1409_v46 = vshrl.u32 %v11255_v60, 16  ;;  %v2161_v18 = vperm.slane %v1407_v55, %v9829_v44 }
 0x3b6   : > { %v3801_v54 = vrot.slane %v3796_v14, 4  ;;  %v2520_v21 = vrot.slane %v2519_v48, 4  ;;  %v2962_v40 = vpack.i.b16 %v2519_v48, %v2500_v62  ;;  %v2965_v9 = vshrl.u32 %v2519_v48, 16 }
 0x3b7   : > { %v3804_v47 = vsel %vm1434_vm1, 0, %v3803_v11  ;;  %v2972_v43 = vshrl.u32 %v2502_v12, 16  ;;  %v4507_v17 = vsel %vm1434_vm1, %v4506_v37, %v3776_v57  ;;  %v4520_v62 = vsel %vm1434_vm1, %v3803_v11, %v3796_v14 }
 0x3b8   : > { %v3802_v36 = vsel %vm1434_vm1, 0, %v3801_v54  ;;  %v4525_v61 = vrot.slane %v3804_v47, 4  ;;  %v2521_v24 = vsel %vm1434_vm1, 0, %v2520_v21  ;;  %v2966_v34 = vpack.i.b16 %v2965_v9, %v2964_v8  ;;  %3127 = vst.msk [vmem:[%s9964_s9 + $0x18] sm:$0xf] %vm3120_vm2, %v2962_v40 }
 0x3b9   : > { %v4511_v0 = vperm.slane %v4507_v17, %v9829_v44  ;;  %v2970_v13 = vpack.i.b16 %v2521_v24, %v2502_v12  ;;  %v2973_v39 = vshrl.u32 %v2521_v24, 16  ;;  %v1410_v6 = vpack.i.b16 %v1409_v46, %v1408_v35 }
 0x3ba   : > { %v4526_v31 = vsel %vm1434_vm1, %v4525_v61, %v3802_v36  ;;  %3143 = vst.msk [vmem:[%s9964_s9 + $0x58] sm:$0xf] %vm3120_vm2, %v2966_v34  ;;  %v2162_v5 = vrot.slane %v2161_v18, 4  ;;  %v2165_v2 = vsel %vm1434_vm1, %v2161_v18, %v2164_v63  ;;  %v3247_v27 = vrot.slane %v11255_v60, 4  ;;  %v11318_v34 = vpop.permute.xlu2 %5293 }
 0x3bb   : > { %v4512_v59 = vrot.slane %v4511_v0, 4  ;;  %v4530_v41 = vperm.slane %v4526_v31, %v9829_v44  ;;  %v2974_v58 = vpack.i.b16 %v2973_v39, %v2972_v43  ;;  %3159 = vst.msk [vmem:[%s9964_s9 + $0x98] sm:$0xf] %vm3120_vm2, %v2970_v13  ;;  %v2173_v55 = vperm.slane %v2165_v2, %v9870_v56 }
 0x3bc   : > { %v2187_v20 = vperm.slane %v1410_v6, %v9829_v44  ;;  %v4524_v49 = vperm.slane %v4520_v62, %v9829_v44  ;;  %v2163_v8 = vsel %vm1434_vm1, %v2162_v5, %v11100_v16  ;;  %v3426_v11 = vshrl.u32 %v3231_v28, 16 }
 0x3bd   : > { %v4513_v35 = vsel %vm1434_vm1, %v4512_v59, %v4505_v53  ;;  %v4531_v15 = vrot.slane %v4530_v41, 4  ;;  %3175 = vst.msk [vmem:[%s9964_s9 + $0xd8] sm:$0xf] %vm3120_vm2, %v2974_v58  ;;  %v2169_v57 = vperm.slane %v2163_v8, %v9870_v56  ;;  %v2176_v14 = vrot.slane %v2173_v55, 4 }
 0x3be   : > { %v4517_v63 = vperm.slane %v4513_v35, %v9870_v56  ;;  %v2188_v12 = vrot.slane %v2187_v20, 4  ;;  %v2191_v60 = vsel %vm1434_vm1, %v2187_v20, %v2190_v4  ;;  %v3425_v37 = vpack.i.b16 %v3247_v27, %v3231_v28 }
 0x3bf   : > { %v4532_v48 = vsel %vm1434_vm1, %v4531_v15, %v4524_v49  ;;  %v2174_v16 = vrot.slane %v2169_v57, 4  ;;  %v3427_v46 = vshrl.u32 %v3247_v27, 16  ;;  %v2177_v21 = vsel %vm1434_vm1, 0, %v2176_v14 }
 0x3c0   : > { %v4518_v54 = vrot.slane %v4517_v63, 4  ;;  %v4536_v53 = vperm.slane %v4532_v48, %v9870_v56  ;;  %v4981_v18 = vshrl.u32 %v4517_v63, 16  ;;  %v2189_v40 = vsel %vm1434_vm1, %v2188_v12, %v11126_v33 }
 0x3c1   : > { %v2199_v9 = vperm.slane %v2191_v60, %v9870_v56  ;;  %v2175_v28 = vsel %vm1434_vm1, 0, %v2174_v16  ;;  %v2195_v17 = vperm.slane %v2189_v40, %v9870_v56  ;;  %v2788_v24 = vsel %vm1434_vm1, %v2176_v14, %v2169_v57  ;;  %v5230_v60 = vpop.permute.xlu1 %5229 }
 0x3c2   : > { %v4519_v47 = vsel %vm1434_vm1, 0, %v4518_v54  ;;  %v4537_v43 = vrot.slane %v4536_v53, 4  ;;  %v4979_v36 = vpack.i.b16 %v4536_v53, %v4517_v63  ;;  %v4982_v4 = vshrl.u32 %v4536_v53, 16  ;;  %v12879_v63 = vld [vmem:[#allocation17_spill] sm:$0xff] }
 0x3c3   : > { %v2202_v61 = vrot.slane %v2199_v9, 4  ;;  %v4989_v62 = vshrl.u32 %v4519_v47, 16  ;;  %v2793_v13 = vrot.slane %v2177_v21, 4  ;;  %v2200_v6 = vrot.slane %v2195_v17, 4 }
 0x3c4   : > { %v4538_v0 = vsel %vm1434_vm1, 0, %v4537_v43  ;;  %v4983_v33 = vpack.i.b16 %v4982_v4, %v4981_v18  ;;  %5143 = vst.msk [vmem:[%s10006_s24 + $0x18] sm:$0xf] %vm3120_vm2, %v4979_v36  ;;  %v3428_v58 = vpack.i.b16 %v3427_v46, %v3426_v11  ;;  %v5395_v55 = vshrl.u32 %v11318_v34, 16 }
 0x3c5   : > { %v4987_v39 = vpack.i.b16 %v4538_v0, %v4519_v47  ;;  %v4990_v31 = vshrl.u32 %v4538_v0, 16  ;;  %v2203_v59 = vsel %vm1434_vm1, 0, %v2202_v61  ;;  %v2794_v41 = vsel %vm1434_vm1, %v2793_v13, %v2175_v28 }
 0x3c6   : > { %5159 = vst.msk [vmem:[%s10006_s24 + $0x58] sm:$0xf] %vm3120_vm2, %v4983_v33  ;;  %v2807_v5 = vsel %vm1434_vm1, %v2202_v61, %v2195_v17  ;;  %v2812_v2 = vrot.slane %v2203_v59, 4  ;;  %v2201_v27 = vsel %vm1434_vm1, 0, %v2200_v6  ;;  %v2798_v35 = vperm.slane %v2794_v41, %v9829_v44  ;;  %v11359_v17 = vpop.permute.xlu2 %1181 }
 0x3c7   : > { %v4991_v20 = vpack.i.b16 %v4990_v31, %v4989_v62  ;;  %5175 = vst.msk [vmem:[%s10006_s24 + $0x98] sm:$0xf] %vm3120_vm2, %v4987_v39  ;;  %v4178_v15 = vperm.slane %v3425_v37, %v9829_v44  ;;  %v4204_v8 = vperm.slane %v3428_v58, %v9829_v44  ;;  %v5388_v57 = vshrl.u32 %v12879_v63, 16 }
 0x3c8   : > { %v2813_v49 = vsel %vm1434_vm1, %v2812_v2, %v2201_v27  ;;  %v2792_v14 = vperm.slane %v2788_v24, %v9829_v44  ;;  %v2799_v12 = vrot.slane %v2798_v35, 4  ;;  %v2811_v48 = vperm.slane %v2807_v5, %v9829_v44 }
 0x3c9   : > { %5191 = vst.msk [vmem:[%s10006_s24 + $0xd8] sm:$0xf] %vm3120_vm2, %v4991_v20  ;;  %v2817_v11 = vperm.slane %v2813_v49, %v9829_v44  ;;  %v4179_v54 = vrot.slane %v4178_v15, 4  ;;  %v4182_v53 = vsel %vm1434_vm1, %v4178_v15, %v4181_v26  ;;  %v4205_v37 = vrot.slane %v4204_v8, 4 }
 0x3ca   : > { %v4208_v16 = vsel %vm1434_vm1, %v4204_v8, %v4207_v38  ;;  %v2800_v46 = vsel %vm1434_vm1, %v2799_v12, %v2792_v14  ;;  %v4190_v21 = vperm.slane %v4182_v53, %v9870_v56  ;;  %v5389_v43 = vshrl.u32 %v5230_v60, 16  ;;  %v5262_v12 = vpop.permute.xlu0 %5261 }
 0x3cb   : > { %v2818_v18 = vrot.slane %v2817_v11, 4  ;;  %v4216_v40 = vperm.slane %v4208_v16, %v9870_v56  ;;  %v2804_v9 = vperm.slane %v2800_v46, %v9870_v56  ;;  %v4180_v47 = vsel %vm1434_vm1, %v4179_v54, %v11175_v3 }
 0x3cc   : > { %v4206_v26 = vsel %vm1434_vm1, %v4205_v37, %v11235_v10  ;;  %v4186_v38 = vperm.slane %v4180_v47, %v9870_v56  ;;  %v4193_v4 = vrot.slane %v4190_v21, 4  ;;  %v5387_v3 = vpack.i.b16 %v5230_v60, %v12879_v63 }
 0x3cd   : > { %v2819_v36 = vsel %vm1434_vm1, %v2818_v18, %v2811_v48  ;;  %v4212_v28 = vperm.slane %v4206_v26, %v9870_v56  ;;  %v2805_v61 = vrot.slane %v2804_v9, 4  ;;  %v4219_v0 = vrot.slane %v4216_v40, 4 }
 0x3ce   : > { %v2823_v24 = vperm.slane %v2819_v36, %v9870_v56  ;;  %v3092_v33 = vshrl.u32 %v2804_v9, 16  ;;  %v4191_v62 = vrot.slane %v4186_v38, 4  ;;  %v4194_v10 = vsel %vm1434_vm1, 0, %v4193_v4  ;;  %v1214_v36 = vpop.permute.xlu1 %1213 }
 0x3cf   : > { %v4217_v13 = vrot.slane %v4212_v28, 4  ;;  %v2806_v39 = vsel %vm1434_vm1, 0, %v2805_v61  ;;  %v3224_v41 = vrot.slane %v11359_v17, 4  ;;  %v4220_v2 = vsel %vm1434_vm1, 0, %v4219_v0 }
 0x3d0   : > { %v2824_v31 = vrot.slane %v2823_v24, 4  ;;  %v3090_v6 = vpack.i.b16 %v2823_v24, %v2804_v9  ;;  %v3093_v59 = vshrl.u32 %v2823_v24, 16  ;;  %v4192_v5 = vsel %vm1434_vm1, 0, %v4191_v62 }
 0x3d1   : > { %v5390_v58 = vpack.i.b16 %v5389_v43, %v5388_v57  ;;  %v4218_v35 = vsel %vm1434_vm1, 0, %v4217_v13  ;;  %v4810_v49 = vrot.slane %v4194_v10, 4  ;;  %v3100_v8 = vshrl.u32 %v2806_v39, 16 }
 0x3d2   : > { %v2825_v20 = vsel %vm1434_vm1, 0, %v2824_v31  ;;  %v3094_v27 = vpack.i.b16 %v3093_v59, %v3092_v33  ;;  %3135 = vst.msk [vmem:[%s9964_s9 + $0x38] sm:$0xf] %vm3120_vm2, %v3090_v6  ;;  %v4829_v14 = vrot.slane %v4220_v2, 4  ;;  %v4805_v48 = vsel %vm1434_vm1, %v4193_v4, %v4186_v38 }
 0x3d3   : > { %v3098_v15 = vpack.i.b16 %v2825_v20, %v2806_v39  ;;  %v3101_v63 = vshrl.u32 %v2825_v20, 16  ;;  %v4811_v57 = vsel %vm1434_vm1, %v4810_v49, %v4192_v5  ;;  %v4824_v11 = vsel %vm1434_vm1, %v4219_v0, %v4212_v28 }
 0x3d4   : > { %3151 = vst.msk [vmem:[%s9964_s9 + $0x78] sm:$0xf] %vm3120_vm2, %v3094_v27  ;;  %v5821_v60 = vperm.slane %v5387_v3, %v9829_v44  ;;  %v4815_v53 = vperm.slane %v4811_v57, %v9829_v44  ;;  %v4830_v37 = vsel %vm1434_vm1, %v4829_v14, %v4218_v35  ;;  %v5847_v16 = vperm.slane %v5390_v58, %v9829_v44 }
 0x3d5   : > { %v3102_v54 = vpack.i.b16 %v3101_v63, %v3100_v8  ;;  %3167 = vst.msk [vmem:[%s9964_s9 + $0xb8] sm:$0xf] %vm3120_vm2, %v3098_v15  ;;  %v1324_v46 = vshrl.u32 %v11359_v17, 16  ;;  %v4834_v18 = vperm.slane %v4830_v37, %v9829_v44  ;;  %v5393_v40 = vpack.i.b16 %v11318_v34, %v5262_v12 }
 0x3d6   : > { %v5829_v21 = vrot.slane %v5821_v60, 4  ;;  %v11388_v9 = vshrl.u32 %v3224_v41, 16  ;;  %v4809_v47 = vperm.slane %v4805_v48, %v9829_v44  ;;  %v4816_v26 = vrot.slane %v4815_v53, 4 }
 0x3d7   : > { %3183 = vst.msk [vmem:[%s9964_s9 + $0xf8] sm:$0xf] %vm3120_vm2, %v3102_v54  ;;  %v5394_v43 = vshrl.u32 %v5262_v12, 16  ;;  %v4828_v38 = vperm.slane %v4824_v11, %v9829_v44  ;;  %v4835_v4 = vrot.slane %v4834_v18, 4  ;;  %v5826_v28 = vperm.slane %v5393_v40, %v9829_v44 }
 0x3d8   : > { %v1325_v61 = vshrl.u32 %v1214_v36, 16  ;;  %v4817_v24 = vsel %vm1434_vm1, %v4816_v26, %v4809_v47  ;;  %v5855_v0 = vrot.slane %v5847_v16, 4  ;;  %v1323_v33 = vpack.i.b16 %v1214_v36, %v11359_v17  ;;  %v1150_v47 = vpop.permute.xlu0 %1149 }
 0x3d9   : > { %v5396_v3 = vpack.i.b16 %v5395_v55, %v5394_v43  ;;  %v4821_v62 = vperm.slane %v4817_v24, %v9870_v56  ;;  %v4836_v10 = vsel %vm1434_vm1, %v4835_v4, %v4828_v38  ;;  %v5827_v13 = vrot.slane %v5826_v28, 4  ;;  %v12880_v38 = vld [vmem:[#allocation18_spill] sm:$0xff] }
 0x3da   : > { %v5830_v39 = vsel %vm1434_vm1, %v5826_v28, %v5829_v21  ;;  %v4840_v31 = vperm.slane %v4836_v10, %v9870_v56  ;;  %v3240_v5 = vrot.slane %v1214_v36, 4  ;;  %v1326_v58 = vpack.i.b16 %v1325_v61, %v1324_v46 }
 0x3db   : > { %v5838_v6 = vperm.slane %v5830_v39, %v9870_v56  ;;  %v5852_v59 = vperm.slane %v5396_v3, %v9829_v44  ;;  %v4822_v2 = vrot.slane %v4821_v62, 4  ;;  %v5109_v34 = vshrl.u32 %v4821_v62, 16 }
 0x3dc   : > { %v5828_v55 = vsel %vm1434_vm1, %v5827_v13, %v5821_v60  ;;  %v4841_v20 = vrot.slane %v4840_v31, 4  ;;  %v5107_v27 = vpack.i.b16 %v4840_v31, %v4821_v62  ;;  %v5110_v35 = vshrl.u32 %v4840_v31, 16 }
 0x3dd   : > { %v5834_v49 = vperm.slane %v5828_v55, %v9870_v56  ;;  %v4823_v15 = vsel %vm1434_vm1, 0, %v4822_v2  ;;  %v5841_v8 = vrot.slane %v5838_v6, 4  ;;  %v5853_v63 = vrot.slane %v5852_v59, 4 }
 0x3de   : > { %v5856_v14 = vsel %vm1434_vm1, %v5852_v59, %v5855_v0  ;;  %v4842_v12 = vsel %vm1434_vm1, 0, %v4841_v20  ;;  %v5111_v48 = vpack.i.b16 %v5110_v35, %v5109_v34  ;;  %v5117_v57 = vshrl.u32 %v4823_v15, 16  ;;  %5151 = vst.msk [vmem:[%s10006_s24 + $0x38] sm:$0xf] %vm3120_vm2, %v5107_v27 }
 0x3df   : > { %v5839_v11 = vrot.slane %v5834_v49, 4  ;;  %v5115_v60 = vpack.i.b16 %v4842_v12, %v4823_v15  ;;  %v5118_v54 = vshrl.u32 %v4842_v12, 16  ;;  %v5842_v53 = vsel %vm1434_vm1, 0, %v5841_v8 }
 0x3e0   : > { %v5854_v37 = vsel %vm1434_vm1, %v5853_v63, %v5847_v16  ;;  %5167 = vst.msk [vmem:[%s10006_s24 + $0x78] sm:$0xf] %vm3120_vm2, %v5111_v48  ;;  %v5864_v21 = vperm.slane %v5856_v14, %v9870_v56  ;;  %v6565_v40 = vsel %vm1434_vm1, %v5841_v8, %v5834_v49  ;;  %v6570_v43 = vrot.slane %v5842_v53, 4 }
 0x3e1   : > { %v5840_v46 = vsel %vm1434_vm1, 0, %v5839_v11  ;;  %v5860_v18 = vperm.slane %v5854_v37, %v9870_v56  ;;  %v5119_v26 = vpack.i.b16 %v5118_v54, %v5117_v57  ;;  %5183 = vst.msk [vmem:[%s10006_s24 + $0xb8] sm:$0xf] %vm3120_vm2, %v5115_v60  ;;  %v1797_v36 = vperm.slane %v1323_v33, %v9829_v44 }
 0x3e2   : > { %v1318_v16 = vshrl.u32 %v12880_v38, 16  ;;  %v5867_v28 = vrot.slane %v5864_v21, 4  ;;  %v6569_v61 = vperm.slane %v6565_v40, %v9829_v44  ;;  %v3341_v24 = vpack.i.b16 %v3240_v5, %v3224_v41 }
 0x3e3   : > { %v5865_v4 = vrot.slane %v5860_v18, 4  ;;  %5199 = vst.msk [vmem:[%s10006_s24 + $0xf8] sm:$0xf] %vm3120_vm2, %v5119_v26  ;;  %v6571_v0 = vsel %vm1434_vm1, %v6570_v43, %v5840_v46  ;;  %v1823_v3 = vperm.slane %v1326_v58, %v9829_v44  ;;  %v3343_v62 = vshrl.u32 %v3240_v5, 16 }
 0x3e4   : > { %v1317_v10 = vpack.i.b16 %v1150_v47, %v12880_v38  ;;  %v5868_v13 = vsel %vm1434_vm1, 0, %v5867_v28  ;;  %v6575_v39 = vperm.slane %v6571_v0, %v9829_v44  ;;  %v6584_v31 = vsel %vm1434_vm1, %v5867_v28, %v5860_v18  ;;  %v11462_v0 = vpop.permute.xlu2 %1229 }
 0x3e5   : > { %v5866_v33 = vsel %vm1434_vm1, 0, %v5865_v4  ;;  %v6589_v6 = vrot.slane %v5868_v13, 4  ;;  %v1798_v17 = vrot.slane %v1797_v36, 4  ;;  %v3344_v41 = vpack.i.b16 %v3343_v62, %v11388_v9 }
 0x3e6   : > { %v3192_v59 = vrot.slane %v12880_v38, 4  ;;  %v6576_v2 = vrot.slane %v6575_v39, 4  ;;  %v6588_v34 = vperm.slane %v6584_v31, %v9829_v44  ;;  %v11440_v5 = vperm.slane %v3341_v24, %v9829_v44 }
 0x3e7   : > { %v1319_v55 = vshrl.u32 %v1150_v47, 16  ;;  %v6590_v58 = vsel %vm1434_vm1, %v6589_v6, %v5866_v33  ;;  %v11444_v20 = vperm.slane %v3344_v41, %v9829_v44  ;;  %v1792_v27 = vperm.slane %v1317_v10, %v9829_v44 }
 0x3e8   : > { %v3208_v35 = vrot.slane %v1150_v47, 4  ;;  %v6577_v49 = vsel %vm1434_vm1, %v6576_v2, %v6569_v61  ;;  %v6594_v9 = vperm.slane %v6590_v58, %v9829_v44  ;;  %v1824_v15 = vrot.slane %v1823_v3, 4 }
 0x3e9   : > { %v1320_v8 = vpack.i.b16 %v1319_v55, %v1318_v16  ;;  %v6581_v63 = vperm.slane %v6577_v49, %v9870_v56  ;;  %v3336_v14 = vshrl.u32 %v3192_v59, 16  ;;  %v1799_v12 = vsel %vm1434_vm1, %v1798_v17, %v1792_v27 }
 0x3ea   : > { %v1800_v48 = vrot.slane %v1792_v27, 4  ;;  %v6595_v57 = vrot.slane %v6594_v9, 4  ;;  %v3815_v11 = vrot.slane %v11440_v5, 4  ;;  %v1805_v60 = vperm.slane %v1799_v12, %v9870_v56 }
 0x3eb   : > { %v1818_v54 = vperm.slane %v1320_v8, %v9829_v44  ;;  %v6582_v53 = vrot.slane %v6581_v63, 4  ;;  %v3841_v37 = vrot.slane %v11444_v20, 4  ;;  %v3337_v18 = vshrl.u32 %v3208_v35, 16 }
 0x3ec   : > { %v1801_v46 = vsel %vm1434_vm1, %v1797_v36, %v1800_v48  ;;  %v6596_v21 = vsel %vm1434_vm1, %v6595_v57, %v6588_v34  ;;  %v3335_v26 = vpack.i.b16 %v3208_v35, %v3192_v59  ;;  %v7045_v28 = vshrl.u32 %v6581_v63, 16 }
 0x3ed   : > { %v1809_v40 = vperm.slane %v1801_v46, %v9870_v56  ;;  %v1825_v47 = vsel %vm1434_vm1, %v1824_v15, %v1818_v54  ;;  %v6583_v43 = vsel %vm1434_vm1, 0, %v6582_v53  ;;  %v6600_v38 = vperm.slane %v6596_v21, %v9870_v56 }
 0x3ee   : > { %v1826_v16 = vrot.slane %v1818_v54, 4  ;;  %v1831_v4 = vperm.slane %v1825_v47, %v9870_v56  ;;  %v1810_v61 = vrot.slane %v1805_v60, 4  ;;  %v3338_v36 = vpack.i.b16 %v3337_v18, %v3336_v14 }
 0x3ef   : > { %v1812_v24 = vrot.slane %v1809_v40, 4  ;;  %v6601_v62 = vrot.slane %v6600_v38, 4  ;;  %v7043_v10 = vpack.i.b16 %v6600_v38, %v6581_v63  ;;  %v7046_v33 = vshrl.u32 %v6600_v38, 16 }
 0x3f0   : > { %v1827_v13 = vsel %vm1434_vm1, %v1823_v3, %v1826_v16  ;;  %v7053_v39 = vshrl.u32 %v6583_v43, 16  ;;  %v1836_v17 = vrot.slane %v1831_v4, 4  ;;  %v1811_v27 = vsel %vm1434_vm1, 0, %v1810_v61  ;;  %v11497_v61 = vpop.permute.xlu2 %5263 }
 0x3f1   : > { %v1813_v31 = vsel %vm1434_vm1, 0, %v1812_v24  ;;  %v1835_v6 = vperm.slane %v1827_v13, %v9870_v56  ;;  %v6602_v41 = vsel %vm1434_vm1, 0, %v6601_v62  ;;  %v7047_v59 = vpack.i.b16 %v7046_v33, %v7045_v28  ;;  %7207 = vst.msk [vmem:[%s10097_s14 + $0x18] sm:$0xf] %vm3120_vm2, %v7043_v10 }
 0x3f2   : > { %v2522_v2 = vsel %vm1434_vm1, %v1812_v24, %v1805_v60  ;;  %v2527_v34 = vrot.slane %v1813_v31, 4  ;;  %v7051_v55 = vpack.i.b16 %v6602_v41, %v6583_v43  ;;  %v7054_v58 = vshrl.u32 %v6602_v41, 16 }
 0x3f3   : > { %v1838_v3 = vrot.slane %v1835_v6, 4  ;;  %v3248_v35 = vrot.slane %v11462_v0, 4  ;;  %7223 = vst.msk [vmem:[%s10097_s14 + $0x58] sm:$0xf] %vm3120_vm2, %v7047_v59  ;;  %v3809_v9 = vperm.slane %v3335_v26, %v9829_v44  ;;  %v3835_v15 = vperm.slane %v3338_v36, %v9829_v44 }
 0x3f4   : > { %v2528_v49 = vsel %vm1434_vm1, %v2527_v34, %v1811_v27  ;;  %v7055_v8 = vpack.i.b16 %v7054_v58, %v7053_v39  ;;  %7239 = vst.msk [vmem:[%s10097_s14 + $0x98] sm:$0xf] %vm3120_vm2, %v7051_v55  ;;  %v2526_v14 = vperm.slane %v2522_v2, %v9829_v44  ;;  %v1837_v48 = vsel %vm1434_vm1, 0, %v1836_v17  ;;  %v1166_v17 = vpop.permute.xlu1 %1165 }
 0x3f5   : > { %v1839_v63 = vsel %vm1434_vm1, 0, %v1838_v3  ;;  %v2532_v12 = vperm.slane %v2528_v49, %v9829_v44  ;;  %v3816_v60 = vsel %vm1434_vm1, %v3815_v11, %v3809_v9  ;;  %v3817_v54 = vrot.slane %v3809_v9, 4 }
 0x3f6   : > { %v2546_v57 = vrot.slane %v1839_v63, 4  ;;  %7255 = vst.msk [vmem:[%s10097_s14 + $0xd8] sm:$0xf] %vm3120_vm2, %v7055_v8  ;;  %v3822_v46 = vperm.slane %v3816_v60, %v9870_v56  ;;  %v3842_v18 = vsel %vm1434_vm1, %v3841_v37, %v3835_v15  ;;  %v3843_v21 = vrot.slane %v3835_v15, 4 }
 0x3f7   : > { %v2533_v53 = vrot.slane %v2532_v12, 4  ;;  %v2541_v40 = vsel %vm1434_vm1, %v1838_v3, %v1831_v4  ;;  %v3818_v26 = vsel %vm1434_vm1, %v11440_v5, %v3817_v54  ;;  %v3848_v43 = vperm.slane %v3842_v18, %v9870_v56 }
 0x3f8   : > { %v2547_v47 = vsel %vm1434_vm1, %v2546_v57, %v1837_v48  ;;  %v3826_v16 = vperm.slane %v3818_v26, %v9870_v56  ;;  %v3827_v28 = vrot.slane %v3822_v46, 4  ;;  %v3844_v4 = vsel %vm1434_vm1, %v11444_v20, %v3843_v21 }
 0x3f9   : > { %v2534_v11 = vsel %vm1434_vm1, %v2533_v53, %v2526_v14  ;;  %v2551_v38 = vperm.slane %v2547_v47, %v9829_v44  ;;  %v3853_v24 = vrot.slane %v3848_v43, 4  ;;  %v1414_v36 = vshrl.u32 %v9812_v23, 16 }
 0x3fa   : > { %v2538_v37 = vperm.slane %v2534_v11, %v9870_v56  ;;  %v2545_v5 = vperm.slane %v2541_v40, %v9829_v44  ;;  %v3829_v10 = vrot.slane %v3826_v16, 4  ;;  %v3852_v33 = vperm.slane %v3844_v4, %v9870_v56  ;;  %v1152_v16 = vpop.permute.xlu2 %1151 }
 0x3fb   : > { %v2552_v62 = vrot.slane %v2551_v38, 4  ;;  %v3828_v31 = vsel %vm1434_vm1, 0, %v3827_v28  ;;  %v3200_v6 = vrot.slane %v9812_v23, 4  ;;  %v3854_v58 = vsel %vm1434_vm1, 0, %v3853_v24 }
 0x3fc   : > { %v2539_v13 = vrot.slane %v2538_v37, 4  ;;  %v2980_v39 = vshrl.u32 %v2538_v37, 16  ;;  %v3830_v20 = vsel %vm1434_vm1, 0, %v3829_v10  ;;  %v3855_v59 = vrot.slane %v3852_v33, 4 }
 0x3fd   : > { %v2553_v41 = vsel %vm1434_vm1, %v2552_v62, %v2545_v5  ;;  %v4539_v2 = vsel %vm1434_vm1, %v3829_v10, %v3822_v46  ;;  %v4544_v27 = vrot.slane %v3830_v20, 4  ;;  %v1413_v9 = vpack.i.b16 %v1166_v17, %v9812_v23 }
 0x3fe   : > { %v2540_v34 = vsel %vm1434_vm1, 0, %v2539_v13  ;;  %v2557_v55 = vperm.slane %v2553_v41, %v9870_v56  ;;  %v3856_v3 = vsel %vm1434_vm1, 0, %v3855_v59  ;;  %v4543_v49 = vperm.slane %v4539_v2, %v9829_v44  ;;  %v1198_v2 = vpop.permute.xlu0 %1197 }
 0x3ff   : > { %v1415_v15 = vshrl.u32 %v1166_v17, 16  ;;  %v4545_v12 = vsel %vm1434_vm1, %v4544_v27, %v3828_v31  ;;  %v2988_v48 = vshrl.u32 %v2540_v34, 16  ;;  %v4558_v60 = vsel %vm1434_vm1, %v3855_v59, %v3848_v43 }
 0x400   : > { %v2558_v8 = vrot.slane %v2557_v55, 4  ;;  %v2978_v63 = vpack.i.b16 %v2557_v55, %v2538_v37  ;;  %v2981_v14 = vshrl.u32 %v2557_v55, 16  ;;  %v4549_v57 = vperm.slane %v4545_v12, %v9829_v44 }
 0x401   : > { %v4563_v54 = vrot.slane %v3856_v3, 4  ;;  %v1416_v23 = vpack.i.b16 %v1415_v15, %v1414_v36  ;;  %v3216_v18 = vrot.slane %v1166_v17, 4  ;;  %v1421_v11 = vshrl.u32 %v11462_v0, 16 }
 0x402   : > { %v2559_v53 = vsel %vm1434_vm1, 0, %v2558_v8  ;;  %v2982_v46 = vpack.i.b16 %v2981_v14, %v2980_v39  ;;  %3128 = vst.msk [vmem:[%s9964_s9 + $0x1c] sm:$0xf] %vm3120_vm2, %v2978_v63  ;;  %v4550_v47 = vrot.slane %v4549_v57, 4  ;;  %v11526_v43 = vshrl.u32 %v3248_v35, 16 }
 0x403   : > { %v2986_v21 = vpack.i.b16 %v2559_v53, %v2540_v34  ;;  %v2989_v40 = vshrl.u32 %v2559_v53, 16  ;;  %v4564_v26 = vsel %vm1434_vm1, %v4563_v54, %v3854_v58  ;;  %v3431_v4 = vpack.i.b16 %v3216_v18, %v3200_v6 }
 0x404   : > { %3144 = vst.msk [vmem:[%s9964_s9 + $0x5c] sm:$0xf] %vm3120_vm2, %v2982_v46  ;;  %v4568_v38 = vperm.slane %v4564_v26, %v9829_v44  ;;  %v4551_v37 = vsel %vm1434_vm1, %v4550_v47, %v4543_v49  ;;  %v3433_v24 = vshrl.u32 %v3216_v18, 16  ;;  %v4562_v5 = vperm.slane %v4558_v60, %v9829_v44 }
 0x405   : > { %v2990_v28 = vpack.i.b16 %v2989_v40, %v2988_v48  ;;  %3160 = vst.msk [vmem:[%s9964_s9 + $0x9c] sm:$0xf] %vm3120_vm2, %v2986_v21  ;;  %v4555_v36 = vperm.slane %v4551_v37, %v9870_v56  ;;  %v3432_v10 = vshrl.u32 %v3200_v6, 16  ;;  %v2208_v33 = vperm.slane %v1413_v9, %v9829_v44 }
 0x406   : > { %v4569_v62 = vrot.slane %v4568_v38, 4  ;;  %v2234_v13 = vperm.slane %v1416_v23, %v9829_v44  ;;  %v1330_v39 = vshrl.u32 %v9818_v52, 16  ;;  %v1331_v31 = vshrl.u32 %v1152_v16, 16 }
 0x407   : > { %3176 = vst.msk [vmem:[%s9964_s9 + $0xdc] sm:$0xf] %vm3120_vm2, %v2990_v28  ;;  %v4556_v17 = vrot.slane %v4555_v36, 4  ;;  %v3434_v20 = vpack.i.b16 %v3433_v24, %v3432_v10  ;;  %v1329_v59 = vpack.i.b16 %v1152_v16, %v9818_v52  ;;  %v5406_v34 = vshrl.u32 %v11497_v61, 16 }
 0x408   : > { %v4570_v41 = vsel %vm1434_vm1, %v4569_v62, %v4562_v5  ;;  %v11546_v55 = vperm.slane %v3431_v4, %v9829_v44  ;;  %v3193_v58 = vrot.slane %v9818_v52, 4  ;;  %v4997_v3 = vshrl.u32 %v4555_v36, 16 }
 0x409   : > { %v4574_v6 = vperm.slane %v4570_v41, %v9870_v56  ;;  %v4557_v27 = vsel %vm1434_vm1, 0, %v4556_v17  ;;  %v1332_v49 = vpack.i.b16 %v1331_v31, %v1330_v39  ;;  %v3209_v9 = vrot.slane %v1152_v16, 4 }
 0x40a   : > { %v1419_v14 = vpack.i.b16 %v11462_v0, %v1198_v2  ;;  %v2216_v12 = vrot.slane %v2208_v33, 4  ;;  %v2242_v48 = vrot.slane %v2234_v13, 4  ;;  %v11552_v57 = vperm.slane %v3434_v20, %v9829_v44 }
 0x40b   : > { %v4575_v15 = vrot.slane %v4574_v6, 4  ;;  %v4995_v8 = vpack.i.b16 %v4574_v6, %v4555_v36  ;;  %v4998_v63 = vshrl.u32 %v4574_v6, 16  ;;  %v11555_v60 = vperm.slane %v1329_v59, %v9829_v44 }
 0x40c   : > { %v3347_v53 = vpack.i.b16 %v3209_v9, %v3193_v58  ;;  %v1420_v46 = vshrl.u32 %v1198_v2, 16  ;;  %v5005_v18 = vshrl.u32 %v4557_v27, 16  ;;  %v11561_v40 = vperm.slane %v1332_v49, %v9829_v44 }
 0x40d   : > { %v4576_v52 = vsel %vm1434_vm1, 0, %v4575_v15  ;;  %v4999_v54 = vpack.i.b16 %v4998_v63, %v4997_v3  ;;  %5144 = vst.msk [vmem:[%s10006_s24 + $0x1c] sm:$0xf] %vm3120_vm2, %v4995_v8  ;;  %v4233_v47 = vrot.slane %v11546_v55, 4  ;;  %v2213_v38 = vperm.slane %v1419_v14, %v9829_v44 }
 0x40e   : > { %v5003_v23 = vpack.i.b16 %v4576_v52, %v4557_v27  ;;  %v5006_v21 = vshrl.u32 %v4576_v52, 16  ;;  %v1422_v26 = vpack.i.b16 %v1421_v11, %v1420_v46  ;;  %v3232_v16 = vrot.slane %v1198_v2, 4 }
 0x40f   : > { %5160 = vst.msk [vmem:[%s10006_s24 + $0x5c] sm:$0xf] %vm3120_vm2, %v4999_v54  ;;  %v4259_v37 = vrot.slane %v11552_v57, 4  ;;  %v3348_v4 = vshrl.u32 %v3193_v58, 16  ;;  %v3349_v24 = vshrl.u32 %v3209_v9, 16  ;;  %v11571_v36 = vperm.slane %v3347_v53, %v9829_v44 }
 0x410   : > { %v5007_v28 = vpack.i.b16 %v5006_v21, %v5005_v18  ;;  %5176 = vst.msk [vmem:[%s10006_s24 + $0x9c] sm:$0xf] %vm3120_vm2, %v5003_v23  ;;  %v2214_v5 = vrot.slane %v2213_v38, 4  ;;  %v2217_v62 = vsel %vm1434_vm1, %v2213_v38, %v2216_v12  ;;  %v2239_v10 = vperm.slane %v1422_v26, %v9829_v44  ;;  %v5296_v38 = vpop.permute.xlu1 %5295 }
 0x411   : > { %v1852_v11 = vrot.slane %v11555_v60, 4  ;;  %v1878_v39 = vrot.slane %v11561_v40, 4  ;;  %v2225_v31 = vperm.slane %v2217_v62, %v9870_v56  ;;  %v3437_v17 = vpack.i.b16 %v3248_v35, %v3232_v16 }
 0x412   : > { %5192 = vst.msk [vmem:[%s10006_s24 + $0xdc] sm:$0xf] %vm3120_vm2, %v5007_v28  ;;  %v2215_v41 = vsel %vm1434_vm1, %v2214_v5, %v2208_v33  ;;  %v2240_v20 = vrot.slane %v2239_v10, 4  ;;  %v2243_v59 = vsel %vm1434_vm1, %v2239_v10, %v2242_v48  ;;  %v3438_v2 = vshrl.u32 %v3232_v16, 16 }
 0x413   : > { %v3350_v6 = vpack.i.b16 %v3349_v24, %v3348_v4  ;;  %v2221_v58 = vperm.slane %v2215_v41, %v9870_v56  ;;  %v2228_v27 = vrot.slane %v2225_v31, 4  ;;  %v2251_v3 = vperm.slane %v2243_v59, %v9870_v56 }
 0x414   : > { %v3869_v49 = vrot.slane %v11571_v36, 4  ;;  %v2241_v9 = vsel %vm1434_vm1, %v2240_v20, %v2234_v13  ;;  %v4230_v15 = vperm.slane %v3437_v17, %v9829_v44  ;;  %v5412_v0 = vshrl.u32 %v9825_v42, 16 }
 0x415   : > { %v2226_v35 = vrot.slane %v2221_v58, 4  ;;  %v2229_v33 = vsel %vm1434_vm1, 0, %v2228_v27  ;;  %v2247_v8 = vperm.slane %v2241_v9, %v9870_v56  ;;  %v2254_v63 = vrot.slane %v2251_v3, 4 }
 0x416   : > { %v2831_v14 = vrot.slane %v2229_v33, 4  ;;  %v3440_v12 = vpack.i.b16 %v11526_v43, %v3438_v2  ;;  %v4231_v48 = vrot.slane %v4230_v15, 4  ;;  %v5400_v52 = vshrl.u32 %v9816_v51, 16 }
 0x417   : > { %v2227_v54 = vsel %vm1434_vm1, 0, %v2226_v35  ;;  %v2252_v53 = vrot.slane %v2247_v8, 4  ;;  %v2255_v13 = vsel %vm1434_vm1, 0, %v2254_v63  ;;  %v4234_v46 = vsel %vm1434_vm1, %v4230_v15, %v4233_v47 }
 0x418   : > { %v2826_v23 = vsel %vm1434_vm1, %v2228_v27, %v2221_v58  ;;  %v2832_v18 = vsel %vm1434_vm1, %v2831_v14, %v2227_v54  ;;  %v2850_v21 = vrot.slane %v2255_v13, 4  ;;  %v4232_v26 = vsel %vm1434_vm1, %v4231_v48, %v11546_v55 }
 0x419   : > { %v11602_v43 = vperm.slane %v3350_v6, %v9829_v44  ;;  %v2253_v16 = vsel %vm1434_vm1, 0, %v2252_v53  ;;  %v2836_v28 = vperm.slane %v2832_v18, %v9829_v44  ;;  %v4238_v4 = vperm.slane %v4232_v26, %v9870_v56 }
 0x41a   : > { %v2845_v47 = vsel %vm1434_vm1, %v2254_v63, %v2247_v8  ;;  %v2851_v24 = vsel %vm1434_vm1, %v2850_v21, %v2253_v16  ;;  %v4242_v5 = vperm.slane %v4234_v46, %v9870_v56  ;;  %v4256_v62 = vperm.slane %v3440_v12, %v9829_v44 }
 0x41b   : > { %v2830_v55 = vperm.slane %v2826_v23, %v9829_v44  ;;  %v2837_v10 = vrot.slane %v2836_v28, 4  ;;  %v2855_v31 = vperm.slane %v2851_v24, %v9829_v44  ;;  %v5405_v17 = vpack.i.b16 %v5296_v38, %v11497_v61  ;;  %v5234_v61 = vpop.permute.xlu2 %5233 }
 0x41c   : > { %v4243_v41 = vrot.slane %v4238_v4, 4  ;;  %v4245_v20 = vrot.slane %v4242_v5, 4  ;;  %v4257_v59 = vrot.slane %v4256_v62, 4  ;;  %v4260_v2 = vsel %vm1434_vm1, %v4256_v62, %v4259_v37 }
 0x41d   : > { %v2838_v6 = vsel %vm1434_vm1, %v2837_v10, %v2830_v55  ;;  %v2849_v58 = vperm.slane %v2845_v47, %v9829_v44  ;;  %v2856_v27 = vrot.slane %v2855_v31, 4  ;;  %v4268_v3 = vperm.slane %v4260_v2, %v9870_v56  ;;  %v5232_v10 = vpop.permute.xlu0 %5231 }
 0x41e   : > { %v2842_v9 = vperm.slane %v2838_v6, %v9870_v56  ;;  %v4246_v15 = vsel %vm1434_vm1, 0, %v4245_v20  ;;  %v4258_v35 = vsel %vm1434_vm1, %v4257_v59, %v11552_v57  ;;  %v5407_v33 = vshrl.u32 %v5296_v38, 16 }
 0x41f   : > { %v2857_v8 = vsel %vm1434_vm1, %v2856_v27, %v2849_v58  ;;  %v4264_v63 = vperm.slane %v4258_v35, %v9870_v56  ;;  %v4271_v37 = vrot.slane %v4268_v3, 4  ;;  %v11625_v14 = vperm.slane %v5405_v17, %v9829_v44 }
 0x420   : > { %v2843_v12 = vrot.slane %v2842_v9, 4  ;;  %v2861_v48 = vperm.slane %v2857_v8, %v9870_v56  ;;  %v4244_v54 = vsel %vm1434_vm1, 0, %v4243_v41  ;;  %v4848_v53 = vrot.slane %v4246_v15, 4 }
 0x421   : > { %v3108_v13 = vshrl.u32 %v2842_v9, 16  ;;  %v4269_v46 = vrot.slane %v4264_v63, 4  ;;  %v4272_v57 = vsel %vm1434_vm1, 0, %v4271_v37  ;;  %v4843_v23 = vsel %vm1434_vm1, %v4245_v20, %v4238_v4 }
 0x422   : > { %v2844_v18 = vsel %vm1434_vm1, 0, %v2843_v12  ;;  %v2862_v21 = vrot.slane %v2861_v48, 4  ;;  %v3106_v26 = vpack.i.b16 %v2861_v48, %v2842_v9  ;;  %v3109_v38 = vshrl.u32 %v2861_v48, 16 }
 0x423   : > { %v4270_v16 = vsel %vm1434_vm1, 0, %v4269_v46  ;;  %v4849_v28 = vsel %vm1434_vm1, %v4848_v53, %v4244_v54  ;;  %v5408_v47 = vpack.i.b16 %v5407_v33, %v5406_v34  ;;  %v5460_v24 = vshrl.u32 %v9827_v1, 16 }
 0x424   : > { %v2863_v5 = vsel %vm1434_vm1, 0, %v2862_v21  ;;  %v3110_v62 = vpack.i.b16 %v3109_v38, %v3108_v13  ;;  %3136 = vst.msk [vmem:[%s9964_s9 + $0x3c] sm:$0xf] %vm3120_vm2, %v3106_v26  ;;  %v4853_v4 = vperm.slane %v4849_v28, %v9829_v44  ;;  %v4867_v55 = vrot.slane %v4272_v57, 4  ;;  %v11662_v13 = vpop.permute.xlu1 %1183 }
 0x425   : > { %v3114_v31 = vpack.i.b16 %v2863_v5, %v2844_v18  ;;  %v3116_v17 = vshrl.u32 %v2844_v18, 16  ;;  %v3117_v41 = vshrl.u32 %v2863_v5, 16  ;;  %v4847_v20 = vperm.slane %v4843_v23, %v9829_v44 }
 0x426   : > { %3152 = vst.msk [vmem:[%s9964_s9 + $0x7c] sm:$0xf] %vm3120_vm2, %v3110_v62  ;;  %v4854_v34 = vrot.slane %v4853_v4, 4  ;;  %v4862_v59 = vsel %vm1434_vm1, %v4271_v37, %v4264_v63  ;;  %v4868_v2 = vsel %vm1434_vm1, %v4867_v55, %v4270_v16  ;;  %v5879_v6 = vrot.slane %v11625_v14, 4 }
 0x427   : > { %v3118_v58 = vpack.i.b16 %v3117_v41, %v3116_v17  ;;  %3168 = vst.msk [vmem:[%s9964_s9 + $0xbc] sm:$0xf] %vm3120_vm2, %v3114_v31  ;;  %v4872_v27 = vperm.slane %v4868_v2, %v9829_v44  ;;  %v5904_v3 = vperm.slane %v5408_v47, %v9829_v44  ;;  %v5399_v9 = vpack.i.b16 %v5232_v10, %v9816_v51 }
 0x428   : > { %v4855_v15 = vsel %vm1434_vm1, %v4854_v34, %v4847_v20  ;;  %v5411_v35 = vpack.i.b16 %v5234_v61, %v9825_v42  ;;  %v5413_v33 = vshrl.u32 %v5234_v61, 16  ;;  %v5401_v8 = vshrl.u32 %v5232_v10, 16  ;;  %v1216_v20 = vpop.permute.xlu0 %1215 }
 0x429   : > { %3184 = vst.msk [vmem:[%s9964_s9 + $0xfc] sm:$0xf] %vm3120_vm2, %v3118_v58  ;;  %v4859_v63 = vperm.slane %v4855_v15, %v9870_v56  ;;  %v4866_v37 = vperm.slane %v4862_v59, %v9829_v44  ;;  %v4873_v12 = vrot.slane %v4872_v27, 4  ;;  %v5873_v48 = vperm.slane %v5399_v9, %v9829_v44 }
 0x42a   : > { %v3895_v54 = vrot.slane %v11602_v43, 4  ;;  %v5402_v53 = vpack.i.b16 %v5401_v8, %v5400_v52  ;;  %v1342_v46 = vshrl.u32 %v9831_v50, 16  ;;  %v3194_v57 = vrot.slane %v9831_v50, 4 }
 0x42b   : > { %v4860_v23 = vrot.slane %v4859_v63, 4  ;;  %v4874_v18 = vsel %vm1434_vm1, %v4873_v12, %v4866_v37  ;;  %v5905_v21 = vrot.slane %v5904_v3, 4  ;;  %v5880_v26 = vsel %vm1434_vm1, %v5879_v6, %v5873_v48 }
 0x42c   : > { %v4878_v38 = vperm.slane %v4874_v18, %v9870_v56  ;;  %v5414_v16 = vpack.i.b16 %v5413_v33, %v5412_v0  ;;  %v11672_v51 = vperm.slane %v5411_v35, %v9829_v44  ;;  %v5881_v52 = vrot.slane %v5873_v48, 4 }
 0x42d   : > { %v4861_v28 = vsel %vm1434_vm1, 0, %v4860_v23  ;;  %v5886_v47 = vperm.slane %v5880_v26, %v9870_v56  ;;  %v5899_v5 = vperm.slane %v5402_v53, %v9829_v44  ;;  %v3225_v62 = vrot.slane %v11662_v13, 4 }
 0x42e   : > { %v4879_v4 = vrot.slane %v4878_v38, 4  ;;  %v5123_v55 = vpack.i.b16 %v4878_v38, %v4859_v63  ;;  %v5125_v10 = vshrl.u32 %v4859_v63, 16  ;;  %v5126_v31 = vshrl.u32 %v4878_v38, 16 }
 0x42f   : > { %v5133_v42 = vshrl.u32 %v4861_v28, 16  ;;  %v5882_v0 = vsel %vm1434_vm1, %v11625_v14, %v5881_v52  ;;  %v5906_v17 = vsel %vm1434_vm1, %v5905_v21, %v5899_v5  ;;  %v5907_v41 = vrot.slane %v5899_v5, 4 }
 0x430   : > { %v4880_v61 = vsel %vm1434_vm1, 0, %v4879_v4  ;;  %v5127_v34 = vpack.i.b16 %v5126_v31, %v5125_v10  ;;  %5152 = vst.msk [vmem:[%s10006_s24 + $0x3c] sm:$0xf] %vm3120_vm2, %v5123_v55  ;;  %v5890_v59 = vperm.slane %v5882_v0, %v9870_v56  ;;  %v5912_v2 = vperm.slane %v5906_v17, %v9870_v56 }
 0x431   : > { %v5131_v6 = vpack.i.b16 %v4880_v61, %v4861_v28  ;;  %v5134_v58 = vshrl.u32 %v4880_v61, 16  ;;  %v5891_v27 = vrot.slane %v5886_v47, 4  ;;  %v5908_v14 = vsel %vm1434_vm1, %v5904_v3, %v5907_v41 }
 0x432   : > { %5168 = vst.msk [vmem:[%s10006_s24 + $0x7c] sm:$0xf] %vm3120_vm2, %v5127_v34  ;;  %v5893_v9 = vrot.slane %v5890_v59, 4  ;;  %v5916_v15 = vperm.slane %v5908_v14, %v9870_v56  ;;  %v5917_v35 = vrot.slane %v5912_v2, 4  ;;  %v1335_v33 = vpack.i.b16 %v1216_v20, %v11662_v13 }
 0x433   : > { %v5135_v8 = vpack.i.b16 %v5134_v58, %v5133_v42  ;;  %5184 = vst.msk [vmem:[%s10006_s24 + $0xbc] sm:$0xf] %vm3120_vm2, %v5131_v6  ;;  %v11694_v63 = vperm.slane %v5414_v16, %v9829_v44  ;;  %v1336_v37 = vshrl.u32 %v11662_v13, 16  ;;  %v1337_v12 = vshrl.u32 %v1216_v20, 16 }
 0x434   : > { %v5894_v48 = vsel %vm1434_vm1, 0, %v5893_v9  ;;  %v5919_v3 = vrot.slane %v5916_v15, 4  ;;  %v6603_v53 = vsel %vm1434_vm1, %v5893_v9, %v5886_v47  ;;  %v11699_v23 = vshrl.u32 %v3225_v62, 16 }
 0x435   : > { %5200 = vst.msk [vmem:[%s10006_s24 + $0xfc] sm:$0xf] %vm3120_vm2, %v5135_v8  ;;  %v5892_v18 = vsel %vm1434_vm1, 0, %v5891_v27  ;;  %v6608_v21 = vrot.slane %v5894_v48, 4  ;;  %v1338_v26 = vpack.i.b16 %v1337_v12, %v1336_v37  ;;  %v1849_v38 = vperm.slane %v1335_v33, %v9829_v44 }
 0x436   : > { %v5918_v16 = vsel %vm1434_vm1, 0, %v5917_v35  ;;  %v5920_v13 = vsel %vm1434_vm1, 0, %v5919_v3  ;;  %v6607_v52 = vperm.slane %v6603_v53, %v9829_v44  ;;  %v3241_v28 = vrot.slane %v1216_v20, 4 }
 0x437   : > { %v6609_v5 = vsel %vm1434_vm1, %v6608_v21, %v5892_v18  ;;  %v6622_v47 = vsel %vm1434_vm1, %v5919_v3, %v5912_v2  ;;  %v6627_v4 = vrot.slane %v5920_v13, 4  ;;  %v1850_v55 = vrot.slane %v1849_v38, 4 }
 0x438   : > { %v6613_v10 = vperm.slane %v6609_v5, %v9829_v44  ;;  %v1853_v31 = vsel %vm1434_vm1, %v1849_v38, %v1852_v11  ;;  %v1875_v42 = vperm.slane %v1338_v26, %v9829_v44  ;;  %v3353_v0 = vpack.i.b16 %v3241_v28, %v3225_v62 }
 0x439   : > { %v6628_v17 = vsel %vm1434_vm1, %v6627_v4, %v5918_v16  ;;  %v1851_v41 = vsel %vm1434_vm1, %v1850_v55, %v11555_v60  ;;  %v1861_v20 = vperm.slane %v1853_v31, %v9870_v56  ;;  %v3355_v61 = vshrl.u32 %v3241_v28, 16 }
 0x43a   : > { %v6614_v34 = vrot.slane %v6613_v10, 4  ;;  %v6632_v59 = vperm.slane %v6628_v17, %v9829_v44  ;;  %v1857_v2 = vperm.slane %v1851_v41, %v9870_v56  ;;  %v1876_v6 = vrot.slane %v1875_v42, 4 }
 0x43b   : > { %v6626_v58 = vperm.slane %v6622_v47, %v9829_v44  ;;  %v1864_v11 = vrot.slane %v1861_v20, 4  ;;  %v1879_v62 = vsel %vm1434_vm1, %v1875_v42, %v1878_v39  ;;  %v3866_v27 = vperm.slane %v3353_v0, %v9829_v44 }
 0x43c   : > { %v6615_v60 = vsel %vm1434_vm1, %v6614_v34, %v6607_v52  ;;  %v6633_v14 = vrot.slane %v6632_v59, 4  ;;  %v1862_v9 = vrot.slane %v1857_v2, 4  ;;  %v1877_v15 = vsel %vm1434_vm1, %v1876_v6, %v11561_v40 }
 0x43d   : > { %v6619_v35 = vperm.slane %v6615_v60, %v9870_v56  ;;  %v1865_v33 = vsel %vm1434_vm1, 0, %v1864_v11  ;;  %v1883_v8 = vperm.slane %v1877_v15, %v9870_v56  ;;  %v1887_v37 = vperm.slane %v1879_v62, %v9870_v56  ;;  %v11759_v62 = vpop.permute.xlu2 %5305 }
 0x43e   : > { %v6634_v12 = vsel %vm1434_vm1, %v6633_v14, %v6626_v58  ;;  %v1863_v39 = vsel %vm1434_vm1, 0, %v1862_v9  ;;  %v2565_v48 = vrot.slane %v1865_v33, 4  ;;  %v3356_v3 = vpack.i.b16 %v3355_v61, %v11699_v23 }
 0x43f   : > { %v6620_v53 = vrot.slane %v6619_v35, 4  ;;  %v6638_v18 = vperm.slane %v6634_v12, %v9870_v56  ;;  %v1888_v21 = vrot.slane %v1883_v8, 4  ;;  %v2560_v40 = vsel %vm1434_vm1, %v1864_v11, %v1857_v2 }
 0x440   : > { %v7061_v26 = vshrl.u32 %v6619_v35, 16  ;;  %v1890_v38 = vrot.slane %v1887_v37, 4  ;;  %v2566_v16 = vsel %vm1434_vm1, %v2565_v48, %v1863_v39  ;;  %v3867_v13 = vrot.slane %v3866_v27, 4 }
 0x441   : > { %v6621_v52 = vsel %vm1434_vm1, 0, %v6620_v53  ;;  %v6639_v28 = vrot.slane %v6638_v18, 4  ;;  %v7059_v5 = vpack.i.b16 %v6638_v18, %v6619_v35  ;;  %v7062_v47 = vshrl.u32 %v6638_v18, 16 }
 0x442   : > { %v1889_v23 = vsel %vm1434_vm1, 0, %v1888_v21  ;;  %v1891_v4 = vsel %vm1434_vm1, 0, %v1890_v38  ;;  %v2564_v55 = vperm.slane %v2560_v40, %v9829_v44  ;;  %v2570_v10 = vperm.slane %v2566_v16, %v9829_v44 }
 0x443   : > { %v6640_v31 = vsel %vm1434_vm1, 0, %v6639_v28  ;;  %v7063_v42 = vpack.i.b16 %v7062_v47, %v7061_v26  ;;  %v7069_v0 = vshrl.u32 %v6621_v52, 16  ;;  %7208 = vst.msk [vmem:[%s10097_s14 + $0x1c] sm:$0xf] %vm3120_vm2, %v7059_v5  ;;  %v2584_v17 = vrot.slane %v1891_v4, 4 }
 0x444   : > { %v7067_v41 = vpack.i.b16 %v6640_v31, %v6621_v52  ;;  %v7070_v20 = vshrl.u32 %v6640_v31, 16  ;;  %v2571_v61 = vrot.slane %v2570_v10, 4  ;;  %v2579_v34 = vsel %vm1434_vm1, %v1890_v38, %v1883_v8 }
 0x445   : > { %7224 = vst.msk [vmem:[%s10097_s14 + $0x5c] sm:$0xf] %vm3120_vm2, %v7063_v42  ;;  %v2585_v59 = vsel %vm1434_vm1, %v2584_v17, %v1889_v23  ;;  %v3868_v2 = vsel %vm1434_vm1, %v3867_v13, %v11571_v36  ;;  %v3870_v6 = vsel %vm1434_vm1, %v3866_v27, %v3869_v49  ;;  %v3892_v58 = vperm.slane %v3356_v3, %v9829_v44  ;;  %v5242_v27 = vpop.permute.xlu1 %5241 }
 0x446   : > { %v7071_v11 = vpack.i.b16 %v7070_v20, %v7069_v0  ;;  %7240 = vst.msk [vmem:[%s10097_s14 + $0x9c] sm:$0xf] %vm3120_vm2, %v7067_v41  ;;  %v2572_v60 = vsel %vm1434_vm1, %v2571_v61, %v2564_v55  ;;  %v2589_v14 = vperm.slane %v2585_v59, %v9829_v44  ;;  %v3874_v9 = vperm.slane %v3868_v2, %v9870_v56 }
 0x447   : > { %v2576_v15 = vperm.slane %v2572_v60, %v9870_v56  ;;  %v3878_v35 = vperm.slane %v3870_v6, %v9870_v56  ;;  %v3893_v36 = vrot.slane %v3892_v58, 4  ;;  %v3896_v49 = vsel %vm1434_vm1, %v3892_v58, %v3895_v54 }
 0x448   : > { %7256 = vst.msk [vmem:[%s10097_s14 + $0xdc] sm:$0xf] %vm3120_vm2, %v7071_v11  ;;  %v2583_v33 = vperm.slane %v2579_v34, %v9829_v44  ;;  %v2590_v8 = vrot.slane %v2589_v14, 4  ;;  %v3879_v37 = vrot.slane %v3874_v9, 4  ;;  %v3904_v12 = vperm.slane %v3896_v49, %v9870_v56  ;;  %v5274_v34 = vpop.permute.xlu0 %5273 }
 0x449   : > { %v5467_v39 = vshrl.u32 %v11759_v62, 16  ;;  %v2577_v48 = vrot.slane %v2576_v15, 4  ;;  %v3881_v3 = vrot.slane %v3878_v35, 4  ;;  %v3894_v53 = vsel %vm1434_vm1, %v3893_v36, %v11602_v43 }
 0x44a   : > { %v2591_v18 = vsel %vm1434_vm1, %v2590_v8, %v2583_v33  ;;  %v3900_v54 = vperm.slane %v3894_v53, %v9870_v56  ;;  %v3907_v21 = vrot.slane %v3904_v12, 4  ;;  %v5459_v40 = vpack.i.b16 %v5242_v27, %v9827_v1 }
 0x44b   : > { %v2578_v26 = vsel %vm1434_vm1, 0, %v2577_v48  ;;  %v2595_v38 = vperm.slane %v2591_v18, %v9870_v56  ;;  %v2996_v16 = vshrl.u32 %v2576_v15, 16  ;;  %v3882_v13 = vsel %vm1434_vm1, 0, %v3881_v3 }
 0x44c   : > { %v3880_v52 = vsel %vm1434_vm1, 0, %v3879_v37  ;;  %v3905_v28 = vrot.slane %v3900_v54, 4  ;;  %v3908_v43 = vsel %vm1434_vm1, 0, %v3907_v21  ;;  %v4577_v5 = vsel %vm1434_vm1, %v3881_v3, %v3874_v9 }
 0x44d   : > { %v2596_v47 = vrot.slane %v2595_v38, 4  ;;  %v2994_v23 = vpack.i.b16 %v2595_v38, %v2576_v15  ;;  %v2997_v4 = vshrl.u32 %v2595_v38, 16  ;;  %v4582_v55 = vrot.slane %v3882_v13, 4  ;;  %v5266_v3 = vpop.permute.xlu1 %5265 }
 0x44e   : > { %v3004_v10 = vshrl.u32 %v2578_v26, 16  ;;  %v3906_v31 = vsel %vm1434_vm1, 0, %v3905_v28  ;;  %v4601_v42 = vrot.slane %v3908_v43, 4  ;;  %v5461_v0 = vshrl.u32 %v5242_v27, 16 }
 0x44f   : > { %v2597_v17 = vsel %vm1434_vm1, 0, %v2596_v47  ;;  %v2998_v41 = vpack.i.b16 %v2997_v4, %v2996_v16  ;;  %3129 = vst.msk [vmem:[%s9964_s9 + $0x20] sm:$0xf] %vm3120_vm2, %v2994_v23  ;;  %v4583_v20 = vsel %vm1434_vm1, %v4582_v55, %v3880_v52  ;;  %v4596_v61 = vsel %vm1434_vm1, %v3907_v21, %v3900_v54 }
 0x450   : > { %v3002_v59 = vpack.i.b16 %v2597_v17, %v2578_v26  ;;  %v3005_v2 = vshrl.u32 %v2597_v17, 16  ;;  %v4587_v6 = vperm.slane %v4583_v20, %v9829_v44  ;;  %v4602_v58 = vsel %vm1434_vm1, %v4601_v42, %v3906_v31 }
 0x451   : > { %3145 = vst.msk [vmem:[%s9964_s9 + $0x60] sm:$0xf] %vm3120_vm2, %v2998_v41  ;;  %v4581_v11 = vperm.slane %v4577_v5, %v9829_v44  ;;  %v4606_v60 = vperm.slane %v4602_v58, %v9829_v44  ;;  %v5462_v14 = vpack.i.b16 %v5461_v0, %v5460_v24  ;;  %v6133_v9 = vperm.slane %v5459_v40, %v9829_v44 }
 0x452   : > { %v3006_v15 = vpack.i.b16 %v3005_v2, %v3004_v10  ;;  %3161 = vst.msk [vmem:[%s9964_s9 + $0xa0] sm:$0xf] %vm3120_vm2, %v3002_v59  ;;  %v4588_v35 = vrot.slane %v4587_v6, 4  ;;  %v4600_v36 = vperm.slane %v4596_v61, %v9829_v44  ;;  %v5465_v49 = vpack.i.b16 %v11759_v62, %v5274_v34  ;;  %v5298_v59 = vpop.permute.xlu0 %5297  ;;  %v11831_v2 = vpop.permute.xlu2 %1217 }
 0x453   : > { %v4607_v27 = vrot.slane %v4606_v60, 4  ;;  %v6141_v33 = vrot.slane %v6133_v9, 4  ;;  %v6159_v8 = vperm.slane %v5462_v14, %v9829_v44  ;;  %v5466_v37 = vshrl.u32 %v5274_v34, 16 }
 0x454   : > { %v5933_v12 = vrot.slane %v11672_v51, 4  ;;  %v5959_v1 = vrot.slane %v11694_v63, 4  ;;  %3177 = vst.msk [vmem:[%s9964_s9 + $0xe0] sm:$0xf] %vm3120_vm2, %v3006_v15  ;;  %v4589_v24 = vsel %vm1434_vm1, %v4588_v35, %v4581_v11  ;;  %v6138_v48 = vperm.slane %v5465_v49, %v9829_v44 }
 0x455   : > { %v4593_v53 = vperm.slane %v4589_v24, %v9870_v56  ;;  %v4608_v62 = vsel %vm1434_vm1, %v4607_v27, %v4600_v36  ;;  %v5468_v18 = vpack.i.b16 %v5467_v39, %v5466_v37  ;;  %v11815_v54 = vshrl.u32 %v3194_v57, 16  ;;  %v11841_v37 = vpop.permute.xlu1 %1153 }
 0x456   : > { %v4612_v21 = vperm.slane %v4608_v62, %v9870_v56  ;;  %v6167_v40 = vrot.slane %v6159_v8, 4  ;;  %v6139_v26 = vrot.slane %v6138_v48, 4  ;;  %v6142_v38 = vsel %vm1434_vm1, %v6138_v48, %v6141_v33 }
 0x457   : > { %v4594_v16 = vrot.slane %v4593_v53, 4  ;;  %v5013_v13 = vshrl.u32 %v4593_v53, 16  ;;  %v6150_v52 = vperm.slane %v6142_v38, %v9870_v56  ;;  %v6164_v28 = vperm.slane %v5468_v18, %v9829_v44 }
 0x458   : > { %v4613_v43 = vrot.slane %v4612_v21, 4  ;;  %v5011_v5 = vpack.i.b16 %v4612_v21, %v4593_v53  ;;  %v5014_v39 = vshrl.u32 %v4612_v21, 16  ;;  %v6140_v47 = vsel %vm1434_vm1, %v6139_v26, %v6133_v9 }
 0x459   : > { %v4595_v23 = vsel %vm1434_vm1, 0, %v4594_v16  ;;  %v6146_v4 = vperm.slane %v6140_v47, %v9870_v56  ;;  %v6153_v55 = vrot.slane %v6150_v52, 4  ;;  %v6165_v10 = vrot.slane %v6164_v28, 4 }
 0x45a   : > { %v4614_v31 = vsel %vm1434_vm1, 0, %v4613_v43  ;;  %v5015_v42 = vpack.i.b16 %v5014_v39, %v5013_v13  ;;  %v5021_v0 = vshrl.u32 %v4595_v23, 16  ;;  %5145 = vst.msk [vmem:[%s10006_s24 + $0x20] sm:$0xf] %vm3120_vm2, %v5011_v5  ;;  %v6168_v17 = vsel %vm1434_vm1, %v6164_v28, %v6167_v40 }
 0x45b   : > { %v5019_v41 = vpack.i.b16 %v4614_v31, %v4595_v23  ;;  %v5022_v20 = vshrl.u32 %v4614_v31, 16  ;;  %v6151_v61 = vrot.slane %v6146_v4, 4  ;;  %v6154_v34 = vsel %vm1434_vm1, 0, %v6153_v55 }
 0x45c   : > { %5161 = vst.msk [vmem:[%s10006_s24 + $0x60] sm:$0xf] %vm3120_vm2, %v5015_v42  ;;  %v6166_v6 = vsel %vm1434_vm1, %v6165_v10, %v6159_v8  ;;  %v6176_v58 = vperm.slane %v6168_v17, %v9870_v56  ;;  %v6798_v11 = vrot.slane %v6154_v34, 4  ;;  %v5418_v60 = vshrl.u32 %v5266_v3, 16 }
 0x45d   : > { %v5023_v14 = vpack.i.b16 %v5022_v20, %v5021_v0  ;;  %5177 = vst.msk [vmem:[%s10006_s24 + $0xa0] sm:$0xf] %vm3120_vm2, %v5019_v41  ;;  %v6152_v9 = vsel %vm1434_vm1, 0, %v6151_v61  ;;  %v6172_v15 = vperm.slane %v6166_v6, %v9870_v56  ;;  %v6793_v35 = vsel %vm1434_vm1, %v6153_v55, %v6146_v4 }
 0x45e   : > { %v6179_v36 = vrot.slane %v6176_v58, 4  ;;  %v6799_v49 = vsel %vm1434_vm1, %v6798_v11, %v6152_v9  ;;  %v5417_v27 = vpack.i.b16 %v5298_v59, %v5266_v3  ;;  %v5419_v33 = vshrl.u32 %v5298_v59, 16 }
 0x45f   : > { %5193 = vst.msk [vmem:[%s10006_s24 + $0xe0] sm:$0xf] %vm3120_vm2, %v5023_v14  ;;  %v1349_v8 = vshrl.u32 %v11831_v2, 16  ;;  %v3242_v24 = vrot.slane %v11831_v2, 4  ;;  %v6177_v48 = vrot.slane %v6172_v15, 4  ;;  %v6803_v53 = vperm.slane %v6799_v49, %v9829_v44 }
 0x460   : > { %v6180_v62 = vsel %vm1434_vm1, 0, %v6179_v36  ;;  %v6797_v18 = vperm.slane %v6793_v35, %v9829_v44  ;;  %v5420_v21 = vpack.i.b16 %v5419_v33, %v5418_v60  ;;  %v5930_v40 = vperm.slane %v5417_v27, %v9829_v44 }
 0x461   : > { %v6178_v3 = vsel %vm1434_vm1, 0, %v6177_v48  ;;  %v6804_v26 = vrot.slane %v6803_v53, 4  ;;  %v6817_v38 = vrot.slane %v6180_v62, 4  ;;  %v1341_v16 = vpack.i.b16 %v11841_v37, %v9831_v50 }
 0x462   : > { %v6812_v13 = vsel %vm1434_vm1, %v6179_v36, %v6172_v15  ;;  %v5931_v52 = vrot.slane %v5930_v40, 4  ;;  %v5934_v28 = vsel %vm1434_vm1, %v5930_v40, %v5933_v12  ;;  %v5956_v43 = vperm.slane %v5420_v21, %v9829_v44 }
 0x463   : > { %v6805_v5 = vsel %vm1434_vm1, %v6804_v26, %v6797_v18  ;;  %v6818_v39 = vsel %vm1434_vm1, %v6817_v38, %v6178_v3  ;;  %v5942_v47 = vperm.slane %v5934_v28, %v9870_v56  ;;  %v1343_v23 = vshrl.u32 %v11841_v37, 16  ;;  %v11893_v26 = vpop.permute.xlu0 %1185 }
 0x464   : > { %v6809_v4 = vperm.slane %v6805_v5, %v9870_v56  ;;  %v6822_v55 = vperm.slane %v6818_v39, %v9829_v44  ;;  %v5932_v10 = vsel %vm1434_vm1, %v5931_v52, %v11672_v51  ;;  %v5957_v31 = vrot.slane %v5956_v43, 4 }
 0x465   : > { %v6816_v12 = vperm.slane %v6812_v13, %v9829_v44  ;;  %v5938_v42 = vperm.slane %v5932_v10, %v9870_v56  ;;  %v5945_v0 = vrot.slane %v5942_v47, 4  ;;  %v5960_v17 = vsel %vm1434_vm1, %v5956_v43, %v5959_v1 }
 0x466   : > { %v6810_v41 = vrot.slane %v6809_v4, 4  ;;  %v6823_v20 = vrot.slane %v6822_v55, 4  ;;  %v5958_v61 = vsel %vm1434_vm1, %v5957_v31, %v11694_v63  ;;  %v11875_v34 = vperm.slane %v1341_v16, %v9829_v44  ;;  %v11909_v31 = vpop.permute.xlu2 %5275 }
 0x467   : > { %v5943_v59 = vrot.slane %v5938_v42, 4  ;;  %v5946_v51 = vsel %vm1434_vm1, 0, %v5945_v0  ;;  %v5964_v6 = vperm.slane %v5958_v61, %v9870_v56  ;;  %v5968_v58 = vperm.slane %v5960_v17, %v9870_v56 }
 0x468   : > { %v6811_v11 = vsel %vm1434_vm1, 0, %v6810_v41  ;;  %v6824_v60 = vsel %vm1434_vm1, %v6823_v20, %v6816_v12  ;;  %v6646_v1 = vrot.slane %v5946_v51, 4  ;;  %v1344_v14 = vpack.i.b16 %v1343_v23, %v1342_v46 }
 0x469   : > { %v6828_v63 = vperm.slane %v6824_v60, %v9870_v56  ;;  %v5944_v9 = vsel %vm1434_vm1, 0, %v5943_v59  ;;  %v5969_v15 = vrot.slane %v5964_v6, 4  ;;  %v6641_v35 = vsel %vm1434_vm1, %v5945_v0, %v5938_v42 }
 0x46a   : > { %v7141_v36 = vshrl.u32 %v6809_v4, 16  ;;  %v5971_v49 = vrot.slane %v5968_v58, 4  ;;  %v6647_v27 = vsel %vm1434_vm1, %v6646_v1, %v5944_v9  ;;  %v1904_v33 = vrot.slane %v11875_v34, 4 }
 0x46b   : > { %v6829_v48 = vrot.slane %v6828_v63, 4  ;;  %v7139_v53 = vpack.i.b16 %v6828_v63, %v6809_v4  ;;  %v7142_v62 = vshrl.u32 %v6828_v63, 16  ;;  %v7149_v18 = vshrl.u32 %v6811_v11, 16 }
 0x46c   : > { %v5970_v46 = vsel %vm1434_vm1, 0, %v5969_v15  ;;  %v5972_v21 = vsel %vm1434_vm1, 0, %v5971_v49  ;;  %v6645_v40 = vperm.slane %v6641_v35, %v9829_v44  ;;  %v6651_v3 = vperm.slane %v6647_v27, %v9829_v44 }
 0x46d   : > { %v6830_v38 = vsel %vm1434_vm1, 0, %v6829_v48  ;;  %v7143_v16 = vpack.i.b16 %v7142_v62, %v7141_v36  ;;  %7213 = vst.msk [vmem:[%s10097_s14 + $0x30] sm:$0xf] %vm3120_vm2, %v7139_v53  ;;  %v6665_v13 = vrot.slane %v5972_v21, 4  ;;  %v1922_v52 = vperm.slane %v1344_v14, %v9829_v44 }
 0x46e   : > { %v7147_v28 = vpack.i.b16 %v6830_v38, %v6811_v11  ;;  %v7150_v43 = vshrl.u32 %v6830_v38, 16  ;;  %v6652_v5 = vrot.slane %v6651_v3, 4  ;;  %v3210_v39 = vrot.slane %v11841_v37, 4 }
 0x46f   : > { %7229 = vst.msk [vmem:[%s10097_s14 + $0x70] sm:$0xf] %vm3120_vm2, %v7143_v16  ;;  %v6660_v47 = vsel %vm1434_vm1, %v5971_v49, %v5964_v6  ;;  %v6666_v23 = vsel %vm1434_vm1, %v6665_v13, %v5970_v46  ;;  %v1347_v4 = vpack.i.b16 %v11831_v2, %v11893_v26  ;;  %v1348_v55 = vshrl.u32 %v11893_v26, 16 }
 0x470   : > { %v7151_v10 = vpack.i.b16 %v7150_v43, %v7149_v18  ;;  %7245 = vst.msk [vmem:[%s10097_s14 + $0xb0] sm:$0xf] %vm3120_vm2, %v7147_v28  ;;  %v6653_v12 = vsel %vm1434_vm1, %v6652_v5, %v6645_v40  ;;  %v6670_v37 = vperm.slane %v6666_v23, %v9829_v44  ;;  %v3359_v42 = vpack.i.b16 %v3210_v39, %v3194_v57  ;;  %v11950_v28 = vpop.permute.xlu2 %5299 }
 0x471   : > { %v6657_v0 = vperm.slane %v6653_v12, %v9870_v56  ;;  %v3361_v17 = vshrl.u32 %v3210_v39, 16  ;;  %v1350_v41 = vpack.i.b16 %v1349_v8, %v1348_v55  ;;  %v1901_v20 = vperm.slane %v1347_v4, %v9829_v44 }
 0x472   : > { %v11921_v61 = vshrl.u32 %v3242_v24, 16  ;;  %7261 = vst.msk [vmem:[%s10097_s14 + $0xf0] sm:$0xf] %vm3120_vm2, %v7151_v10  ;;  %v6664_v59 = vperm.slane %v6660_v47, %v9829_v44  ;;  %v6671_v51 = vrot.slane %v6670_v37, 4  ;;  %v1930_v6 = vrot.slane %v1922_v52, 4 }
 0x473   : > { %v6658_v50 = vrot.slane %v6657_v0, 4  ;;  %v3362_v57 = vpack.i.b16 %v3361_v17, %v11815_v54  ;;  %v11928_v58 = vperm.slane %v3359_v42, %v9829_v44  ;;  %v1902_v11 = vrot.slane %v1901_v20, 4 }
 0x474   : > { %v6672_v8 = vsel %vm1434_vm1, %v6671_v51, %v6664_v59  ;;  %v1905_v60 = vsel %vm1434_vm1, %v1901_v20, %v1904_v33  ;;  %v1927_v1 = vperm.slane %v1350_v41, %v9829_v44  ;;  %v3226_v14 = vrot.slane %v11893_v26, 4 }
 0x475   : > { %v6659_v63 = vsel %vm1434_vm1, 0, %v6658_v50  ;;  %v6676_v9 = vperm.slane %v6672_v8, %v9870_v56  ;;  %v7077_v15 = vshrl.u32 %v6657_v0, 16  ;;  %v1903_v54 = vsel %vm1434_vm1, %v1902_v11, %v11875_v34 }
 0x476   : > { %v11939_v35 = vperm.slane %v3362_v57, %v9829_v44  ;;  %v1909_v36 = vperm.slane %v1903_v54, %v9870_v56  ;;  %v1913_v49 = vperm.slane %v1905_v60, %v9870_v56  ;;  %v1928_v27 = vrot.slane %v1927_v1, 4 }
 0x477   : > { %v6677_v33 = vrot.slane %v6676_v9, 4  ;;  %v7075_v48 = vpack.i.b16 %v6676_v9, %v6657_v0  ;;  %v7078_v53 = vshrl.u32 %v6676_v9, 16  ;;  %v7085_v62 = vshrl.u32 %v6659_v63, 16  ;;  %v5236_v9 = vpop.permute.xlu1 %5235 }
 0x478   : > { %v1914_v18 = vrot.slane %v1909_v36, 4  ;;  %v1916_v46 = vrot.slane %v1913_v49, 4  ;;  %v1929_v21 = vsel %vm1434_vm1, %v1928_v27, %v1922_v52  ;;  %v1931_v40 = vsel %vm1434_vm1, %v1927_v1, %v1930_v6 }
 0x479   : > { %v6678_v34 = vsel %vm1434_vm1, 0, %v6677_v33  ;;  %v7079_v3 = vpack.i.b16 %v7078_v53, %v7077_v15  ;;  %7209 = vst.msk [vmem:[%s10097_s14 + $0x20] sm:$0xf] %vm3120_vm2, %v7075_v48  ;;  %v1935_v26 = vperm.slane %v1929_v21, %v9870_v56  ;;  %v1939_v38 = vperm.slane %v1931_v40, %v9870_v56  ;;  %v11992_v40 = vpop.permute.xlu2 %1187 }
 0x47a   : > { %v7083_v16 = vpack.i.b16 %v6678_v34, %v6659_v63  ;;  %v7086_v13 = vshrl.u32 %v6678_v34, 16  ;;  %v1915_v43 = vsel %vm1434_vm1, 0, %v1914_v18  ;;  %v1917_v52 = vsel %vm1434_vm1, 0, %v1916_v46 }
 0x47b   : > { %7225 = vst.msk [vmem:[%s10097_s14 + $0x60] sm:$0xf] %vm3120_vm2, %v7079_v3  ;;  %v3921_v5 = vrot.slane %v11928_v58, 4  ;;  %v1940_v39 = vrot.slane %v1935_v26, 4  ;;  %v1942_v47 = vrot.slane %v1939_v38, 4  ;;  %v2603_v23 = vrot.slane %v1917_v52, 4 }
 0x47c   : > { %v7087_v4 = vpack.i.b16 %v7086_v13, %v7085_v62  ;;  %7241 = vst.msk [vmem:[%s10097_s14 + $0xa0] sm:$0xf] %vm3120_vm2, %v7083_v16  ;;  %v3947_v55 = vrot.slane %v11939_v35, 4  ;;  %v3365_v10 = vpack.i.b16 %v3242_v24, %v3226_v14  ;;  %v3366_v12 = vshrl.u32 %v3226_v14, 16  ;;  %v5244_v16 = vpop.permute.xlu0 %5243 }
 0x47d   : > { %v1941_v37 = vsel %vm1434_vm1, 0, %v1940_v39  ;;  %v1943_v42 = vsel %vm1434_vm1, 0, %v1942_v47  ;;  %v2598_v0 = vsel %vm1434_vm1, %v1916_v46, %v1909_v36  ;;  %v2604_v17 = vsel %vm1434_vm1, %v2603_v23, %v1915_v43 }
 0x47e   : > { %7257 = vst.msk [vmem:[%s10097_s14 + $0xe0] sm:$0xf] %vm3120_vm2, %v7087_v4  ;;  %v2608_v41 = vperm.slane %v2604_v17, %v9829_v44  ;;  %v2617_v20 = vsel %vm1434_vm1, %v1942_v47, %v1935_v26  ;;  %v2622_v59 = vrot.slane %v1943_v42, 4  ;;  %v3368_v51 = vpack.i.b16 %v11921_v61, %v3366_v12 }
 0x47f   : > { %v5478_v2 = vshrl.u32 %v11909_v31, 16  ;;  %v3918_v24 = vperm.slane %v3365_v10, %v9829_v44  ;;  %v5424_v6 = vshrl.u32 %v9841_v19, 16  ;;  %v5472_v50 = vshrl.u32 %v9843_v30, 16 }
 0x480   : > { %v2602_v57 = vperm.slane %v2598_v0, %v9829_v44  ;;  %v2609_v11 = vrot.slane %v2608_v41, 4  ;;  %v2623_v8 = vsel %vm1434_vm1, %v2622_v59, %v1941_v37  ;;  %v3944_v60 = vperm.slane %v3368_v51, %v9829_v44 }
 0x481   : > { %v2621_v1 = vperm.slane %v2617_v20, %v9829_v44  ;;  %v2627_v14 = vperm.slane %v2623_v8, %v9829_v44  ;;  %v3919_v61 = vrot.slane %v3918_v24, 4  ;;  %v3922_v63 = vsel %vm1434_vm1, %v3918_v24, %v3921_v5 }
 0x482   : > { %v2610_v15 = vsel %vm1434_vm1, %v2609_v11, %v2602_v57  ;;  %v3930_v54 = vperm.slane %v3922_v63, %v9870_v56  ;;  %v3945_v36 = vrot.slane %v3944_v60, 4  ;;  %v3948_v49 = vsel %vm1434_vm1, %v3944_v60, %v3947_v55  ;;  %v1220_v11 = vpop.permute.xlu1 %1219 }
 0x483   : > { %v2614_v27 = vperm.slane %v2610_v15, %v9870_v56  ;;  %v2628_v33 = vrot.slane %v2627_v14, 4  ;;  %v3920_v48 = vsel %vm1434_vm1, %v3919_v61, %v11928_v58  ;;  %v3956_v53 = vperm.slane %v3948_v49, %v9870_v56 }
 0x484   : > { %v3926_v62 = vperm.slane %v3920_v48, %v9870_v56  ;;  %v3933_v18 = vrot.slane %v3930_v54, 4  ;;  %v3946_v46 = vsel %vm1434_vm1, %v3945_v36, %v11939_v35  ;;  %v5423_v21 = vpack.i.b16 %v5236_v9, %v9841_v19 }
 0x485   : > { %v2615_v34 = vrot.slane %v2614_v27, 4  ;;  %v2629_v3 = vsel %vm1434_vm1, %v2628_v33, %v2621_v1  ;;  %v3952_v26 = vperm.slane %v3946_v46, %v9870_v56  ;;  %v5425_v38 = vshrl.u32 %v5236_v9, 16 }
 0x486   : > { %v2633_v58 = vperm.slane %v2629_v3, %v9870_v56  ;;  %v3931_v13 = vrot.slane %v3926_v62, 4  ;;  %v3934_v43 = vsel %vm1434_vm1, 0, %v3933_v18  ;;  %v3959_v52 = vrot.slane %v3956_v53, 4 }
 0x487   : > { %v2616_v35 = vsel %vm1434_vm1, 0, %v2615_v34  ;;  %v3957_v5 = vrot.slane %v3952_v26, 4  ;;  %v4620_v19 = vrot.slane %v3934_v43, 4  ;;  %v1360_v39 = vshrl.u32 %v11992_v40, 16 }
 0x488   : > { %v2634_v47 = vrot.slane %v2633_v58, 4  ;;  %v3010_v23 = vpack.i.b16 %v2633_v58, %v2614_v27  ;;  %v3012_v4 = vshrl.u32 %v2614_v27, 16  ;;  %v3013_v55 = vshrl.u32 %v2633_v58, 16 }
 0x489   : > { %v3932_v10 = vsel %vm1434_vm1, 0, %v3931_v13  ;;  %v3960_v12 = vsel %vm1434_vm1, 0, %v3959_v52  ;;  %v4615_v37 = vsel %vm1434_vm1, %v3933_v18, %v3926_v62  ;;  %v5426_v42 = vpack.i.b16 %v5425_v38, %v5424_v6  ;;  %v12031_v62 = vpop.permute.xlu2 %5245  ;;  %v5268_v18 = vpop.permute.xlu0 %5267 }
 0x48a   : > { %v2635_v0 = vsel %vm1434_vm1, 0, %v2634_v47  ;;  %v3014_v17 = vpack.i.b16 %v3013_v55, %v3012_v4  ;;  %v3020_v41 = vshrl.u32 %v2616_v35, 16  ;;  %3130 = vst.msk [vmem:[%s9964_s9 + $0x24] sm:$0xf] %vm3120_vm2, %v3010_v23  ;;  %v4621_v20 = vsel %vm1434_vm1, %v4620_v19, %v3932_v10 }
 0x48b   : > { %v3018_v59 = vpack.i.b16 %v2635_v0, %v2616_v35  ;;  %v3021_v51 = vshrl.u32 %v2635_v0, 16  ;;  %v3958_v24 = vsel %vm1434_vm1, 0, %v3957_v5  ;;  %v4625_v57 = vperm.slane %v4621_v20, %v9829_v44 }
 0x48c   : > { %3146 = vst.msk [vmem:[%s9964_s9 + $0x64] sm:$0xf] %vm3120_vm2, %v3014_v17  ;;  %v4619_v6 = vperm.slane %v4615_v37, %v9829_v44  ;;  %v4639_v8 = vrot.slane %v3960_v12, 4  ;;  %v12013_v60 = vperm.slane %v5423_v21, %v9829_v44  ;;  %v3227_v1 = vrot.slane %v11992_v40, 4 }
 0x48d   : > { %v3022_v14 = vpack.i.b16 %v3021_v51, %v3020_v41  ;;  %3162 = vst.msk [vmem:[%s9964_s9 + $0xa4] sm:$0xf] %vm3120_vm2, %v3018_v59  ;;  %v4626_v61 = vrot.slane %v4625_v57, 4  ;;  %v5471_v63 = vpack.i.b16 %v5244_v16, %v9843_v30  ;;  %v5473_v9 = vshrl.u32 %v5244_v16, 16 }
 0x48e   : > { %v4634_v15 = vsel %vm1434_vm1, %v3959_v52, %v3952_v26  ;;  %v4640_v54 = vsel %vm1434_vm1, %v4639_v8, %v3958_v24  ;;  %v1359_v36 = vpack.i.b16 %v1220_v11, %v11992_v40  ;;  %v1361_v49 = vshrl.u32 %v1220_v11, 16 }
 0x48f   : > { %3178 = vst.msk [vmem:[%s9964_s9 + $0xe4] sm:$0xf] %vm3120_vm2, %v3022_v14  ;;  %v4627_v27 = vsel %vm1434_vm1, %v4626_v61, %v4619_v6  ;;  %v4644_v33 = vperm.slane %v4640_v54, %v9829_v44  ;;  %v12027_v48 = vperm.slane %v5426_v42, %v9829_v44  ;;  %v5474_v53 = vpack.i.b16 %v5473_v9, %v5472_v50 }
 0x490   : > { %v4631_v46 = vperm.slane %v4627_v27, %v9870_v56  ;;  %v12035_v21 = vperm.slane %v5471_v63, %v9829_v44  ;;  %v1362_v40 = vpack.i.b16 %v1361_v49, %v1360_v39  ;;  %v3243_v34 = vrot.slane %v1220_v11, 4 }
 0x491   : > { %v5431_v3 = vshrl.u32 %v11950_v28, 16  ;;  %v4638_v26 = vperm.slane %v4634_v15, %v9829_v44  ;;  %v4645_v38 = vrot.slane %v4644_v33, 4  ;;  %v5484_v16 = vshrl.u32 %v9864_v45, 16  ;;  %v12071_v63 = vpop.permute.xlu2 %5269  ;;  %v12073_v9 = vpop.permute.xlu0 %1155 }
 0x492   : > { %v4632_v58 = vrot.slane %v4631_v46, 4  ;;  %v5985_v30 = vrot.slane %v12013_v60, 4  ;;  %v3378_v50 = vshrl.u32 %v3227_v1, 16  ;;  %v12042_v13 = vperm.slane %v1359_v36, %v9829_v44 }
 0x493   : > { %v4646_v43 = vsel %vm1434_vm1, %v4645_v38, %v4638_v26  ;;  %v12046_v52 = vperm.slane %v5474_v53, %v9829_v44  ;;  %v3377_v35 = vpack.i.b16 %v3243_v34, %v3227_v1  ;;  %v3379_v5 = vshrl.u32 %v3243_v34, 16 }
 0x494   : > { %v4650_v19 = vperm.slane %v4646_v43, %v9870_v56  ;;  %v6011_v39 = vrot.slane %v12027_v48, 4  ;;  %v6193_v47 = vrot.slane %v12035_v21, 4  ;;  %v12052_v23 = vperm.slane %v1362_v40, %v9829_v44 }
 0x495   : > { %v4633_v4 = vsel %vm1434_vm1, 0, %v4632_v58  ;;  %v5029_v55 = vshrl.u32 %v4631_v46, 16  ;;  %v3380_v10 = vpack.i.b16 %v3379_v5, %v3378_v50  ;;  %v5483_v12 = vpack.i.b16 %v12031_v62, %v9864_v45 }
 0x496   : > { %v4651_v37 = vrot.slane %v4650_v19, 4  ;;  %v5027_v42 = vpack.i.b16 %v4650_v19, %v4631_v46  ;;  %v5030_v0 = vshrl.u32 %v4650_v19, 16  ;;  %v12058_v17 = vperm.slane %v3377_v35, %v9829_v44 }
 0x497   : > { %v6219_v41 = vrot.slane %v12046_v52, 4  ;;  %v1954_v20 = vrot.slane %v12042_v13, 4  ;;  %v12063_v59 = vperm.slane %v3380_v10, %v9829_v44  ;;  %v5429_v51 = vpack.i.b16 %v11950_v28, %v5268_v18 }
 0x498   : > { %v4652_v24 = vsel %vm1434_vm1, 0, %v4651_v37  ;;  %v5031_v57 = vpack.i.b16 %v5030_v0, %v5029_v55  ;;  %5146 = vst.msk [vmem:[%s10006_s24 + $0x24] sm:$0xf] %vm3120_vm2, %v5027_v42  ;;  %v1980_v11 = vrot.slane %v12052_v23, 4  ;;  %v5430_v6 = vshrl.u32 %v5268_v18, 16 }
 0x499   : > { %v5035_v8 = vpack.i.b16 %v4652_v24, %v4633_v4  ;;  %v5037_v1 = vshrl.u32 %v4633_v4, 16  ;;  %v5038_v14 = vshrl.u32 %v4652_v24, 16  ;;  %v5982_v61 = vperm.slane %v5429_v51, %v9829_v44 }
 0x49a   : > { %5162 = vst.msk [vmem:[%s10006_s24 + $0x64] sm:$0xf] %vm3120_vm2, %v5031_v57  ;;  %v3971_v28 = vrot.slane %v12058_v17, 4  ;;  %v5485_v15 = vshrl.u32 %v12031_v62, 16  ;;  %v12080_v54 = vperm.slane %v5483_v12, %v9829_v44  ;;  %v5432_v36 = vpack.i.b16 %v5431_v3, %v5430_v6 }
 0x49b   : > { %v5039_v49 = vpack.i.b16 %v5038_v14, %v5037_v1  ;;  %5178 = vst.msk [vmem:[%s10006_s24 + $0xa4] sm:$0xf] %vm3120_vm2, %v5035_v8  ;;  %v3997_v27 = vrot.slane %v12063_v59, 4  ;;  %v5983_v33 = vrot.slane %v5982_v61, 4  ;;  %v5986_v53 = vsel %vm1434_vm1, %v5982_v61, %v5985_v30 }
 0x49c   : > { %v5994_v18 = vperm.slane %v5986_v53, %v9870_v56  ;;  %v6008_v46 = vperm.slane %v5432_v36, %v9829_v44  ;;  %v5442_v40 = vshrl.u32 %v12071_v63, 16  ;;  %v1353_v34 = vpack.i.b16 %v12073_v9, %v9845_v22 }
 0x49d   : > { %5194 = vst.msk [vmem:[%s10006_s24 + $0xe4] sm:$0xf] %vm3120_vm2, %v5039_v49  ;;  %v5984_v3 = vsel %vm1434_vm1, %v5983_v33, %v12013_v60  ;;  %v1354_v26 = vshrl.u32 %v9845_v22, 16  ;;  %v3195_v38 = vrot.slane %v9845_v22, 4  ;;  %v1355_v58 = vshrl.u32 %v12073_v9, 16 }
 0x49e   : > { %v5990_v30 = vperm.slane %v5984_v3, %v9870_v56  ;;  %v5997_v50 = vrot.slane %v5994_v18, 4  ;;  %v6009_v43 = vrot.slane %v6008_v46, 4  ;;  %v6012_v35 = vsel %vm1434_vm1, %v6008_v46, %v6011_v39 }
 0x49f   : > { %v6020_v5 = vperm.slane %v6012_v35, %v9870_v56  ;;  %v1356_v19 = vpack.i.b16 %v1355_v58, %v1354_v26  ;;  %v1948_v4 = vperm.slane %v1353_v34, %v9829_v44  ;;  %v1366_v55 = vshrl.u32 %v9867_v7, 16 }
 0x4a0   : > { %v5995_v60 = vrot.slane %v5990_v30, 4  ;;  %v5998_v10 = vsel %vm1434_vm1, 0, %v5997_v50  ;;  %v6010_v12 = vsel %vm1434_vm1, %v6009_v43, %v12027_v48  ;;  %v6679_v37 = vsel %vm1434_vm1, %v5997_v50, %v5990_v30  ;;  %v12126_v43 = vpop.permute.xlu1 %5277 }
 0x4a1   : > { %v6016_v42 = vperm.slane %v6010_v12, %v9870_v56  ;;  %v6023_v0 = vrot.slane %v6020_v5, 4  ;;  %v6684_v51 = vrot.slane %v5998_v10, 4  ;;  %v3196_v39 = vrot.slane %v9867_v7, 4 }
 0x4a2   : > { %v5996_v24 = vsel %vm1434_vm1, 0, %v5995_v60  ;;  %v1955_v57 = vsel %vm1434_vm1, %v1954_v20, %v1948_v4  ;;  %v1956_v6 = vrot.slane %v1948_v4, 4  ;;  %v1974_v8 = vperm.slane %v1356_v19, %v9829_v44 }
 0x4a3   : > { %v6021_v1 = vrot.slane %v6016_v42, 4  ;;  %v6024_v14 = vsel %vm1434_vm1, 0, %v6023_v0  ;;  %v6683_v48 = vperm.slane %v6679_v37, %v9829_v44  ;;  %v6685_v61 = vsel %vm1434_vm1, %v6684_v51, %v5996_v24 }
 0x4a4   : > { %v6689_v36 = vperm.slane %v6685_v61, %v9829_v44  ;;  %v6698_v49 = vsel %vm1434_vm1, %v6023_v0, %v6016_v42  ;;  %v6703_v33 = vrot.slane %v6024_v14, 4  ;;  %v1957_v53 = vsel %vm1434_vm1, %v12042_v13, %v1956_v6 }
 0x4a5   : > { %v6022_v20 = vsel %vm1434_vm1, 0, %v6021_v1  ;;  %v1961_v18 = vperm.slane %v1955_v57, %v9870_v56  ;;  %v1965_v46 = vperm.slane %v1957_v53, %v9870_v56  ;;  %v1981_v34 = vsel %vm1434_vm1, %v1980_v11, %v1974_v8 }
 0x4a6   : > { %v6690_v3 = vrot.slane %v6689_v36, 4  ;;  %v6704_v26 = vsel %vm1434_vm1, %v6703_v33, %v6022_v20  ;;  %v1982_v58 = vrot.slane %v1974_v8, 4  ;;  %v1987_v30 = vperm.slane %v1981_v34, %v9870_v56 }
 0x4a7   : > { %v6708_v50 = vperm.slane %v6704_v26, %v9829_v44  ;;  %v3372_v13 = vshrl.u32 %v3195_v38, 16  ;;  %v1966_v35 = vrot.slane %v1961_v18, 4  ;;  %v1968_v5 = vrot.slane %v1965_v46, 4 }
 0x4a8   : > { %v6691_v19 = vsel %vm1434_vm1, %v6690_v3, %v6683_v48  ;;  %v6702_v4 = vperm.slane %v6698_v49, %v9829_v44  ;;  %v1983_v11 = vsel %vm1434_vm1, %v12052_v23, %v1982_v58  ;;  %v1992_v60 = vrot.slane %v1987_v30, 4 }
 0x4a9   : > { %v6695_v10 = vperm.slane %v6691_v19, %v9870_v56  ;;  %v6709_v12 = vrot.slane %v6708_v50, 4  ;;  %v1969_v37 = vsel %vm1434_vm1, 0, %v1968_v5  ;;  %v3211_v42 = vrot.slane %v12073_v9, 4 }
 0x4aa   : > { %v1967_v0 = vsel %vm1434_vm1, 0, %v1966_v35  ;;  %v1991_v51 = vperm.slane %v1983_v11, %v9870_v56  ;;  %v2641_v24 = vrot.slane %v1969_v37, 4  ;;  %v12141_v57 = vshrl.u32 %v3196_v39, 16 }
 0x4ab   : > { %v6696_v6 = vrot.slane %v6695_v10, 4  ;;  %v6710_v23 = vsel %vm1434_vm1, %v6709_v12, %v6702_v4  ;;  %v1993_v8 = vsel %vm1434_vm1, 0, %v1992_v60  ;;  %v2636_v1 = vsel %vm1434_vm1, %v1968_v5, %v1961_v18 }
 0x4ac   : > { %v6714_v14 = vperm.slane %v6710_v23, %v9870_v56  ;;  %v7093_v48 = vshrl.u32 %v6695_v10, 16  ;;  %v1994_v9 = vrot.slane %v1991_v51, 4  ;;  %v2642_v61 = vsel %vm1434_vm1, %v2641_v24, %v1967_v0 }
 0x4ad   : > { %v6697_v36 = vsel %vm1434_vm1, 0, %v6696_v6  ;;  %v2646_v49 = vperm.slane %v2642_v61, %v9829_v44  ;;  %v3371_v33 = vpack.i.b16 %v3211_v42, %v3195_v38  ;;  %v3373_v53 = vshrl.u32 %v3211_v42, 16 }
 0x4ae   : > { %v6715_v20 = vrot.slane %v6714_v14, 4  ;;  %v7091_v46 = vpack.i.b16 %v6714_v14, %v6695_v10  ;;  %v7094_v34 = vshrl.u32 %v6714_v14, 16  ;;  %v2640_v18 = vperm.slane %v2636_v1, %v9829_v44  ;;  %v5302_v10 = vpop.permute.xlu1 %5301 }
 0x4af   : > { %v1995_v3 = vsel %vm1434_vm1, 0, %v1994_v9  ;;  %v2647_v26 = vrot.slane %v2646_v49, 4  ;;  %v2655_v58 = vsel %vm1434_vm1, %v1994_v9, %v1987_v30  ;;  %v3374_v50 = vpack.i.b16 %v3373_v53, %v3372_v13 }
 0x4b0   : > { %v6716_v35 = vsel %vm1434_vm1, 0, %v6715_v20  ;;  %v7095_v5 = vpack.i.b16 %v7094_v34, %v7093_v48  ;;  %v7101_v19 = vshrl.u32 %v6697_v36, 16  ;;  %7210 = vst.msk [vmem:[%s10097_s14 + $0x24] sm:$0xf] %vm3120_vm2, %v7091_v46  ;;  %v2660_v22 = vrot.slane %v1995_v3, 4 }
 0x4b1   : > { %v7099_v38 = vpack.i.b16 %v6716_v35, %v6697_v36  ;;  %v7102_v4 = vshrl.u32 %v6716_v35, 16  ;;  %v2648_v11 = vsel %vm1434_vm1, %v2647_v26, %v2640_v18  ;;  %v3965_v60 = vperm.slane %v3371_v33, %v9829_v44 }
 0x4b2   : > { %7226 = vst.msk [vmem:[%s10097_s14 + $0x64] sm:$0xf] %vm3120_vm2, %v7095_v5  ;;  %v2652_v30 = vperm.slane %v2648_v11, %v9870_v56  ;;  %v2659_v13 = vperm.slane %v2655_v58, %v9829_v44  ;;  %v2661_v12 = vsel %vm1434_vm1, %v2660_v22, %v1993_v8  ;;  %v3991_v37 = vperm.slane %v3374_v50, %v9829_v44  ;;  %v1158_v5 = vpop.permute.xlu2 %1157 }
 0x4b3   : > { %v7103_v42 = vpack.i.b16 %v7102_v4, %v7101_v19  ;;  %7242 = vst.msk [vmem:[%s10097_s14 + $0xa4] sm:$0xf] %vm3120_vm2, %v7099_v38  ;;  %v2665_v0 = vperm.slane %v2661_v12, %v9829_v44  ;;  %v3972_v51 = vsel %vm1434_vm1, %v3971_v28, %v3965_v60  ;;  %v3973_v24 = vrot.slane %v3965_v60, 4 }
 0x4b4   : > { %v2653_v6 = vrot.slane %v2652_v30, 4  ;;  %v3978_v23 = vperm.slane %v3972_v51, %v9870_v56  ;;  %v3998_v1 = vsel %vm1434_vm1, %v3997_v27, %v3991_v37  ;;  %v5441_v8 = vpack.i.b16 %v5302_v10, %v12071_v63 }
 0x4b5   : > { %7258 = vst.msk [vmem:[%s10097_s14 + $0xe4] sm:$0xf] %vm3120_vm2, %v7103_v42  ;;  %v2666_v14 = vrot.slane %v2665_v0, 4  ;;  %v3974_v48 = vsel %vm1434_vm1, %v12058_v17, %v3973_v24  ;;  %v3999_v9 = vrot.slane %v3991_v37, 4  ;;  %v4004_v61 = vperm.slane %v3998_v1, %v9870_v56 }
 0x4b6   : > { %v2654_v28 = vsel %vm1434_vm1, 0, %v2653_v6  ;;  %v3982_v36 = vperm.slane %v3974_v48, %v9870_v56  ;;  %v3983_v49 = vrot.slane %v3978_v23, 4  ;;  %v5436_v33 = vshrl.u32 %v9862_v25, 16  ;;  %v5238_v6 = vpop.permute.xlu0 %5237 }
 0x4b7   : > { %v2667_v27 = vsel %vm1434_vm1, %v2666_v14, %v2659_v13  ;;  %v4000_v53 = vsel %vm1434_vm1, %v12063_v59, %v3999_v9  ;;  %v4009_v20 = vrot.slane %v4004_v61, 4  ;;  %v5443_v46 = vshrl.u32 %v5302_v10, 16 }
 0x4b8   : > { %v2671_v34 = vperm.slane %v2667_v27, %v9870_v56  ;;  %v3028_v17 = vshrl.u32 %v2652_v30, 16  ;;  %v3985_v18 = vrot.slane %v3982_v36, 4  ;;  %v4008_v3 = vperm.slane %v4000_v53, %v9870_v56 }
 0x4b9   : > { %v3036_v26 = vshrl.u32 %v2654_v28, 16  ;;  %v3984_v58 = vsel %vm1434_vm1, 0, %v3983_v49  ;;  %v4010_v50 = vsel %vm1434_vm1, 0, %v4009_v20  ;;  %v6034_v35 = vperm.slane %v5441_v8, %v9829_v44 }
 0x4ba   : > { %v2672_v19 = vrot.slane %v2671_v34, 4  ;;  %v3026_v22 = vpack.i.b16 %v2671_v34, %v2652_v30  ;;  %v3029_v59 = vshrl.u32 %v2671_v34, 16  ;;  %v3986_v38 = vsel %vm1434_vm1, 0, %v3985_v18 }
 0x4bb   : > { %v4011_v4 = vrot.slane %v4008_v3, 4  ;;  %v4653_v11 = vsel %vm1434_vm1, %v3985_v18, %v3978_v23  ;;  %v4658_v60 = vrot.slane %v3986_v38, 4  ;;  %v5444_v10 = vpack.i.b16 %v5443_v46, %v5442_v40 }
 0x4bc   : > { %v2673_v13 = vsel %vm1434_vm1, 0, %v2672_v19  ;;  %v3030_v12 = vpack.i.b16 %v3029_v59, %v3028_v17  ;;  %3131 = vst.msk [vmem:[%s9964_s9 + $0x28] sm:$0xf] %vm3120_vm2, %v3026_v22  ;;  %v6035_v37 = vrot.slane %v6034_v35, 4  ;;  %v1365_v30 = vpack.i.b16 %v1158_v5, %v9867_v7 }
 0x4bd   : > { %v3034_v42 = vpack.i.b16 %v2673_v13, %v2654_v28  ;;  %v3037_v0 = vshrl.u32 %v2673_v13, 16  ;;  %v4012_v51 = vsel %vm1434_vm1, 0, %v4011_v4  ;;  %v4659_v24 = vsel %vm1434_vm1, %v4658_v60, %v3984_v58 }
 0x4be   : > { %3147 = vst.msk [vmem:[%s9964_s9 + $0x68] sm:$0xf] %vm3120_vm2, %v3030_v12  ;;  %v4657_v63 = vperm.slane %v4653_v11, %v9829_v44  ;;  %v4663_v40 = vperm.slane %v4659_v24, %v9829_v44  ;;  %v4672_v23 = vsel %vm1434_vm1, %v4011_v4, %v4004_v61  ;;  %v4677_v1 = vrot.slane %v4012_v51, 4 }
 0x4bf   : > { %v3038_v8 = vpack.i.b16 %v3037_v0, %v3036_v26  ;;  %3163 = vst.msk [vmem:[%s9964_s9 + $0xa8] sm:$0xf] %vm3120_vm2, %v3034_v42  ;;  %v4676_v14 = vperm.slane %v4672_v23, %v9829_v44  ;;  %v6060_v48 = vperm.slane %v5444_v10, %v9829_v44  ;;  %v1367_v9 = vshrl.u32 %v1158_v5, 16 }
 0x4c0   : > { %v4664_v28 = vrot.slane %v4663_v40, 4  ;;  %v4678_v36 = vsel %vm1434_vm1, %v4677_v1, %v4010_v50  ;;  %v3212_v49 = vrot.slane %v1158_v5, 4  ;;  %v5435_v27 = vpack.i.b16 %v5238_v6, %v9862_v25 }
 0x4c1   : > { %3179 = vst.msk [vmem:[%s9964_s9 + $0xe8] sm:$0xf] %vm3120_vm2, %v3038_v8  ;;  %v4682_v53 = vperm.slane %v4678_v36, %v9829_v44  ;;  %v1368_v61 = vpack.i.b16 %v1367_v9, %v1366_v55  ;;  %v12220_v20 = vperm.slane %v1365_v30, %v9829_v44  ;;  %v5437_v46 = vshrl.u32 %v5238_v6, 16  ;;  %v1190_v36 = vpop.permute.xlu1 %1189 }
 0x4c2   : > { %v4665_v34 = vsel %vm1434_vm1, %v4664_v28, %v4657_v63  ;;  %v3383_v17 = vpack.i.b16 %v3212_v49, %v3196_v39  ;;  %v3385_v18 = vshrl.u32 %v3212_v49, 16  ;;  %v6029_v3 = vperm.slane %v5435_v27, %v9829_v44 }
 0x4c3   : > { %v4669_v25 = vperm.slane %v4665_v34, %v9870_v56  ;;  %v4683_v26 = vrot.slane %v4682_v53, 4  ;;  %v12228_v58 = vperm.slane %v1368_v61, %v9829_v44  ;;  %v5438_v50 = vpack.i.b16 %v5437_v46, %v5436_v33  ;;  %v5240_v46 = vpop.permute.xlu2 %5239 }
 0x4c4   : > { %v6061_v55 = vrot.slane %v6060_v48, 4  ;;  %v3386_v5 = vpack.i.b16 %v3385_v18, %v12141_v57  ;;  %v6036_v19 = vsel %vm1434_vm1, %v6035_v37, %v6029_v3  ;;  %v6037_v22 = vrot.slane %v6029_v3, 4 }
 0x4c5   : > { %v4670_v59 = vrot.slane %v4669_v25, 4  ;;  %v4684_v7 = vsel %vm1434_vm1, %v4683_v26, %v4676_v14  ;;  %v2008_v39 = vrot.slane %v12220_v20, 4  ;;  %v12235_v38 = vperm.slane %v3383_v17, %v9829_v44 }
 0x4c6   : > { %v4688_v4 = vperm.slane %v4684_v7, %v9870_v56  ;;  %v5045_v11 = vshrl.u32 %v4669_v25, 16  ;;  %v2034_v60 = vrot.slane %v12228_v58, 4  ;;  %v6038_v33 = vsel %vm1434_vm1, %v6034_v35, %v6037_v22 }
 0x4c7   : > { %v12241_v57 = vperm.slane %v3386_v5, %v9829_v44  ;;  %v6042_v10 = vperm.slane %v6036_v19, %v9870_v56  ;;  %v6046_v13 = vperm.slane %v6038_v33, %v9870_v56  ;;  %v6055_v12 = vperm.slane %v5438_v50, %v9829_v44 }
 0x4c8   : > { %v4671_v37 = vsel %vm1434_vm1, 0, %v4670_v59  ;;  %v4689_v30 = vrot.slane %v4688_v4, 4  ;;  %v5043_v42 = vpack.i.b16 %v4688_v4, %v4669_v25  ;;  %v5046_v0 = vshrl.u32 %v4688_v4, 16  ;;  %v1222_v25 = vpop.permute.xlu0 %1221 }
 0x4c9   : > { %v4025_v51 = vrot.slane %v12235_v38, 4  ;;  %v6047_v24 = vrot.slane %v6042_v10, 4  ;;  %v6049_v6 = vrot.slane %v6046_v13, 4  ;;  %v6062_v35 = vsel %vm1434_vm1, %v6061_v55, %v6055_v12 }
 0x4ca   : > { %v4690_v63 = vsel %vm1434_vm1, 0, %v4689_v30  ;;  %v5047_v40 = vpack.i.b16 %v5046_v0, %v5045_v11  ;;  %5147 = vst.msk [vmem:[%s10006_s24 + $0x28] sm:$0xf] %vm3120_vm2, %v5043_v42  ;;  %v6063_v23 = vrot.slane %v6055_v12, 4  ;;  %v6068_v1 = vperm.slane %v6062_v35, %v9870_v56 }
 0x4cb   : > { %v5051_v8 = vpack.i.b16 %v4690_v63, %v4671_v37  ;;  %v5053_v14 = vshrl.u32 %v4671_v37, 16  ;;  %v5054_v9 = vshrl.u32 %v4690_v63, 16  ;;  %v6050_v28 = vsel %vm1434_vm1, 0, %v6049_v6 }
 0x4cc   : > { %5163 = vst.msk [vmem:[%s10006_s24 + $0x68] sm:$0xf] %vm3120_vm2, %v5047_v40  ;;  %v4051_v49 = vrot.slane %v12241_v57, 4  ;;  %v6064_v27 = vsel %vm1434_vm1, %v6060_v48, %v6063_v23  ;;  %v6717_v53 = vsel %vm1434_vm1, %v6049_v6, %v6042_v10  ;;  %v6722_v61 = vrot.slane %v6050_v28, 4 }
 0x4cd   : > { %v5055_v34 = vpack.i.b16 %v5054_v9, %v5053_v14  ;;  %5179 = vst.msk [vmem:[%s10006_s24 + $0xa8] sm:$0xf] %vm3120_vm2, %v5051_v8  ;;  %v6048_v17 = vsel %vm1434_vm1, 0, %v6047_v24  ;;  %v6072_v18 = vperm.slane %v6064_v27, %v9870_v56  ;;  %v6073_v3 = vrot.slane %v6068_v1, 4 }
 0x4ce   : > { %v6721_v26 = vperm.slane %v6717_v53, %v9829_v44  ;;  %v6723_v50 = vsel %vm1434_vm1, %v6722_v61, %v6048_v17  ;;  %v3228_v55 = vrot.slane %v1190_v36, 4  ;;  %v5448_v48 = vshrl.u32 %v9873_v32, 16 }
 0x4cf   : > { %5195 = vst.msk [vmem:[%s10006_s24 + $0xe8] sm:$0xf] %vm3120_vm2, %v5055_v34  ;;  %v6075_v5 = vrot.slane %v6072_v18, 4  ;;  %v6727_v19 = vperm.slane %v6723_v50, %v9829_v44  ;;  %v5447_v22 = vpack.i.b16 %v5240_v46, %v9873_v32  ;;  %v5449_v59 = vshrl.u32 %v5240_v46, 16 }
 0x4d0   : > { %v1372_v7 = vshrl.u32 %v1190_v36, 16  ;;  %v1371_v4 = vpack.i.b16 %v1222_v25, %v1190_v36  ;;  %v1373_v11 = vshrl.u32 %v1222_v25, 16  ;;  %v3244_v33 = vrot.slane %v1222_v25, 4 }
 0x4d1   : > { %v6076_v10 = vsel %vm1434_vm1, 0, %v6075_v5  ;;  %v6728_v13 = vrot.slane %v6727_v19, 4  ;;  %v6736_v12 = vsel %vm1434_vm1, %v6075_v5, %v6068_v1  ;;  %v5450_v37 = vpack.i.b16 %v5449_v59, %v5448_v48 }
 0x4d2   : > { %v6074_v30 = vsel %vm1434_vm1, 0, %v6073_v3  ;;  %v6741_v42 = vrot.slane %v6076_v10, 4  ;;  %v12274_v0 = vperm.slane %v5447_v22, %v9829_v44  ;;  %v1374_v24 = vpack.i.b16 %v1373_v11, %v1372_v7 }
 0x4d3   : > { %v6729_v32 = vsel %vm1434_vm1, %v6728_v13, %v6721_v26  ;;  %v6740_v6 = vperm.slane %v6736_v12, %v9829_v44  ;;  %v3390_v35 = vshrl.u32 %v3228_v55, 16  ;;  %v2005_v63 = vperm.slane %v1371_v4, %v9829_v44 }
 0x4d4   : > { %v6733_v40 = vperm.slane %v6729_v32, %v9870_v56  ;;  %v6742_v23 = vsel %vm1434_vm1, %v6741_v42, %v6074_v30  ;;  %v12282_v1 = vperm.slane %v5450_v37, %v9829_v44  ;;  %v2031_v8 = vperm.slane %v1374_v24, %v9829_v44 }
 0x4d5   : > { %v6746_v14 = vperm.slane %v6742_v23, %v9829_v44  ;;  %v2006_v9 = vrot.slane %v2005_v63, 4  ;;  %v2009_v28 = vsel %vm1434_vm1, %v2005_v63, %v2008_v39  ;;  %v3389_v36 = vpack.i.b16 %v3244_v33, %v3228_v55  ;;  %v5248_v23 = vpop.permute.xlu1 %5247 }
 0x4d6   : > { %v6734_v27 = vrot.slane %v6733_v40, 4  ;;  %v6089_v53 = vrot.slane %v12274_v0, 4  ;;  %v2017_v61 = vperm.slane %v2009_v28, %v9870_v56  ;;  %v2032_v46 = vrot.slane %v2031_v8, 4 }
 0x4d7   : > { %v6747_v34 = vrot.slane %v6746_v14, 4  ;;  %v7109_v17 = vshrl.u32 %v6733_v40, 16  ;;  %v2007_v18 = vsel %vm1434_vm1, %v2006_v9, %v12220_v20  ;;  %v2035_v3 = vsel %vm1434_vm1, %v2031_v8, %v2034_v60 }
 0x4d8   : > { %v6735_v25 = vsel %vm1434_vm1, 0, %v6734_v27  ;;  %v2013_v39 = vperm.slane %v2007_v18, %v9870_v56  ;;  %v2020_v26 = vrot.slane %v2017_v61, 4  ;;  %v2033_v50 = vsel %vm1434_vm1, %v2032_v46, %v12228_v58 }
 0x4d9   : > { %v6748_v55 = vsel %vm1434_vm1, %v6747_v34, %v6740_v6  ;;  %v2039_v48 = vperm.slane %v2033_v50, %v9870_v56  ;;  %v2043_v5 = vperm.slane %v2035_v3, %v9870_v56  ;;  %v3391_v19 = vshrl.u32 %v3244_v33, 16 }
 0x4da   : > { %v6752_v20 = vperm.slane %v6748_v55, %v9870_v56  ;;  %v2018_v22 = vrot.slane %v2013_v39, 4  ;;  %v2021_v60 = vsel %vm1434_vm1, 0, %v2020_v26  ;;  %v2674_v59 = vsel %vm1434_vm1, %v2020_v26, %v2013_v39 }
 0x4db   : > { %v7117_v7 = vshrl.u32 %v6735_v25, 16  ;;  %v2044_v4 = vrot.slane %v2039_v48, 4  ;;  %v2046_v11 = vrot.slane %v2043_v5, 4  ;;  %v2679_v10 = vrot.slane %v2021_v60, 4 }
 0x4dc   : > { %v6753_v58 = vrot.slane %v6752_v20, 4  ;;  %v7107_v13 = vpack.i.b16 %v6752_v20, %v6733_v40  ;;  %v7110_v12 = vshrl.u32 %v6752_v20, 16  ;;  %v2019_v37 = vsel %vm1434_vm1, 0, %v2018_v22 }
 0x4dd   : > { %v2047_v33 = vsel %vm1434_vm1, 0, %v2046_v11  ;;  %v2678_v30 = vperm.slane %v2674_v59, %v9829_v44  ;;  %v2680_v42 = vsel %vm1434_vm1, %v2679_v10, %v2019_v37  ;;  %v2693_v24 = vsel %vm1434_vm1, %v2046_v11, %v2039_v48  ;;  %v5280_v11 = vpop.permute.xlu0 %5279 }
 0x4de   : > { %v6754_v32 = vsel %vm1434_vm1, 0, %v6753_v58  ;;  %v7111_v6 = vpack.i.b16 %v7110_v12, %v7109_v17  ;;  %7211 = vst.msk [vmem:[%s10097_s14 + $0x28] sm:$0xf] %vm3120_vm2, %v7107_v13  ;;  %v2045_v63 = vsel %vm1434_vm1, 0, %v2044_v4  ;;  %v2684_v40 = vperm.slane %v2680_v42, %v9829_v44 }
 0x4df   : > { %v7115_v8 = vpack.i.b16 %v6754_v32, %v6735_v25  ;;  %v7118_v14 = vshrl.u32 %v6754_v32, 16  ;;  %v2698_v9 = vrot.slane %v2047_v33, 4  ;;  %v3392_v28 = vpack.i.b16 %v3391_v19, %v3390_v35 }
 0x4e0   : > { %7227 = vst.msk [vmem:[%s10097_s14 + $0x68] sm:$0xf] %vm3120_vm2, %v7111_v6  ;;  %v2685_v27 = vrot.slane %v2684_v40, 4  ;;  %v2697_v61 = vperm.slane %v2693_v24, %v9829_v44  ;;  %v4022_v46 = vperm.slane %v3389_v36, %v9829_v44  ;;  %v5496_v34 = vshrl.u32 %v9875_v29, 16 }
 0x4e1   : > { %v7119_v17 = vpack.i.b16 %v7118_v14, %v7117_v7  ;;  %7243 = vst.msk [vmem:[%s10097_s14 + $0xa8] sm:$0xf] %vm3120_vm2, %v7115_v8  ;;  %v2699_v18 = vsel %vm1434_vm1, %v2698_v9, %v2045_v63  ;;  %v4048_v3 = vperm.slane %v3392_v28, %v9829_v44  ;;  %v5497_v25 = vshrl.u32 %v5248_v23, 16 }
 0x4e2   : > { %v2686_v39 = vsel %vm1434_vm1, %v2685_v27, %v2678_v30  ;;  %v2703_v35 = vperm.slane %v2699_v18, %v9829_v44  ;;  %v4023_v26 = vrot.slane %v4022_v46, 4  ;;  %v4026_v50 = vsel %vm1434_vm1, %v4022_v46, %v4025_v51  ;;  %v5312_v46 = vpop.permute.xlu2 %5311 }
 0x4e3   : > { %7259 = vst.msk [vmem:[%s10097_s14 + $0xe8] sm:$0xf] %vm3120_vm2, %v7119_v17  ;;  %v2690_v36 = vperm.slane %v2686_v39, %v9870_v56  ;;  %v4034_v55 = vperm.slane %v4026_v50, %v9870_v56  ;;  %v4049_v48 = vrot.slane %v4048_v3, 4  ;;  %v4052_v5 = vsel %vm1434_vm1, %v4048_v3, %v4051_v49 }
 0x4e4   : > { %v2704_v19 = vrot.slane %v2703_v35, 4  ;;  %v4024_v20 = vsel %vm1434_vm1, %v4023_v26, %v12235_v38  ;;  %v4060_v22 = vperm.slane %v4052_v5, %v9870_v56  ;;  %v5495_v60 = vpack.i.b16 %v5248_v23, %v9875_v29 }
 0x4e5   : > { %v6115_v51 = vrot.slane %v12282_v1, 4  ;;  %v2691_v59 = vrot.slane %v2690_v36, 4  ;;  %v4030_v7 = vperm.slane %v4024_v20, %v9870_v56  ;;  %v4037_v4 = vrot.slane %v4034_v55, 4 }
 0x4e6   : > { %v2705_v10 = vsel %vm1434_vm1, %v2704_v19, %v2697_v61  ;;  %v4050_v49 = vsel %vm1434_vm1, %v4049_v48, %v12241_v57  ;;  %v4063_v58 = vrot.slane %v4060_v22, 4  ;;  %v5498_v13 = vpack.i.b16 %v5497_v25, %v5496_v34 }
 0x4e7   : > { %v2692_v38 = vsel %vm1434_vm1, 0, %v2691_v59  ;;  %v2709_v12 = vperm.slane %v2705_v10, %v9870_v56  ;;  %v4035_v37 = vrot.slane %v4030_v7, 4  ;;  %v4038_v29 = vsel %vm1434_vm1, 0, %v4037_v4  ;;  %v5304_v59 = vpop.permute.xlu0 %5303 }
 0x4e8   : > { %v3044_v33 = vshrl.u32 %v2690_v36, 16  ;;  %v4056_v30 = vperm.slane %v4050_v49, %v9870_v56  ;;  %v4064_v42 = vsel %vm1434_vm1, 0, %v4063_v58  ;;  %v6289_v24 = vperm.slane %v5495_v60, %v9829_v44  ;;  %v5272_v60 = vpop.permute.xlu1 %5271 }
 0x4e9   : > { %v2710_v32 = vrot.slane %v2709_v12, 4  ;;  %v3042_v6 = vpack.i.b16 %v2709_v12, %v2690_v36  ;;  %v3045_v57 = vshrl.u32 %v2709_v12, 16  ;;  %v4036_v63 = vsel %vm1434_vm1, 0, %v4035_v37 }
 0x4ea   : > { %v3052_v40 = vshrl.u32 %v2692_v38, 16  ;;  %v4061_v23 = vrot.slane %v4056_v30, 4  ;;  %v4691_v8 = vsel %vm1434_vm1, %v4037_v4, %v4030_v7  ;;  %v4696_v14 = vrot.slane %v4038_v29, 4 }
 0x4eb   : > { %v2711_v9 = vsel %vm1434_vm1, 0, %v2710_v32  ;;  %v3046_v28 = vpack.i.b16 %v3045_v57, %v3044_v33  ;;  %3132 = vst.msk [vmem:[%s9964_s9 + $0x2c] sm:$0xf] %vm3120_vm2, %v3042_v6  ;;  %v4710_v27 = vsel %vm1434_vm1, %v4063_v58, %v4056_v30  ;;  %v4715_v61 = vrot.slane %v4064_v42, 4 }
 0x4ec   : > { %v3050_v34 = vpack.i.b16 %v2711_v9, %v2692_v38  ;;  %v3053_v17 = vshrl.u32 %v2711_v9, 16  ;;  %v4062_v18 = vsel %vm1434_vm1, 0, %v4061_v23  ;;  %v4697_v3 = vsel %vm1434_vm1, %v4696_v14, %v4036_v63 }
 0x4ed   : > { %3148 = vst.msk [vmem:[%s9964_s9 + $0x6c] sm:$0xf] %vm3120_vm2, %v3046_v28  ;;  %v4701_v25 = vperm.slane %v4697_v3, %v9829_v44  ;;  %v4716_v39 = vsel %vm1434_vm1, %v4715_v61, %v4062_v18  ;;  %v6297_v35 = vrot.slane %v6289_v24, 4  ;;  %v6315_v26 = vperm.slane %v5498_v13, %v9829_v44 }
 0x4ee   : > { %v3054_v50 = vpack.i.b16 %v3053_v17, %v3052_v40  ;;  %3164 = vst.msk [vmem:[%s9964_s9 + $0xac] sm:$0xf] %vm3120_vm2, %v3050_v34  ;;  %v4720_v36 = vperm.slane %v4716_v39, %v9829_v44  ;;  %v5503_v55 = vshrl.u32 %v5312_v46, 16  ;;  %v5501_v48 = vpack.i.b16 %v5312_v46, %v5280_v11 }
 0x4ef   : > { %v4695_v5 = vperm.slane %v4691_v8, %v9829_v44  ;;  %v4702_v19 = vrot.slane %v4701_v25, 4  ;;  %v4714_v20 = vperm.slane %v4710_v27, %v9829_v44  ;;  %v5502_v22 = vshrl.u32 %v5280_v11, 16 }
 0x4f0   : > { %3180 = vst.msk [vmem:[%s9964_s9 + $0xec] sm:$0xf] %vm3120_vm2, %v3054_v50  ;;  %v4721_v7 = vrot.slane %v4720_v36, 4  ;;  %v6323_v4 = vrot.slane %v6315_v26, 4  ;;  %v6294_v10 = vperm.slane %v5501_v48, %v9829_v44  ;;  %v5453_v49 = vpack.i.b16 %v5304_v59, %v5272_v60 }
 0x4f1   : > { %v4703_v58 = vsel %vm1434_vm1, %v4702_v19, %v4695_v5  ;;  %v5504_v13 = vpack.i.b16 %v5503_v55, %v5502_v22  ;;  %v5454_v38 = vshrl.u32 %v5272_v60, 16  ;;  %v5455_v12 = vshrl.u32 %v5304_v59, 16  ;;  %v5308_v19 = vpop.permute.xlu1 %5307 }
 0x4f2   : > { %v4707_v37 = vperm.slane %v4703_v58, %v9870_v56  ;;  %v4722_v29 = vsel %vm1434_vm1, %v4721_v7, %v4714_v20  ;;  %v6295_v33 = vrot.slane %v6294_v10, 4  ;;  %v6298_v11 = vsel %vm1434_vm1, %v6294_v10, %v6297_v35 }
 0x4f3   : > { %v4726_v30 = vperm.slane %v4722_v29, %v9870_v56  ;;  %v6306_v42 = vperm.slane %v6298_v11, %v9870_v56  ;;  %v6320_v32 = vperm.slane %v5504_v13, %v9829_v44  ;;  %v5456_v6 = vpack.i.b16 %v5455_v12, %v5454_v38 }
 0x4f4   : > { %v4708_v57 = vrot.slane %v4707_v37, 4  ;;  %v5061_v63 = vshrl.u32 %v4707_v37, 16  ;;  %v6296_v40 = vsel %vm1434_vm1, %v6295_v33, %v6289_v24  ;;  %v6086_v23 = vperm.slane %v5453_v49, %v9829_v44 }
 0x4f5   : > { %v4727_v8 = vrot.slane %v4726_v30, 4  ;;  %v5059_v14 = vpack.i.b16 %v4726_v30, %v4707_v37  ;;  %v5062_v9 = vshrl.u32 %v4726_v30, 16  ;;  %v6302_v28 = vperm.slane %v6296_v40, %v9870_v56 }
 0x4f6   : > { %v4709_v27 = vsel %vm1434_vm1, 0, %v4708_v57  ;;  %v6309_v61 = vrot.slane %v6306_v42, 4  ;;  %v6321_v46 = vrot.slane %v6320_v32, 4  ;;  %v6324_v34 = vsel %vm1434_vm1, %v6320_v32, %v6323_v4 }
 0x4f7   : > { %v4728_v17 = vsel %vm1434_vm1, 0, %v4727_v8  ;;  %v5063_v18 = vpack.i.b16 %v5062_v9, %v5061_v63  ;;  %v5069_v3 = vshrl.u32 %v4709_v27, 16  ;;  %5148 = vst.msk [vmem:[%s10006_s24 + $0x2c] sm:$0xf] %vm3120_vm2, %v5059_v14  ;;  %v6307_v24 = vrot.slane %v6302_v28, 4 }
 0x4f8   : > { %v5067_v25 = vpack.i.b16 %v4728_v17, %v4709_v27  ;;  %v5070_v39 = vshrl.u32 %v4728_v17, 16  ;;  %v6310_v35 = vsel %vm1434_vm1, 0, %v6309_v61  ;;  %v6322_v50 = vsel %vm1434_vm1, %v6321_v46, %v6315_v26 }
 0x4f9   : > { %5164 = vst.msk [vmem:[%s10006_s24 + $0x6c] sm:$0xf] %vm3120_vm2, %v5063_v18  ;;  %v6308_v36 = vsel %vm1434_vm1, 0, %v6307_v24  ;;  %v6328_v55 = vperm.slane %v6322_v50, %v9870_v56  ;;  %v6332_v48 = vperm.slane %v6324_v34, %v9870_v56  ;;  %v6907_v5 = vsel %vm1434_vm1, %v6309_v61, %v6302_v28 }
 0x4fa   : > { %v5071_v20 = vpack.i.b16 %v5070_v39, %v5069_v3  ;;  %5180 = vst.msk [vmem:[%s10006_s24 + $0xac] sm:$0xf] %vm3120_vm2, %v5067_v25  ;;  %v6911_v22 = vperm.slane %v6907_v5, %v9829_v44  ;;  %v6912_v60 = vrot.slane %v6310_v35, 4  ;;  %v6087_v59 = vrot.slane %v6086_v23, 4 }
 0x4fb   : > { %v6333_v26 = vrot.slane %v6328_v55, 4  ;;  %v6335_v7 = vrot.slane %v6332_v48, 4  ;;  %v6090_v4 = vsel %vm1434_vm1, %v6086_v23, %v6089_v53  ;;  %v6112_v10 = vperm.slane %v5456_v6, %v9829_v44 }
 0x4fc   : > { %5196 = vst.msk [vmem:[%s10006_s24 + $0xec] sm:$0xf] %vm3120_vm2, %v5071_v20  ;;  %v6913_v49 = vsel %vm1434_vm1, %v6912_v60, %v6308_v36  ;;  %v6088_v58 = vsel %vm1434_vm1, %v6087_v59, %v12274_v0  ;;  %v6098_v13 = vperm.slane %v6090_v4, %v9870_v56  ;;  %v5477_v38 = vpack.i.b16 %v5308_v19, %v11909_v31 }
 0x4fd   : > { %v6334_v12 = vsel %vm1434_vm1, 0, %v6333_v26  ;;  %v6336_v37 = vsel %vm1434_vm1, 0, %v6335_v7  ;;  %v6917_v29 = vperm.slane %v6913_v49, %v9829_v44  ;;  %v6926_v53 = vsel %vm1434_vm1, %v6335_v7, %v6328_v55 }
 0x4fe   : > { %v6930_v33 = vperm.slane %v6926_v53, %v9829_v44  ;;  %v6931_v11 = vrot.slane %v6336_v37, 4  ;;  %v6094_v30 = vperm.slane %v6088_v58, %v9870_v56  ;;  %v6101_v42 = vrot.slane %v6098_v13, 4 }
 0x4ff   : > { %v6918_v32 = vrot.slane %v6917_v29, 4  ;;  %v6113_v0 = vrot.slane %v6112_v10, 4  ;;  %v6116_v6 = vsel %vm1434_vm1, %v6112_v10, %v6115_v51  ;;  %v5479_v57 = vshrl.u32 %v5308_v19, 16 }
 0x500   : > { %v6932_v63 = vsel %vm1434_vm1, %v6931_v11, %v6334_v12  ;;  %v6099_v40 = vrot.slane %v6094_v30, 4  ;;  %v6102_v23 = vsel %vm1434_vm1, 0, %v6101_v42  ;;  %v6124_v8 = vperm.slane %v6116_v6, %v9870_v56 }
 0x501   : > { %v6919_v14 = vsel %vm1434_vm1, %v6918_v32, %v6911_v22  ;;  %v6936_v9 = vperm.slane %v6932_v63, %v9829_v44  ;;  %v6114_v28 = vsel %vm1434_vm1, %v6113_v0, %v12282_v1  ;;  %v6755_v27 = vsel %vm1434_vm1, %v6101_v42, %v6094_v30 }
 0x502   : > { %v6923_v61 = vperm.slane %v6919_v14, %v9870_v56  ;;  %v6100_v51 = vsel %vm1434_vm1, 0, %v6099_v40  ;;  %v6120_v46 = vperm.slane %v6114_v28, %v9870_v56  ;;  %v6127_v34 = vrot.slane %v6124_v8, 4 }
 0x503   : > { %v6937_v17 = vrot.slane %v6936_v9, 4  ;;  %v6759_v18 = vperm.slane %v6755_v27, %v9829_v44  ;;  %v6760_v3 = vrot.slane %v6102_v23, 4  ;;  %v5480_v24 = vpack.i.b16 %v5479_v57, %v5478_v2  ;;  %v5310_v9 = vpop.permute.xlu0 %5309 }
 0x504   : > { %v6924_v25 = vrot.slane %v6923_v61, 4  ;;  %v7189_v39 = vshrl.u32 %v6923_v61, 16  ;;  %v6125_v35 = vrot.slane %v6120_v46, 4  ;;  %v6128_v1 = vsel %vm1434_vm1, 0, %v6127_v34 }
 0x505   : > { %v6938_v50 = vsel %vm1434_vm1, %v6937_v17, %v6930_v33  ;;  %v6761_v36 = vsel %vm1434_vm1, %v6760_v3, %v6100_v51  ;;  %v6774_v55 = vsel %vm1434_vm1, %v6127_v34, %v6120_v46  ;;  %v6779_v48 = vrot.slane %v6128_v1, 4 }
 0x506   : > { %v6925_v5 = vsel %vm1434_vm1, 0, %v6924_v25  ;;  %v6942_v19 = vperm.slane %v6938_v50, %v9870_v56  ;;  %v6126_v20 = vsel %vm1434_vm1, 0, %v6125_v35  ;;  %v6765_v31 = vperm.slane %v6761_v36, %v9829_v44 }
 0x507   : > { %v7197_v2 = vshrl.u32 %v6925_v5, 16  ;;  %v6778_v22 = vperm.slane %v6774_v55, %v9829_v44  ;;  %v6780_v60 = vsel %vm1434_vm1, %v6779_v48, %v6126_v20  ;;  %v6190_v59 = vperm.slane %v5477_v38, %v9829_v44 }
 0x508   : > { %v6943_v26 = vrot.slane %v6942_v19, 4  ;;  %v7187_v7 = vpack.i.b16 %v6942_v19, %v6923_v61  ;;  %v7190_v4 = vshrl.u32 %v6942_v19, 16  ;;  %v6766_v10 = vrot.slane %v6765_v31, 4 }
 0x509   : > { %v6784_v49 = vperm.slane %v6780_v60, %v9829_v44  ;;  %v6191_v58 = vrot.slane %v6190_v59, 4  ;;  %v6194_v13 = vsel %vm1434_vm1, %v6190_v59, %v6193_v47  ;;  %v6216_v12 = vperm.slane %v5480_v24, %v9829_v44 }
 0x50a   : > { %v6944_v37 = vsel %vm1434_vm1, 0, %v6943_v26  ;;  %v7191_v29 = vpack.i.b16 %v7190_v4, %v7189_v39  ;;  %7216 = vst.msk [vmem:[%s10097_s14 + $0x3c] sm:$0xf] %vm3120_vm2, %v7187_v7  ;;  %v6767_v38 = vsel %vm1434_vm1, %v6766_v10, %v6759_v18  ;;  %v6202_v53 = vperm.slane %v6194_v13, %v9870_v56 }
 0x50b   : > { %v7195_v33 = vpack.i.b16 %v6944_v37, %v6925_v5  ;;  %v7198_v11 = vshrl.u32 %v6944_v37, 16  ;;  %v6771_v30 = vperm.slane %v6767_v38, %v9870_v56  ;;  %v6785_v42 = vrot.slane %v6784_v49, 4 }
 0x50c   : > { %7232 = vst.msk [vmem:[%s10097_s14 + $0x7c] sm:$0xf] %vm3120_vm2, %v7191_v29  ;;  %v6192_v47 = vsel %vm1434_vm1, %v6191_v58, %v12035_v21  ;;  %v6205_v32 = vrot.slane %v6202_v53, 4  ;;  %v6217_v0 = vrot.slane %v6216_v12, 4  ;;  %v6220_v6 = vsel %vm1434_vm1, %v6216_v12, %v6219_v41 }
 0x50d   : > { %v5486_v57 = vpack.i.b16 %v5485_v15, %v5484_v16  ;;  %v7199_v63 = vpack.i.b16 %v7198_v11, %v7197_v2  ;;  %7248 = vst.msk [vmem:[%s10097_s14 + $0xbc] sm:$0xf] %vm3120_vm2, %v7195_v33  ;;  %v6772_v40 = vrot.slane %v6771_v30, 4  ;;  %v6786_v23 = vsel %vm1434_vm1, %v6785_v42, %v6778_v22 }
 0x50e   : > { %v6790_v8 = vperm.slane %v6786_v23, %v9870_v56  ;;  %v6198_v21 = vperm.slane %v6192_v47, %v9870_v56  ;;  %v6206_v14 = vsel %vm1434_vm1, 0, %v6205_v32  ;;  %v6218_v41 = vsel %vm1434_vm1, %v6217_v0, %v12046_v52 }
 0x50f   : > { %7264 = vst.msk [vmem:[%s10097_s14 + $0xfc] sm:$0xf] %vm3120_vm2, %v7199_v63  ;;  %v6773_v45 = vsel %vm1434_vm1, 0, %v6772_v40  ;;  %v7125_v62 = vshrl.u32 %v6771_v30, 16  ;;  %v6224_v16 = vperm.slane %v6218_v41, %v9870_v56  ;;  %v6228_v15 = vperm.slane %v6220_v6, %v9870_v56 }
 0x510   : > { %v6791_v28 = vrot.slane %v6790_v8, 4  ;;  %v7123_v27 = vpack.i.b16 %v6790_v8, %v6771_v30  ;;  %v7126_v61 = vshrl.u32 %v6790_v8, 16  ;;  %v6836_v51 = vrot.slane %v6206_v14, 4 }
 0x511   : > { %v5490_v46 = vshrl.u32 %v12126_v43, 16  ;;  %v6203_v34 = vrot.slane %v6198_v21, 4  ;;  %v6229_v52 = vrot.slane %v6224_v16, 4  ;;  %v6231_v17 = vrot.slane %v6228_v15, 4 }
 0x512   : > { %v6792_v18 = vsel %vm1434_vm1, 0, %v6791_v28  ;;  %v7127_v3 = vpack.i.b16 %v7126_v61, %v7125_v62  ;;  %v7133_v24 = vshrl.u32 %v6773_v45, 16  ;;  %7212 = vst.msk [vmem:[%s10097_s14 + $0x2c] sm:$0xf] %vm3120_vm2, %v7123_v27  ;;  %v5489_v25 = vpack.i.b16 %v5310_v9, %v12126_v43 }
 0x513   : > { %v7131_v39 = vpack.i.b16 %v6792_v18, %v6773_v45  ;;  %v7134_v35 = vshrl.u32 %v6792_v18, 16  ;;  %v6204_v1 = vsel %vm1434_vm1, 0, %v6203_v34  ;;  %v6831_v50 = vsel %vm1434_vm1, %v6205_v32, %v6198_v21 }
 0x514   : > { %7228 = vst.msk [vmem:[%s10097_s14 + $0x6c] sm:$0xf] %vm3120_vm2, %v7127_v3  ;;  %v6230_v36 = vsel %vm1434_vm1, 0, %v6229_v52  ;;  %v6232_v55 = vsel %vm1434_vm1, 0, %v6231_v17  ;;  %v6837_v48 = vsel %vm1434_vm1, %v6836_v51, %v6204_v1  ;;  %v5491_v5 = vshrl.u32 %v5310_v9, 16 }
 0x515   : > { %v6263_v19 = vperm.slane %v5486_v57, %v9829_v44  ;;  %v7135_v20 = vpack.i.b16 %v7134_v35, %v7133_v24  ;;  %7244 = vst.msk [vmem:[%s10097_s14 + $0xac] sm:$0xf] %vm3120_vm2, %v7131_v39  ;;  %v6841_v43 = vperm.slane %v6837_v48, %v9829_v44  ;;  %v6855_v31 = vrot.slane %v6232_v55, 4 }
 0x516   : > { %v6245_v2 = vrot.slane %v12080_v54, 4  ;;  %v6850_v22 = vsel %vm1434_vm1, %v6231_v17, %v6224_v16  ;;  %v5492_v60 = vpack.i.b16 %v5491_v5, %v5490_v46  ;;  %v6242_v59 = vperm.slane %v5489_v25, %v9829_v44 }
 0x517   : > { %7260 = vst.msk [vmem:[%s10097_s14 + $0xec] sm:$0xf] %vm3120_vm2, %v7135_v20  ;;  %v6835_v26 = vperm.slane %v6831_v50, %v9829_v44  ;;  %v6842_v7 = vrot.slane %v6841_v43, 4  ;;  %v6856_v4 = vsel %vm1434_vm1, %v6855_v31, %v6230_v36  ;;  %v6271_v12 = vrot.slane %v6263_v19, 4 }
 0x518   : > { %v6860_v10 = vperm.slane %v6856_v4, %v9829_v44  ;;  %v6243_v49 = vrot.slane %v6242_v59, 4  ;;  %v6246_v58 = vsel %vm1434_vm1, %v6242_v59, %v6245_v2  ;;  %v6268_v13 = vperm.slane %v5492_v60, %v9829_v44 }
 0x519   : > { %v6843_v37 = vsel %vm1434_vm1, %v6842_v7, %v6835_v26  ;;  %v6854_v29 = vperm.slane %v6850_v22, %v9829_v44  ;;  %v6254_v38 = vperm.slane %v6246_v58, %v9870_v56 }
 0x51a   : > { %v6847_v53 = vperm.slane %v6843_v37, %v9870_v56  ;;  %v6861_v33 = vrot.slane %v6860_v10, 4  ;;  %v6244_v11 = vsel %vm1434_vm1, %v6243_v49, %v12080_v54  ;;  %v6269_v30 = vrot.slane %v6268_v13, 4  ;;  %v7309_v37 = vld [vmem:[%s9964_s9 + $0x10] sm:$0xff] (%p9024_p0)  }
 0x51b   : > { %v6250_v42 = vperm.slane %v6244_v11, %v9870_v56  ;;  %v6257_v47 = vrot.slane %v6254_v38, 4  ;;  %v6272_v32 = vsel %vm1434_vm1, %v6268_v13, %v6271_v12  ;;  %v7305_v12 = vld [vmem:[%s9964_s9 + $0x8] sm:$0xff] (%p9024_p0)   ;;  %v7317_v38 = vld [vmem:[%s9964_s9 + $0x20] sm:$0xff] (%p9024_p0)   ;;  %7310 = vst [vmem:[%s12563_s2 + $0x10] sm:$0xff] (%p9024_p0), %v7309_v37   ;;  %v7329_v11 = vld [vmem:[%s9964_s9 + $0x38] sm:$0xff] (%p9024_p0)  }
 0x51c   : > { %v6848_v0 = vrot.slane %v6847_v53, 4  ;;  %v6862_v6 = vsel %vm1434_vm1, %v6861_v33, %v6854_v29  ;;  %v6270_v57 = vsel %vm1434_vm1, %v6269_v30, %v6263_v19  ;;  %v6280_v21 = vperm.slane %v6272_v32, %v9870_v56  ;;  %v7313_v29 = vld [vmem:[%s9964_s9 + $0x18] sm:$0xff] (%p9024_p0)   ;;  %7306 = vst [vmem:[%s12563_s2 + $0x8] sm:$0xff] (%p9024_p0), %v7305_v12   ;;  %v7325_v33 = vld [vmem:[%s9964_s9 + $0x30] sm:$0xff] (%p9024_p0)   ;;  %v7333_v30 = vld [vmem:[%s9964_s9 + $0x40] sm:$0xff] (%p9024_p0)  }
 0x51d   : > { %v6866_v63 = vperm.slane %v6862_v6, %v9870_v56  ;;  %v6255_v40 = vrot.slane %v6250_v42, 4  ;;  %v6258_v23 = vsel %vm1434_vm1, 0, %v6257_v47  ;;  %v6276_v8 = vperm.slane %v6270_v57, %v9870_v56  ;;  %7314 = vst [vmem:[%s12563_s2 + $0x18] sm:$0xff] (%p9024_p0), %v7313_v29   ;;  %v7345_v32 = vld [vmem:[%s9964_s9 + $0x58] sm:$0xff] (%p9024_p0)   ;;  %v7353_v6 = vld [vmem:[%s9964_s9 + $0x68] sm:$0xff] (%p9024_p0)   ;;  %v7357_v57 = vld [vmem:[%s9964_s9 + $0x70] sm:$0xff] (%p9024_p0)  }
 0x51e   : > { %v6849_v54 = vsel %vm1434_vm1, 0, %v6848_v0  ;;  %v6874_v14 = vrot.slane %v6258_v23, 4  ;;  %v7157_v62 = vshrl.u32 %v6847_v53, 16  ;;  %v6283_v28 = vrot.slane %v6280_v21, 4  ;;  %7318 = vst [vmem:[%s12563_s2 + $0x20] sm:$0xff] (%p9024_p0), %v7317_v38   ;;  %v7349_v0 = vld [vmem:[%s9964_s9 + $0x60] sm:$0xff] (%p9024_p0)  }
 0x51f   : > { %v6867_v41 = vrot.slane %v6866_v63, 4  ;;  %v7155_v45 = vpack.i.b16 %v6866_v63, %v6847_v53  ;;  %v7158_v16 = vshrl.u32 %v6866_v63, 16  ;;  %v6256_v15 = vsel %vm1434_vm1, 0, %v6255_v40  ;;  %v7321_v53 = vld [vmem:[%s9964_s9 + $0x28] sm:$0xff] (%p9024_p0)   ;;  %7326 = vst [vmem:[%s12563_s2 + $0x30] sm:$0xff] (%p9024_p0), %v7325_v33   ;;  %v7361_v63 = vld [vmem:[%s9964_s9 + $0x78] sm:$0xff] (%p9024_p0)  }
 0x520   : > { %v6281_v9 = vrot.slane %v6276_v8, 4  ;;  %v6869_v27 = vsel %vm1434_vm1, %v6257_v47, %v6250_v42  ;;  %v7165_v46 = vshrl.u32 %v6849_v54, 16  ;;  %v6875_v34 = vsel %vm1434_vm1, %v6874_v14, %v6256_v15  ;;  %7322 = vst [vmem:[%s12563_s2 + $0x28] sm:$0xff] (%p9024_p0), %v7321_v53   ;;  %v7337_v42 = vld [vmem:[%s9964_s9 + $0x48] sm:$0xff] (%p9024_p0)   ;;  %v7341_v47 = vld [vmem:[%s9964_s9 + $0x50] sm:$0xff] (%p9024_p0)   ;;  %v7365_v40 = vld [vmem:[%s9964_s9 + $0x80] sm:$0xff] (%p9024_p0)  }
 0x521   : > { %v6868_v61 = vsel %vm1434_vm1, 0, %v6867_v41  ;;  %v7159_v51 = vpack.i.b16 %v7158_v16, %v7157_v62  ;;  %7214 = vst.msk [vmem:[%s10097_s14 + $0x34] sm:$0xf] %vm3120_vm2, %v7155_v45  ;;  %v6284_v3 = vsel %vm1434_vm1, 0, %v6283_v28  ;;  %v6879_v24 = vperm.slane %v6875_v34, %v9829_v44  ;;  %v7369_v23 = vld [vmem:[%s9964_s9 + $0x88] sm:$0xff] (%p9024_p0)   ;;  %v7381_v21 = vld [vmem:[%s9964_s9 + $0xa0] sm:$0xff] (%p9024_p0)  }
 0x522   : > { %v7163_v52 = vpack.i.b16 %v6868_v61, %v6849_v54  ;;  %v7166_v17 = vshrl.u32 %v6868_v61, 16  ;;  %v6282_v18 = vsel %vm1434_vm1, 0, %v6281_v9  ;;  %v6893_v25 = vrot.slane %v6284_v3, 4  ;;  %7330 = vst [vmem:[%s12563_s2 + $0x38] sm:$0xff] (%p9024_p0), %v7329_v11   ;;  %v7377_v54 = vld [vmem:[%s9964_s9 + $0x98] sm:$0xff] (%p9024_p0)   ;;  %v7385_v14 = vld [vmem:[%s9964_s9 + $0xa8] sm:$0xff] (%p9024_p0)  }
 0x523   : > { %7230 = vst.msk [vmem:[%s10097_s14 + $0x74] sm:$0xf] %vm3120_vm2, %v7159_v51  ;;  %v6873_v35 = vperm.slane %v6869_v27, %v9829_v44  ;;  %v6880_v1 = vrot.slane %v6879_v24, 4  ;;  %v6888_v50 = vsel %vm1434_vm1, %v6283_v28, %v6276_v8  ;;  %v7373_v8 = vld [vmem:[%s9964_s9 + $0x90] sm:$0xff] (%p9024_p0)   ;;  %v7393_v45 = vld [vmem:[%s9964_s9 + $0xb8] sm:$0xff] (%p9024_p0)   ;;  %v7397_v62 = vld [vmem:[%s9964_s9 + $0xc0] sm:$0xff] (%p9024_p0)  }
 0x524   : > { %v7167_v39 = vpack.i.b16 %v7166_v17, %v7165_v46  ;;  %7246 = vst.msk [vmem:[%s10097_s14 + $0xb4] sm:$0xf] %vm3120_vm2, %v7163_v52  ;;  %v6894_v36 = vsel %vm1434_vm1, %v6893_v25, %v6282_v18  ;;  %v6892_v19 = vperm.slane %v6888_v50, %v9829_v44  ;;  %v7389_v41 = vld [vmem:[%s9964_s9 + $0xb0] sm:$0xff] (%p9024_p0)   ;;  %v7401_v16 = vld [vmem:[%s9964_s9 + $0xc8] sm:$0xff] (%p9024_p0)   ;;  %v7409_v9 = vld [vmem:[%s9964_s9 + $0xd8] sm:$0xff] (%p9024_p0)  }
 0x525   : > { %v6898_v55 = vperm.slane %v6894_v36, %v9829_v44  ;;  %v6881_v48 = vsel %vm1434_vm1, %v6880_v1, %v6873_v35  ;;  %7334 = vst [vmem:[%s12563_s2 + $0x80] sm:$0xff] (%p9024_p0), %v7333_v30   ;;  %v7405_v15 = vld [vmem:[%s9964_s9 + $0xd0] sm:$0xff] (%p9024_p0)   ;;  %v7413_v28 = vld [vmem:[%s9964_s9 + $0xe0] sm:$0xff] (%p9024_p0)   ;;  %v7417_v27 = vld [vmem:[%s9964_s9 + $0xe8] sm:$0xff] (%p9024_p0)  }
 0x526   : > { %7262 = vst.msk [vmem:[%s10097_s14 + $0xf4] sm:$0xf] %vm3120_vm2, %v7167_v39  ;;  %v6885_v5 = vperm.slane %v6881_v48, %v9870_v56  ;;  %v7421_v61 = vld [vmem:[%s9964_s9 + $0xf0] sm:$0xff] (%p9024_p0)   ;;  %v7425_v51 = vld [vmem:[%s9964_s9 + $0xf8] sm:$0xff] (%p9024_p0)  }
 0x527   : > { %v6899_v20 = vrot.slane %v6898_v55, 4  ;;  %7338 = vst [vmem:[%s12563_s2 + $0x88] sm:$0xff] (%p9024_p0), %v7337_v42  }
 0x528   : > { %v6886_v43 = vrot.slane %v6885_v5, 4  ;;  %v7173_v22 = vshrl.u32 %v6885_v5, 16  ;;  %7342 = vst [vmem:[%s12563_s2 + $0x90] sm:$0xff] (%p9024_p0), %v7341_v47  }
 0x529   : > { %v6900_v31 = vsel %vm1434_vm1, %v6899_v20, %v6892_v19  ;;  %7346 = vst [vmem:[%s12563_s2 + $0x98] sm:$0xff] (%p9024_p0), %v7345_v32  }
 0x52a   : > { %v6904_v2 = vperm.slane %v6900_v31, %v9870_v56  ;;  %v6887_v60 = vsel %vm1434_vm1, 0, %v6886_v43  ;;  %v7301_v56 = vld [vmem:[%s9964_s9] sm:$0xff] (%p9024_p0)   ;;  %7350 = vst [vmem:[%s12563_s2 + $0xa0] sm:$0xff] (%p9024_p0), %v7349_v0  }
 0x52b   : > { %v7181_v49 = vshrl.u32 %v6887_v60, 16  ;;  %7302 = vst [vmem:[%s12563_s2] sm:$0xff] (%p9024_p0), %v7301_v56  }
 0x52c   : > { %v6905_v59 = vrot.slane %v6904_v2, 4  ;;  %v7171_v26 = vpack.i.b16 %v6904_v2, %v6885_v5  ;;  %v7174_v7 = vshrl.u32 %v6904_v2, 16  ;;  %7354 = vst [vmem:[%s12563_s2 + $0xa8] sm:$0xff] (%p9024_p0), %v7353_v6  }
 0x52d   : > { %7358 = vst [vmem:[%s12563_s2 + $0xb0] sm:$0xff] (%p9024_p0), %v7357_v57  }
 0x52e   : > { %v6906_v4 = vsel %vm1434_vm1, 0, %v6905_v59  ;;  %v7175_v10 = vpack.i.b16 %v7174_v7, %v7173_v22  ;;  %7215 = vst.msk [vmem:[%s10097_s14 + $0x38] sm:$0xf] %vm3120_vm2, %v7171_v26 }
 0x52f   : > { %v7179_v44 = vpack.i.b16 %v6906_v4, %v6887_v60  ;;  %v7182_v58 = vshrl.u32 %v6906_v4, 16  ;;  %7279 = sbr.rel (!%p9024_p0) target bundleno = 1347 (0x543), region = 60  ;;  %7362 = vst [vmem:[%s12563_s2 + $0xb8] sm:$0xff] (%p9024_p0), %v7361_v63  }
 0x530   : > { %7231 = vst.msk [vmem:[%s10097_s14 + $0x78] sm:$0xf] %vm3120_vm2, %v7175_v10 }
 0x531   : > { %v7183_v13 = vpack.i.b16 %v7182_v58, %v7181_v49  ;;  %7247 = vst.msk [vmem:[%s10097_s14 + $0xb8] sm:$0xf] %vm3120_vm2, %v7179_v44 }
 0x532   : > { %7366 = vst [vmem:[%s12563_s2 + $0x100] sm:$0xff] (%p9024_p0), %v7365_v40  }
 0x533   : > { %7263 = vst.msk [vmem:[%s10097_s14 + $0xf8] sm:$0xf] %vm3120_vm2, %v7183_v13 }
 0x534   : > { %7370 = vst [vmem:[%s12563_s2 + $0x108] sm:$0xff] %v7369_v23  }
 0x535   : > { %7374 = vst [vmem:[%s12563_s2 + $0x110] sm:$0xff] %v7373_v8  }
 0x536   : > { %7378 = vst [vmem:[%s12563_s2 + $0x118] sm:$0xff] %v7377_v54  }
 0x537   : > { %7382 = vst [vmem:[%s12563_s2 + $0x120] sm:$0xff] %v7381_v21  }
 0x538   : > { %7386 = vst [vmem:[%s12563_s2 + $0x128] sm:$0xff] %v7385_v14  }
 0x539   : > { %7390 = vst [vmem:[%s12563_s2 + $0x130] sm:$0xff] %v7389_v41  }
 0x53a   : > { %7394 = vst [vmem:[%s12563_s2 + $0x138] sm:$0xff] %v7393_v45  }
 0x53b   : > { %7398 = vst [vmem:[%s12563_s2 + $0x180] sm:$0xff] %v7397_v62  }
 0x53c   : > { %7402 = vst [vmem:[%s12563_s2 + $0x188] sm:$0xff] %v7401_v16  }
 0x53d   : > { %7406 = vst [vmem:[%s12563_s2 + $0x190] sm:$0xff] %v7405_v15  }
 0x53e   : > { %7410 = vst [vmem:[%s12563_s2 + $0x198] sm:$0xff] %v7409_v9  }
 0x53f   : > { %7414 = vst [vmem:[%s12563_s2 + $0x1a0] sm:$0xff] %v7413_v28  }
 0x540   : > { %7418 = vst [vmem:[%s12563_s2 + $0x1a8] sm:$0xff] %v7417_v27  }
 0x541   : > { %7422 = vst [vmem:[%s12563_s2 + $0x1b0] sm:$0xff] %v7421_v61  }
 0x542   : > { %7426 = vst [vmem:[%s12563_s2 + $0x1b8] sm:$0xff] %v7425_v51  }
 0x543 PF: > { %7580 = sbr.rel (!%p9024_p0) target bundleno = 1389 (0x56d), region = 101  ;;  %s12883_s6 = sld [smem:[#allocation15_spill]] (%p9024_p0)  ;;  %v7602_v46 = vld [vmem:[%s10006_s24] sm:$0xff] (%p9024_p0)   ;;  %v7606_v34 = vld [vmem:[%s10006_s24 + $0x8] sm:$0xff] (%p9024_p0)   ;;  %v7610_v52 = vld [vmem:[%s10006_s24 + $0x10] sm:$0xff] (%p9024_p0)  }
 0x544   : > { %s8471_s7 = sshll.u32 (%p9024_p0), %s8853_s27, 4  ;;  %s12884_s16 = sld [smem:[#allocation23_spill]] (%p9024_p0)  ;;  %v7614_v17 = vld [vmem:[%s10006_s24 + $0x18] sm:$0xff] (%p9024_p0)   ;;  %v7618_v18 = vld [vmem:[%s10006_s24 + $0x20] sm:$0xff] (%p9024_p0)   ;;  %v7622_v3 = vld [vmem:[%s10006_s24 + $0x28] sm:$0xff] (%p9024_p0)  }
 0x545   : > { %v7626_v24 = vld [vmem:[%s10006_s24 + $0x30] sm:$0xff] (%p9024_p0)   ;;  %v7630_v25 = vld [vmem:[%s10006_s24 + $0x38] sm:$0xff] (%p9024_p0)   ;;  %v7634_v39 = vld [vmem:[%s10006_s24 + $0x40] sm:$0xff] (%p9024_p0)  }
 0x546   : > { %v7638_v35 = vld [vmem:[%s10006_s24 + $0x48] sm:$0xff] (%p9024_p0)   ;;  %v7642_v1 = vld [vmem:[%s10006_s24 + $0x50] sm:$0xff] (%p9024_p0)   ;;  %v7646_v50 = vld [vmem:[%s10006_s24 + $0x58] sm:$0xff] (%p9024_p0)  }
 0x547   : > { %v7650_v36 = vld [vmem:[%s10006_s24 + $0x60] sm:$0xff] (%p9024_p0)   ;;  %v7654_v55 = vld [vmem:[%s10006_s24 + $0x68] sm:$0xff] (%p9024_p0)   ;;  %v7658_v48 = vld [vmem:[%s10006_s24 + $0x70] sm:$0xff] (%p9024_p0)  }
 0x548   : > { %v7662_v5 = vld [vmem:[%s10006_s24 + $0x78] sm:$0xff]   ;;  %v7666_v19 = vld [vmem:[%s10006_s24 + $0x80] sm:$0xff]   ;;  %v7670_v20 = vld [vmem:[%s10006_s24 + $0x88] sm:$0xff]  }
 0x549   : > { %s8472_s5 = sshll.u32 %s12883_s6, 7  ;;  %v7674_v43 = vld [vmem:[%s10006_s24 + $0x90] sm:$0xff]   ;;  %v7678_v31 = vld [vmem:[%s10006_s24 + $0x98] sm:$0xff]   ;;  %v7682_v2 = vld [vmem:[%s10006_s24 + $0xa0] sm:$0xff]  }
 0x54a   : > { %s7583_s28 = sadd.s32 %s8472_s5, %s8471_s7  ;;  %v7686_v22 = vld [vmem:[%s10006_s24 + $0xa8] sm:$0xff]   ;;  %v7690_v60 = vld [vmem:[%s10006_s24 + $0xb0] sm:$0xff]   ;;  %v7694_v59 = vld [vmem:[%s10006_s24 + $0xb8] sm:$0xff]  }
 0x54b   : > { %s8473_s10 = sshll.u32 %s7583_s28, 2  ;;  %v7698_v26 = vld [vmem:[%s10006_s24 + $0xc0] sm:$0xff]   ;;  %v7702_v7 = vld [vmem:[%s10006_s24 + $0xc8] sm:$0xff]   ;;  %v7706_v4 = vld [vmem:[%s10006_s24 + $0xd0] sm:$0xff]  }
 0x54c   : > { %s12636_s9 = scalar_lea.vmem %s12884_s16, %s8473_s10  ;;  %v7710_v10 = vld [vmem:[%s10006_s24 + $0xd8] sm:$0xff]   ;;  %v7714_v44 = vld [vmem:[%s10006_s24 + $0xe0] sm:$0xff]   ;;  %v7718_v49 = vld [vmem:[%s10006_s24 + $0xe8] sm:$0xff]  }
 0x54d   : > { %7603 = vst [vmem:[%s12636_s9] sm:$0xff] %v7602_v46   ;;  %v7722_v58 = vld [vmem:[%s10006_s24 + $0xf0] sm:$0xff]   ;;  %v7726_v13 = vld [vmem:[%s10006_s24 + $0xf8] sm:$0xff]  }
 0x54e   : > { %7607 = vst [vmem:[%s12636_s9 + $0x8] sm:$0xff] %v7606_v34  }
 0x54f   : > { %7611 = vst [vmem:[%s12636_s9 + $0x10] sm:$0xff] %v7610_v52  }
 0x550   : > { %7615 = vst [vmem:[%s12636_s9 + $0x18] sm:$0xff] %v7614_v17  }
 0x551   : > { %7619 = vst [vmem:[%s12636_s9 + $0x20] sm:$0xff] %v7618_v18  }
 0x552   : > { %7623 = vst [vmem:[%s12636_s9 + $0x28] sm:$0xff] %v7622_v3  }
 0x553   : > { %7627 = vst [vmem:[%s12636_s9 + $0x30] sm:$0xff] %v7626_v24  }
 0x554   : > { %7631 = vst [vmem:[%s12636_s9 + $0x38] sm:$0xff] %v7630_v25  }
 0x555   : > { %7635 = vst [vmem:[%s12636_s9 + $0x80] sm:$0xff] %v7634_v39  }
 0x556   : > { %7639 = vst [vmem:[%s12636_s9 + $0x88] sm:$0xff] %v7638_v35  }
 0x557   : > { %7643 = vst [vmem:[%s12636_s9 + $0x90] sm:$0xff] %v7642_v1  }
 0x558   : > { %7647 = vst [vmem:[%s12636_s9 + $0x98] sm:$0xff] %v7646_v50  }
 0x559   : > { %7651 = vst [vmem:[%s12636_s9 + $0xa0] sm:$0xff] %v7650_v36  }
 0x55a   : > { %7655 = vst [vmem:[%s12636_s9 + $0xa8] sm:$0xff] %v7654_v55  }
 0x55b   : > { %7659 = vst [vmem:[%s12636_s9 + $0xb0] sm:$0xff] %v7658_v48  }
 0x55c   : > { %7663 = vst [vmem:[%s12636_s9 + $0xb8] sm:$0xff] %v7662_v5  }
 0x55d   : > { %7667 = vst [vmem:[%s12636_s9 + $0x100] sm:$0xff] %v7666_v19  }
 0x55e   : > { %7671 = vst [vmem:[%s12636_s9 + $0x108] sm:$0xff] %v7670_v20  }
 0x55f   : > { %7675 = vst [vmem:[%s12636_s9 + $0x110] sm:$0xff] %v7674_v43  }
 0x560   : > { %7679 = vst [vmem:[%s12636_s9 + $0x118] sm:$0xff] %v7678_v31  }
 0x561   : > { %7683 = vst [vmem:[%s12636_s9 + $0x120] sm:$0xff] %v7682_v2  }
 0x562   : > { %7687 = vst [vmem:[%s12636_s9 + $0x128] sm:$0xff] %v7686_v22  }
 0x563   : > { %7691 = vst [vmem:[%s12636_s9 + $0x130] sm:$0xff] %v7690_v60  }
 0x564   : > { %7695 = vst [vmem:[%s12636_s9 + $0x138] sm:$0xff] %v7694_v59  }
 0x565   : > { %7699 = vst [vmem:[%s12636_s9 + $0x180] sm:$0xff] %v7698_v26  }
 0x566   : > { %7703 = vst [vmem:[%s12636_s9 + $0x188] sm:$0xff] %v7702_v7  }
 0x567   : > { %7707 = vst [vmem:[%s12636_s9 + $0x190] sm:$0xff] %v7706_v4  }
 0x568   : > { %7711 = vst [vmem:[%s12636_s9 + $0x198] sm:$0xff] %v7710_v10  }
 0x569   : > { %7715 = vst [vmem:[%s12636_s9 + $0x1a0] sm:$0xff] %v7714_v44  }
 0x56a   : > { %7719 = vst [vmem:[%s12636_s9 + $0x1a8] sm:$0xff] %v7718_v49  }
 0x56b   : > { %7723 = vst [vmem:[%s12636_s9 + $0x1b0] sm:$0xff] %v7722_v58  }
 0x56c   : > { %7727 = vst [vmem:[%s12636_s9 + $0x1b8] sm:$0xff] %v7726_v13  }
 0x56d PF: > { %7881 = sbr.rel (!%p9024_p0) target bundleno = 1431 (0x597), region = 142  ;;  %s12885_s15 = sld [smem:[#allocation15_spill]] (%p9024_p0)  ;;  %v7903_v56 = vld [vmem:[%s10097_s14] sm:$0xff] (%p9024_p0)   ;;  %v7907_v12 = vld [vmem:[%s10097_s14 + $0x8] sm:$0xff] (%p9024_p0)   ;;  %v7911_v37 = vld [vmem:[%s10097_s14 + $0x10] sm:$0xff] (%p9024_p0)  }
 0x56e   : > { %s8474_s21 = sshll.u32 (%p9024_p0), %s8853_s27, 4  ;;  %s12886_s17 = sld [smem:[#allocation24_spill]] (%p9024_p0)  ;;  %v7915_v29 = vld [vmem:[%s10097_s14 + $0x18] sm:$0xff] (%p9024_p0)   ;;  %v7919_v38 = vld [vmem:[%s10097_s14 + $0x20] sm:$0xff] (%p9024_p0)   ;;  %v7923_v53 = vld [vmem:[%s10097_s14 + $0x28] sm:$0xff] (%p9024_p0)  }
 0x56f   : > { %v7927_v33 = vld [vmem:[%s10097_s14 + $0x30] sm:$0xff] (%p9024_p0)   ;;  %v7931_v11 = vld [vmem:[%s10097_s14 + $0x38] sm:$0xff] (%p9024_p0)   ;;  %v7935_v30 = vld [vmem:[%s10097_s14 + $0x40] sm:$0xff] (%p9024_p0)  }
 0x570   : > { %v7939_v42 = vld [vmem:[%s10097_s14 + $0x48] sm:$0xff] (%p9024_p0)   ;;  %v7943_v47 = vld [vmem:[%s10097_s14 + $0x50] sm:$0xff] (%p9024_p0)   ;;  %v7947_v32 = vld [vmem:[%s10097_s14 + $0x58] sm:$0xff] (%p9024_p0)  }
 0x571   : > { %v7951_v0 = vld [vmem:[%s10097_s14 + $0x60] sm:$0xff] (%p9024_p0)   ;;  %v7955_v6 = vld [vmem:[%s10097_s14 + $0x68] sm:$0xff] (%p9024_p0)   ;;  %v7959_v57 = vld [vmem:[%s10097_s14 + $0x70] sm:$0xff] (%p9024_p0)  }
 0x572   : > { %v7963_v63 = vld [vmem:[%s10097_s14 + $0x78] sm:$0xff]   ;;  %v7967_v40 = vld [vmem:[%s10097_s14 + $0x80] sm:$0xff]   ;;  %v7971_v23 = vld [vmem:[%s10097_s14 + $0x88] sm:$0xff]  }
 0x573   : > { %s8475_s23 = sshll.u32 %s12885_s15, 7  ;;  %v7975_v8 = vld [vmem:[%s10097_s14 + $0x90] sm:$0xff]   ;;  %v7979_v54 = vld [vmem:[%s10097_s14 + $0x98] sm:$0xff]   ;;  %v7983_v21 = vld [vmem:[%s10097_s14 + $0xa0] sm:$0xff]  }
 0x574   : > { %s7884_s24 = sadd.s32 %s8475_s23, %s8474_s21  ;;  %v7987_v14 = vld [vmem:[%s10097_s14 + $0xa8] sm:$0xff]   ;;  %v7991_v41 = vld [vmem:[%s10097_s14 + $0xb0] sm:$0xff]   ;;  %v7995_v45 = vld [vmem:[%s10097_s14 + $0xb8] sm:$0xff]  }
 0x575   : > { %s8476_s11 = sshll.u32 %s7884_s24, 2  ;;  %v7999_v62 = vld [vmem:[%s10097_s14 + $0xc0] sm:$0xff]   ;;  %v8003_v16 = vld [vmem:[%s10097_s14 + $0xc8] sm:$0xff]   ;;  %v8007_v15 = vld [vmem:[%s10097_s14 + $0xd0] sm:$0xff]  }
 0x576   : > { %s12709_s20 = scalar_lea.vmem %s12886_s17, %s8476_s11  ;;  %v8011_v9 = vld [vmem:[%s10097_s14 + $0xd8] sm:$0xff]   ;;  %v8015_v28 = vld [vmem:[%s10097_s14 + $0xe0] sm:$0xff]   ;;  %v8019_v27 = vld [vmem:[%s10097_s14 + $0xe8] sm:$0xff]  }
 0x577   : > { %7904 = vst [vmem:[%s12709_s20] sm:$0xff] %v7903_v56   ;;  %v8023_v61 = vld [vmem:[%s10097_s14 + $0xf0] sm:$0xff]   ;;  %v8027_v51 = vld [vmem:[%s10097_s14 + $0xf8] sm:$0xff]  }
 0x578   : > { %7908 = vst [vmem:[%s12709_s20 + $0x8] sm:$0xff] %v7907_v12  }
 0x579   : > { %7912 = vst [vmem:[%s12709_s20 + $0x10] sm:$0xff] %v7911_v37  }
 0x57a   : > { %7916 = vst [vmem:[%s12709_s20 + $0x18] sm:$0xff] %v7915_v29  }
 0x57b   : > { %7920 = vst [vmem:[%s12709_s20 + $0x20] sm:$0xff] %v7919_v38  }
 0x57c   : > { %7924 = vst [vmem:[%s12709_s20 + $0x28] sm:$0xff] %v7923_v53  }
 0x57d   : > { %7928 = vst [vmem:[%s12709_s20 + $0x30] sm:$0xff] %v7927_v33  }
 0x57e   : > { %7932 = vst [vmem:[%s12709_s20 + $0x38] sm:$0xff] %v7931_v11  }
 0x57f   : > { %7936 = vst [vmem:[%s12709_s20 + $0x80] sm:$0xff] %v7935_v30  }
 0x580   : > { %7940 = vst [vmem:[%s12709_s20 + $0x88] sm:$0xff] %v7939_v42  }
 0x581   : > { %7944 = vst [vmem:[%s12709_s20 + $0x90] sm:$0xff] %v7943_v47  }
 0x582   : > { %7948 = vst [vmem:[%s12709_s20 + $0x98] sm:$0xff] %v7947_v32  }
 0x583   : > { %7952 = vst [vmem:[%s12709_s20 + $0xa0] sm:$0xff] %v7951_v0  }
 0x584   : > { %7956 = vst [vmem:[%s12709_s20 + $0xa8] sm:$0xff] %v7955_v6  }
 0x585   : > { %7960 = vst [vmem:[%s12709_s20 + $0xb0] sm:$0xff] %v7959_v57  }
 0x586   : > { %7964 = vst [vmem:[%s12709_s20 + $0xb8] sm:$0xff] %v7963_v63  }
 0x587   : > { %7968 = vst [vmem:[%s12709_s20 + $0x100] sm:$0xff] %v7967_v40  }
 0x588   : > { %7972 = vst [vmem:[%s12709_s20 + $0x108] sm:$0xff] %v7971_v23  }
 0x589   : > { %7976 = vst [vmem:[%s12709_s20 + $0x110] sm:$0xff] %v7975_v8  }
 0x58a   : > { %7980 = vst [vmem:[%s12709_s20 + $0x118] sm:$0xff] %v7979_v54  }
 0x58b   : > { %7984 = vst [vmem:[%s12709_s20 + $0x120] sm:$0xff] %v7983_v21  }
 0x58c   : > { %7988 = vst [vmem:[%s12709_s20 + $0x128] sm:$0xff] %v7987_v14  }
 0x58d   : > { %7992 = vst [vmem:[%s12709_s20 + $0x130] sm:$0xff] %v7991_v41  }
 0x58e   : > { %7996 = vst [vmem:[%s12709_s20 + $0x138] sm:$0xff] %v7995_v45  }
 0x58f   : > { %8000 = vst [vmem:[%s12709_s20 + $0x180] sm:$0xff] %v7999_v62  }
 0x590   : > { %8004 = vst [vmem:[%s12709_s20 + $0x188] sm:$0xff] %v8003_v16  }
 0x591   : > { %8008 = vst [vmem:[%s12709_s20 + $0x190] sm:$0xff] %v8007_v15  }
 0x592   : > { %8012 = vst [vmem:[%s12709_s20 + $0x198] sm:$0xff] %v8011_v9  }
 0x593   : > { %8016 = vst [vmem:[%s12709_s20 + $0x1a0] sm:$0xff] %v8015_v28  }
 0x594   : > { %8020 = vst [vmem:[%s12709_s20 + $0x1a8] sm:$0xff] %v8019_v27  }
 0x595   : > { %8024 = vst [vmem:[%s12709_s20 + $0x1b0] sm:$0xff] %v8023_v61  }
 0x596   : > { %8028 = vst [vmem:[%s12709_s20 + $0x1b8] sm:$0xff] %v8027_v51  }
 0x597 PF: > { %s23_s8 = sadd.s32 1, %s8869_s8   ;;  %s12887_s1 = sld [smem:[#allocation16_spill]] }
 0x598   : > { %p20_p1 = scmp.ge.s32.totalorder %s23_s8, 6   ;;  %s12888_s24 = smov %s8845_s25 }
 0x599   : > { %s12889_s25 = smov %s8849_s26  ;;  %s12890_s26 = smov %s9037_s3 }
 0x59a   : > { %s12891_s27 = smov %s8861_s29  ;;  %s12892_s28 = smov %s8865_s30 }
 0x59b   : > { %s12894_s30 = smov %s12900_s18  ;;  %22 = sbr.rel (!%p20_p1) target bundleno = 14 (0xe), region = 239 }
 0x59d   : > { %s12893_s29 = smov %s12887_s1 }
 0x5a0   :  { %8206 = vsyncpa [#allocation3], 1 }
 0x5a1   :  { %8208 = vsyncpa [#allocation3 + $0x1], 1 }
 0x5a2   :  { %8209 = vsyncpa [#allocation5], 1 }
 0x5a3   :  { %8210 = vsyncpa [#allocation8], 1 }

</bundles_post_ra>
